<compile_context>
chip_gen: v7x
topology: tpu7x:2x2x1
jax: 0.10.0
libtpu: 0.0.40
codegen_flags: <defaults>
</compile_context>

<pallas_src>
import functools

import jax
import jax.numpy as jnp
from jax.experimental import pallas as pl
from jax.experimental.pallas import tpu as pltpu


# ---------------------------------------------------------------------------
# Kernel 1: fused 3x3 conv (stride 1, pad 1) + bias + ReLU  (im2col fused)
# ---------------------------------------------------------------------------
def _conv3x3_relu_kernel(xf_ref, w_ref, b_ref, o_ref, *, wrow):
    """One image per grid step.

    xf_ref : (F2, Cin)      f32  -- zero-padded image flattened row-major over
                                    (H+2, W+2), plus 2 trailing zero rows.
    w_ref  : (9, Cin, Cout) bf16 -- tap-major (kh*3+kw).
    b_ref  : (1, Cout)      f32
    o_ref  : (M, Cout)      f32  -- M = H*(W+2); the last 2 columns of each
                                    image row are junk, sliced off in wrapper.
    """
    m_rows, cout = o_ref.shape
    xb = xf_ref[...].astype(jnp.bfloat16)            # single cast for all taps
    acc = jnp.zeros((m_rows, cout), jnp.float32)
    for kh in range(3):
        for kw in range(3):
            off = kh * wrow + kw                      # static, contiguous slice
            acc = acc + jnp.dot(xb[off:off + m_rows, :], w_ref[kh * 3 + kw],
                                preferred_element_type=jnp.float32)
    o_ref[...] = jnp.maximum(acc + b_ref[...], 0.0)


def conv3x3_relu(x, w, b):
    """x: (N,H,W,Cin) f32, w: (3,3,Cin,Cout), b: (Cout,) -> (N,H,W,Cout) f32."""
    n, h, wdt, cin = x.shape
    cout = w.shape[-1]
    wrow = wdt + 2
    m_rows = h * wrow
    f2 = (h + 2) * wrow + 2

    xp = jnp.pad(x, ((0, 0), (1, 1), (1, 1), (0, 0)))           # zero conv pad
    xf = xp.reshape(n, (h + 2) * wrow, cin)
    xf = jnp.pad(xf, ((0, 0), (0, 2), (0, 0)))                   # (n, F2, Cin)
    wf = w.reshape(9, cin, cout).astype(jnp.bfloat16)            # tap-major
    b2 = b.reshape(1, cout).astype(jnp.float32)

    out = pl.pallas_call(
        functools.partial(_conv3x3_relu_kernel, wrow=wrow),
        out_shape=jax.ShapeDtypeStruct((n, m_rows, cout), jnp.float32),
        grid=(n,),
        in_specs=[
            pl.BlockSpec((None, f2, cin), lambda i: (i, 0, 0)),
            pl.BlockSpec((9, cin, cout), lambda i: (0, 0, 0)),
            pl.BlockSpec((1, cout), lambda i: (0, 0)),
        ],
        out_specs=pl.BlockSpec((None, m_rows, cout), lambda i: (i, 0, 0)),
        compiler_params=pltpu.CompilerParams(dimension_semantics=("parallel",)),
    )(xf, wf, b2)
    return out.reshape(n, h, wrow, cout)[:, :, :wdt, :]


# ---------------------------------------------------------------------------
# Kernel 2: MaxPool2d (stride 2) on even/odd parity planes
# ---------------------------------------------------------------------------
def _maxpool_kernel(x00_ref, x01_ref, x10_ref, x11_ref, o_ref, *, k):
    """x{r}{c}_ref: (Hh, Wh, C) = rows of parity r, cols of parity c (already
    -inf padded in the wrapper). Only contiguous value slices + elementwise max."""
    ho, wo, _ = o_ref.shape
    planes = ((x00_ref[...], x01_ref[...]),
              (x10_ref[...], x11_ref[...]))
    m = None
    for kh in range(k):
        for kw in range(k):
            src = planes[kh % 2][kw % 2]
            win = src[kh // 2:kh // 2 + ho, kw // 2:kw // 2 + wo, :]
            m = win if m is None else jnp.maximum(m, win)
    o_ref[...] = m


def _padded_extent(size, k, pad, out):
    need = 2 * (out - 1) + k           # highest padded index actually read + 1
    p = max(size + pad, need)
    return p + (p % 2)                 # even, so parity split is exact


def maxpool2d(x, *, k, s, pad):
    assert s == 2 and k in (2, 3)
    n, h, w, c = x.shape
    ho = (h + 2 * pad - k) // s + 1
    wo = (w + 2 * pad - k) // s + 1
    hp = _padded_extent(h, k, pad, ho)
    wp = _padded_extent(w, k, pad, wo)
    xp = jnp.pad(x, ((0, 0), (pad, hp - h - pad), (pad, wp - w - pad), (0, 0)),
                 constant_values=-jnp.inf)
    # Parity split in plain JAX (tiny tensors) so the kernel never needs
    # strided or unaligned-stride reads.
    planes = [xp[:, r::2, co::2, :] for r in (0, 1) for co in (0, 1)]
    hh, wh = hp // 2, wp // 2
    in_spec = pl.BlockSpec((None, hh, wh, c), lambda i: (i, 0, 0, 0))
    return pl.pallas_call(
        functools.partial(_maxpool_kernel, k=k),
        out_shape=jax.ShapeDtypeStruct((n, ho, wo, c), jnp.float32),
        grid=(n,),
        in_specs=[in_spec] * 4,
        out_specs=pl.BlockSpec((None, ho, wo, c), lambda i: (i, 0, 0, 0)),
        compiler_params=pltpu.CompilerParams(dimension_semantics=("parallel",)),
    )(*planes)


# ---------------------------------------------------------------------------
# Kernel 3: fused fc1 + ReLU + (Dropout=identity) + fc2, K-tiled
# ---------------------------------------------------------------------------
def _mlp_head_kernel(x_ref, w1_ref, b1_ref, w2_ref, b2_ref, o_ref, acc_ref):
    kk = pl.program_id(0)

    @pl.when(kk == 0)
    def _init():
        acc_ref[...] = jnp.zeros_like(acc_ref)

    a = x_ref[...].astype(jnp.bfloat16)
    acc_ref[...] += jnp.dot(a, w1_ref[...], preferred_element_type=jnp.float32)

    @pl.when(kk == pl.num_programs(0) - 1)
    def _finish():
        h = jnp.maximum(acc_ref[...] + b1_ref[...], 0.0)
        # TODO(synk): Dropout(p=0.5) implemented as identity (eval semantics);
        # training-mode stochastic masking/scaling is not replicated.
        o_ref[...] = (jnp.dot(h.astype(jnp.bfloat16), w2_ref[...],
                              preferred_element_type=jnp.float32)
                      + b2_ref[...])


def _pick_tk(kdim, tk):
    if kdim % tk == 0:
        return tk
    for cand in range(min(tk, kdim), 0, -1):       # largest divisor <= tk
        if kdim % cand == 0:
            return cand
    return kdim


def mlp_head(x, w1, b1, w2, b2, *, tk=512):
    """out = (relu(x @ w1 + b1)) @ w2 + b2, all inside one K-tiled Pallas call."""
    n, kdim = x.shape
    h1 = w1.shape[1]                       # 625
    c2 = w2.shape[1]                       # 5
    h1p = ((h1 + 127) // 128) * 128        # 640: lane-dense hidden
    c2p = 128                              # lane-dense final store
    tk = _pick_tk(kdim, tk)

    w1p = jnp.pad(w1.astype(jnp.bfloat16), ((0, 0), (0, h1p - h1)))
    b1p = jnp.pad(b1.astype(jnp.float32), (0, h1p - h1)).reshape(1, h1p)
    w2p = jnp.pad(w2.astype(jnp.bfloat16), ((0, h1p - h1), (0, c2p - c2)))
    b2p = jnp.pad(b2.astype(jnp.float32), (0, c2p - c2)).reshape(1, c2p)

    out = pl.pallas_call(
        _mlp_head_kernel,
        out_shape=jax.ShapeDtypeStruct((n, c2p), jnp.float32),
        grid=(kdim // tk,),
        in_specs=[
            pl.BlockSpec((n, tk), lambda kk: (0, kk)),
            pl.BlockSpec((tk, h1p), lambda kk: (kk, 0)),
            pl.BlockSpec((1, h1p), lambda kk: (0, 0)),
            pl.BlockSpec((h1p, c2p), lambda kk: (0, 0)),
            pl.BlockSpec((1, c2p), lambda kk: (0, 0)),
        ],
        out_specs=pl.BlockSpec((n, c2p), lambda kk: (0, 0)),
        scratch_shapes=[pltpu.VMEM((n, h1p), jnp.float32)],
        compiler_params=pltpu.CompilerParams(dimension_semantics=("arbitrary",)),
    )(x, w1p, b1p, w2p, b2p)
    return out[:, :c2]


# ---------------------------------------------------------------------------
# Parameters (deterministic, xavier-uniform style)
# ---------------------------------------------------------------------------
def _xavier(key, shape, fan_in, fan_out):
    lim = (6.0 / (fan_in + fan_out)) ** 0.5
    return jax.random.uniform(key, shape, jnp.float32, -lim, lim)


def init_params(key, flat_features):
    ks = jax.random.split(key, 5)
    return {
        "w1": _xavier(ks[0], (3, 3, 3, 32), 9 * 3, 9 * 32),
        "b1": jnp.zeros((32,), jnp.float32),
        "w2": _xavier(ks[1], (3, 3, 32, 64), 9 * 32, 9 * 64),
        "b2": jnp.zeros((64,), jnp.float32),
        "w3": _xavier(ks[2], (3, 3, 64, 128), 9 * 64, 9 * 128),
        "b3": jnp.zeros((128,), jnp.float32),
        "wfc1": _xavier(ks[3], (flat_features, 625), flat_features, 625),
        "bfc1": jnp.zeros((625,), jnp.float32),
        "wfc2": _xavier(ks[4], (625, 5), 625, 5),
        "bfc2": jnp.zeros((5,), jnp.float32),
    }


# ---------------------------------------------------------------------------
# Forward pass (mirrors CNN.forward)
# ---------------------------------------------------------------------------
def cnn_forward(x_nchw, params):
    x = jnp.transpose(x_nchw.astype(jnp.float32), (0, 2, 3, 1))   # NCHW -> NHWC

    # layer1: Conv2d(3,32,3,s=1,p=1) + ReLU + MaxPool2d(3, stride=2)
    x = conv3x3_relu(x, params["w1"], params["b1"])
    x = maxpool2d(x, k=3, s=2, pad=0)

    # layer2: Conv2d(32,64,3,s=1,p=1) + ReLU + MaxPool2d(2, stride=2)
    x = conv3x3_relu(x, params["w2"], params["b2"])
    x = maxpool2d(x, k=2, s=2, pad=0)

    # layer3: Conv2d(64,128,3,s=1,p=1) + ReLU + MaxPool2d(2, stride=2, padding=1)
    x = conv3x3_relu(x, params["w3"], params["b3"])
    x = maxpool2d(x, k=2, s=2, pad=1)

    # flatten in NCHW order to match torch's out.view(out.size(0), -1)
    n = x.shape[0]
    x = jnp.transpose(x, (0, 3, 1, 2)).reshape(n, -1)

    # layer4 (fc1 + ReLU + Dropout[identity]) + fc2, fused in one kernel
    return mlp_head(x, params["wfc1"], params["bfc1"],
                    params["wfc2"], params["bfc2"])


if __name__ == "__main__":
    key = jax.random.PRNGKey(0)
    k_x, k_p = jax.random.split(key)

    # Small input consistent with the module (3 input channels); 32x32 spatial.
    N, C, H, W = 2, 3, 32, 32
    x = jax.random.normal(k_x, (N, C, H, W), jnp.float32)

    # Flatten size for 32x32: 32 -> pool(3,2) 15 -> pool(2,2) 7 -> pool(2,2,p=1) 4
    flat_features = 128 * 4 * 4  # 2048 (module hard-codes 131072 for ~249x249 input)
    params = init_params(k_p, flat_features)

    out = jax.jit(cnn_forward)(x, params)
    out = jax.block_until_ready(out)
    assert out.shape == (N, 5), out.shape
    assert bool(jnp.all(jnp.isfinite(out)))
    print("KERNEL_OK")
</pallas_src>

<mosaic_0001>
module attributes {stable_mosaic.version = 11 : i64} {
  func.func @_conv3x3_relu_kernel(%arg0: i32, %arg1: memref<1x1158x3xf32, #tpu.memory_space<vmem>>, %arg2: memref<9x3x32xbf16, #tpu.memory_space<vmem>>, %arg3: memref<1x32xf32, #tpu.memory_space<vmem>>, %arg4: memref<1x1088x32xf32, #tpu.memory_space<vmem>>) attributes {dimension_semantics = [#tpu.dimension_semantics<parallel>], iteration_bounds = array<i64: 2>, scalar_prefetch = 0 : i64, scratch_operands = 0 : i64, tpu.core_type = #tpu.core_type<tc>, window_params = [{transform_indices = @transform_0, window_bounds = array<i64: 1, 1158, 3>}, {pipeline_mode = #tpu.pipeline_mode<synchronous>, transform_indices = @transform_1, window_bounds = array<i64: 9, 3, 32>}, {pipeline_mode = #tpu.pipeline_mode<synchronous>, transform_indices = @transform_2, window_bounds = array<i64: 1, 32>}, {transform_indices = @transform_3, window_bounds = array<i64: 1, 1088, 32>}]} {
    %c0 = arith.constant 0 : index
    %c0_0 = arith.constant 0 : index
    %c0_1 = arith.constant 0 : index
    %0 = vector.load %arg1[%c0, %c0_0, %c0_1] : memref<1x1158x3xf32, #tpu.memory_space<vmem>>, vector<1x1158x3xf32>
    %1 = vector.shape_cast %0 : vector<1x1158x3xf32> to vector<1158x3xf32>
    %2 = arith.truncf %1 : vector<1158x3xf32> to vector<1158x3xbf16>
    %cst = arith.constant 0.000000e+00 : f32
    %3 = vector.broadcast %cst : f32 to vector<1088x32xf32>
    %4 = vector.extract_strided_slice %2 {offsets = [0, 0], sizes = [1088, 3], strides = [1, 1]} : vector<1158x3xbf16> to vector<1088x3xbf16>
    %c0_2 = arith.constant 0 : index
    %c0_3 = arith.constant 0 : index
    %c0_4 = arith.constant 0 : index
    %5 = vector.load %arg2[%c0_2, %c0_3, %c0_4] : memref<9x3x32xbf16, #tpu.memory_space<vmem>>, vector<1x3x32xbf16>
    %6 = vector.shape_cast %5 : vector<1x3x32xbf16> to vector<3x32xbf16>
    %cst_5 = arith.constant dense<0.000000e+00> : vector<1088x32xf32>
    %7 = tpu.matmul %4, %6, %cst_5 {dimension_numbers = #tpu.dot_dimension_numbers<[1], [0], [0], [1], [0, 0, 1, 1], [], []>} : vector<1088x3xbf16>, vector<3x32xbf16>, vector<1088x32xf32> -> vector<1088x32xf32>
    %8 = arith.addf %3, %7 : vector<1088x32xf32>
    %9 = vector.extract_strided_slice %2 {offsets = [1, 0], sizes = [1088, 3], strides = [1, 1]} : vector<1158x3xbf16> to vector<1088x3xbf16>
    %c1 = arith.constant 1 : index
    %c0_6 = arith.constant 0 : index
    %c0_7 = arith.constant 0 : index
    %10 = vector.load %arg2[%c1, %c0_6, %c0_7] : memref<9x3x32xbf16, #tpu.memory_space<vmem>>, vector<1x3x32xbf16>
    %11 = vector.shape_cast %10 : vector<1x3x32xbf16> to vector<3x32xbf16>
    %cst_8 = arith.constant dense<0.000000e+00> : vector<1088x32xf32>
    %12 = tpu.matmul %9, %11, %cst_8 {dimension_numbers = #tpu.dot_dimension_numbers<[1], [0], [0], [1], [0, 0, 1, 1], [], []>} : vector<1088x3xbf16>, vector<3x32xbf16>, vector<1088x32xf32> -> vector<1088x32xf32>
    %13 = arith.addf %8, %12 : vector<1088x32xf32>
    %14 = vector.extract_strided_slice %2 {offsets = [2, 0], sizes = [1088, 3], strides = [1, 1]} : vector<1158x3xbf16> to vector<1088x3xbf16>
    %c2 = arith.constant 2 : index
    %c0_9 = arith.constant 0 : index
    %c0_10 = arith.constant 0 : index
    %15 = vector.load %arg2[%c2, %c0_9, %c0_10] : memref<9x3x32xbf16, #tpu.memory_space<vmem>>, vector<1x3x32xbf16>
    %16 = vector.shape_cast %15 : vector<1x3x32xbf16> to vector<3x32xbf16>
    %cst_11 = arith.constant dense<0.000000e+00> : vector<1088x32xf32>
    %17 = tpu.matmul %14, %16, %cst_11 {dimension_numbers = #tpu.dot_dimension_numbers<[1], [0], [0], [1], [0, 0, 1, 1], [], []>} : vector<1088x3xbf16>, vector<3x32xbf16>, vector<1088x32xf32> -> vector<1088x32xf32>
    %18 = arith.addf %13, %17 : vector<1088x32xf32>
    %19 = vector.extract_strided_slice %2 {offsets = [34, 0], sizes = [1088, 3], strides = [1, 1]} : vector<1158x3xbf16> to vector<1088x3xbf16>
    %c3 = arith.constant 3 : index
    %c0_12 = arith.constant 0 : index
    %c0_13 = arith.constant 0 : index
    %20 = vector.load %arg2[%c3, %c0_12, %c0_13] : memref<9x3x32xbf16, #tpu.memory_space<vmem>>, vector<1x3x32xbf16>
    %21 = vector.shape_cast %20 : vector<1x3x32xbf16> to vector<3x32xbf16>
    %cst_14 = arith.constant dense<0.000000e+00> : vector<1088x32xf32>
    %22 = tpu.matmul %19, %21, %cst_14 {dimension_numbers = #tpu.dot_dimension_numbers<[1], [0], [0], [1], [0, 0, 1, 1], [], []>} : vector<1088x3xbf16>, vector<3x32xbf16>, vector<1088x32xf32> -> vector<1088x32xf32>
    %23 = arith.addf %18, %22 : vector<1088x32xf32>
    %24 = vector.extract_strided_slice %2 {offsets = [35, 0], sizes = [1088, 3], strides = [1, 1]} : vector<1158x3xbf16> to vector<1088x3xbf16>
    %c4 = arith.constant 4 : index
    %c0_15 = arith.constant 0 : index
    %c0_16 = arith.constant 0 : index
    %25 = vector.load %arg2[%c4, %c0_15, %c0_16] : memref<9x3x32xbf16, #tpu.memory_space<vmem>>, vector<1x3x32xbf16>
    %26 = vector.shape_cast %25 : vector<1x3x32xbf16> to vector<3x32xbf16>
    %cst_17 = arith.constant dense<0.000000e+00> : vector<1088x32xf32>
    %27 = tpu.matmul %24, %26, %cst_17 {dimension_numbers = #tpu.dot_dimension_numbers<[1], [0], [0], [1], [0, 0, 1, 1], [], []>} : vector<1088x3xbf16>, vector<3x32xbf16>, vector<1088x32xf32> -> vector<1088x32xf32>
    %28 = arith.addf %23, %27 : vector<1088x32xf32>
    %29 = vector.extract_strided_slice %2 {offsets = [36, 0], sizes = [1088, 3], strides = [1, 1]} : vector<1158x3xbf16> to vector<1088x3xbf16>
    %c5 = arith.constant 5 : index
    %c0_18 = arith.constant 0 : index
    %c0_19 = arith.constant 0 : index
    %30 = vector.load %arg2[%c5, %c0_18, %c0_19] : memref<9x3x32xbf16, #tpu.memory_space<vmem>>, vector<1x3x32xbf16>
    %31 = vector.shape_cast %30 : vector<1x3x32xbf16> to vector<3x32xbf16>
    %cst_20 = arith.constant dense<0.000000e+00> : vector<1088x32xf32>
    %32 = tpu.matmul %29, %31, %cst_20 {dimension_numbers = #tpu.dot_dimension_numbers<[1], [0], [0], [1], [0, 0, 1, 1], [], []>} : vector<1088x3xbf16>, vector<3x32xbf16>, vector<1088x32xf32> -> vector<1088x32xf32>
    %33 = arith.addf %28, %32 : vector<1088x32xf32>
    %34 = vector.extract_strided_slice %2 {offsets = [68, 0], sizes = [1088, 3], strides = [1, 1]} : vector<1158x3xbf16> to vector<1088x3xbf16>
    %c6 = arith.constant 6 : index
    %c0_21 = arith.constant 0 : index
    %c0_22 = arith.constant 0 : index
    %35 = vector.load %arg2[%c6, %c0_21, %c0_22] : memref<9x3x32xbf16, #tpu.memory_space<vmem>>, vector<1x3x32xbf16>
    %36 = vector.shape_cast %35 : vector<1x3x32xbf16> to vector<3x32xbf16>
    %cst_23 = arith.constant dense<0.000000e+00> : vector<1088x32xf32>
    %37 = tpu.matmul %34, %36, %cst_23 {dimension_numbers = #tpu.dot_dimension_numbers<[1], [0], [0], [1], [0, 0, 1, 1], [], []>} : vector<1088x3xbf16>, vector<3x32xbf16>, vector<1088x32xf32> -> vector<1088x32xf32>
    %38 = arith.addf %33, %37 : vector<1088x32xf32>
    %39 = vector.extract_strided_slice %2 {offsets = [69, 0], sizes = [1088, 3], strides = [1, 1]} : vector<1158x3xbf16> to vector<1088x3xbf16>
    %c7 = arith.constant 7 : index
    %c0_24 = arith.constant 0 : index
    %c0_25 = arith.constant 0 : index
    %40 = vector.load %arg2[%c7, %c0_24, %c0_25] : memref<9x3x32xbf16, #tpu.memory_space<vmem>>, vector<1x3x32xbf16>
    %41 = vector.shape_cast %40 : vector<1x3x32xbf16> to vector<3x32xbf16>
    %cst_26 = arith.constant dense<0.000000e+00> : vector<1088x32xf32>
    %42 = tpu.matmul %39, %41, %cst_26 {dimension_numbers = #tpu.dot_dimension_numbers<[1], [0], [0], [1], [0, 0, 1, 1], [], []>} : vector<1088x3xbf16>, vector<3x32xbf16>, vector<1088x32xf32> -> vector<1088x32xf32>
    %43 = arith.addf %38, %42 : vector<1088x32xf32>
    %44 = vector.extract_strided_slice %2 {offsets = [70, 0], sizes = [1088, 3], strides = [1, 1]} : vector<1158x3xbf16> to vector<1088x3xbf16>
    %c8 = arith.constant 8 : index
    %c0_27 = arith.constant 0 : index
    %c0_28 = arith.constant 0 : index
    %45 = vector.load %arg2[%c8, %c0_27, %c0_28] : memref<9x3x32xbf16, #tpu.memory_space<vmem>>, vector<1x3x32xbf16>
    %46 = vector.shape_cast %45 : vector<1x3x32xbf16> to vector<3x32xbf16>
    %cst_29 = arith.constant dense<0.000000e+00> : vector<1088x32xf32>
    %47 = tpu.matmul %44, %46, %cst_29 {dimension_numbers = #tpu.dot_dimension_numbers<[1], [0], [0], [1], [0, 0, 1, 1], [], []>} : vector<1088x3xbf16>, vector<3x32xbf16>, vector<1088x32xf32> -> vector<1088x32xf32>
    %48 = arith.addf %43, %47 : vector<1088x32xf32>
    %c0_30 = arith.constant 0 : index
    %c0_31 = arith.constant 0 : index
    %49 = vector.load %arg3[%c0_30, %c0_31] : memref<1x32xf32, #tpu.memory_space<vmem>>, vector<1x32xf32>
    %50 = vector.broadcast %49 : vector<1x32xf32> to vector<1088x32xf32>
    %51 = arith.addf %48, %50 : vector<1088x32xf32>
    %cst_32 = arith.constant 0.000000e+00 : f32
    %52 = vector.broadcast %cst_32 : f32 to vector<1088x32xf32>
    %53 = arith.maximumf %51, %52 : vector<1088x32xf32>
    %c0_33 = arith.constant 0 : index
    %c0_34 = arith.constant 0 : index
    %c0_35 = arith.constant 0 : index
    %54 = vector.load %arg4[%c0_33, %c0_34, %c0_35] : memref<1x1088x32xf32, #tpu.memory_space<vmem>>, vector<1x1088x32xf32>
    %55 = vector.shape_cast %54 : vector<1x1088x32xf32> to vector<1088x32xf32>
    %56 = vector.shape_cast %53 : vector<1088x32xf32> to vector<1x1088x32xf32>
    tpu.vector_store %arg4[%c0_33, %c0_34, %c0_35], %56 {strides = array<i32>} : memref<1x1088x32xf32, #tpu.memory_space<vmem>>, vector<1x1088x32xf32>,
    return
  }
  func.func @transform_0(%arg0: i32) -> (i32, i32, i32) {
    %c0_i32 = arith.constant 0 : i32
    %c0_i32_0 = arith.constant 0 : i32
    %c0_i32_1 = arith.constant 0 : i32
    return %arg0, %c0_i32, %c0_i32_0 : i32, i32, i32
  }
  func.func @transform_1(%arg0: i32) -> (i32, i32, i32) {
    %c0_i32 = arith.constant 0 : i32
    %c0_i32_0 = arith.constant 0 : i32
    %c0_i32_1 = arith.constant 0 : i32
    %c0_i32_2 = arith.constant 0 : i32
    return %c0_i32, %c0_i32_0, %c0_i32_1 : i32, i32, i32
  }
  func.func @transform_2(%arg0: i32) -> (i32, i32) {
    %c0_i32 = arith.constant 0 : i32
    %c0_i32_0 = arith.constant 0 : i32
    %c0_i32_1 = arith.constant 0 : i32
    return %c0_i32, %c0_i32_0 : i32, i32
  }
  func.func @transform_3(%arg0: i32) -> (i32, i32, i32) {
    %c0_i32 = arith.constant 0 : i32
    %c0_i32_0 = arith.constant 0 : i32
    %c0_i32_1 = arith.constant 0 : i32
    return %arg0, %c0_i32, %c0_i32_0 : i32, i32, i32
  }
}

module attributes {stable_mosaic.version = 11 : i64} {
  func.func @_maxpool_kernel(%arg0: i32, %arg1: memref<1x16x16x32xf32, #tpu.memory_space<vmem>>, %arg2: memref<1x16x16x32xf32, #tpu.memory_space<vmem>>, %arg3: memref<1x16x16x32xf32, #tpu.memory_space<vmem>>, %arg4: memref<1x16x16x32xf32, #tpu.memory_space<vmem>>, %arg5: memref<1x15x15x32xf32, #tpu.memory_space<vmem>>) attributes {dimension_semantics = [#tpu.dimension_semantics<parallel>], iteration_bounds = array<i64: 2>, scalar_prefetch = 0 : i64, scratch_operands = 0 : i64, tpu.core_type = #tpu.core_type<tc>, window_params = [{transform_indices = @transform_0, window_bounds = array<i64: 1, 16, 16, 32>}, {transform_indices = @transform_1, window_bounds = array<i64: 1, 16, 16, 32>}, {transform_indices = @transform_2, window_bounds = array<i64: 1, 16, 16, 32>}, {transform_indices = @transform_3, window_bounds = array<i64: 1, 16, 16, 32>}, {transform_indices = @transform_4, window_bounds = array<i64: 1, 15, 15, 32>}]} {
    %c0 = arith.constant 0 : index
    %c0_0 = arith.constant 0 : index
    %c0_1 = arith.constant 0 : index
    %c0_2 = arith.constant 0 : index
    %0 = vector.load %arg1[%c0, %c0_0, %c0_1, %c0_2] : memref<1x16x16x32xf32, #tpu.memory_space<vmem>>, vector<1x16x16x32xf32>
    %1 = vector.shape_cast %0 : vector<1x16x16x32xf32> to vector<16x16x32xf32>
    %c0_3 = arith.constant 0 : index
    %c0_4 = arith.constant 0 : index
    %c0_5 = arith.constant 0 : index
    %c0_6 = arith.constant 0 : index
    %2 = vector.load %arg2[%c0_3, %c0_4, %c0_5, %c0_6] : memref<1x16x16x32xf32, #tpu.memory_space<vmem>>, vector<1x16x16x32xf32>
    %3 = vector.shape_cast %2 : vector<1x16x16x32xf32> to vector<16x16x32xf32>
    %c0_7 = arith.constant 0 : index
    %c0_8 = arith.constant 0 : index
    %c0_9 = arith.constant 0 : index
    %c0_10 = arith.constant 0 : index
    %4 = vector.load %arg3[%c0_7, %c0_8, %c0_9, %c0_10] : memref<1x16x16x32xf32, #tpu.memory_space<vmem>>, vector<1x16x16x32xf32>
    %5 = vector.shape_cast %4 : vector<1x16x16x32xf32> to vector<16x16x32xf32>
    %c0_11 = arith.constant 0 : index
    %c0_12 = arith.constant 0 : index
    %c0_13 = arith.constant 0 : index
    %c0_14 = arith.constant 0 : index
    %6 = vector.load %arg4[%c0_11, %c0_12, %c0_13, %c0_14] : memref<1x16x16x32xf32, #tpu.memory_space<vmem>>, vector<1x16x16x32xf32>
    %7 = vector.shape_cast %6 : vector<1x16x16x32xf32> to vector<16x16x32xf32>
    %8 = vector.extract_strided_slice %1 {offsets = [0, 0, 0], sizes = [15, 15, 32], strides = [1, 1, 1]} : vector<16x16x32xf32> to vector<15x15x32xf32>
    %9 = vector.extract_strided_slice %3 {offsets = [0, 0, 0], sizes = [15, 15, 32], strides = [1, 1, 1]} : vector<16x16x32xf32> to vector<15x15x32xf32>
    %10 = arith.maximumf %8, %9 : vector<15x15x32xf32>
    %11 = vector.extract_strided_slice %1 {offsets = [0, 1, 0], sizes = [15, 15, 32], strides = [1, 1, 1]} : vector<16x16x32xf32> to vector<15x15x32xf32>
    %12 = arith.maximumf %10, %11 : vector<15x15x32xf32>
    %13 = vector.extract_strided_slice %5 {offsets = [0, 0, 0], sizes = [15, 15, 32], strides = [1, 1, 1]} : vector<16x16x32xf32> to vector<15x15x32xf32>
    %14 = arith.maximumf %12, %13 : vector<15x15x32xf32>
    %15 = vector.extract_strided_slice %7 {offsets = [0, 0, 0], sizes = [15, 15, 32], strides = [1, 1, 1]} : vector<16x16x32xf32> to vector<15x15x32xf32>
    %16 = arith.maximumf %14, %15 : vector<15x15x32xf32>
    %17 = vector.extract_strided_slice %5 {offsets = [0, 1, 0], sizes = [15, 15, 32], strides = [1, 1, 1]} : vector<16x16x32xf32> to vector<15x15x32xf32>
    %18 = arith.maximumf %16, %17 : vector<15x15x32xf32>
    %19 = vector.extract_strided_slice %1 {offsets = [1, 0, 0], sizes = [15, 15, 32], strides = [1, 1, 1]} : vector<16x16x32xf32> to vector<15x15x32xf32>
    %20 = arith.maximumf %18, %19 : vector<15x15x32xf32>
    %21 = vector.extract_strided_slice %3 {offsets = [1, 0, 0], sizes = [15, 15, 32], strides = [1, 1, 1]} : vector<16x16x32xf32> to vector<15x15x32xf32>
    %22 = arith.maximumf %20, %21 : vector<15x15x32xf32>
    %23 = vector.extract_strided_slice %1 {offsets = [1, 1, 0], sizes = [15, 15, 32], strides = [1, 1, 1]} : vector<16x16x32xf32> to vector<15x15x32xf32>
    %24 = arith.maximumf %22, %23 : vector<15x15x32xf32>
    %c0_15 = arith.constant 0 : index
    %c0_16 = arith.constant 0 : index
    %c0_17 = arith.constant 0 : index
    %c0_18 = arith.constant 0 : index
    %25 = vector.load %arg5[%c0_15, %c0_16, %c0_17, %c0_18] : memref<1x15x15x32xf32, #tpu.memory_space<vmem>>, vector<1x15x15x32xf32>
    %26 = vector.shape_cast %25 : vector<1x15x15x32xf32> to vector<15x15x32xf32>
    %27 = vector.shape_cast %24 : vector<15x15x32xf32> to vector<1x15x15x32xf32>
    tpu.vector_store %arg5[%c0_15, %c0_16, %c0_17, %c0_18], %27 {strides = array<i32>} : memref<1x15x15x32xf32, #tpu.memory_space<vmem>>, vector<1x15x15x32xf32>,
    return
  }
  func.func @transform_0(%arg0: i32) -> (i32, i32, i32, i32) {
    %c0_i32 = arith.constant 0 : i32
    %c0_i32_0 = arith.constant 0 : i32
    %c0_i32_1 = arith.constant 0 : i32
    %c0_i32_2 = arith.constant 0 : i32
    return %arg0, %c0_i32, %c0_i32_0, %c0_i32_1 : i32, i32, i32, i32
  }
  func.func @transform_1(%arg0: i32) -> (i32, i32, i32, i32) {
    %c0_i32 = arith.constant 0 : i32
    %c0_i32_0 = arith.constant 0 : i32
    %c0_i32_1 = arith.constant 0 : i32
    %c0_i32_2 = arith.constant 0 : i32
    return %arg0, %c0_i32, %c0_i32_0, %c0_i32_1 : i32, i32, i32, i32
  }
  func.func @transform_2(%arg0: i32) -> (i32, i32, i32, i32) {
    %c0_i32 = arith.constant 0 : i32
    %c0_i32_0 = arith.constant 0 : i32
    %c0_i32_1 = arith.constant 0 : i32
    %c0_i32_2 = arith.constant 0 : i32
    return %arg0, %c0_i32, %c0_i32_0, %c0_i32_1 : i32, i32, i32, i32
  }
  func.func @transform_3(%arg0: i32) -> (i32, i32, i32, i32) {
    %c0_i32 = arith.constant 0 : i32
    %c0_i32_0 = arith.constant 0 : i32
    %c0_i32_1 = arith.constant 0 : i32
    %c0_i32_2 = arith.constant 0 : i32
    return %arg0, %c0_i32, %c0_i32_0, %c0_i32_1 : i32, i32, i32, i32
  }
  func.func @transform_4(%arg0: i32) -> (i32, i32, i32, i32) {
    %c0_i32 = arith.constant 0 : i32
    %c0_i32_0 = arith.constant 0 : i32
    %c0_i32_1 = arith.constant 0 : i32
    %c0_i32_2 = arith.constant 0 : i32
    return %arg0, %c0_i32, %c0_i32_0, %c0_i32_1 : i32, i32, i32, i32
  }
}

module attributes {stable_mosaic.version = 11 : i64} {
  func.func @_conv3x3_relu_kernel(%arg0: i32, %arg1: memref<1x291x32xf32, #tpu.memory_space<vmem>>, %arg2: memref<9x32x64xbf16, #tpu.memory_space<vmem>>, %arg3: memref<1x64xf32, #tpu.memory_space<vmem>>, %arg4: memref<1x255x64xf32, #tpu.memory_space<vmem>>) attributes {dimension_semantics = [#tpu.dimension_semantics<parallel>], iteration_bounds = array<i64: 2>, scalar_prefetch = 0 : i64, scratch_operands = 0 : i64, tpu.core_type = #tpu.core_type<tc>, window_params = [{transform_indices = @transform_0, window_bounds = array<i64: 1, 291, 32>}, {pipeline_mode = #tpu.pipeline_mode<synchronous>, transform_indices = @transform_1, window_bounds = array<i64: 9, 32, 64>}, {pipeline_mode = #tpu.pipeline_mode<synchronous>, transform_indices = @transform_2, window_bounds = array<i64: 1, 64>}, {transform_indices = @transform_3, window_bounds = array<i64: 1, 255, 64>}]} {
    %c0 = arith.constant 0 : index
    %c0_0 = arith.constant 0 : index
    %c0_1 = arith.constant 0 : index
    %0 = vector.load %arg1[%c0, %c0_0, %c0_1] : memref<1x291x32xf32, #tpu.memory_space<vmem>>, vector<1x291x32xf32>
    %1 = vector.shape_cast %0 : vector<1x291x32xf32> to vector<291x32xf32>
    %2 = arith.truncf %1 : vector<291x32xf32> to vector<291x32xbf16>
    %cst = arith.constant 0.000000e+00 : f32
    %3 = vector.broadcast %cst : f32 to vector<255x64xf32>
    %4 = vector.extract_strided_slice %2 {offsets = [0, 0], sizes = [255, 32], strides = [1, 1]} : vector<291x32xbf16> to vector<255x32xbf16>
    %c0_2 = arith.constant 0 : index
    %c0_3 = arith.constant 0 : index
    %c0_4 = arith.constant 0 : index
    %5 = vector.load %arg2[%c0_2, %c0_3, %c0_4] : memref<9x32x64xbf16, #tpu.memory_space<vmem>>, vector<1x32x64xbf16>
    %6 = vector.shape_cast %5 : vector<1x32x64xbf16> to vector<32x64xbf16>
    %cst_5 = arith.constant dense<0.000000e+00> : vector<255x64xf32>
    %7 = tpu.matmul %4, %6, %cst_5 {dimension_numbers = #tpu.dot_dimension_numbers<[1], [0], [0], [1], [0, 0, 1, 1], [], []>} : vector<255x32xbf16>, vector<32x64xbf16>, vector<255x64xf32> -> vector<255x64xf32>
    %8 = arith.addf %3, %7 : vector<255x64xf32>
    %9 = vector.extract_strided_slice %2 {offsets = [1, 0], sizes = [255, 32], strides = [1, 1]} : vector<291x32xbf16> to vector<255x32xbf16>
    %c1 = arith.constant 1 : index
    %c0_6 = arith.constant 0 : index
    %c0_7 = arith.constant 0 : index
    %10 = vector.load %arg2[%c1, %c0_6, %c0_7] : memref<9x32x64xbf16, #tpu.memory_space<vmem>>, vector<1x32x64xbf16>
    %11 = vector.shape_cast %10 : vector<1x32x64xbf16> to vector<32x64xbf16>
    %cst_8 = arith.constant dense<0.000000e+00> : vector<255x64xf32>
    %12 = tpu.matmul %9, %11, %cst_8 {dimension_numbers = #tpu.dot_dimension_numbers<[1], [0], [0], [1], [0, 0, 1, 1], [], []>} : vector<255x32xbf16>, vector<32x64xbf16>, vector<255x64xf32> -> vector<255x64xf32>
    %13 = arith.addf %8, %12 : vector<255x64xf32>
    %14 = vector.extract_strided_slice %2 {offsets = [2, 0], sizes = [255, 32], strides = [1, 1]} : vector<291x32xbf16> to vector<255x32xbf16>
    %c2 = arith.constant 2 : index
    %c0_9 = arith.constant 0 : index
    %c0_10 = arith.constant 0 : index
    %15 = vector.load %arg2[%c2, %c0_9, %c0_10] : memref<9x32x64xbf16, #tpu.memory_space<vmem>>, vector<1x32x64xbf16>
    %16 = vector.shape_cast %15 : vector<1x32x64xbf16> to vector<32x64xbf16>
    %cst_11 = arith.constant dense<0.000000e+00> : vector<255x64xf32>
    %17 = tpu.matmul %14, %16, %cst_11 {dimension_numbers = #tpu.dot_dimension_numbers<[1], [0], [0], [1], [0, 0, 1, 1], [], []>} : vector<255x32xbf16>, vector<32x64xbf16>, vector<255x64xf32> -> vector<255x64xf32>
    %18 = arith.addf %13, %17 : vector<255x64xf32>
    %19 = vector.extract_strided_slice %2 {offsets = [17, 0], sizes = [255, 32], strides = [1, 1]} : vector<291x32xbf16> to vector<255x32xbf16>
    %c3 = arith.constant 3 : index
    %c0_12 = arith.constant 0 : index
    %c0_13 = arith.constant 0 : index
    %20 = vector.load %arg2[%c3, %c0_12, %c0_13] : memref<9x32x64xbf16, #tpu.memory_space<vmem>>, vector<1x32x64xbf16>
    %21 = vector.shape_cast %20 : vector<1x32x64xbf16> to vector<32x64xbf16>
    %cst_14 = arith.constant dense<0.000000e+00> : vector<255x64xf32>
    %22 = tpu.matmul %19, %21, %cst_14 {dimension_numbers = #tpu.dot_dimension_numbers<[1], [0], [0], [1], [0, 0, 1, 1], [], []>} : vector<255x32xbf16>, vector<32x64xbf16>, vector<255x64xf32> -> vector<255x64xf32>
    %23 = arith.addf %18, %22 : vector<255x64xf32>
    %24 = vector.extract_strided_slice %2 {offsets = [18, 0], sizes = [255, 32], strides = [1, 1]} : vector<291x32xbf16> to vector<255x32xbf16>
    %c4 = arith.constant 4 : index
    %c0_15 = arith.constant 0 : index
    %c0_16 = arith.constant 0 : index
    %25 = vector.load %arg2[%c4, %c0_15, %c0_16] : memref<9x32x64xbf16, #tpu.memory_space<vmem>>, vector<1x32x64xbf16>
    %26 = vector.shape_cast %25 : vector<1x32x64xbf16> to vector<32x64xbf16>
    %cst_17 = arith.constant dense<0.000000e+00> : vector<255x64xf32>
    %27 = tpu.matmul %24, %26, %cst_17 {dimension_numbers = #tpu.dot_dimension_numbers<[1], [0], [0], [1], [0, 0, 1, 1], [], []>} : vector<255x32xbf16>, vector<32x64xbf16>, vector<255x64xf32> -> vector<255x64xf32>
    %28 = arith.addf %23, %27 : vector<255x64xf32>
    %29 = vector.extract_strided_slice %2 {offsets = [19, 0], sizes = [255, 32], strides = [1, 1]} : vector<291x32xbf16> to vector<255x32xbf16>
    %c5 = arith.constant 5 : index
    %c0_18 = arith.constant 0 : index
    %c0_19 = arith.constant 0 : index
    %30 = vector.load %arg2[%c5, %c0_18, %c0_19] : memref<9x32x64xbf16, #tpu.memory_space<vmem>>, vector<1x32x64xbf16>
    %31 = vector.shape_cast %30 : vector<1x32x64xbf16> to vector<32x64xbf16>
    %cst_20 = arith.constant dense<0.000000e+00> : vector<255x64xf32>
    %32 = tpu.matmul %29, %31, %cst_20 {dimension_numbers = #tpu.dot_dimension_numbers<[1], [0], [0], [1], [0, 0, 1, 1], [], []>} : vector<255x32xbf16>, vector<32x64xbf16>, vector<255x64xf32> -> vector<255x64xf32>
    %33 = arith.addf %28, %32 : vector<255x64xf32>
    %34 = vector.extract_strided_slice %2 {offsets = [34, 0], sizes = [255, 32], strides = [1, 1]} : vector<291x32xbf16> to vector<255x32xbf16>
    %c6 = arith.constant 6 : index
    %c0_21 = arith.constant 0 : index
    %c0_22 = arith.constant 0 : index
    %35 = vector.load %arg2[%c6, %c0_21, %c0_22] : memref<9x32x64xbf16, #tpu.memory_space<vmem>>, vector<1x32x64xbf16>
    %36 = vector.shape_cast %35 : vector<1x32x64xbf16> to vector<32x64xbf16>
    %cst_23 = arith.constant dense<0.000000e+00> : vector<255x64xf32>
    %37 = tpu.matmul %34, %36, %cst_23 {dimension_numbers = #tpu.dot_dimension_numbers<[1], [0], [0], [1], [0, 0, 1, 1], [], []>} : vector<255x32xbf16>, vector<32x64xbf16>, vector<255x64xf32> -> vector<255x64xf32>
    %38 = arith.addf %33, %37 : vector<255x64xf32>
    %39 = vector.extract_strided_slice %2 {offsets = [35, 0], sizes = [255, 32], strides = [1, 1]} : vector<291x32xbf16> to vector<255x32xbf16>
    %c7 = arith.constant 7 : index
    %c0_24 = arith.constant 0 : index
    %c0_25 = arith.constant 0 : index
    %40 = vector.load %arg2[%c7, %c0_24, %c0_25] : memref<9x32x64xbf16, #tpu.memory_space<vmem>>, vector<1x32x64xbf16>
    %41 = vector.shape_cast %40 : vector<1x32x64xbf16> to vector<32x64xbf16>
    %cst_26 = arith.constant dense<0.000000e+00> : vector<255x64xf32>
    %42 = tpu.matmul %39, %41, %cst_26 {dimension_numbers = #tpu.dot_dimension_numbers<[1], [0], [0], [1], [0, 0, 1, 1], [], []>} : vector<255x32xbf16>, vector<32x64xbf16>, vector<255x64xf32> -> vector<255x64xf32>
    %43 = arith.addf %38, %42 : vector<255x64xf32>
    %44 = vector.extract_strided_slice %2 {offsets = [36, 0], sizes = [255, 32], strides = [1, 1]} : vector<291x32xbf16> to vector<255x32xbf16>
    %c8 = arith.constant 8 : index
    %c0_27 = arith.constant 0 : index
    %c0_28 = arith.constant 0 : index
    %45 = vector.load %arg2[%c8, %c0_27, %c0_28] : memref<9x32x64xbf16, #tpu.memory_space<vmem>>, vector<1x32x64xbf16>
    %46 = vector.shape_cast %45 : vector<1x32x64xbf16> to vector<32x64xbf16>
    %cst_29 = arith.constant dense<0.000000e+00> : vector<255x64xf32>
    %47 = tpu.matmul %44, %46, %cst_29 {dimension_numbers = #tpu.dot_dimension_numbers<[1], [0], [0], [1], [0, 0, 1, 1], [], []>} : vector<255x32xbf16>, vector<32x64xbf16>, vector<255x64xf32> -> vector<255x64xf32>
    %48 = arith.addf %43, %47 : vector<255x64xf32>
    %c0_30 = arith.constant 0 : index
    %c0_31 = arith.constant 0 : index
    %49 = vector.load %arg3[%c0_30, %c0_31] : memref<1x64xf32, #tpu.memory_space<vmem>>, vector<1x64xf32>
    %50 = vector.broadcast %49 : vector<1x64xf32> to vector<255x64xf32>
    %51 = arith.addf %48, %50 : vector<255x64xf32>
    %cst_32 = arith.constant 0.000000e+00 : f32
    %52 = vector.broadcast %cst_32 : f32 to vector<255x64xf32>
    %53 = arith.maximumf %51, %52 : vector<255x64xf32>
    %c0_33 = arith.constant 0 : index
    %c0_34 = arith.constant 0 : index
    %c0_35 = arith.constant 0 : index
    %54 = vector.load %arg4[%c0_33, %c0_34, %c0_35] : memref<1x255x64xf32, #tpu.memory_space<vmem>>, vector<1x255x64xf32>
    %55 = vector.shape_cast %54 : vector<1x255x64xf32> to vector<255x64xf32>
    %56 = vector.shape_cast %53 : vector<255x64xf32> to vector<1x255x64xf32>
    tpu.vector_store %arg4[%c0_33, %c0_34, %c0_35], %56 {strides = array<i32>} : memref<1x255x64xf32, #tpu.memory_space<vmem>>, vector<1x255x64xf32>,
    return
  }
  func.func @transform_0(%arg0: i32) -> (i32, i32, i32) {
    %c0_i32 = arith.constant 0 : i32
    %c0_i32_0 = arith.constant 0 : i32
    %c0_i32_1 = arith.constant 0 : i32
    return %arg0, %c0_i32, %c0_i32_0 : i32, i32, i32
  }
  func.func @transform_1(%arg0: i32) -> (i32, i32, i32) {
    %c0_i32 = arith.constant 0 : i32
    %c0_i32_0 = arith.constant 0 : i32
    %c0_i32_1 = arith.constant 0 : i32
    %c0_i32_2 = arith.constant 0 : i32
    return %c0_i32, %c0_i32_0, %c0_i32_1 : i32, i32, i32
  }
  func.func @transform_2(%arg0: i32) -> (i32, i32) {
    %c0_i32 = arith.constant 0 : i32
    %c0_i32_0 = arith.constant 0 : i32
    %c0_i32_1 = arith.constant 0 : i32
    return %c0_i32, %c0_i32_0 : i32, i32
  }
  func.func @transform_3(%arg0: i32) -> (i32, i32, i32) {
    %c0_i32 = arith.constant 0 : i32
    %c0_i32_0 = arith.constant 0 : i32
    %c0_i32_1 = arith.constant 0 : i32
    return %arg0, %c0_i32, %c0_i32_0 : i32, i32, i32
  }
}

module attributes {stable_mosaic.version = 11 : i64} {
  func.func @_maxpool_kernel(%arg0: i32, %arg1: memref<1x8x8x64xf32, #tpu.memory_space<vmem>>, %arg2: memref<1x8x8x64xf32, #tpu.memory_space<vmem>>, %arg3: memref<1x8x8x64xf32, #tpu.memory_space<vmem>>, %arg4: memref<1x8x8x64xf32, #tpu.memory_space<vmem>>, %arg5: memref<1x7x7x64xf32, #tpu.memory_space<vmem>>) attributes {dimension_semantics = [#tpu.dimension_semantics<parallel>], iteration_bounds = array<i64: 2>, scalar_prefetch = 0 : i64, scratch_operands = 0 : i64, tpu.core_type = #tpu.core_type<tc>, window_params = [{transform_indices = @transform_0, window_bounds = array<i64: 1, 8, 8, 64>}, {transform_indices = @transform_1, window_bounds = array<i64: 1, 8, 8, 64>}, {transform_indices = @transform_2, window_bounds = array<i64: 1, 8, 8, 64>}, {transform_indices = @transform_3, window_bounds = array<i64: 1, 8, 8, 64>}, {transform_indices = @transform_4, window_bounds = array<i64: 1, 7, 7, 64>}]} {
    %c0 = arith.constant 0 : index
    %c0_0 = arith.constant 0 : index
    %c0_1 = arith.constant 0 : index
    %c0_2 = arith.constant 0 : index
    %0 = vector.load %arg1[%c0, %c0_0, %c0_1, %c0_2] : memref<1x8x8x64xf32, #tpu.memory_space<vmem>>, vector<1x8x8x64xf32>
    %1 = vector.shape_cast %0 : vector<1x8x8x64xf32> to vector<8x8x64xf32>
    %c0_3 = arith.constant 0 : index
    %c0_4 = arith.constant 0 : index
    %c0_5 = arith.constant 0 : index
    %c0_6 = arith.constant 0 : index
    %2 = vector.load %arg2[%c0_3, %c0_4, %c0_5, %c0_6] : memref<1x8x8x64xf32, #tpu.memory_space<vmem>>, vector<1x8x8x64xf32>
    %3 = vector.shape_cast %2 : vector<1x8x8x64xf32> to vector<8x8x64xf32>
    %c0_7 = arith.constant 0 : index
    %c0_8 = arith.constant 0 : index
    %c0_9 = arith.constant 0 : index
    %c0_10 = arith.constant 0 : index
    %4 = vector.load %arg3[%c0_7, %c0_8, %c0_9, %c0_10] : memref<1x8x8x64xf32, #tpu.memory_space<vmem>>, vector<1x8x8x64xf32>
    %5 = vector.shape_cast %4 : vector<1x8x8x64xf32> to vector<8x8x64xf32>
    %c0_11 = arith.constant 0 : index
    %c0_12 = arith.constant 0 : index
    %c0_13 = arith.constant 0 : index
    %c0_14 = arith.constant 0 : index
    %6 = vector.load %arg4[%c0_11, %c0_12, %c0_13, %c0_14] : memref<1x8x8x64xf32, #tpu.memory_space<vmem>>, vector<1x8x8x64xf32>
    %7 = vector.shape_cast %6 : vector<1x8x8x64xf32> to vector<8x8x64xf32>
    %8 = vector.extract_strided_slice %1 {offsets = [0, 0, 0], sizes = [7, 7, 64], strides = [1, 1, 1]} : vector<8x8x64xf32> to vector<7x7x64xf32>
    %9 = vector.extract_strided_slice %3 {offsets = [0, 0, 0], sizes = [7, 7, 64], strides = [1, 1, 1]} : vector<8x8x64xf32> to vector<7x7x64xf32>
    %10 = arith.maximumf %8, %9 : vector<7x7x64xf32>
    %11 = vector.extract_strided_slice %5 {offsets = [0, 0, 0], sizes = [7, 7, 64], strides = [1, 1, 1]} : vector<8x8x64xf32> to vector<7x7x64xf32>
    %12 = arith.maximumf %10, %11 : vector<7x7x64xf32>
    %13 = vector.extract_strided_slice %7 {offsets = [0, 0, 0], sizes = [7, 7, 64], strides = [1, 1, 1]} : vector<8x8x64xf32> to vector<7x7x64xf32>
    %14 = arith.maximumf %12, %13 : vector<7x7x64xf32>
    %c0_15 = arith.constant 0 : index
    %c0_16 = arith.constant 0 : index
    %c0_17 = arith.constant 0 : index
    %c0_18 = arith.constant 0 : index
    %15 = vector.load %arg5[%c0_15, %c0_16, %c0_17, %c0_18] : memref<1x7x7x64xf32, #tpu.memory_space<vmem>>, vector<1x7x7x64xf32>
    %16 = vector.shape_cast %15 : vector<1x7x7x64xf32> to vector<7x7x64xf32>
    %17 = vector.shape_cast %14 : vector<7x7x64xf32> to vector<1x7x7x64xf32>
    tpu.vector_store %arg5[%c0_15, %c0_16, %c0_17, %c0_18], %17 {strides = array<i32>} : memref<1x7x7x64xf32, #tpu.memory_space<vmem>>, vector<1x7x7x64xf32>,
    return
  }
  func.func @transform_0(%arg0: i32) -> (i32, i32, i32, i32) {
    %c0_i32 = arith.constant 0 : i32
    %c0_i32_0 = arith.constant 0 : i32
    %c0_i32_1 = arith.constant 0 : i32
    %c0_i32_2 = arith.constant 0 : i32
    return %arg0, %c0_i32, %c0_i32_0, %c0_i32_1 : i32, i32, i32, i32
  }
  func.func @transform_1(%arg0: i32) -> (i32, i32, i32, i32) {
    %c0_i32 = arith.constant 0 : i32
    %c0_i32_0 = arith.constant 0 : i32
    %c0_i32_1 = arith.constant 0 : i32
    %c0_i32_2 = arith.constant 0 : i32
    return %arg0, %c0_i32, %c0_i32_0, %c0_i32_1 : i32, i32, i32, i32
  }
  func.func @transform_2(%arg0: i32) -> (i32, i32, i32, i32) {
    %c0_i32 = arith.constant 0 : i32
    %c0_i32_0 = arith.constant 0 : i32
    %c0_i32_1 = arith.constant 0 : i32
    %c0_i32_2 = arith.constant 0 : i32
    return %arg0, %c0_i32, %c0_i32_0, %c0_i32_1 : i32, i32, i32, i32
  }
  func.func @transform_3(%arg0: i32) -> (i32, i32, i32, i32) {
    %c0_i32 = arith.constant 0 : i32
    %c0_i32_0 = arith.constant 0 : i32
    %c0_i32_1 = arith.constant 0 : i32
    %c0_i32_2 = arith.constant 0 : i32
    return %arg0, %c0_i32, %c0_i32_0, %c0_i32_1 : i32, i32, i32, i32
  }
  func.func @transform_4(%arg0: i32) -> (i32, i32, i32, i32) {
    %c0_i32 = arith.constant 0 : i32
    %c0_i32_0 = arith.constant 0 : i32
    %c0_i32_1 = arith.constant 0 : i32
    %c0_i32_2 = arith.constant 0 : i32
    return %arg0, %c0_i32, %c0_i32_0, %c0_i32_1 : i32, i32, i32, i32
  }
}

module attributes {stable_mosaic.version = 11 : i64} {
  func.func @_conv3x3_relu_kernel(%arg0: i32, %arg1: memref<1x83x64xf32, #tpu.memory_space<vmem>>, %arg2: memref<9x64x128xbf16, #tpu.memory_space<vmem>>, %arg3: memref<1x128xf32, #tpu.memory_space<vmem>>, %arg4: memref<1x63x128xf32, #tpu.memory_space<vmem>>) attributes {dimension_semantics = [#tpu.dimension_semantics<parallel>], iteration_bounds = array<i64: 2>, scalar_prefetch = 0 : i64, scratch_operands = 0 : i64, tpu.core_type = #tpu.core_type<tc>, window_params = [{transform_indices = @transform_0, window_bounds = array<i64: 1, 83, 64>}, {pipeline_mode = #tpu.pipeline_mode<synchronous>, transform_indices = @transform_1, window_bounds = array<i64: 9, 64, 128>}, {pipeline_mode = #tpu.pipeline_mode<synchronous>, transform_indices = @transform_2, window_bounds = array<i64: 1, 128>}, {transform_indices = @transform_3, window_bounds = array<i64: 1, 63, 128>}]} {
    %c0 = arith.constant 0 : index
    %c0_0 = arith.constant 0 : index
    %c0_1 = arith.constant 0 : index
    %0 = vector.load %arg1[%c0, %c0_0, %c0_1] : memref<1x83x64xf32, #tpu.memory_space<vmem>>, vector<1x83x64xf32>
    %1 = vector.shape_cast %0 : vector<1x83x64xf32> to vector<83x64xf32>
    %2 = arith.truncf %1 : vector<83x64xf32> to vector<83x64xbf16>
    %cst = arith.constant 0.000000e+00 : f32
    %3 = vector.broadcast %cst : f32 to vector<63x128xf32>
    %4 = vector.extract_strided_slice %2 {offsets = [0, 0], sizes = [63, 64], strides = [1, 1]} : vector<83x64xbf16> to vector<63x64xbf16>
    %c0_2 = arith.constant 0 : index
    %c0_3 = arith.constant 0 : index
    %c0_4 = arith.constant 0 : index
    %5 = vector.load %arg2[%c0_2, %c0_3, %c0_4] : memref<9x64x128xbf16, #tpu.memory_space<vmem>>, vector<1x64x128xbf16>
    %6 = vector.shape_cast %5 : vector<1x64x128xbf16> to vector<64x128xbf16>
    %cst_5 = arith.constant dense<0.000000e+00> : vector<63x128xf32>
    %7 = tpu.matmul %4, %6, %cst_5 {dimension_numbers = #tpu.dot_dimension_numbers<[1], [0], [0], [1], [0, 0, 1, 1], [], []>} : vector<63x64xbf16>, vector<64x128xbf16>, vector<63x128xf32> -> vector<63x128xf32>
    %8 = arith.addf %3, %7 : vector<63x128xf32>
    %9 = vector.extract_strided_slice %2 {offsets = [1, 0], sizes = [63, 64], strides = [1, 1]} : vector<83x64xbf16> to vector<63x64xbf16>
    %c1 = arith.constant 1 : index
    %c0_6 = arith.constant 0 : index
    %c0_7 = arith.constant 0 : index
    %10 = vector.load %arg2[%c1, %c0_6, %c0_7] : memref<9x64x128xbf16, #tpu.memory_space<vmem>>, vector<1x64x128xbf16>
    %11 = vector.shape_cast %10 : vector<1x64x128xbf16> to vector<64x128xbf16>
    %cst_8 = arith.constant dense<0.000000e+00> : vector<63x128xf32>
    %12 = tpu.matmul %9, %11, %cst_8 {dimension_numbers = #tpu.dot_dimension_numbers<[1], [0], [0], [1], [0, 0, 1, 1], [], []>} : vector<63x64xbf16>, vector<64x128xbf16>, vector<63x128xf32> -> vector<63x128xf32>
    %13 = arith.addf %8, %12 : vector<63x128xf32>
    %14 = vector.extract_strided_slice %2 {offsets = [2, 0], sizes = [63, 64], strides = [1, 1]} : vector<83x64xbf16> to vector<63x64xbf16>
    %c2 = arith.constant 2 : index
    %c0_9 = arith.constant 0 : index
    %c0_10 = arith.constant 0 : index
    %15 = vector.load %arg2[%c2, %c0_9, %c0_10] : memref<9x64x128xbf16, #tpu.memory_space<vmem>>, vector<1x64x128xbf16>
    %16 = vector.shape_cast %15 : vector<1x64x128xbf16> to vector<64x128xbf16>
    %cst_11 = arith.constant dense<0.000000e+00> : vector<63x128xf32>
    %17 = tpu.matmul %14, %16, %cst_11 {dimension_numbers = #tpu.dot_dimension_numbers<[1], [0], [0], [1], [0, 0, 1, 1], [], []>} : vector<63x64xbf16>, vector<64x128xbf16>, vector<63x128xf32> -> vector<63x128xf32>
    %18 = arith.addf %13, %17 : vector<63x128xf32>
    %19 = vector.extract_strided_slice %2 {offsets = [9, 0], sizes = [63, 64], strides = [1, 1]} : vector<83x64xbf16> to vector<63x64xbf16>
    %c3 = arith.constant 3 : index
    %c0_12 = arith.constant 0 : index
    %c0_13 = arith.constant 0 : index
    %20 = vector.load %arg2[%c3, %c0_12, %c0_13] : memref<9x64x128xbf16, #tpu.memory_space<vmem>>, vector<1x64x128xbf16>
    %21 = vector.shape_cast %20 : vector<1x64x128xbf16> to vector<64x128xbf16>
    %cst_14 = arith.constant dense<0.000000e+00> : vector<63x128xf32>
    %22 = tpu.matmul %19, %21, %cst_14 {dimension_numbers = #tpu.dot_dimension_numbers<[1], [0], [0], [1], [0, 0, 1, 1], [], []>} : vector<63x64xbf16>, vector<64x128xbf16>, vector<63x128xf32> -> vector<63x128xf32>
    %23 = arith.addf %18, %22 : vector<63x128xf32>
    %24 = vector.extract_strided_slice %2 {offsets = [10, 0], sizes = [63, 64], strides = [1, 1]} : vector<83x64xbf16> to vector<63x64xbf16>
    %c4 = arith.constant 4 : index
    %c0_15 = arith.constant 0 : index
    %c0_16 = arith.constant 0 : index
    %25 = vector.load %arg2[%c4, %c0_15, %c0_16] : memref<9x64x128xbf16, #tpu.memory_space<vmem>>, vector<1x64x128xbf16>
    %26 = vector.shape_cast %25 : vector<1x64x128xbf16> to vector<64x128xbf16>
    %cst_17 = arith.constant dense<0.000000e+00> : vector<63x128xf32>
    %27 = tpu.matmul %24, %26, %cst_17 {dimension_numbers = #tpu.dot_dimension_numbers<[1], [0], [0], [1], [0, 0, 1, 1], [], []>} : vector<63x64xbf16>, vector<64x128xbf16>, vector<63x128xf32> -> vector<63x128xf32>
    %28 = arith.addf %23, %27 : vector<63x128xf32>
    %29 = vector.extract_strided_slice %2 {offsets = [11, 0], sizes = [63, 64], strides = [1, 1]} : vector<83x64xbf16> to vector<63x64xbf16>
    %c5 = arith.constant 5 : index
    %c0_18 = arith.constant 0 : index
    %c0_19 = arith.constant 0 : index
    %30 = vector.load %arg2[%c5, %c0_18, %c0_19] : memref<9x64x128xbf16, #tpu.memory_space<vmem>>, vector<1x64x128xbf16>
    %31 = vector.shape_cast %30 : vector<1x64x128xbf16> to vector<64x128xbf16>
    %cst_20 = arith.constant dense<0.000000e+00> : vector<63x128xf32>
    %32 = tpu.matmul %29, %31, %cst_20 {dimension_numbers = #tpu.dot_dimension_numbers<[1], [0], [0], [1], [0, 0, 1, 1], [], []>} : vector<63x64xbf16>, vector<64x128xbf16>, vector<63x128xf32> -> vector<63x128xf32>
    %33 = arith.addf %28, %32 : vector<63x128xf32>
    %34 = vector.extract_strided_slice %2 {offsets = [18, 0], sizes = [63, 64], strides = [1, 1]} : vector<83x64xbf16> to vector<63x64xbf16>
    %c6 = arith.constant 6 : index
    %c0_21 = arith.constant 0 : index
    %c0_22 = arith.constant 0 : index
    %35 = vector.load %arg2[%c6, %c0_21, %c0_22] : memref<9x64x128xbf16, #tpu.memory_space<vmem>>, vector<1x64x128xbf16>
    %36 = vector.shape_cast %35 : vector<1x64x128xbf16> to vector<64x128xbf16>
    %cst_23 = arith.constant dense<0.000000e+00> : vector<63x128xf32>
    %37 = tpu.matmul %34, %36, %cst_23 {dimension_numbers = #tpu.dot_dimension_numbers<[1], [0], [0], [1], [0, 0, 1, 1], [], []>} : vector<63x64xbf16>, vector<64x128xbf16>, vector<63x128xf32> -> vector<63x128xf32>
    %38 = arith.addf %33, %37 : vector<63x128xf32>
    %39 = vector.extract_strided_slice %2 {offsets = [19, 0], sizes = [63, 64], strides = [1, 1]} : vector<83x64xbf16> to vector<63x64xbf16>
    %c7 = arith.constant 7 : index
    %c0_24 = arith.constant 0 : index
    %c0_25 = arith.constant 0 : index
    %40 = vector.load %arg2[%c7, %c0_24, %c0_25] : memref<9x64x128xbf16, #tpu.memory_space<vmem>>, vector<1x64x128xbf16>
    %41 = vector.shape_cast %40 : vector<1x64x128xbf16> to vector<64x128xbf16>
    %cst_26 = arith.constant dense<0.000000e+00> : vector<63x128xf32>
    %42 = tpu.matmul %39, %41, %cst_26 {dimension_numbers = #tpu.dot_dimension_numbers<[1], [0], [0], [1], [0, 0, 1, 1], [], []>} : vector<63x64xbf16>, vector<64x128xbf16>, vector<63x128xf32> -> vector<63x128xf32>
    %43 = arith.addf %38, %42 : vector<63x128xf32>
    %44 = vector.extract_strided_slice %2 {offsets = [20, 0], sizes = [63, 64], strides = [1, 1]} : vector<83x64xbf16> to vector<63x64xbf16>
    %c8 = arith.constant 8 : index
    %c0_27 = arith.constant 0 : index
    %c0_28 = arith.constant 0 : index
    %45 = vector.load %arg2[%c8, %c0_27, %c0_28] : memref<9x64x128xbf16, #tpu.memory_space<vmem>>, vector<1x64x128xbf16>
    %46 = vector.shape_cast %45 : vector<1x64x128xbf16> to vector<64x128xbf16>
    %cst_29 = arith.constant dense<0.000000e+00> : vector<63x128xf32>
    %47 = tpu.matmul %44, %46, %cst_29 {dimension_numbers = #tpu.dot_dimension_numbers<[1], [0], [0], [1], [0, 0, 1, 1], [], []>} : vector<63x64xbf16>, vector<64x128xbf16>, vector<63x128xf32> -> vector<63x128xf32>
    %48 = arith.addf %43, %47 : vector<63x128xf32>
    %c0_30 = arith.constant 0 : index
    %c0_31 = arith.constant 0 : index
    %49 = vector.load %arg3[%c0_30, %c0_31] : memref<1x128xf32, #tpu.memory_space<vmem>>, vector<1x128xf32>
    %50 = vector.broadcast %49 : vector<1x128xf32> to vector<63x128xf32>
    %51 = arith.addf %48, %50 : vector<63x128xf32>
    %cst_32 = arith.constant 0.000000e+00 : f32
    %52 = vector.broadcast %cst_32 : f32 to vector<63x128xf32>
    %53 = arith.maximumf %51, %52 : vector<63x128xf32>
    %c0_33 = arith.constant 0 : index
    %c0_34 = arith.constant 0 : index
    %c0_35 = arith.constant 0 : index
    %54 = vector.load %arg4[%c0_33, %c0_34, %c0_35] : memref<1x63x128xf32, #tpu.memory_space<vmem>>, vector<1x63x128xf32>
    %55 = vector.shape_cast %54 : vector<1x63x128xf32> to vector<63x128xf32>
    %56 = vector.shape_cast %53 : vector<63x128xf32> to vector<1x63x128xf32>
    tpu.vector_store %arg4[%c0_33, %c0_34, %c0_35], %56 {strides = array<i32>} : memref<1x63x128xf32, #tpu.memory_space<vmem>>, vector<1x63x128xf32>,
    return
  }
  func.func @transform_0(%arg0: i32) -> (i32, i32, i32) {
    %c0_i32 = arith.constant 0 : i32
    %c0_i32_0 = arith.constant 0 : i32
    %c0_i32_1 = arith.constant 0 : i32
    return %arg0, %c0_i32, %c0_i32_0 : i32, i32, i32
  }
  func.func @transform_1(%arg0: i32) -> (i32, i32, i32) {
    %c0_i32 = arith.constant 0 : i32
    %c0_i32_0 = arith.constant 0 : i32
    %c0_i32_1 = arith.constant 0 : i32
    %c0_i32_2 = arith.constant 0 : i32
    return %c0_i32, %c0_i32_0, %c0_i32_1 : i32, i32, i32
  }
  func.func @transform_2(%arg0: i32) -> (i32, i32) {
    %c0_i32 = arith.constant 0 : i32
    %c0_i32_0 = arith.constant 0 : i32
    %c0_i32_1 = arith.constant 0 : i32
    return %c0_i32, %c0_i32_0 : i32, i32
  }
  func.func @transform_3(%arg0: i32) -> (i32, i32, i32) {
    %c0_i32 = arith.constant 0 : i32
    %c0_i32_0 = arith.constant 0 : i32
    %c0_i32_1 = arith.constant 0 : i32
    return %arg0, %c0_i32, %c0_i32_0 : i32, i32, i32
  }
}

module attributes {stable_mosaic.version = 11 : i64} {
  func.func @_maxpool_kernel(%arg0: i32, %arg1: memref<1x4x4x128xf32, #tpu.memory_space<vmem>>, %arg2: memref<1x4x4x128xf32, #tpu.memory_space<vmem>>, %arg3: memref<1x4x4x128xf32, #tpu.memory_space<vmem>>, %arg4: memref<1x4x4x128xf32, #tpu.memory_space<vmem>>, %arg5: memref<1x4x4x128xf32, #tpu.memory_space<vmem>>) attributes {dimension_semantics = [#tpu.dimension_semantics<parallel>], iteration_bounds = array<i64: 2>, scalar_prefetch = 0 : i64, scratch_operands = 0 : i64, tpu.core_type = #tpu.core_type<tc>, window_params = [{transform_indices = @transform_0, window_bounds = array<i64: 1, 4, 4, 128>}, {transform_indices = @transform_1, window_bounds = array<i64: 1, 4, 4, 128>}, {transform_indices = @transform_2, window_bounds = array<i64: 1, 4, 4, 128>}, {transform_indices = @transform_3, window_bounds = array<i64: 1, 4, 4, 128>}, {transform_indices = @transform_4, window_bounds = array<i64: 1, 4, 4, 128>}]} {
    %c0 = arith.constant 0 : index
    %c0_0 = arith.constant 0 : index
    %c0_1 = arith.constant 0 : index
    %c0_2 = arith.constant 0 : index
    %0 = vector.load %arg1[%c0, %c0_0, %c0_1, %c0_2] : memref<1x4x4x128xf32, #tpu.memory_space<vmem>>, vector<1x4x4x128xf32>
    %1 = vector.shape_cast %0 : vector<1x4x4x128xf32> to vector<4x4x128xf32>
    %c0_3 = arith.constant 0 : index
    %c0_4 = arith.constant 0 : index
    %c0_5 = arith.constant 0 : index
    %c0_6 = arith.constant 0 : index
    %2 = vector.load %arg2[%c0_3, %c0_4, %c0_5, %c0_6] : memref<1x4x4x128xf32, #tpu.memory_space<vmem>>, vector<1x4x4x128xf32>
    %3 = vector.shape_cast %2 : vector<1x4x4x128xf32> to vector<4x4x128xf32>
    %c0_7 = arith.constant 0 : index
    %c0_8 = arith.constant 0 : index
    %c0_9 = arith.constant 0 : index
    %c0_10 = arith.constant 0 : index
    %4 = vector.load %arg3[%c0_7, %c0_8, %c0_9, %c0_10] : memref<1x4x4x128xf32, #tpu.memory_space<vmem>>, vector<1x4x4x128xf32>
    %5 = vector.shape_cast %4 : vector<1x4x4x128xf32> to vector<4x4x128xf32>
    %c0_11 = arith.constant 0 : index
    %c0_12 = arith.constant 0 : index
    %c0_13 = arith.constant 0 : index
    %c0_14 = arith.constant 0 : index
    %6 = vector.load %arg4[%c0_11, %c0_12, %c0_13, %c0_14] : memref<1x4x4x128xf32, #tpu.memory_space<vmem>>, vector<1x4x4x128xf32>
    %7 = vector.shape_cast %6 : vector<1x4x4x128xf32> to vector<4x4x128xf32>
    %8 = arith.maximumf %1, %3 : vector<4x4x128xf32>
    %9 = arith.maximumf %8, %5 : vector<4x4x128xf32>
    %10 = arith.maximumf %9, %7 : vector<4x4x128xf32>
    %c0_15 = arith.constant 0 : index
    %c0_16 = arith.constant 0 : index
    %c0_17 = arith.constant 0 : index
    %c0_18 = arith.constant 0 : index
    %11 = vector.load %arg5[%c0_15, %c0_16, %c0_17, %c0_18] : memref<1x4x4x128xf32, #tpu.memory_space<vmem>>, vector<1x4x4x128xf32>
    %12 = vector.shape_cast %11 : vector<1x4x4x128xf32> to vector<4x4x128xf32>
    %13 = vector.shape_cast %10 : vector<4x4x128xf32> to vector<1x4x4x128xf32>
    tpu.vector_store %arg5[%c0_15, %c0_16, %c0_17, %c0_18], %13 {strides = array<i32>} : memref<1x4x4x128xf32, #tpu.memory_space<vmem>>, vector<1x4x4x128xf32>,
    return
  }
  func.func @transform_0(%arg0: i32) -> (i32, i32, i32, i32) {
    %c0_i32 = arith.constant 0 : i32
    %c0_i32_0 = arith.constant 0 : i32
    %c0_i32_1 = arith.constant 0 : i32
    %c0_i32_2 = arith.constant 0 : i32
    return %arg0, %c0_i32, %c0_i32_0, %c0_i32_1 : i32, i32, i32, i32
  }
  func.func @transform_1(%arg0: i32) -> (i32, i32, i32, i32) {
    %c0_i32 = arith.constant 0 : i32
    %c0_i32_0 = arith.constant 0 : i32
    %c0_i32_1 = arith.constant 0 : i32
    %c0_i32_2 = arith.constant 0 : i32
    return %arg0, %c0_i32, %c0_i32_0, %c0_i32_1 : i32, i32, i32, i32
  }
  func.func @transform_2(%arg0: i32) -> (i32, i32, i32, i32) {
    %c0_i32 = arith.constant 0 : i32
    %c0_i32_0 = arith.constant 0 : i32
    %c0_i32_1 = arith.constant 0 : i32
    %c0_i32_2 = arith.constant 0 : i32
    return %arg0, %c0_i32, %c0_i32_0, %c0_i32_1 : i32, i32, i32, i32
  }
  func.func @transform_3(%arg0: i32) -> (i32, i32, i32, i32) {
    %c0_i32 = arith.constant 0 : i32
    %c0_i32_0 = arith.constant 0 : i32
    %c0_i32_1 = arith.constant 0 : i32
    %c0_i32_2 = arith.constant 0 : i32
    return %arg0, %c0_i32, %c0_i32_0, %c0_i32_1 : i32, i32, i32, i32
  }
  func.func @transform_4(%arg0: i32) -> (i32, i32, i32, i32) {
    %c0_i32 = arith.constant 0 : i32
    %c0_i32_0 = arith.constant 0 : i32
    %c0_i32_1 = arith.constant 0 : i32
    %c0_i32_2 = arith.constant 0 : i32
    return %arg0, %c0_i32, %c0_i32_0, %c0_i32_1 : i32, i32, i32, i32
  }
}

module attributes {stable_mosaic.version = 11 : i64} {
  func.func @_mlp_head_kernel(%arg0: i32, %arg1: memref<2x512xf32, #tpu.memory_space<vmem>>, %arg2: memref<512x640xbf16, #tpu.memory_space<vmem>>, %arg3: memref<1x640xf32, #tpu.memory_space<vmem>>, %arg4: memref<640x128xbf16, #tpu.memory_space<vmem>>, %arg5: memref<1x128xf32, #tpu.memory_space<vmem>>, %arg6: memref<2x128xf32, #tpu.memory_space<vmem>>, %arg7: memref<2x640xf32, #tpu.memory_space<vmem>>) attributes {dimension_semantics = [#tpu.dimension_semantics<arbitrary>], iteration_bounds = array<i64: 4>, scalar_prefetch = 0 : i64, scratch_operands = 1 : i64, tpu.core_type = #tpu.core_type<tc>, window_params = [{transform_indices = @transform_0, window_bounds = array<i64: 2, 512>}, {transform_indices = @transform_1, window_bounds = array<i64: 512, 640>}, {pipeline_mode = #tpu.pipeline_mode<synchronous>, transform_indices = @transform_2, window_bounds = array<i64: 1, 640>}, {pipeline_mode = #tpu.pipeline_mode<synchronous>, transform_indices = @transform_3, window_bounds = array<i64: 640, 128>}, {pipeline_mode = #tpu.pipeline_mode<synchronous>, transform_indices = @transform_4, window_bounds = array<i64: 1, 128>}, {pipeline_mode = #tpu.pipeline_mode<synchronous>, transform_indices = @transform_5, window_bounds = array<i64: 2, 128>}]} {
    %c0_i32 = arith.constant 0 : i32
    %0 = arith.cmpi eq, %arg0, %c0_i32 : i32
    %1 = arith.extui %0 : i1 to i32
    %c0_i32_0 = arith.constant 0 : i32
    %2 = arith.cmpi ne, %1, %c0_i32_0 : i32
    scf.if %2 {
      %cst_9 = arith.constant 0.000000e+00 : f32
      %13 = vector.broadcast %cst_9 : f32 to vector<2x640xf32>
      %c0_10 = arith.constant 0 : index
      %c0_11 = arith.constant 0 : index
      %14 = vector.load %arg7[%c0_10, %c0_11] : memref<2x640xf32, #tpu.memory_space<vmem>>, vector<2x640xf32>
      tpu.vector_store %arg7[%c0_10, %c0_11], %13 {strides = array<i32>} : memref<2x640xf32, #tpu.memory_space<vmem>>, vector<2x640xf32>,
    } else {
    }
    %c0 = arith.constant 0 : index
    %c0_1 = arith.constant 0 : index
    %3 = vector.load %arg1[%c0, %c0_1] : memref<2x512xf32, #tpu.memory_space<vmem>>, vector<2x512xf32>
    %4 = arith.truncf %3 : vector<2x512xf32> to vector<2x512xbf16>
    %c0_2 = arith.constant 0 : index
    %c0_3 = arith.constant 0 : index
    %5 = vector.load %arg7[%c0_2, %c0_3] : memref<2x640xf32, #tpu.memory_space<vmem>>, vector<2x640xf32>
    %c0_4 = arith.constant 0 : index
    %c0_5 = arith.constant 0 : index
    %6 = vector.load %arg2[%c0_4, %c0_5] : memref<512x640xbf16, #tpu.memory_space<vmem>>, vector<512x640xbf16>
    %cst = arith.constant dense<0.000000e+00> : vector<2x640xf32>
    %7 = tpu.matmul %4, %6, %cst {dimension_numbers = #tpu.dot_dimension_numbers<[1], [0], [0], [1], [0, 0, 1, 1], [], []>} : vector<2x512xbf16>, vector<512x640xbf16>, vector<2x640xf32> -> vector<2x640xf32>
    %8 = arith.addf %5, %7 : vector<2x640xf32>
    %c0_6 = arith.constant 0 : index
    %c0_7 = arith.constant 0 : index
    %9 = vector.load %arg7[%c0_6, %c0_7] : memref<2x640xf32, #tpu.memory_space<vmem>>, vector<2x640xf32>
    tpu.vector_store %arg7[%c0_6, %c0_7], %8 {strides = array<i32>} : memref<2x640xf32, #tpu.memory_space<vmem>>, vector<2x640xf32>,
    %c3_i32 = arith.constant 3 : i32
    %10 = arith.cmpi eq, %arg0, %c3_i32 : i32
    %11 = arith.extui %10 : i1 to i32
    %c0_i32_8 = arith.constant 0 : i32
    %12 = arith.cmpi ne, %11, %c0_i32_8 : i32
    scf.if %12 {
      %c0_9 = arith.constant 0 : index
      %c0_10 = arith.constant 0 : index
      %13 = vector.load %arg7[%c0_9, %c0_10] : memref<2x640xf32, #tpu.memory_space<vmem>>, vector<2x640xf32>
      %c0_11 = arith.constant 0 : index
      %c0_12 = arith.constant 0 : index
      %14 = vector.load %arg3[%c0_11, %c0_12] : memref<1x640xf32, #tpu.memory_space<vmem>>, vector<1x640xf32>
      %15 = vector.broadcast %14 : vector<1x640xf32> to vector<2x640xf32>
      %16 = arith.addf %13, %15 : vector<2x640xf32>
      %cst_13 = arith.constant 0.000000e+00 : f32
      %17 = vector.broadcast %cst_13 : f32 to vector<2x640xf32>
      %18 = arith.maximumf %16, %17 : vector<2x640xf32>
      %19 = arith.truncf %18 : vector<2x640xf32> to vector<2x640xbf16>
      %c0_14 = arith.constant 0 : index
      %c0_15 = arith.constant 0 : index
      %20 = vector.load %arg4[%c0_14, %c0_15] : memref<640x128xbf16, #tpu.memory_space<vmem>>, vector<640x128xbf16>
      %cst_16 = arith.constant dense<0.000000e+00> : vector<2x128xf32>
      %21 = tpu.matmul %19, %20, %cst_16 {dimension_numbers = #tpu.dot_dimension_numbers<[1], [0], [0], [1], [0, 0, 1, 1], [], []>} : vector<2x640xbf16>, vector<640x128xbf16>, vector<2x128xf32> -> vector<2x128xf32>
      %c0_17 = arith.constant 0 : index
      %c0_18 = arith.constant 0 : index
      %22 = vector.load %arg5[%c0_17, %c0_18] : memref<1x128xf32, #tpu.memory_space<vmem>>, vector<1x128xf32>
      %23 = vector.broadcast %22 : vector<1x128xf32> to vector<2x128xf32>
      %24 = arith.addf %21, %23 : vector<2x128xf32>
      %c0_19 = arith.constant 0 : index
      %c0_20 = arith.constant 0 : index
      %25 = vector.load %arg6[%c0_19, %c0_20] : memref<2x128xf32, #tpu.memory_space<vmem>>, vector<2x128xf32>
      tpu.vector_store %arg6[%c0_19, %c0_20], %24 {strides = array<i32>} : memref<2x128xf32, #tpu.memory_space<vmem>>, vector<2x128xf32>,
    } else {
    }
    return
  }
  func.func @transform_0(%arg0: i32) -> (i32, i32) {
    %c0_i32 = arith.constant 0 : i32
    %c0_i32_0 = arith.constant 0 : i32
    return %c0_i32, %arg0 : i32, i32
  }
  func.func @transform_1(%arg0: i32) -> (i32, i32) {
    %c0_i32 = arith.constant 0 : i32
    %c0_i32_0 = arith.constant 0 : i32
    return %arg0, %c0_i32 : i32, i32
  }
  func.func @transform_2(%arg0: i32) -> (i32, i32) {
    %c0_i32 = arith.constant 0 : i32
    %c0_i32_0 = arith.constant 0 : i32
    %c0_i32_1 = arith.constant 0 : i32
    return %c0_i32, %c0_i32_0 : i32, i32
  }
  func.func @transform_3(%arg0: i32) -> (i32, i32) {
    %c0_i32 = arith.constant 0 : i32
    %c0_i32_0 = arith.constant 0 : i32
    %c0_i32_1 = arith.constant 0 : i32
    return %c0_i32, %c0_i32_0 : i32, i32
  }
  func.func @transform_4(%arg0: i32) -> (i32, i32) {
    %c0_i32 = arith.constant 0 : i32
    %c0_i32_0 = arith.constant 0 : i32
    %c0_i32_1 = arith.constant 0 : i32
    return %c0_i32, %c0_i32_0 : i32, i32
  }
  func.func @transform_5(%arg0: i32) -> (i32, i32) {
    %c0_i32 = arith.constant 0 : i32
    %c0_i32_0 = arith.constant 0 : i32
    %c0_i32_1 = arith.constant 0 : i32
    return %c0_i32, %c0_i32_0 : i32, i32
  }
}

</mosaic_0001>

<bundles_post_ra>
// kernel: cnn_forward.8
= control target key start
LH: loop header
LB: loop body
LE: loop exit
PB: predicated region body
PF: predicated region fallthrough
CT: control target
= control target key end

     0   :  { %s1025_s15 = smov 0   ;;  %s1443_s0 = inlined_call_operand.vmem [shape: f32[2,16,16,32], index: 0, kind: input, shape index: {}]   ;;  %s1444_s1 = inlined_call_operand.vmem [shape: f32[2,16,16,32], index: 1, kind: input, shape index: {}]   ;;  %s1445_s2 = inlined_call_operand.vmem [shape: f32[2,16,16,32], index: 2, kind: input, shape index: {}]   ;;  %s1446_s3 = inlined_call_operand.vmem [shape: f32[2,16,16,32], index: 3, kind: input, shape index: {}]   ;;  %s1447_s4 = inlined_call_operand.vmem [shape: f32[2,15,15,32], index: 4, kind: output, shape index: {}]  }
   0x1 LB: > { %s963_s16 = sadd.s32 4294967295, %s998_s15   ;;  %p967_p0 = scmp.ge.s32.totalorder %s998_s15, 1  ;;  %s998_s15 = sphi %s1025_s15, %s14_s15  }
   0x2   : > { %p192_p1 = scmp.lt.s32.totalorder %s998_s15, 3 }
   0x4   : > { %p193_p2 = pnand %p967_p0, %p192_p1 }
   0x5   : > { %p233_p3 = scmp.lt.s32.totalorder (!%p193_p2), %s963_s16, 1  ;;  %vm442_vm0 = vcmask (!%p193_p2), 1046528   ;;  %vm840_vm1 = vcmask (!%p193_p2), 261120   ;;  %vm842_vm2 = vcmask (!%p193_p2), 260096  }
   0x6   : > { %196 = sbr.rel (%p193_p2) target bundleno = 110 (0x6e), region = 36 }
   0xd   : > { %s1449_s16 = smov (!%p233_p3, %s963_s16), 1 }
   0xe   : > { %s979_s17 = sshll.u32 %s1449_s16, 8  ;;  %s983_s30 = smul.u32 240, %s1449_s16 }
   0xf   : > { %s1039_s20 = scalar_lea.vmem %s1443_s0, %s979_s17  ;;  %s1044_s23 = scalar_lea.vmem %s1444_s1, %s979_s17 }
  0x10   : > { %s1049_s26 = scalar_lea.vmem %s1445_s2, %s979_s17  ;;  %v258_v0 = vld [vmem:[%s1039_s20] sm:$0xff]  ;;  %v259_v1 = vld [vmem:[%s1039_s20 + $0x8] sm:$0xff]  ;;  %v1054_v2 = vld [vmem:[%s1039_s20 + $0x10] sm:$0xff]  ;;  %s1059_s29 = scalar_lea.vmem %s1446_s3, %s979_s17 }
  0x11   : > { %v1062_v3 = vld [vmem:[%s1039_s20 + $0x18] sm:$0xff]  ;;  %v290_v4 = vld [vmem:[%s1044_s23] sm:$0xff]  ;;  %v1066_v5 = vld [vmem:[%s1044_s23 + $0x10] sm:$0xff]  ;;  %v443_v6 = vrot.slane %v258_v0, 1  ;;  %v444_v7 = vrot.slane %v259_v1, 1  ;;  %v446_v8 = vrot.slane %v1054_v2, 1  ;;  %s1146_s7 = scalar_lea.vmem %s1447_s4, %s983_s30 }
  0x12   : > { %v322_v9 = vld [vmem:[%s1049_s26] sm:$0xff]  ;;  %v1071_v10 = vld [vmem:[%s1049_s26 + $0x8] sm:$0xff]  ;;  %v324_v11 = vld [vmem:[%s1049_s26 + $0x10] sm:$0xff]  ;;  %v382_v12 = vmax.f32 %v258_v0, %v290_v4  ;;  %v384_v13 = vmax.f32 %v1054_v2, %v1066_v5  ;;  %v1077_v14 = vrot.slane %v1062_v3, 1 }
  0x13   : > { %v445_v15 = vsel %vm442_vm0, %v443_v6, %v444_v7  ;;  %v638_v16 = vrot.slane %v322_v9, 1  ;;  %v639_v17 = vrot.slane %v1071_v10, 1  ;;  %v641_v18 = vrot.slane %v324_v11, 1  ;;  %v291_v19 = vld [vmem:[%s1044_s23 + $0x8] sm:$0xff]  ;;  %v352_v20 = vld [vmem:[%s1059_s29] sm:$0xff]  ;;  %v1088_v23 = vld [vmem:[%s1044_s23 + $0x18] sm:$0xff] }
  0x14   : > { %v1085_v21 = vsel %vm442_vm0, %v446_v8, %v1077_v14  ;;  %v518_v22 = vmax.f32 %v382_v12, %v445_v15  ;;  %v325_v24 = vld [vmem:[%s1049_s26 + $0x18] sm:$0xff]  ;;  %v383_v25 = vmax.f32 %v259_v1, %v291_v19  ;;  %v385_v28 = vmax.f32 %v1062_v3, %v1088_v23  ;;  %v262_v30 = vld [vmem:[%s1039_s20 + $0x20] sm:$0xff]  ;;  %v1097_v31 = vld [vmem:[%s1039_s20 + $0x28] sm:$0xff] }
  0x15   : > { %v520_v26 = vmax.f32 %v384_v13, %v1085_v21  ;;  %v640_v27 = vsel %vm442_vm0, %v638_v16, %v639_v17  ;;  %v642_v29 = vrot.slane %v325_v24, 1  ;;  %v1100_v32 = vld [vmem:[%s1044_s23 + $0x20] sm:$0xff]  ;;  %v354_v33 = vld [vmem:[%s1059_s29 + $0x10] sm:$0xff]  ;;  %v449_v38 = vrot.slane %v262_v30, 1  ;;  %v295_v39 = vld [vmem:[%s1044_s23 + $0x28] sm:$0xff] }
  0x16   : > { %v548_v34 = vmax.f32 %v518_v22, %v322_v9  ;;  %v519_v35 = vmax.f32 %v383_v25, %v444_v7  ;;  %v326_v36 = vld [vmem:[%s1049_s26 + $0x20] sm:$0xff]  ;;  %v386_v37 = vmax.f32 %v262_v30, %v1100_v32  ;;  %v353_v41 = vld [vmem:[%s1059_s29 + $0x8] sm:$0xff]  ;;  %v521_v42 = vmax.f32 %v385_v28, %v1077_v14  ;;  %v355_v49 = vld [vmem:[%s1059_s29 + $0x18] sm:$0xff] }
  0x17   : > { %v550_v40 = vmax.f32 %v520_v26, %v324_v11  ;;  %v1109_v43 = vrot.slane %v1097_v31, 1  ;;  %v643_v44 = vsel %vm442_vm0, %v641_v18, %v642_v29  ;;  %v1113_v45 = vld [vmem:[%s1049_s26 + $0x28] sm:$0xff]  ;;  %v644_v48 = vrot.slane %v326_v36, 1  ;;  %v264_v51 = vld [vmem:[%s1039_s20 + $0x30] sm:$0xff]  ;;  %v1127_v61 = vld [vmem:[%s1039_s20 + $0x38] sm:$0xff] }
  0x18   : > { %v578_v46 = vmax.f32 %v548_v34, %v352_v20  ;;  %v549_v47 = vmax.f32 %v519_v35, %v1071_v10  ;;  %v387_v50 = vmax.f32 %v1097_v31, %v295_v39  ;;  %v1120_v52 = vld [vmem:[%s1044_s23 + $0x30] sm:$0xff]  ;;  %v551_v54 = vmax.f32 %v521_v42, %v325_v24  ;;  %v356_v62 = vld [vmem:[%s1059_s29 + $0x20] sm:$0xff]  ;;  %v297_v11 = vld [vmem:[%s1044_s23 + $0x38] sm:$0xff] }
  0x19   : > { %v580_v53 = vmax.f32 %v550_v40, %v354_v33  ;;  %v451_v55 = vsel %vm442_vm0, %v449_v38, %v1109_v43  ;;  %v645_v56 = vrot.slane %v1113_v45, 1  ;;  %v328_v1 = vld [vmem:[%s1049_s26 + $0x30] sm:$0xff]  ;;  %v388_v4 = vmax.f32 %v264_v51, %v1120_v52  ;;  %v357_v20 = vld [vmem:[%s1059_s29 + $0x28] sm:$0xff]  ;;  %v329_v25 = vld [vmem:[%s1049_s26 + $0x38] sm:$0xff] }
  0x1a   : > { %v713_v57 = vmax.f32 %v578_v46, %v640_v27  ;;  %v579_v58 = vmax.f32 %v549_v47, %v353_v41  ;;  %v522_v59 = vmax.f32 %v386_v37, %v451_v55  ;;  %v523_v60 = vmax.f32 %v387_v50, %v1109_v43  ;;  %v358_v34 = vld [vmem:[%s1059_s29 + $0x30] sm:$0xff]  ;;  %v1163_v37 = vld [vmem:[%s1039_s20 + $0x48] sm:$0xff]  ;;  %v330_v41 = vld [vmem:[%s1049_s26 + $0x40] sm:$0xff] }
  0x1b   : > { %v715_v63 = vmax.f32 %v580_v53, %v643_v44  ;;  %v581_v0 = vmax.f32 %v551_v54, %v355_v49  ;;  %v452_v6 = vrot.slane %v264_v51, 1  ;;  %v1137_v15 = vrot.slane %v1127_v61, 1  ;;  %v299_v42 = vld [vmem:[%s1044_s23 + $0x48] sm:$0xff]  ;;  %v359_v47 = vld [vmem:[%s1059_s29 + $0x38] sm:$0xff] }
  0x1c   : > { %v743_v7 = vmax.f32 %v713_v57, %v1054_v2  ;;  %v714_v8 = vmax.f32 %v579_v58, %v639_v17  ;;  %v552_v9 = vmax.f32 %v522_v59, %v326_v36  ;;  %v553_v10 = vmax.f32 %v523_v60, %v1113_v45  ;;  %v1189_v57 = vld [vmem:[%s1044_s23 + $0x50] sm:$0xff] }
  0x1d   : > { %v745_v12 = vmax.f32 %v715_v63, %v262_v30  ;;  %v716_v13 = vmax.f32 %v581_v0, %v642_v29  ;;  %v646_v16 = vsel %vm442_vm0, %v644_v48, %v645_v56  ;;  %v647_v17 = vrot.slane %v328_v1, 1  ;;  %v266_v30 = vld [vmem:[%s1039_s20 + $0x40] sm:$0xff] }
  0x1e   : > { %v773_v18 = vmax.f32 %v743_v7, %v1066_v5  ;;  %v744_v19 = vmax.f32 %v714_v8, %v1062_v3  ;;  %v582_v2 = vmax.f32 %v552_v9, %v356_v62  ;;  %v454_v5 = vsel %vm442_vm0, %v452_v6, %v1137_v15  ;;  %v269_v62 = vld [vmem:[%s1039_s20 + $0x58] sm:$0xff]  ;;  %v360_v6 = vld [vmem:[%s1059_s29 + $0x40] sm:$0xff] }
  0x1f   : > { %v775_v22 = vmax.f32 %v745_v12, %v1100_v32  ;;  %v746_v24 = vmax.f32 %v716_v13, %v1097_v31  ;;  %v389_v3 = vmax.f32 %v1127_v61, %v297_v11  ;;  %v524_v28 = vmax.f32 %v388_v4, %v454_v5  ;;  %v1158_v32 = vld [vmem:[%s1044_s23 + $0x40] sm:$0xff]  ;;  %v332_v4 = vld [vmem:[%s1049_s26 + $0x50] sm:$0xff]  ;;  %v301_v12 = vld [vmem:[%s1044_s23 + $0x58] sm:$0xff] }
  0x20   : > { %v810_v26 = vmax.f32 %v773_v18, %v1085_v21  ;;  %v774_v27 = vmax.f32 %v744_v19, %v1088_v23  ;;  %v717_v29 = vmax.f32 %v582_v2, %v646_v16  ;;  %v583_v36 = vmax.f32 %v553_v10, %v357_v20  ;;  %v361_v13 = vld [vmem:[%s1059_s29 + $0x48] sm:$0xff]  ;;  %v333_v2 = vld [vmem:[%s1049_s26 + $0x58] sm:$0xff] }
  0x21   : > { %v812_v31 = vmax.f32 %v775_v22, %v451_v55  ;;  %v776_v33 = vmax.f32 %v746_v24, %v295_v39  ;;  %v525_v35 = vmax.f32 %v389_v3, %v1137_v15  ;;  %v554_v23 = vmax.f32 %v524_v28, %v328_v1  ;;  %v1218_v28 = vld [vmem:[%s1039_s20 + $0x68] sm:$0xff] }
  0x22   : > { %841 = vst.msk [vmem:[%s1146_s7] sm:$0xff] %vm840_vm1, %v810_v26  ;;  %v811_v21 = vmax.f32 %v774_v27, %v1077_v14  ;;  %v747_v38 = vmax.f32 %v717_v29, %v264_v51  ;;  %v648_v40 = vrot.slane %v329_v25, 1  ;;  %v718_v45 = vmax.f32 %v583_v36, %v645_v56  ;;  %v331_v51 = vld [vmem:[%s1049_s26 + $0x48] sm:$0xff]  ;;  %v268_v56 = vld [vmem:[%s1039_s20 + $0x50] sm:$0xff] }
  0x23   : > { %844 = vst.msk [vmem:[%s1146_s7 + $0x10] sm:$0xff] %vm840_vm1, %v812_v31  ;;  %v813_v39 = vmax.f32 %v776_v33, %v1109_v43  ;;  %v555_v44 = vmax.f32 %v525_v35, %v329_v25  ;;  %v390_v46 = vmax.f32 %v266_v30, %v1158_v32  ;;  %v584_v14 = vmax.f32 %v554_v23, %v358_v34  ;;  %v1211_v25 = vld [vmem:[%s1044_s23 + $0x60] sm:$0xff]  ;;  %v362_v33 = vld [vmem:[%s1059_s29 + $0x50] sm:$0xff]  ;;  %v303_v23 = vld [vmem:[%s1044_s23 + $0x68] sm:$0xff] }
  0x24   : > { %843 = vst.msk [vmem:[%s1146_s7 + $0x8] sm:$0x7f] %vm842_vm2, %v811_v21  ;;  %v777_v48 = vmax.f32 %v747_v38, %v1120_v52  ;;  %v455_v49 = vrot.slane %v266_v30, 1  ;;  %v1179_v50 = vrot.slane %v1163_v37, 1  ;;  %v748_v43 = vmax.f32 %v718_v45, %v1127_v61 }
  0x25   : > { %845 = vst.msk [vmem:[%s1146_s7 + $0x18] sm:$0x7f] %vm842_vm2, %v813_v39  ;;  %v649_v53 = vsel %vm442_vm0, %v647_v17, %v648_v40  ;;  %v650_v54 = vrot.slane %v330_v41, 1  ;;  %v391_v55 = vmax.f32 %v1163_v37, %v299_v42  ;;  %v585_v60 = vmax.f32 %v555_v44, %v359_v47  ;;  %v363_v39 = vld [vmem:[%s1059_s29 + $0x58] sm:$0xff] }
  0x26   : > { %v814_v52 = vmax.f32 %v777_v48, %v454_v5  ;;  %v457_v58 = vsel %vm442_vm0, %v455_v49, %v1179_v50  ;;  %v719_v59 = vmax.f32 %v584_v14, %v649_v53  ;;  %v778_v61 = vmax.f32 %v748_v43, %v297_v11  ;;  %v270_v5 = vld [vmem:[%s1039_s20 + $0x60] sm:$0xff]  ;;  %v335_v14 = vld [vmem:[%s1049_s26 + $0x68] sm:$0xff]  ;;  %v272_v48 = vld [vmem:[%s1039_s20 + $0x70] sm:$0xff] }
  0x27   : > { %v526_v63 = vmax.f32 %v390_v46, %v457_v58  ;;  %v527_v0 = vmax.f32 %v391_v55, %v1179_v50  ;;  %v651_v1 = vrot.slane %v331_v51, 1  ;;  %v720_v8 = vmax.f32 %v585_v60, %v648_v40  ;;  %v1236_v49 = vld [vmem:[%s1044_s23 + $0x70] sm:$0xff] }
  0x28   : > { %846 = vst.msk [vmem:[%s1146_s7 + $0x20] sm:$0xff] %vm840_vm1, %v814_v52  ;;  %v749_v7 = vmax.f32 %v719_v59, %v266_v30  ;;  %v392_v9 = vmax.f32 %v268_v56, %v1189_v57  ;;  %v458_v10 = vrot.slane %v268_v56, 1  ;;  %v815_v11 = vmax.f32 %v778_v61, %v1137_v15  ;;  %v364_v59 = vld [vmem:[%s1059_s29 + $0x60] sm:$0xff] }
  0x29   : > { %v556_v16 = vmax.f32 %v526_v63, %v330_v41  ;;  %v557_v18 = vmax.f32 %v527_v0, %v331_v51  ;;  %v1203_v19 = vrot.slane %v269_v62, 1  ;;  %v750_v20 = vmax.f32 %v720_v8, %v1163_v37  ;;  %v334_v37 = vld [vmem:[%s1049_s26 + $0x60] sm:$0xff]  ;;  %v336_v63 = vld [vmem:[%s1049_s26 + $0x70] sm:$0xff]  ;;  %v365_v8 = vld [vmem:[%s1059_s29 + $0x68] sm:$0xff] }
  0x2a   : > { %v779_v17 = vmax.f32 %v749_v7, %v1158_v32  ;;  %v652_v22 = vsel %vm442_vm0, %v650_v54, %v651_v1  ;;  %v653_v24 = vrot.slane %v332_v4, 1  ;;  %847 = vst.msk [vmem:[%s1146_s7 + $0x28] sm:$0x7f] %vm842_vm2, %v815_v11  ;;  %v393_v26 = vmax.f32 %v269_v62, %v301_v12  ;;  %v305_v7 = vld [vmem:[%s1044_s23 + $0x78] sm:$0xff] }
  0x2b   : > { %v586_v15 = vmax.f32 %v556_v16, %v360_v6  ;;  %v460_v3 = vsel %vm442_vm0, %v458_v10, %v1203_v19  ;;  %v587_v27 = vmax.f32 %v557_v18, %v361_v13  ;;  %v780_v30 = vmax.f32 %v750_v20, %v299_v42  ;;  %v337_v11 = vld [vmem:[%s1049_s26 + $0x78] sm:$0xff]  ;;  %v1263_v20 = vld [vmem:[%s1044_s23 + $0x80] sm:$0xff] }
  0x2c   : > { %v816_v29 = vmax.f32 %v779_v17, %v457_v58  ;;  %v528_v32 = vmax.f32 %v392_v9, %v460_v3  ;;  %v654_v31 = vrot.slane %v333_v2, 1  ;;  %v529_v35 = vmax.f32 %v393_v26, %v1203_v19  ;;  %v273_v58 = vld [vmem:[%s1039_s20 + $0x78] sm:$0xff]  ;;  %v274_v17 = vld [vmem:[%s1039_s20 + $0x80] sm:$0xff] }
  0x2d   : > { %v721_v34 = vmax.f32 %v586_v15, %v652_v22  ;;  %v722_v36 = vmax.f32 %v587_v27, %v651_v1  ;;  %v394_v21 = vmax.f32 %v270_v5, %v1211_v25  ;;  %v817_v38 = vmax.f32 %v780_v30, %v1179_v50 }
  0x2e   : > { %848 = vst.msk [vmem:[%s1146_s7 + $0x30] sm:$0xff] %vm840_vm1, %v816_v29  ;;  %v558_v40 = vmax.f32 %v528_v32, %v332_v4  ;;  %v461_v41 = vrot.slane %v270_v5, 1  ;;  %v1229_v42 = vrot.slane %v1218_v28, 1  ;;  %v559_v45 = vmax.f32 %v529_v35, %v333_v2  ;;  %v275_v29 = vld [vmem:[%s1039_s20 + $0x88] sm:$0xff]  ;;  %v366_v32 = vld [vmem:[%s1059_s29 + $0x70] sm:$0xff] }
  0x2f   : > { %v751_v44 = vmax.f32 %v721_v34, %v268_v56  ;;  %v752_v46 = vmax.f32 %v722_v36, %v269_v62  ;;  %v655_v47 = vsel %vm442_vm0, %v653_v24, %v654_v31  ;;  %849 = vst.msk [vmem:[%s1146_s7 + $0x38] sm:$0x7f] %vm842_vm2, %v817_v38  ;;  %v656_v43 = vrot.slane %v334_v37, 1  ;;  %v307_v35 = vld [vmem:[%s1044_s23 + $0x88] sm:$0xff] }
  0x30   : > { %v588_v50 = vmax.f32 %v558_v40, %v362_v33  ;;  %v463_v51 = vsel %vm442_vm0, %v461_v41, %v1229_v42  ;;  %v395_v53 = vmax.f32 %v1218_v28, %v303_v23  ;;  %v589_v52 = vmax.f32 %v559_v45, %v363_v39  ;;  %v339_v38 = vld [vmem:[%s1049_s26 + $0x88] sm:$0xff]  ;;  %v367_v40 = vld [vmem:[%s1059_s29 + $0x78] sm:$0xff] }
  0x31   : > { %v781_v54 = vmax.f32 %v751_v44, %v1189_v57  ;;  %v782_v55 = vmax.f32 %v752_v46, %v301_v12  ;;  %v530_v56 = vmax.f32 %v394_v21, %v463_v51  ;;  %v657_v61 = vrot.slane %v335_v14, 1 }
  0x32   : > { %v723_v60 = vmax.f32 %v588_v50, %v655_v47  ;;  %v531_v62 = vmax.f32 %v395_v53, %v1229_v42  ;;  %v396_v0 = vmax.f32 %v272_v48, %v1236_v49  ;;  %v724_v6 = vmax.f32 %v589_v52, %v654_v31  ;;  %v1287_v50 = vld [vmem:[%s1044_s23 + $0x90] sm:$0xff] }
  0x33   : > { %v818_v1 = vmax.f32 %v781_v54, %v460_v3  ;;  %v819_v4 = vmax.f32 %v782_v55, %v1203_v19  ;;  %v560_v57 = vmax.f32 %v530_v56, %v334_v37  ;;  %v464_v12 = vrot.slane %v272_v48, 1  ;;  %v277_v55 = vld [vmem:[%s1039_s20 + $0x98] sm:$0xff] }
  0x34   : > { %v753_v9 = vmax.f32 %v723_v60, %v270_v5  ;;  %v561_v10 = vmax.f32 %v531_v62, %v335_v14  ;;  %v1252_v13 = vrot.slane %v273_v58, 1  ;;  %v754_v18 = vmax.f32 %v724_v6, %v1218_v28  ;;  %v309_v60 = vld [vmem:[%s1044_s23 + $0x98] sm:$0xff] }
  0x35   : > { %850 = vst.msk [vmem:[%s1146_s7 + $0x40] sm:$0xff] %vm840_vm1, %v818_v1  ;;  %v590_v16 = vmax.f32 %v560_v57, %v364_v59  ;;  %v658_v19 = vsel %vm442_vm0, %v656_v43, %v657_v61  ;;  %v659_v2 = vrot.slane %v336_v63, 1  ;;  %v397_v5 = vmax.f32 %v273_v58, %v305_v7  ;;  %v340_v59 = vld [vmem:[%s1049_s26 + $0x90] sm:$0xff] }
  0x36   : > { %851 = vst.msk [vmem:[%s1146_s7 + $0x48] sm:$0x7f] %vm842_vm2, %v819_v4  ;;  %v783_v22 = vmax.f32 %v753_v9, %v1211_v25  ;;  %v466_v24 = vsel %vm442_vm0, %v464_v12, %v1252_v13  ;;  %v591_v15 = vmax.f32 %v561_v10, %v365_v8  ;;  %v784_v3 = vmax.f32 %v754_v18, %v303_v23  ;;  %v338_v25 = vld [vmem:[%s1049_s26 + $0x80] sm:$0xff]  ;;  %v369_v4 = vld [vmem:[%s1059_s29 + $0x88] sm:$0xff]  ;;  %v341_v9 = vld [vmem:[%s1049_s26 + $0x98] sm:$0xff] }
  0x37   : > { %v532_v26 = vmax.f32 %v396_v0, %v466_v24  ;;  %v725_v27 = vmax.f32 %v590_v16, %v658_v19  ;;  %v660_v28 = vrot.slane %v337_v11, 1  ;;  %v533_v31 = vmax.f32 %v397_v5, %v1252_v13  ;;  %v278_v16 = vld [vmem:[%s1039_s20 + $0xa0] sm:$0xff]  ;;  %v370_v5 = vld [vmem:[%s1059_s29 + $0x90] sm:$0xff] }
  0x38   : > { %v820_v30 = vmax.f32 %v783_v22, %v463_v51  ;;  %v726_v33 = vmax.f32 %v591_v15, %v657_v61  ;;  %v398_v34 = vmax.f32 %v274_v17, %v1263_v20  ;;  %v821_v36 = vmax.f32 %v784_v3, %v1229_v42  ;;  %v368_v61 = vld [vmem:[%s1059_s29 + $0x80] sm:$0xff] }
  0x39   : > { %v562_v37 = vmax.f32 %v532_v26, %v336_v63  ;;  %v755_v21 = vmax.f32 %v725_v27, %v272_v48  ;;  %v467_v23 = vrot.slane %v274_v17, 1  ;;  %v563_v41 = vmax.f32 %v533_v31, %v337_v11  ;;  %v276_v48 = vld [vmem:[%s1039_s20 + $0x90] sm:$0xff]  ;;  %v1309_v18 = vld [vmem:[%s1044_s23 + $0xa0] sm:$0xff]  ;;  %v279_v27 = vld [vmem:[%s1039_s20 + $0xa8] sm:$0xff] }
  0x3a   : > { %852 = vst.msk [vmem:[%s1146_s7 + $0x50] sm:$0xff] %vm840_vm1, %v820_v30  ;;  %v756_v39 = vmax.f32 %v726_v33, %v273_v58  ;;  %v1279_v44 = vrot.slane %v275_v29, 1  ;;  %v661_v45 = vsel %vm442_vm0, %v659_v2, %v660_v28  ;;  %v662_v47 = vrot.slane %v338_v25, 1  ;;  %v311_v31 = vld [vmem:[%s1044_s23 + $0xa8] sm:$0xff]  ;;  %v371_v33 = vld [vmem:[%s1059_s29 + $0x98] sm:$0xff] }
  0x3b   : > { %853 = vst.msk [vmem:[%s1146_s7 + $0x58] sm:$0x7f] %vm842_vm2, %v821_v36  ;;  %v592_v42 = vmax.f32 %v562_v37, %v366_v32  ;;  %v785_v46 = vmax.f32 %v755_v21, %v1236_v49  ;;  %v399_v14 = vmax.f32 %v275_v29, %v307_v35  ;;  %v593_v53 = vmax.f32 %v563_v41, %v367_v40  ;;  %v342_v32 = vld [vmem:[%s1049_s26 + $0xa0] sm:$0xff]  ;;  %v343_v37 = vld [vmem:[%s1049_s26 + $0xa8] sm:$0xff] }
  0x3c   : > { %v786_v51 = vmax.f32 %v756_v39, %v305_v7  ;;  %v469_v43 = vsel %vm442_vm0, %v467_v23, %v1279_v44  ;;  %v663_v54 = vrot.slane %v339_v38, 1  ;;  %v400_v0 = vmax.f32 %v276_v48, %v1287_v50 }
  0x3d   : > { %v822_v56 = vmax.f32 %v785_v46, %v466_v24  ;;  %v534_v52 = vmax.f32 %v398_v34, %v469_v43  ;;  %v727_v58 = vmax.f32 %v592_v42, %v661_v45  ;;  %v535_v49 = vmax.f32 %v399_v14, %v1279_v44  ;;  %v280_v42 = vld [vmem:[%s1039_s20 + $0xb0] sm:$0xff] }
  0x3e   : > { %v823_v62 = vmax.f32 %v786_v51, %v1252_v13  ;;  %v728_v63 = vmax.f32 %v593_v53, %v660_v28  ;;  %v470_v1 = vrot.slane %v276_v48, 1  ;;  %v1301_v8 = vrot.slane %v277_v55, 1  ;;  %v1332_v46 = vld [vmem:[%s1044_s23 + $0xb0] sm:$0xff] }
  0x3f   : > { %854 = vst.msk [vmem:[%s1146_s7 + $0x60] sm:$0xff] %vm840_vm1, %v822_v56  ;;  %v564_v57 = vmax.f32 %v534_v52, %v338_v25  ;;  %v757_v6 = vmax.f32 %v727_v58, %v274_v17  ;;  %v565_v7 = vmax.f32 %v535_v49, %v339_v38  ;;  %v664_v12 = vsel %vm442_vm0, %v662_v47, %v663_v54  ;;  %v281_v56 = vld [vmem:[%s1039_s20 + $0xb8] sm:$0xff]  ;;  %v344_v52 = vld [vmem:[%s1049_s26 + $0xb0] sm:$0xff] }
  0x40   : > { %855 = vst.msk [vmem:[%s1146_s7 + $0x68] sm:$0x7f] %vm842_vm2, %v823_v62  ;;  %v758_v10 = vmax.f32 %v728_v63, %v275_v29  ;;  %v665_v13 = vrot.slane %v340_v59, 1  ;;  %v401_v11 = vmax.f32 %v277_v55, %v309_v60  ;;  %v472_v17 = vsel %vm442_vm0, %v470_v1, %v1301_v8  ;;  %v313_v58 = vld [vmem:[%s1044_s23 + $0xb8] sm:$0xff] }
  0x41   : > { %v594_v19 = vmax.f32 %v564_v57, %v368_v61  ;;  %v787_v2 = vmax.f32 %v757_v6, %v1263_v20  ;;  %v595_v22 = vmax.f32 %v565_v7, %v369_v4  ;;  %v536_v15 = vmax.f32 %v400_v0, %v472_v17  ;;  %v373_v61 = vld [vmem:[%s1059_s29 + $0xa8] sm:$0xff]  ;;  %v345_v57 = vld [vmem:[%s1049_s26 + $0xb8] sm:$0xff]  ;;  %v1347_v6 = vld [vmem:[%s1039_s20 + $0xc0] sm:$0xff] }
  0x42   : > { %v788_v24 = vmax.f32 %v758_v10, %v307_v35  ;;  %v537_v3 = vmax.f32 %v401_v11, %v1301_v8  ;;  %v666_v26 = vrot.slane %v341_v9, 1  ;;  %v402_v20 = vmax.f32 %v278_v16, %v1309_v18  ;;  %v1350_v7 = vld [vmem:[%s1044_s23 + $0xc0] sm:$0xff] }
  0x43   : > { %v824_v28 = vmax.f32 %v787_v2, %v469_v43  ;;  %v729_v29 = vmax.f32 %v594_v19, %v664_v12  ;;  %v730_v30 = vmax.f32 %v595_v22, %v663_v54  ;;  %v566_v34 = vmax.f32 %v536_v15, %v340_v59  ;;  %v372_v59 = vld [vmem:[%s1059_s29 + $0xa0] sm:$0xff]  ;;  %v283_v2 = vld [vmem:[%s1039_s20 + $0xc8] sm:$0xff] }
  0x44   : > { %v825_v25 = vmax.f32 %v788_v24, %v1279_v44  ;;  %v567_v35 = vmax.f32 %v537_v3, %v341_v9  ;;  %v473_v36 = vrot.slane %v278_v16, 1  ;;  %v1325_v38 = vrot.slane %v279_v27, 1 }
  0x45   : > { %856 = vst.msk [vmem:[%s1146_s7 + $0x70] sm:$0xff] %vm840_vm1, %v824_v28  ;;  %v759_v21 = vmax.f32 %v729_v29, %v276_v48  ;;  %v760_v23 = vmax.f32 %v730_v30, %v277_v55  ;;  %v667_v40 = vsel %vm442_vm0, %v665_v13, %v666_v26  ;;  %v596_v41 = vmax.f32 %v566_v34, %v370_v5  ;;  %v346_v5 = vld [vmem:[%s1049_s26 + $0xc0] sm:$0xff]  ;;  %v315_v28 = vld [vmem:[%s1044_s23 + $0xc8] sm:$0xff]  ;;  %v375_v29 = vld [vmem:[%s1059_s29 + $0xb8] sm:$0xff] }
  0x46   : > { %857 = vst.msk [vmem:[%s1146_s7 + $0x78] sm:$0x7f] %vm842_vm2, %v825_v25  ;;  %v668_v39 = vrot.slane %v342_v32, 1  ;;  %v403_v44 = vmax.f32 %v279_v27, %v311_v31  ;;  %v597_v45 = vmax.f32 %v567_v35, %v371_v33  ;;  %v475_v48 = vsel %vm442_vm0, %v473_v36, %v1325_v38  ;;  %v374_v30 = vld [vmem:[%s1059_s29 + $0xb0] sm:$0xff]  ;;  %v347_v25 = vld [vmem:[%s1049_s26 + $0xc8] sm:$0xff] }
  0x47   : > { %v789_v47 = vmax.f32 %v759_v21, %v1287_v50  ;;  %v790_v14 = vmax.f32 %v760_v23, %v309_v60  ;;  %v669_v51 = vrot.slane %v343_v37, 1  ;;  %v538_v43 = vmax.f32 %v402_v20, %v475_v48  ;;  %v284_v21 = vld [vmem:[%s1039_s20 + $0xd0] sm:$0xff] }
  0x48   : > { %v731_v53 = vmax.f32 %v596_v41, %v667_v40  ;;  %v539_v54 = vmax.f32 %v403_v44, %v1325_v38  ;;  %v732_v55 = vmax.f32 %v597_v45, %v666_v26  ;;  %v404_v60 = vmax.f32 %v280_v42, %v1332_v46  ;;  %v1382_v23 = vld [vmem:[%s1044_s23 + $0xd0] sm:$0xff] }
  0x49   : > { %v826_v50 = vmax.f32 %v789_v47, %v472_v17  ;;  %v827_v49 = vmax.f32 %v790_v14, %v1301_v8  ;;  %v476_v62 = vrot.slane %v280_v42, 1  ;;  %v568_v63 = vmax.f32 %v538_v43, %v342_v32  ;;  %v285_v14 = vld [vmem:[%s1039_s20 + $0xd8] sm:$0xff] }
  0x4a   : > { %v761_v0 = vmax.f32 %v731_v53, %v278_v16  ;;  %v569_v1 = vmax.f32 %v539_v54, %v343_v37  ;;  %v762_v4 = vmax.f32 %v732_v55, %v279_v27  ;;  %v1356_v8 = vrot.slane %v281_v56, 1  ;;  %v348_v54 = vld [vmem:[%s1049_s26 + $0xd0] sm:$0xff] }
  0x4b   : > { %858 = vst.msk [vmem:[%s1146_s7 + $0x80] sm:$0xff] %vm840_vm1, %v826_v50  ;;  %v670_v9 = vsel %vm442_vm0, %v668_v39, %v669_v51  ;;  %v671_v10 = vrot.slane %v344_v52, 1  ;;  %v405_v12 = vmax.f32 %v281_v56, %v313_v58  ;;  %v598_v13 = vmax.f32 %v568_v63, %v372_v59  ;;  %v377_v59 = vld [vmem:[%s1059_s29 + $0xc8] sm:$0xff]  ;;  %v349_v63 = vld [vmem:[%s1049_s26 + $0xd8] sm:$0xff] }
  0x4c   : > { %859 = vst.msk [vmem:[%s1146_s7 + $0x88] sm:$0x7f] %vm842_vm2, %v827_v49  ;;  %v791_v11 = vmax.f32 %v761_v0, %v1309_v18  ;;  %v792_v16 = vmax.f32 %v762_v4, %v311_v31  ;;  %v599_v19 = vmax.f32 %v569_v1, %v373_v61  ;;  %v478_v17 = vsel %vm442_vm0, %v476_v62, %v1356_v8  ;;  %v317_v49 = vld [vmem:[%s1044_s23 + $0xd8] sm:$0xff] }
  0x4d   : > { %v541_v22 = vmax.f32 %v405_v12, %v1356_v8  ;;  %v672_v24 = vrot.slane %v345_v57, 1  ;;  %v406_v15 = vmax.f32 %v1347_v6, %v1350_v7  ;;  %v540_v18 = vmax.f32 %v404_v60, %v478_v17 }
  0x4e   : > { %v828_v3 = vmax.f32 %v791_v11, %v475_v48  ;;  %v829_v26 = vmax.f32 %v792_v16, %v1325_v38  ;;  %v733_v27 = vmax.f32 %v598_v13, %v670_v9  ;;  %v734_v20 = vmax.f32 %v599_v19, %v669_v51  ;;  %v376_v51 = vld [vmem:[%s1059_s29 + $0xc0] sm:$0xff] }
  0x4f   : > { %v571_v32 = vmax.f32 %v541_v22, %v345_v57  ;;  %v479_v31 = vrot.slane %v1347_v6, 1  ;;  %v1372_v33 = vrot.slane %v283_v2, 1  ;;  %v570_v34 = vmax.f32 %v540_v18, %v344_v52  ;;  %v286_v9 = vld [vmem:[%s1039_s20 + $0xe0] sm:$0xff]  ;;  %v319_v18 = vld [vmem:[%s1044_s23 + $0xe8] sm:$0xff] }
  0x50   : > { %860 = vst.msk [vmem:[%s1146_s7 + $0x90] sm:$0xff] %vm840_vm1, %v828_v3  ;;  %v763_v35 = vmax.f32 %v733_v27, %v280_v42  ;;  %v673_v36 = vsel %vm442_vm0, %v671_v10, %v672_v24  ;;  %v674_v37 = vrot.slane %v346_v5, 1  ;;  %v764_v38 = vmax.f32 %v734_v20, %v281_v56  ;;  %v318_v10 = vld [vmem:[%s1044_s23 + $0xe0] sm:$0xff] }
  0x51   : > { %861 = vst.msk [vmem:[%s1146_s7 + $0x98] sm:$0x7f] %vm842_vm2, %v829_v26  ;;  %v481_v40 = vsel %vm442_vm0, %v479_v31, %v1372_v33  ;;  %v407_v41 = vmax.f32 %v283_v2, %v315_v28  ;;  %v601_v39 = vmax.f32 %v571_v32, %v375_v29  ;;  %v600_v44 = vmax.f32 %v570_v34, %v374_v30  ;;  %v350_v3 = vld [vmem:[%s1049_s26 + $0xe0] sm:$0xff]  ;;  %v351_v30 = vld [vmem:[%s1049_s26 + $0xe8] sm:$0xff]  ;;  %v379_v32 = vld [vmem:[%s1059_s29 + $0xd8] sm:$0xff] }
  0x52   : > { %v793_v45 = vmax.f32 %v763_v35, %v1332_v46  ;;  %v542_v47 = vmax.f32 %v406_v15, %v481_v40  ;;  %v675_v42 = vrot.slane %v347_v25, 1  ;;  %v794_v48 = vmax.f32 %v764_v38, %v313_v58 }
  0x53   : > { %v543_v43 = vmax.f32 %v407_v41, %v1372_v33  ;;  %v736_v53 = vmax.f32 %v601_v39, %v672_v24  ;;  %v408_v55 = vmax.f32 %v284_v21, %v1382_v23  ;;  %v735_v50 = vmax.f32 %v600_v44, %v673_v36  ;;  %v378_v24 = vld [vmem:[%s1059_s29 + $0xd0] sm:$0xff] }
  0x54   : > { %v830_v56 = vmax.f32 %v793_v45, %v478_v17  ;;  %v572_v52 = vmax.f32 %v542_v47, %v346_v5  ;;  %v482_v46 = vrot.slane %v284_v21, 1  ;;  %v831_v58 = vmax.f32 %v794_v48, %v1356_v8  ;;  %v287_v17 = vld [vmem:[%s1039_s20 + $0xe8] sm:$0xff] }
  0x55   : > { %v573_v60 = vmax.f32 %v543_v43, %v347_v25  ;;  %v766_v62 = vmax.f32 %v736_v53, %v283_v2  ;;  %v483_v61 = vrot.slane %v285_v14, 1  ;;  %v765_v1 = vmax.f32 %v735_v50, %v1347_v6 }
  0x56   : > { %862 = vst.msk [vmem:[%s1146_s7 + $0xa0] sm:$0xff] %vm840_vm1, %v830_v56  ;;  %v602_v0 = vmax.f32 %v572_v52, %v376_v51  ;;  %v676_v4 = vsel %vm442_vm0, %v674_v37, %v675_v42  ;;  %v677_v57 = vrot.slane %v348_v54, 1  ;;  %v409_v13 = vmax.f32 %v285_v14, %v317_v49  ;;  %v381_v51 = vld [vmem:[%s1059_s29 + $0xe8] sm:$0xff] }
  0x57   : > { %863 = vst.msk [vmem:[%s1146_s7 + $0xa8] sm:$0x7f] %vm842_vm2, %v831_v58  ;;  %v796_v8 = vmax.f32 %v766_v62, %v315_v28  ;;  %v484_v12 = vsel %vm442_vm0, %v482_v46, %v483_v61  ;;  %v603_v11 = vmax.f32 %v573_v60, %v377_v59  ;;  %v795_v16 = vmax.f32 %v765_v1, %v1350_v7  ;;  %v320_v1 = vld [vmem:[%s1044_s23 + $0xf0] sm:$0xff] }
  0x58   : > { %v544_v19 = vmax.f32 %v408_v55, %v484_v12  ;;  %v737_v6 = vmax.f32 %v602_v0, %v676_v4  ;;  %v678_v2 = vrot.slane %v349_v63, 1  ;;  %v545_v5 = vmax.f32 %v409_v13, %v483_v61  ;;  %v289_v55 = vld [vmem:[%s1039_s20 + $0xf8] sm:$0xff] }
  0x59   : > { %v833_v22 = vmax.f32 %v796_v8, %v1372_v33  ;;  %v738_v15 = vmax.f32 %v603_v11, %v675_v42  ;;  %v410_v26 = vmax.f32 %v286_v9, %v318_v10  ;;  %v832_v27 = vmax.f32 %v795_v16, %v481_v40  ;;  %v321_v4 = vld [vmem:[%s1044_s23 + $0xf8] sm:$0xff] }
  0x5a   : > { %v574_v28 = vmax.f32 %v544_v19, %v348_v54  ;;  %v767_v29 = vmax.f32 %v737_v6, %v284_v21  ;;  %v485_v7 = vrot.slane %v286_v9, 1  ;;  %v575_v20 = vmax.f32 %v545_v5, %v349_v63  ;;  %v288_v54 = vld [vmem:[%s1039_s20 + $0xf0] sm:$0xff] }
  0x5b   : > { %865 = vst.msk [vmem:[%s1146_s7 + $0xb8] sm:$0x7f] %vm842_vm2, %v833_v22  ;;  %v768_v31 = vmax.f32 %v738_v15, %v285_v14  ;;  %v486_v25 = vrot.slane %v287_v17, 1  ;;  %v679_v33 = vsel %vm442_vm0, %v677_v57, %v678_v2  ;;  %v680_v36 = vrot.slane %v350_v3, 1  ;;  %v380_v14 = vld [vmem:[%s1059_s29 + $0xe0] sm:$0xff] }
  0x5c   : > { %864 = vst.msk [vmem:[%s1146_s7 + $0xb0] sm:$0xff] %vm840_vm1, %v832_v27  ;;  %v604_v34 = vmax.f32 %v574_v28, %v378_v24  ;;  %v797_v35 = vmax.f32 %v767_v29, %v1382_v23  ;;  %v411_v37 = vmax.f32 %v287_v17, %v319_v18  ;;  %v605_v40 = vmax.f32 %v575_v20, %v379_v32 }
  0x5d   : > { %v798_v21 = vmax.f32 %v768_v31, %v317_v49  ;;  %v487_v38 = vsel %vm442_vm0, %v485_v7, %v486_v25  ;;  %v681_v41 = vrot.slane %v351_v30, 1  ;;  %v805_v58 = vrot.slane %v288_v54, 1 }
  0x5e   : > { %v834_v39 = vmax.f32 %v797_v35, %v484_v12  ;;  %v546_v44 = vmax.f32 %v410_v26, %v487_v38  ;;  %v739_v45 = vmax.f32 %v604_v34, %v679_v33  ;;  %v547_v47 = vmax.f32 %v411_v37, %v486_v25 }
  0x5f   : > { %v835_v42 = vmax.f32 %v798_v21, %v483_v61  ;;  %v740_v48 = vmax.f32 %v605_v40, %v678_v2  ;;  %v682_v52 = vsel %vm442_vm0, %v680_v36, %v681_v41  ;;  %v806_v60 = vrot.slane %v289_v55, 1 }
  0x60   : > { %866 = vst.msk [vmem:[%s1146_s7 + $0xc0] sm:$0xff] %vm840_vm1, %v834_v39  ;;  %v576_v23 = vmax.f32 %v546_v44, %v350_v3  ;;  %v769_v43 = vmax.f32 %v739_v45, %v286_v9  ;;  %v577_v53 = vmax.f32 %v547_v47, %v351_v30 }
  0x61   : > { %867 = vst.msk [vmem:[%s1146_s7 + $0xc8] sm:$0x7f] %vm842_vm2, %v835_v42  ;;  %v770_v56 = vmax.f32 %v740_v48, %v287_v17 }
  0x62   : > { %v606_v50 = vmax.f32 %v576_v23, %v380_v14  ;;  %v799_v46 = vmax.f32 %v769_v43, %v318_v10  ;;  %v607_v49 = vmax.f32 %v577_v53, %v381_v51  ;;  %v807_v10 = vsel %vm442_vm0, %v805_v58, %v806_v60 }
  0x63   : > { %v800_v59 = vmax.f32 %v770_v56, %v319_v18 }
  0x64   : > { %v836_v62 = vmax.f32 %v799_v46, %v487_v38  ;;  %v741_v61 = vmax.f32 %v606_v50, %v682_v52  ;;  %v742_v63 = vmax.f32 %v607_v49, %v681_v41 }
  0x65   : > { %v837_v0 = vmax.f32 %v800_v59, %v486_v25 }
  0x66   : > { %868 = vst.msk [vmem:[%s1146_s7 + $0xd0] sm:$0xff] %vm840_vm1, %v836_v62  ;;  %v771_v57 = vmax.f32 %v741_v61, %v288_v54  ;;  %v772_v9 = vmax.f32 %v742_v63, %v289_v55 }
  0x67   : > { %869 = vst.msk [vmem:[%s1146_s7 + $0xd8] sm:$0x7f] %vm842_vm2, %v837_v0 }
  0x68   : > { %v801_v8 = vmax.f32 %v771_v57, %v320_v1  ;;  %v802_v12 = vmax.f32 %v772_v9, %v321_v4 }
  0x6a   : > { %v838_v13 = vmax.f32 %v801_v8, %v807_v10  ;;  %v839_v11 = vmax.f32 %v802_v12, %v806_v60 }
  0x6c   : > { %870 = vst.msk [vmem:[%s1146_s7 + $0xe0] sm:$0xff] %vm840_vm1, %v838_v13 }
  0x6d   : > { %871 = vst.msk [vmem:[%s1146_s7 + $0xe8] sm:$0x7f] %vm842_vm2, %v839_v11 }
  0x6e PF: > { %s14_s15 = sadd.s32 1, %s998_s15  }
  0x6f   : > { %p11_p4 = scmp.ge.s32.totalorder %s14_s15, 4  }
  0x71   :  { %13 = sbr.rel (!%p11_p4) target bundleno = 1 (0x1), region = 75 }

// kernel: cnn_forward.10
= control target key start
LH: loop header
LB: loop body
LE: loop exit
PB: predicated region body
PF: predicated region fallthrough
CT: control target
= control target key end

     0   :  { %s468_s15 = smov 0   ;;  %s546_s0 = inlined_call_operand.vmem [shape: f32[2,8,8,64], index: 0, kind: input, shape index: {}]   ;;  %s547_s1 = inlined_call_operand.vmem [shape: f32[2,8,8,64], index: 1, kind: input, shape index: {}]   ;;  %s548_s2 = inlined_call_operand.vmem [shape: f32[2,8,8,64], index: 2, kind: input, shape index: {}]   ;;  %s549_s3 = inlined_call_operand.vmem [shape: f32[2,8,8,64], index: 3, kind: input, shape index: {}]   ;;  %s550_s4 = inlined_call_operand.vmem [shape: f32[2,7,7,64], index: 4, kind: output, shape index: {}]  }
   0x1 LB: > { %s406_s16 = sadd.s32 4294967295, %s441_s15   ;;  %p410_p0 = scmp.ge.s32.totalorder %s441_s15, 1  ;;  %s441_s15 = sphi %s468_s15, %s14_s15  }
   0x2   : > { %p192_p1 = scmp.lt.s32.totalorder %s441_s15, 3 }
   0x4   : > { %p193_p2 = pnand %p410_p0, %p192_p1 }
   0x5   : > { %p233_p3 = scmp.lt.s32.totalorder (!%p193_p2), %s406_s16, 1  ;;  %vm307_vm0 = vcmask (!%p193_p2), 522240  }
   0x6   : > { %196 = sbr.rel (%p193_p2) target bundleno = 32 (0x20), region = 36 }
   0xd   : > { %s552_s16 = smov (!%p233_p3, %s406_s16), 1 }
   0xe   : > { %s422_s17 = sshll.u32 %s552_s16, 6  ;;  %s426_s18 = smul.u32 56, %s552_s16 }
   0xf   : > { %s479_s21 = scalar_lea.vmem %s546_s0, %s422_s17  ;;  %s484_s24 = scalar_lea.vmem %s547_s1, %s422_s17 }
  0x10   : > { %s489_s27 = scalar_lea.vmem %s548_s2, %s422_s17  ;;  %s494_s30 = scalar_lea.vmem %s549_s3, %s422_s17  ;;  %v258_v0 = vld [vmem:[%s479_s21] sm:$0xff]  ;;  %v259_v2 = vld [vmem:[%s479_s21 + $0x8] sm:$0xff]  ;;  %v260_v9 = vld [vmem:[%s479_s21 + $0x10] sm:$0xff] }
  0x11   : > { %v265_v1 = vld [vmem:[%s484_s24] sm:$0xff]  ;;  %v266_v5 = vld [vmem:[%s484_s24 + $0x8] sm:$0xff]  ;;  %v267_v12 = vld [vmem:[%s484_s24 + $0x10] sm:$0xff]  ;;  %s510_s7 = scalar_lea.vmem %s550_s4, %s426_s18 }
  0x12   : > { %v272_v3 = vld [vmem:[%s489_s27] sm:$0xff]  ;;  %v286_v4 = vmax.f32 %v258_v0, %v265_v1  ;;  %v273_v7 = vld [vmem:[%s489_s27 + $0x8] sm:$0xff]  ;;  %v287_v8 = vmax.f32 %v259_v2, %v266_v5  ;;  %v274_v13 = vld [vmem:[%s489_s27 + $0x10] sm:$0xff]  ;;  %v288_v15 = vmax.f32 %v260_v9, %v267_v12 }
  0x13   : > { %v279_v6 = vld [vmem:[%s494_s30] sm:$0xff]  ;;  %v280_v11 = vld [vmem:[%s494_s30 + $0x8] sm:$0xff]  ;;  %v261_v16 = vld [vmem:[%s479_s21 + $0x18] sm:$0xff] }
  0x14   : > { %v293_v10 = vmax.f32 %v286_v4, %v272_v3  ;;  %v294_v14 = vmax.f32 %v287_v8, %v273_v7  ;;  %v268_v17 = vld [vmem:[%s484_s24 + $0x18] sm:$0xff]  ;;  %v281_v20 = vld [vmem:[%s494_s30 + $0x10] sm:$0xff]  ;;  %v262_v22 = vld [vmem:[%s479_s21 + $0x20] sm:$0xff]  ;;  %v295_v25 = vmax.f32 %v288_v15, %v274_v13 }
  0x15   : > { %v275_v18 = vld [vmem:[%s489_s27 + $0x18] sm:$0xff]  ;;  %v289_v21 = vmax.f32 %v261_v16, %v268_v17  ;;  %v269_v23 = vld [vmem:[%s484_s24 + $0x20] sm:$0xff]  ;;  %v263_v29 = vld [vmem:[%s479_s21 + $0x28] sm:$0xff] }
  0x16   : > { %v300_v19 = vmax.f32 %v293_v10, %v279_v6  ;;  %v301_v24 = vmax.f32 %v294_v14, %v280_v11  ;;  %v282_v26 = vld [vmem:[%s494_s30 + $0x18] sm:$0xff]  ;;  %v276_v27 = vld [vmem:[%s489_s27 + $0x20] sm:$0xff]  ;;  %v290_v28 = vmax.f32 %v262_v22, %v269_v23  ;;  %v270_v32 = vld [vmem:[%s484_s24 + $0x28] sm:$0xff]  ;;  %v302_v34 = vmax.f32 %v295_v25, %v281_v20 }
  0x17   : > { %v296_v30 = vmax.f32 %v289_v21, %v275_v18  ;;  %v283_v31 = vld [vmem:[%s494_s30 + $0x20] sm:$0xff]  ;;  %v277_v33 = vld [vmem:[%s489_s27 + $0x28] sm:$0xff]  ;;  %v291_v36 = vmax.f32 %v263_v29, %v270_v32  ;;  %v264_v37 = vld [vmem:[%s479_s21 + $0x30] sm:$0xff] }
  0x18   : > { %308 = vst.msk [vmem:[%s510_s7] sm:$0x7f] %vm307_vm0, %v300_v19  ;;  %309 = vst.msk [vmem:[%s510_s7 + $0x8] sm:$0x7f] %vm307_vm0, %v301_v24  ;;  %v297_v35 = vmax.f32 %v290_v28, %v276_v27  ;;  %v271_v38 = vld [vmem:[%s484_s24 + $0x30] sm:$0xff]  ;;  %v284_v41 = vld [vmem:[%s494_s30 + $0x28] sm:$0xff] }
  0x19   : > { %v278_v39 = vld [vmem:[%s489_s27 + $0x30] sm:$0xff]  ;;  %v303_v40 = vmax.f32 %v296_v30, %v282_v26  ;;  %v292_v42 = vmax.f32 %v264_v37, %v271_v38  ;;  %310 = vst.msk [vmem:[%s510_s7 + $0x10] sm:$0x7f] %vm307_vm0, %v302_v34  ;;  %v298_v44 = vmax.f32 %v291_v36, %v277_v33 }
  0x1a   : > { %v304_v43 = vmax.f32 %v297_v35, %v283_v31  ;;  %v285_v45 = vld [vmem:[%s494_s30 + $0x30] sm:$0xff] }
  0x1b   : > { %311 = vst.msk [vmem:[%s510_s7 + $0x18] sm:$0x7f] %vm307_vm0, %v303_v40  ;;  %v299_v46 = vmax.f32 %v292_v42, %v278_v39  ;;  %v305_v47 = vmax.f32 %v298_v44, %v284_v41 }
  0x1c   : > { %312 = vst.msk [vmem:[%s510_s7 + $0x20] sm:$0x7f] %vm307_vm0, %v304_v43 }
  0x1d   : > { %v306_v48 = vmax.f32 %v299_v46, %v285_v45  ;;  %313 = vst.msk [vmem:[%s510_s7 + $0x28] sm:$0x7f] %vm307_vm0, %v305_v47 }
  0x1f   : > { %314 = vst.msk [vmem:[%s510_s7 + $0x30] sm:$0x7f] %vm307_vm0, %v306_v48 }
  0x20 PF: > { %s14_s15 = sadd.s32 1, %s441_s15  }
  0x21   : > { %p11_p4 = scmp.ge.s32.totalorder %s14_s15, 4  }
  0x23   :  { %13 = sbr.rel (!%p11_p4) target bundleno = 1 (0x1), region = 75 }

// kernel: cnn_forward.9
= control target key start
LH: loop header
LB: loop body
LE: loop exit
PB: predicated region body
PF: predicated region fallthrough
CT: control target
= control target key end

     0   :  { %s3769_s12 = smov 0   ;;  %s4681_s0 = inlined_call_operand.vmem [shape: f32[2,291,32], index: 0, kind: input, shape index: {}]   ;;  %s4682_s1 = inlined_call_operand.vmem [shape: bf16[9,32,64], index: 1, kind: input, shape index: {}]   ;;  %s4683_s2 = inlined_call_operand.vmem [shape: f32[1,64], index: 2, kind: input, shape index: {}]   ;;  %s4684_s3 = inlined_call_operand.vmem [shape: f32[2,255,64], index: 3, kind: output, shape index: {}]  }
   0x1 LB: > { %s2762_s13 = sadd.s32 4294967295, %s3747_s12   ;;  %p2766_p0 = scmp.ge.s32.totalorder %s3747_s12, 1  ;;  %s3747_s12 = sphi %s3769_s12, %s13_s12  }
   0x2   : > { %p137_p1 = scmp.lt.s32.totalorder %s3747_s12, 3 }
   0x4   : > { %p138_p2 = pnand %p2766_p0, %p137_p1 }
   0x6   : > { %141 = sbr.rel (%p138_p2) target bundleno = 534 (0x216), region = 32 }
   0xd   : > { %v3780_v0 = vld [vmem:[%s4682_s1 + $0x40] sm:$0xff]   ;;  %p161_p3 = scmp.lt.s32.totalorder %s2762_s13, 1  ;;  %v3724_v1 = vld [vmem:[%s4682_s1 + $0x10] sm:$0xff]   ;;  %v3789_v2 = vld [vmem:[%s4682_s1 + $0x48] sm:$0xff]   ;;  %vm377_vm0 = vcmask 261120   ;;  %vm814_vm1 = vcmask 1046528  }
   0xe   : > { %3274 = vmatprep.subr.bf16.mxu0 %v3780_v0  ;;  %3130 = vmatprep.subr.bf16.mxu1 %v3724_v1  ;;  %v3726_v3 = vld [vmem:[%s4682_s1 + $0x18] sm:$0xff]   ;;  %v3802_v4 = vld [vmem:[%s4682_s1] sm:$0xff]   ;;  %v3728_v5 = vld [vmem:[%s4682_s1 + $0x50] sm:$0xff]   ;;  %vm237_vm2 = vsmask.f32 7424  ;;  %vm2315_vm4 = vcmask 1045504  }
   0xf   : > { %s4731_s13 = smov (!%p161_p3, %s2762_s13), 1  ;;  %3275 = vmatpush3.bf16.msra.mxu0 %v3780_v0  ;;  %3131 = vmatpush3.bf16.msra.mxu1 %v3724_v1  ;;  %v3729_v36 = vld [vmem:[%s4682_s1 + $0x58] sm:$0xff]   ;;  %v3730_v58 = vld [vmem:[%s4682_s1 + $0x8] sm:$0xff]   ;;  %v3900_v59 = vld [vmem:[%s4682_s1 + $0x60] sm:$0xff]   ;;  %vm1546_vm3 = vsmask.f32 6400 }
  0x10   : > { %3276 = vmatprep.subr.bf16.mxu0 %v3789_v2  ;;  %s3714_s22 = smul.u32 296, %s4731_s13  ;;  %3132 = vmatprep.subr.bf16.mxu1 %v3726_v3  ;;  %s2967_s4 = sshll.u32 %s4731_s13, 8  ;;  %vm2673_vm5 = vcmask 523264   ;;  %vm2705_vm6 = vcmask 522240  }
  0x11   : > { %s4578_s7 = scalar_lea.vmem %s4684_s3, %s2967_s4 }
  0x12   : > { %s3807_s27 = scalar_lea.vmem %s4681_s0, %s3714_s22 }
  0x13   : > { %3277 = vmatpush3.bf16.msra.mxu0 %v3789_v2  ;;  %v174_v6 = vld [vmem:[%s3807_s27 + $0x10] sm:$0xff]  ;;  %v175_v7 = vld [vmem:[%s3807_s27 + $0x18] sm:$0xff]  ;;  %v176_v8 = vld [vmem:[%s3807_s27 + $0x20] sm:$0xff]  ;;  %3133 = vmatpush3.bf16.msra.mxu1 %v3726_v3 }
  0x14   : > { %v177_v9 = vld [vmem:[%s3807_s27 + $0x28] sm:$0xff]  ;;  %v3817_v10 = vpack.c.bf16 %v175_v7, %v174_v6  ;;  %v178_v11 = vld [vmem:[%s3807_s27 + $0x30] sm:$0xff]  ;;  %v179_v12 = vld [vmem:[%s3807_s27 + $0x38] sm:$0xff]  ;;  %3310 = vmatprep.subr.bf16.mxu0 %v3728_v5  ;;  %3166 = vmatprep.subr.bf16.mxu1 %v3802_v4 }
  0x15   : > { %v3821_v13 = vpack.c.bf16 %v177_v9, %v176_v8  ;;  %v3823_v14 = vpack.c.bf16 %v179_v12, %v178_v11  ;;  %v172_v15 = vld [vmem:[%s3807_s27] sm:$0xff]  ;;  %v173_v16 = vld [vmem:[%s3807_s27 + $0x8] sm:$0xff]  ;;  %v182_v27 = vld [vmem:[%s3807_s27 + $0x50] sm:$0xff] }
  0x16   : > { %v180_v17 = vld [vmem:[%s3807_s27 + $0x40] sm:$0xff]  ;;  %v4690_v18 = vrot.slane %v3817_v10, 1  ;;  %v3830_v19 = vpack.c.bf16 %v173_v16, %v172_v15  ;;  %v246_v20 = vshll.u32 %v3817_v10, 16  ;;  %v250_v21 = vshrl.u32 %v3817_v10, 16  ;;  %v181_v22 = vld [vmem:[%s3807_s27 + $0x48] sm:$0xff]  ;;  %v183_v28 = vld [vmem:[%s3807_s27 + $0x58] sm:$0xff] }
  0x17   : > { %v818_v23 = vrot.slane %v3821_v13, 1  ;;  %v820_v24 = vrot.slane %v3823_v14, 1  ;;  %v254_v25 = vshll.u32 %v3821_v13, 16  ;;  %v3838_v26 = vpack.c.bf16 %v181_v22, %v180_v17  ;;  %v184_v43 = vld [vmem:[%s3807_s27 + $0x60] sm:$0xff]  ;;  %v185_v44 = vld [vmem:[%s3807_s27 + $0x68] sm:$0xff]  ;;  %v186_v52 = vld [vmem:[%s3807_s27 + $0x70] sm:$0xff] }
  0x18   : > { %v239_v29 = vshrl.u32 %v3830_v19, 16  ;;  %v241_v30 = vshll.u32 %v3830_v19, 16  ;;  %v248_v31 = vrot.slane %v246_v20, 1  ;;  %v3864_v39 = vpack.c.bf16 %v183_v28, %v182_v27  ;;  %v187_v53 = vld [vmem:[%s3807_s27 + $0x78] sm:$0xff]  ;;  %v188_v54 = vld [vmem:[%s3807_s27 + $0x80] sm:$0xff]  ;;  %v189_v57 = vld [vmem:[%s3807_s27 + $0x88] sm:$0xff] }
  0x19   : > { %v3849_v32 = vsel %vm814_vm1, %v4690_v18, %v818_v23  ;;  %v3852_v33 = vsel %vm814_vm1, %v818_v23, %v820_v24  ;;  %v256_v34 = vrot.slane %v254_v25, 1  ;;  %v822_v35 = vrot.slane %v3838_v26, 1  ;;  %v190_v17 = vld [vmem:[%s3807_s27 + $0x90] sm:$0xff] }
  0x1a   : > { %3278 = vmatprep.mubr.msk.bf16.mxu0 %vm377_vm0, %v3849_v32  ;;  %v243_v37 = vrot.slane %v241_v30, 1  ;;  %v252_v38 = vor.u32 %v250_v21, %v248_v31  ;;  %v258_v40 = vshrl.u32 %v3821_v13, 16  ;;  %v262_v42 = vshll.u32 %v3823_v14, 16 }
  0x1b   : > { %3279 = vmatmul.mubr.msk.bf16.vlgmr.msra.gmra.mrb[0].mxu0 %vm377_vm0, %v3852_v33  ;;  %v3870_v41 = vsel %vm814_vm1, %v820_v24, %v822_v35  ;;  %v824_v46 = vrot.slane %v3864_v39, 1  ;;  %v270_v48 = vshll.u32 %v3838_v26, 16  ;;  %v266_v51 = vshrl.u32 %v3823_v14, 16  ;;  %v191_v24 = vld [vmem:[%s3807_s27 + $0x98] sm:$0xff] }
  0x1c   : > { %v244_v45 = vor.u32 %v243_v37, %v239_v29  ;;  %3311 = vmatpush3.bf16.msra.mxu0 %v3728_v5  ;;  %3282 = vmatprep.mubr.msk.bf16.mxu0 %vm377_vm0, %v3870_v41  ;;  %v260_v47 = vor.u32 %v258_v40, %v256_v34  ;;  %v3882_v49 = vsel %vm237_vm2, %v252_v38, %v256_v34  ;;  %v264_v50 = vrot.slane %v262_v42, 1 }
  0x1d   : > { %3312 = vmatprep.subr.bf16.mxu0 %v3729_v36  ;;  %v3891_v56 = vpack.c.bf16 %v185_v44, %v184_v43  ;;  %v274_v61 = vshrl.u32 %v3838_v26, 16  ;;  %v278_v62 = vshll.u32 %v3864_v39, 16  ;;  %v3911_v63 = vsel %vm814_vm1, %v822_v35, %v824_v46 }
  0x1e   : > { %v249_v55 = vsel %vm237_vm2, %v244_v45, %v248_v31  ;;  %v3904_v60 = vsel %vm237_vm2, %v260_v47, %v264_v50  ;;  %v272_v1 = vrot.slane %v270_v48, 1  ;;  %v3916_v5 = vpack.c.bf16 %v187_v53, %v186_v52  ;;  %v192_v52 = vld [vmem:[%s3807_s27 + $0xa0] sm:$0xff]  ;;  %v193_v53 = vld [vmem:[%s3807_s27 + $0xa8] sm:$0xff] }
  0x1f   : > { %3134 = vmatprep.mubr.msk.bf16.mxu1 %vm377_vm0, %v249_v55  ;;  %v826_v3 = vrot.slane %v3891_v56, 1  ;;  %v268_v6 = vor.u32 %v266_v51, %v264_v50  ;;  %v3923_v7 = vpack.c.bf16 %v189_v57, %v188_v54  ;;  %v280_v11 = vrot.slane %v278_v62, 1 }
  0x20   : > { %3135 = vmatmul.mubr.msk.bf16.vlgmr.msra.gmra.mrb[0].mxu1 %vm377_vm0, %v3882_v49  ;;  %3313 = vmatpush3.bf16.msra.mxu0 %v3729_v36  ;;  %v276_v9 = vor.u32 %v274_v61, %v272_v1  ;;  %v828_v12 = vrot.slane %v3916_v5, 1  ;;  %v282_v15 = vshrl.u32 %v3864_v39, 16  ;;  %v286_v16 = vshll.u32 %v3891_v56, 16 }
  0x21   : > { %3167 = vmatpush3.bf16.msra.mxu1 %v3802_v4  ;;  %3138 = vmatprep.mubr.msk.bf16.mxu1 %vm377_vm0, %v3904_v60  ;;  %v3926_v8 = vsel %vm814_vm1, %v824_v46, %v826_v3  ;;  %v3936_v4 = vld [vmem:[%s4682_s1 + $0x20] sm:$0xff]   ;;  %v3947_v22 = vsel %vm237_vm2, %v268_v6, %v272_v1  ;;  %v830_v23 = vrot.slane %v3923_v7, 1  ;;  %v290_v28 = vshrl.u32 %v3891_v56, 16  ;;  %v195_v6 = vld [vmem:[%s3807_s27 + $0xb8] sm:$0xff] }
  0x22   : > { %3168 = vmatprep.subr.bf16.mxu1 %v3730_v58  ;;  %3346 = vmatprep.subr.bf16.mxu0 %v3900_v59  ;;  %v3952_v27 = vsel %vm237_vm2, %v276_v9, %v280_v11  ;;  %v294_v29 = vshll.u32 %v3916_v5, 16  ;;  %v1548_v30 = vrot.slane %v246_v20, 2  ;;  %v3962_v31 = vsel %vm814_vm1, %v826_v3, %v828_v12  ;;  %v194_v3 = vld [vmem:[%s3807_s27 + $0xb0] sm:$0xff] }
  0x23   : > { %3283 = vmatmul.mubr.msk.bf16.gmra.mrb[4].mxu0 %vm377_vm0, %v3911_v63  ;;  %v284_v34 = vor.u32 %v282_v15, %v280_v11  ;;  %v288_v35 = vrot.slane %v286_v16, 1  ;;  %v3968_v36 = vpack.c.bf16 %v191_v24, %v190_v17  ;;  %v3973_v20 = vsel %vm814_vm1, %v828_v12, %v830_v23 }
  0x24   : > { %3286 = vmatprep.mubr.msk.bf16.mxu0 %vm377_vm0, %v3926_v8  ;;  %v1547_v37 = vrot.slane %v250_v21, 1  ;;  %v1550_v38 = vrot.slane %v258_v40, 1  ;;  %v1551_v43 = vrot.slane %v254_v25, 2  ;;  %v296_v45 = vrot.slane %v294_v29, 1 }
  0x25   : > { %3169 = vmatpush3.bf16.msra.mxu1 %v3730_v58  ;;  %v292_v44 = vor.u32 %v290_v28, %v288_v35  ;;  %v832_v21 = vrot.slane %v3968_v36, 1  ;;  %v302_v40 = vshll.u32 %v3923_v7, 16  ;;  %v3992_v25 = vsel %vm237_vm2, %v284_v34, %v288_v35 }
  0x26   : > { %3202 = vmatprep.subr.bf16.mxu1 %v3936_v4  ;;  %v298_v46 = vshrl.u32 %v3916_v5, 16  ;;  %v1549_v47 = vor.u32 %v1548_v30, %v1547_v37  ;;  %v1552_v50 = vor.u32 %v1551_v43, %v1550_v38  ;;  %v306_v55 = vshrl.u32 %v3923_v7, 16  ;;  %v196_v43 = vld [vmem:[%s3807_s27 + $0xc0] sm:$0xff] }
  0x27   : > { %v3998_v54 = vsel %vm237_vm2, %v292_v44, %v296_v45  ;;  %v4688_v57 = vshll.u32 %v3968_v36, 16  ;;  %v1555_v58 = vrot.slane %v262_v42, 2  ;;  %v1554_v1 = vrot.slane %v266_v51, 1  ;;  %v197_v44 = vld [vmem:[%s3807_s27 + $0xc8] sm:$0xff] }
  0x28   : > { %3139 = vmatmul.mubr.msk.bf16.gmra.mrb[4].mxu1 %vm377_vm0, %v3947_v22  ;;  %v4013_v9 = vsel %vm814_vm1, %v830_v23, %v832_v21  ;;  %v304_v11 = vrot.slane %v302_v40, 1  ;;  %v4017_v12 = vpack.c.bf16 %v193_v53, %v192_v52  ;;  %v300_v42 = vor.u32 %v298_v46, %v296_v45 }
  0x29   : > { %3142 = vmatprep.mubr.msk.bf16.mxu1 %vm377_vm0, %v3952_v27  ;;  %v1553_v51 = vsel %vm1546_vm3, %v1549_v47, %v1552_v50  ;;  %v1558_v17 = vrot.slane %v274_v61, 1  ;;  %v1559_v23 = vrot.slane %v270_v48, 2  ;;  %v312_v30 = vrot.slane %v4688_v57, 1 }
  0x2a   : > { %v308_v24 = vor.u32 %v306_v55, %v304_v11  ;;  %v4032_v34 = vpack.c.bf16 %v195_v6, %v194_v3  ;;  %v1556_v35 = vor.u32 %v1555_v58, %v1554_v1  ;;  %v4686_v61 = vshll.u32 %v4017_v12, 16  ;;  %v198_v3 = vld [vmem:[%s3807_s27 + $0xd0] sm:$0xff]  ;;  %v199_v6 = vld [vmem:[%s3807_s27 + $0xd8] sm:$0xff] }
  0x2b   : > { %3287 = vmatmul.mubr.msk.bf16.gmra.mrb[8].mxu0 %vm377_vm0, %v3962_v31  ;;  %v4039_v48 = vsel %vm237_vm2, %v300_v42, %v304_v11  ;;  %v4689_v37 = vshrl.u32 %v3968_v36, 16  ;;  %v1560_v38 = vor.u32 %v1559_v23, %v1558_v17  ;;  %v4687_v47 = vshrl.u32 %v4017_v12, 16  ;;  %v3733_v17 = vld [vmem:[%s4682_s1 + $0x68] sm:$0xff]  }
  0x2c   : > { %3290 = vmatprep.mubr.msk.bf16.mxu0 %vm377_vm0, %v3973_v20  ;;  %4703 = vst [vmem:[#allocation2_spill] sm:$0xff] %v4039_v48  ;;  %v4045_v45 = vsel %vm237_vm2, %v308_v24, %v312_v30  ;;  %v4685_v52 = vshll.u32 %v4032_v34, 16  ;;  %v4050_v53 = vsel %vm1546_vm3, %v1552_v50, %v1556_v35  ;;  %v1562_v58 = vrot.slane %v282_v15, 1 }
  0x2d   : > { %4704 = vst [vmem:[#allocation3_spill] sm:$0xff] %v4045_v45  ;;  %v1563_v1 = vrot.slane %v278_v62, 2  ;;  %v320_v11 = vrot.slane %v4686_v61, 1  ;;  %v4062_v42 = vpack.c.bf16 %v197_v44, %v196_v43  ;;  %v1566_v50 = vrot.slane %v290_v28, 1 }
  0x2e   : > { %v316_v62 = vor.u32 %v4689_v37, %v312_v30  ;;  %v4073_v15 = vsel %vm1546_vm3, %v1556_v35, %v1560_v38  ;;  %v4082_v23 = vpack.c.bf16 %v199_v6, %v198_v3  ;;  %v330_v44 = vshrl.u32 %v4032_v34, 16  ;;  %v200_v3 = vld [vmem:[%s3807_s27 + $0xe0] sm:$0xff]  ;;  %v201_v6 = vld [vmem:[%s3807_s27 + $0xe8] sm:$0xff] }
  0x2f   : > { %v324_v28 = vor.u32 %v4687_v47, %v320_v11  ;;  %v1564_v24 = vor.u32 %v1563_v1, %v1562_v58  ;;  %v4693_v30 = vshll.u32 %v4062_v42, 16  ;;  %v4099_v58 = vld [vmem:[%s4682_s1 + $0x70] sm:$0xff]   ;;  %v338_v1 = vshrl.u32 %v4062_v42, 16 }
  0x30   : > { %3143 = vmatmul.mubr.msk.bf16.gmra.mrb[8].mxu1 %vm377_vm0, %v3992_v25  ;;  %v4091_v43 = vsel %vm237_vm2, %v316_v62, %v320_v11  ;;  %v202_v62 = vld [vmem:[%s3807_s27 + $0xf0] sm:$0xff]  ;;  %v4691_v61 = vrot.slane %v4017_v12, 1  ;;  %v4123_v57 = vpack.c.bf16 %v201_v6, %v200_v3  ;;  %v1574_v37 = vrot.slane %v306_v55, 1 }
  0x31   : > { %3146 = vmatprep.mubr.msk.bf16.mxu1 %vm377_vm0, %v3998_v54  ;;  %4705 = vst [vmem:[#allocation4_spill] sm:$0xff] %v4091_v43  ;;  %v4107_v11 = vsel %vm1546_vm3, %v1560_v38, %v1564_v24  ;;  %v1571_v38 = vrot.slane %v294_v29, 2  ;;  %v1575_v18 = vrot.slane %v302_v40, 2  ;;  %v815_v40 = vrot.slane %v3830_v19, 1 }
  0x32   : > { %v4137_v29 = vsel %vm814_vm1, %v832_v21, %v4691_v61  ;;  %v350_v3 = vshll.u32 %v4123_v57, 16  ;;  %v346_v6 = vshrl.u32 %v4082_v23, 16 }
  0x33   : > { %3291 = vmatmul.mubr.msk.bf16.gmra.mrb[12].mxu0 %vm377_vm0, %v4013_v9  ;;  %v1576_v61 = vor.u32 %v1575_v18, %v1574_v37  ;;  %v4710_v18 = vshrl.u32 %v3968_v36, 16 }
  0x34   : > { %3314 = vmatprep.mubr.msk.bf16.mxu0 %vm377_vm0, %v1553_v51  ;;  %v1567_v51 = vrot.slane %v286_v16, 2  ;;  %v328_v16 = vrot.slane %v4685_v52, 1  ;;  %v203_v52 = vld [vmem:[%s3807_s27 + $0xf8] sm:$0xff] }
  0x35   : > { %v1578_v37 = vrot.slane %v4710_v18, 1 }
  0x36   : > { %v1568_v35 = vor.u32 %v1567_v51, %v1566_v50  ;;  %v4692_v50 = vshll.u32 %v4082_v23, 16  ;;  %v1570_v51 = vrot.slane %v298_v46, 1  ;;  %v332_v46 = vor.u32 %v330_v44, %v328_v16 }
  0x38   : > { %3147 = vmatmul.mubr.msk.bf16.gmra.mrb[12].mxu1 %vm377_vm0, %v4039_v48  ;;  %v4119_v47 = vsel %vm1546_vm3, %v1564_v24, %v1568_v35  ;;  %v344_v24 = vrot.slane %v4692_v50, 1  ;;  %v1572_v55 = vor.u32 %v1571_v38, %v1570_v51  ;;  %v352_v38 = vrot.slane %v350_v3, 1 }
  0x39   : > { %3150 = vmatprep.mubr.msk.bf16.mxu1 %vm377_vm0, %v4045_v45 }
  0x3b   : > { %3315 = vmatmul.mubr.msk.bf16.vlgmr.msra.gmra.mrb[0].mxu0 %vm377_vm0, %v4050_v53 }
  0x3c   : > { %3347 = vmatpush3.bf16.msra.mxu0 %v3900_v59  ;;  %3318 = vmatprep.mubr.msk.bf16.mxu0 %vm377_vm0, %v4073_v15  ;;  %v4102_v59 = vsel %vm237_vm2, %v324_v28, %v328_v16  ;;  %v336_v28 = vrot.slane %v4693_v30, 1  ;;  %v4141_v16 = vpack.c.bf16 %v203_v52, %v202_v62  ;;  %v4708_v52 = vrot.slane %v3817_v10, 1 }
  0x3d   : > { %3348 = vmatprep.subr.bf16.mxu0 %v3733_v17  ;;  %4706 = vst [vmem:[#allocation5_spill] sm:$0xff] %v4102_v59  ;;  %v354_v30 = vshrl.u32 %v4123_v57, 16 }
  0x3e   : > { %v4150_v21 = vsel %vm237_vm2, %v332_v46, %v336_v28  ;;  %v4156_v62 = vsel %vm814_vm1, %v815_v40, %v4708_v52  ;;  %v358_v51 = vshll.u32 %v4141_v16, 16  ;;  %v4711_v46 = vshll.u32 %v3968_v36, 16 }
  0x3f   : > { %4707 = vst [vmem:[#allocation6_spill] sm:$0xff] %v4150_v21  ;;  %v4175_v52 = vsel %vm1546_vm3, %v1572_v55, %v1576_v61  ;;  %v356_v45 = vor.u32 %v354_v30, %v352_v38 }
  0x40   : > { %3151 = vmatmul.mubr.msk.bf16.gmra.mrb[16].mxu1 %vm377_vm0, %v4091_v43  ;;  %3349 = vmatpush3.bf16.msra.mxu0 %v3733_v17  ;;  %v340_v17 = vor.u32 %v338_v1, %v336_v28  ;;  %v4166_v28 = vsel %vm1546_vm3, %v1568_v35, %v1572_v55  ;;  %v1579_v40 = vrot.slane %v4711_v46, 2  ;;  %v4713_v35 = vshll.u32 %v4017_v12, 16 }
  0x41   : > { %3154 = vmatprep.mubr.msk.bf16.mxu1 %vm377_vm0, %v4102_v59  ;;  %3382 = vmatprep.subr.bf16.mxu0 %v4099_v58  ;;  %v4712_v59 = vshrl.u32 %v4017_v12, 16  ;;  %v360_v48 = vrot.slane %v358_v51, 1 }
  0x42   : > { %v4159_v50 = vsel %vm237_vm2, %v340_v17, %v344_v24  ;;  %v348_v17 = vor.u32 %v346_v6, %v344_v24  ;;  %v1583_v43 = vrot.slane %v4713_v35, 2  ;;  %v1580_v18 = vor.u32 %v1579_v40, %v1578_v37 }
  0x43   : > { %3319 = vmatmul.mubr.msk.bf16.gmra.mrb[4].mxu0 %vm377_vm0, %v4107_v11  ;;  %4709 = vst [vmem:[#allocation7_spill] sm:$0xff] %v4159_v50  ;;  %v4189_v46 = vsel %vm237_vm2, %v356_v45, %v360_v48  ;;  %v362_v35 = vshrl.u32 %v4141_v16, 16  ;;  %v4716_v37 = vshll.u32 %v4032_v34, 16  ;;  %v1590_v45 = vrot.slane %v338_v1, 1 }
  0x44   : > { %3322 = vmatprep.mubr.msk.bf16.mxu0 %vm377_vm0, %v4119_v47  ;;  %v4186_v24 = vsel %vm237_vm2, %v348_v17, %v352_v38  ;;  %4715 = vst [vmem:[#allocation9_spill] sm:$0xff] %v4189_v46 }
  0x45   : > { %4714 = vst [vmem:[#allocation8_spill] sm:$0xff] %v4186_v24  ;;  %v1587_v40 = vrot.slane %v4716_v37, 2  ;;  %v204_v37 = vld [vmem:[%s3807_s27 + $0x100] sm:$0xff] }
  0x48   : > { %3155 = vmatmul.mubr.msk.bf16.gmra.mrb[20].mxu1 %vm377_vm0, %v4150_v21  ;;  %v1582_v21 = vrot.slane %v4712_v59, 1  ;;  %v4194_v59 = vsel %vm1546_vm3, %v1576_v61, %v1580_v18  ;;  %v4208_v61 = vor.u32 %v362_v35, %v360_v48 }
  0x49   : > { %3158 = vmatprep.mubr.msk.bf16.mxu1 %vm377_vm0, %v4159_v50  ;;  %v1586_v50 = vrot.slane %v330_v44, 1 }
  0x4a   : > { %v1584_v55 = vor.u32 %v1583_v43, %v1582_v21  ;;  %v4717_v21 = vshll.u32 %v4062_v42, 16  ;;  %4718 = vst [vmem:[#allocation10_spill] sm:$0xff] %v4208_v61 }
  0x4b   : > { %3323 = vmatmul.mubr.msk.bf16.gmra.mrb[8].mxu0 %vm377_vm0, %v4166_v28  ;;  %v1588_v44 = vor.u32 %v1587_v40, %v1586_v50  ;;  %v1598_v40 = vrot.slane %v354_v30, 1  ;;  %v3734_v30 = vld [vmem:[%s4682_s1 + $0x28] sm:$0xff]  }
  0x4c   : > { %3326 = vmatprep.mubr.msk.bf16.mxu0 %vm377_vm0, %v4175_v52  ;;  %v4202_v43 = vsel %vm1546_vm3, %v1580_v18, %v1584_v55  ;;  %v1591_v38 = vrot.slane %v4717_v21, 2  ;;  %v1594_v18 = vrot.slane %v346_v6, 1  ;;  %v4719_v21 = vshll.u32 %v4082_v23, 16 }
  0x4d   : > { %v4217_v1 = vsel %vm1546_vm3, %v1584_v55, %v1588_v44 }
  0x4e   : > { %v1592_v17 = vor.u32 %v1591_v38, %v1590_v45  ;;  %v1595_v48 = vrot.slane %v4719_v21, 2  ;;  %v1599_v45 = vrot.slane %v350_v3, 2 }
  0x50   : > { %3159 = vmatmul.mubr.msk.bf16.gmra.mrb[24].mxu1 %vm377_vm0, %v4186_v24  ;;  %v205_v24 = vld [vmem:[%s3807_s27 + $0x108] sm:$0xff]  ;;  %v4224_v50 = vsel %vm1546_vm3, %v1588_v44, %v1592_v17  ;;  %v1596_v6 = vor.u32 %v1595_v48, %v1594_v18  ;;  %v1600_v55 = vor.u32 %v1599_v45, %v1598_v40  ;;  %v1603_v44 = vrot.slane %v358_v51, 2  ;;  %v3736_v51 = vld [vmem:[%s4682_s1 + $0x30] sm:$0xff]  }
  0x51   : > { %3162 = vmatprep.mubr.msk.bf16.mxu1 %vm377_vm0, %v4189_v46  ;;  %v4226_v38 = vpack.c.bf16 %v205_v24, %v204_v37  ;;  %v1602_v24 = vrot.slane %v362_v35, 1 }
  0x52   : > { %v4242_v3 = vsel %vm1546_vm3, %v1592_v17, %v1596_v6  ;;  %v4250_v18 = vsel %vm1546_vm3, %v1596_v6, %v1600_v55 }
  0x53   : > { %3327 = vmatmul.mubr.msk.bf16.gmra.mrb[12].mxu0 %vm377_vm0, %v4194_v59  ;;  %v1107_v21 = vshll.u32 %v4226_v38, 16  ;;  %v1111_v46 = vshrl.u32 %v4226_v38, 16 }
  0x54   : > { %3330 = vmatprep.mubr.msk.bf16.mxu0 %vm377_vm0, %v4202_v43 }
  0x55   : > { %v1606_v48 = vrot.slane %v1111_v46, 1 }
  0x58   : > { %3163 = vmatmul.mubr.msk.bf16.gmra.mrb[28].mxu1 %vm377_vm0, %v4208_v61  ;;  %v207_v61 = vld [vmem:[%s3807_s27 + $0x118] sm:$0xff] }
  0x59   : > { %3170 = vmatprep.mubr.msk.bf16.mxu1 %vm377_vm0, %v3830_v19  ;;  %v206_v19 = vld [vmem:[%s3807_s27 + $0x110] sm:$0xff] }
  0x5a   : > { %v4244_v37 = vpack.c.bf16 %v207_v61, %v206_v19 }
  0x5b   : > { %3331 = vmatmul.mubr.msk.bf16.gmra.mrb[16].mxu0 %vm377_vm0, %v4217_v1 }
  0x5c   : > { %3334 = vmatprep.mubr.msk.bf16.mxu0 %vm377_vm0, %v4224_v50  ;;  %v1611_v35 = vshrl.u32 %v4244_v37, 16  ;;  %v1614_v61 = vshll.u32 %v4244_v37, 16 }
  0x5e   : > { %v1613_v45 = vrot.slane %v1611_v35, 1  ;;  %v1616_v6 = vrot.slane %v1614_v61, 2  ;;  %v840_v35 = vrot.slane %v4082_v23, 1 }
  0x60   : > { %3171 = vmatmul.mubr.msk.bf16.vlgmr.msra.gmra.mrb[0].mxu1 %vm377_vm0, %v3817_v10  ;;  %v1607_v10 = vrot.slane %v1107_v21, 2 }
  0x61   : > { %3203 = vmatpush3.bf16.msra.mxu1 %v3936_v4  ;;  %3174 = vmatprep.mubr.msk.bf16.mxu1 %vm377_vm0, %v3821_v13  ;;  %v1604_v4 = vor.u32 %v1603_v44, %v1602_v24  ;;  %v3737_v24 = vld [vmem:[%s4682_s1 + $0x78] sm:$0xff]   ;;  %v3739_v44 = vld [vmem:[%s4682_s1 + $0x80] sm:$0xff]  }
  0x62   : > { %3204 = vmatprep.subr.bf16.mxu1 %v3734_v30  ;;  %v1608_v17 = vor.u32 %v1607_v10, %v1606_v48  ;;  %v4720_v48 = vrot.slane %v4017_v12, 1 }
  0x63   : > { %3335 = vmatmul.mubr.msk.bf16.gmra.mrb[20].mxu0 %vm377_vm0, %v4242_v3  ;;  %v4268_v40 = vsel %vm1546_vm3, %v1600_v55, %v1604_v4 }
  0x64   : > { %3338 = vmatprep.mubr.msk.bf16.mxu0 %vm377_vm0, %v4250_v18  ;;  %v4273_v19 = vsel %vm1546_vm3, %v1604_v4, %v1608_v17  ;;  %v838_v4 = vrot.slane %v4062_v42, 1 }
  0x65   : > { %3205 = vmatpush3.bf16.msra.mxu1 %v3734_v30  ;;  %v4279_v30 = vor.u32 %v1616_v6, %v1613_v45  ;;  %v842_v45 = vrot.slane %v4123_v57, 1  ;;  %v844_v6 = vrot.slane %v4141_v16, 1 }
  0x66   : > { %3238 = vmatprep.subr.bf16.mxu1 %v3736_v51 }
  0x67   : > { %v4285_v55 = vsel %vm1546_vm3, %v1608_v17, %v4279_v30  ;;  %v4348_v17 = vsel %vm814_vm1, %v838_v4, %v840_v35 }
  0x68   : > { %3175 = vmatmul.mubr.msk.bf16.gmra.mrb[4].mxu1 %vm377_vm0, %v3823_v14 }
  0x69   : > { %3178 = vmatprep.mubr.msk.bf16.mxu1 %vm377_vm0, %v3838_v26 }
  0x6b   : > { %3339 = vmatmul.mubr.msk.bf16.gmra.mrb[24].mxu0 %vm377_vm0, %v4268_v40 }
  0x6c   : > { %3342 = vmatprep.mubr.msk.bf16.mxu0 %vm377_vm0, %v4273_v19 }
  0x70   : > { %3179 = vmatmul.mubr.msk.bf16.gmra.mrb[8].mxu1 %vm377_vm0, %v3864_v39 }
  0x71   : > { %3182 = vmatprep.mubr.msk.bf16.mxu1 %vm377_vm0, %v3891_v56 }
  0x73   : > { %3343 = vmatmul.mubr.msk.bf16.gmra.mrb[28].mxu0 %vm377_vm0, %v4285_v55 }
  0x74   : > { %3350 = vmatprep.mubr.msk.bf16.mxu0 %vm377_vm0, %v3852_v33 }
  0x78   : > { %3183 = vmatmul.mubr.msk.bf16.gmra.mrb[12].mxu1 %vm377_vm0, %v3916_v5 }
  0x79   : > { %3186 = vmatprep.mubr.msk.bf16.mxu1 %vm377_vm0, %v3923_v7 }
  0x7b   : > { %3351 = vmatmul.mubr.msk.bf16.vlgmr.msra.gmra.mrb[0].mxu0 %vm377_vm0, %v3870_v41 }
  0x7c   : > { %3383 = vmatpush3.bf16.msra.mxu0 %v4099_v58  ;;  %3354 = vmatprep.mubr.msk.bf16.mxu0 %vm377_vm0, %v3911_v63  ;;  %v836_v58 = vrot.slane %v4032_v34, 1 }
  0x7d   : > { %3384 = vmatprep.subr.bf16.mxu0 %v3737_v24 }
  0x7e   : > { %v4332_v10 = vsel %vm814_vm1, %v4720_v48, %v836_v58  ;;  %v4343_v61 = vsel %vm814_vm1, %v836_v58, %v838_v4  ;;  %v4367_v58 = vsel %vm814_vm1, %v842_v45, %v844_v6  ;;  %v846_v48 = vrot.slane %v4226_v38, 1  ;;  %v208_v4 = vld [vmem:[%s3807_s27 + $0x120] sm:$0x7] }
  0x80   : > { %3187 = vmatmul.mubr.msk.bf16.gmra.mrb[16].mxu1 %vm377_vm0, %v3968_v36  ;;  %3385 = vmatpush3.bf16.msra.mxu0 %v3737_v24  ;;  %v3738_v24 = vld [vmem:[%s4682_s1 + $0x38] sm:$0xff]  }
  0x81   : > { %3190 = vmatprep.mubr.msk.bf16.mxu1 %vm377_vm0, %v4017_v12  ;;  %3418 = vmatprep.subr.bf16.mxu0 %v3739_v44 }
  0x83   : > { %3355 = vmatmul.mubr.msk.bf16.gmra.mrb[4].mxu0 %vm377_vm0, %v3926_v8 }
  0x84   : > { %3358 = vmatprep.mubr.msk.bf16.mxu0 %vm377_vm0, %v3962_v31 }
  0x88   : > { %3191 = vmatmul.mubr.msk.bf16.gmra.mrb[20].mxu1 %vm377_vm0, %v4032_v34 }
  0x89   : > { %3194 = vmatprep.mubr.msk.bf16.mxu1 %vm377_vm0, %v4062_v42 }
  0x8b   : > { %3359 = vmatmul.mubr.msk.bf16.gmra.mrb[8].mxu0 %vm377_vm0, %v3973_v20 }
  0x8c   : > { %3362 = vmatprep.mubr.msk.bf16.mxu0 %vm377_vm0, %v4013_v9 }
  0x90   : > { %3195 = vmatmul.mubr.msk.bf16.gmra.mrb[24].mxu1 %vm377_vm0, %v4082_v23 }
  0x91   : > { %3198 = vmatprep.mubr.msk.bf16.mxu1 %vm377_vm0, %v4123_v57 }
  0x93   : > { %3363 = vmatmul.mubr.msk.bf16.gmra.mrb[12].mxu0 %vm377_vm0, %v4137_v29 }
  0x94   : > { %3366 = vmatprep.mubr.msk.bf16.mxu0 %vm377_vm0, %v4332_v10 }
  0x98   : > { %3199 = vmatmul.mubr.msk.bf16.gmra.mrb[28].mxu1 %vm377_vm0, %v4141_v16 }
  0x99   : > { %3206 = vmatprep.mubr.msk.bf16.mxu1 %vm377_vm0, %v4156_v62  ;;  %v4362_v62 = vsel %vm814_vm1, %v840_v35, %v842_v45 }
  0x9b   : > { %3367 = vmatmul.mubr.msk.bf16.gmra.mrb[16].mxu0 %vm377_vm0, %v4343_v61 }
  0x9c   : > { %3370 = vmatprep.mubr.msk.bf16.mxu0 %vm377_vm0, %v4348_v17 }
  0xa0   : > { %3207 = vmatmul.mubr.msk.bf16.vlgmr.msra.gmra.mrb[0].mxu1 %vm377_vm0, %v3849_v32  ;;  %v1331_v32 = vrot.slane %v4244_v37, 1 }
  0xa1   : > { %3239 = vmatpush3.bf16.msra.mxu1 %v3736_v51  ;;  %3210 = vmatprep.mubr.msk.bf16.mxu1 %vm377_vm0, %v3852_v33  ;;  %v4380_v33 = vsel %vm814_vm1, %v844_v6, %v846_v48  ;;  %v4382_v51 = vpack.c.bf16 %v208_v4, %v208_v4 }
  0xa2   : > { %3240 = vmatprep.subr.bf16.mxu1 %v3738_v24  ;;  %v4387_v35 = vsel %vm814_vm1, %v846_v48, %v1331_v32 }
  0xa3   : > { %3371 = vmatmul.mubr.msk.bf16.gmra.mrb[20].mxu0 %vm377_vm0, %v4362_v62  ;;  %v1878_v45 = vrot.slane %v4382_v51, 1 }
  0xa4   : > { %3374 = vmatprep.mubr.msk.bf16.mxu0 %vm377_vm0, %v4367_v58 }
  0xa5   : > { %3241 = vmatpush3.bf16.msra.mxu1 %v3738_v24  ;;  %v2341_v24 = vrot.slane %v4141_v16, 2 }
  0xa6   : > { %3454 = vmatprep.subr.bf16.mxu1 %v3780_v0 }
  0xa8   : > { %3211 = vmatmul.mubr.msk.bf16.gmra.mrb[4].mxu1 %vm377_vm0, %v3870_v41  ;;  %v1879_v41 = vsel %vm814_vm1, %v1331_v32, %v1878_v45 }
  0xa9   : > { %3214 = vmatprep.mubr.msk.bf16.mxu1 %vm377_vm0, %v3911_v63  ;;  %v3740_v63 = vld [vmem:[%s4682_s1 + $0x88] sm:$0xff]  }
  0xab   : > { %3375 = vmatmul.mubr.msk.bf16.gmra.mrb[24].mxu0 %vm377_vm0, %v4380_v33 }
  0xac   : > { %3378 = vmatprep.mubr.msk.bf16.mxu0 %vm377_vm0, %v4387_v35 }
  0xb0   : > { %3215 = vmatmul.mubr.msk.bf16.gmra.mrb[8].mxu1 %vm377_vm0, %v3926_v8  ;;  %v2097_v8 = vshll.u32 %v4382_v51, 16 }
  0xb1   : > { %3218 = vmatprep.mubr.msk.bf16.mxu1 %vm377_vm0, %v3962_v31  ;;  %v2316_v31 = vrot.slane %v3821_v13, 2  ;;  %v2319_v13 = vrot.slane %v3838_v26, 2  ;;  %v2325_v26 = vrot.slane %v3916_v5, 2 }
  0xb3   : > { %3379 = vmatmul.mubr.msk.bf16.gmra.mrb[28].mxu0 %vm377_vm0, %v1879_v41 }
  0xb4   : > { %3386 = vmatprep.mubr.msk.bf16.mxu0 %vm377_vm0, %v4050_v53 }
  0xb8   : > { %3219 = vmatmul.mubr.msk.bf16.gmra.mrb[12].mxu1 %vm377_vm0, %v3973_v20  ;;  %v2317_v20 = vrot.slane %v3823_v14, 2  ;;  %v2321_v14 = vrot.slane %v3864_v39, 2 }
  0xb9   : > { %3222 = vmatprep.mubr.msk.bf16.mxu1 %vm377_vm0, %v4013_v9  ;;  %v4722_v9 = vld [vmem:[#allocation3_spill] sm:$0xff] }
  0xba   : > { %v2322_v53 = vsel %vm2315_vm4, %v2319_v13, %v2321_v14 }
  0xbb   : > { %3387 = vmatmul.mubr.msk.bf16.vlgmr.msra.gmra.mrb[0].mxu0 %vm377_vm0, %v4073_v15  ;;  %v2323_v15 = vrot.slane %v3891_v56, 2  ;;  %v2329_v56 = vrot.slane %v3968_v36, 2  ;;  %v2333_v36 = vrot.slane %v4032_v34, 2  ;;  %v2337_v34 = vrot.slane %v4082_v23, 2 }
  0xbc   : > { %3419 = vmatpush3.bf16.msra.mxu0 %v3739_v44  ;;  %3390 = vmatprep.mubr.msk.bf16.mxu0 %vm377_vm0, %v4107_v11  ;;  %v4724_v11 = vld [vmem:[#allocation5_spill] sm:$0xff] }
  0xbd   : > { %3420 = vmatprep.subr.bf16.mxu0 %v3740_v63  ;;  %v2324_v39 = vsel %vm2315_vm4, %v2321_v14, %v2323_v15 }
  0xc0   : > { %3223 = vmatmul.mubr.msk.bf16.gmra.mrb[16].mxu1 %vm377_vm0, %v4137_v29  ;;  %3421 = vmatpush3.bf16.msra.mxu0 %v3740_v63 }
  0xc1   : > { %3226 = vmatprep.mubr.msk.bf16.mxu1 %vm377_vm0, %v4332_v10 }
  0xc3   : > { %3391 = vmatmul.mubr.msk.bf16.gmra.mrb[4].mxu0 %vm377_vm0, %v4119_v47  ;;  %v4723_v47 = vld [vmem:[#allocation4_spill] sm:$0xff] }
  0xc4   : > { %3394 = vmatprep.mubr.msk.bf16.mxu0 %vm377_vm0, %v4166_v28  ;;  %v4725_v28 = vld [vmem:[#allocation6_spill] sm:$0xff] }
  0xc8   : > { %3227 = vmatmul.mubr.msk.bf16.gmra.mrb[20].mxu1 %vm377_vm0, %v4343_v61 }
  0xc9   : > { %3230 = vmatprep.mubr.msk.bf16.mxu1 %vm377_vm0, %v4348_v17 }
  0xcb   : > { %3395 = vmatmul.mubr.msk.bf16.gmra.mrb[8].mxu0 %vm377_vm0, %v4175_v52  ;;  %v2326_v52 = vsel %vm2315_vm4, %v2323_v15, %v2325_v26 }
  0xcc   : > { %3398 = vmatprep.mubr.msk.bf16.mxu0 %vm377_vm0, %v4194_v59  ;;  %v2327_v59 = vrot.slane %v3923_v7, 2  ;;  %v2331_v7 = vrot.slane %v4017_v12, 2  ;;  %v2335_v12 = vrot.slane %v4062_v42, 2 }
  0xce   : > { %v2328_v5 = vsel %vm2315_vm4, %v2325_v26, %v2327_v59  ;;  %v2336_v44 = vsel %vm2315_vm4, %v2333_v36, %v2335_v12  ;;  %v2338_v6 = vsel %vm2315_vm4, %v2335_v12, %v2337_v34 }
  0xd0   : > { %3231 = vmatmul.mubr.msk.bf16.gmra.mrb[24].mxu1 %vm377_vm0, %v4362_v62 }
  0xd1   : > { %3234 = vmatprep.mubr.msk.bf16.mxu1 %vm377_vm0, %v4367_v58 }
  0xd3   : > { %3399 = vmatmul.mubr.msk.bf16.gmra.mrb[12].mxu0 %vm377_vm0, %v4202_v43  ;;  %v4726_v43 = vld [vmem:[#allocation7_spill] sm:$0xff] }
  0xd4   : > { %3402 = vmatprep.mubr.msk.bf16.mxu0 %vm377_vm0, %v4217_v1  ;;  %v4727_v1 = vld [vmem:[#allocation8_spill] sm:$0xff] }
  0xd8   : > { %3235 = vmatmul.mubr.msk.bf16.gmra.mrb[28].mxu1 %vm377_vm0, %v4380_v33 }
  0xd9   : > { %3242 = vmatprep.mubr.msk.bf16.mxu1 %vm377_vm0, %v3882_v49  ;;  %v2094_v49 = vshrl.u32 %v4382_v51, 16 }
  0xdb   : > { %3403 = vmatmul.mubr.msk.bf16.gmra.mrb[16].mxu0 %vm377_vm0, %v4224_v50  ;;  %v2330_v50 = vsel %vm2315_vm4, %v2327_v59, %v2329_v56 }
  0xdc   : > { %3406 = vmatprep.mubr.msk.bf16.mxu0 %vm377_vm0, %v4242_v3  ;;  %v1109_v3 = vrot.slane %v1107_v21, 1  ;;  %v2334_v21 = vsel %vm2315_vm4, %v2331_v7, %v2333_v36 }
  0xe0   : > { %3243 = vmatmul.mubr.msk.bf16.vlgmr.msra.gmra.mrb[0].mxu1 %vm377_vm0, %v3904_v60  ;;  %v2099_v60 = vrot.slane %v2097_v8, 2 }
  0xe1   : > { %3456 = vmatpush3.bf16.msra.mxu1 %v3780_v0  ;;  %3246 = vmatprep.mubr.msk.bf16.mxu1 %vm377_vm0, %v3947_v22  ;;  %v2096_v0 = vrot.slane %v2094_v49, 1 }
  0xe2   : > { %3455 = vmatprep.subr.bf16.mxu1 %v3789_v2 }
  0xe3   : > { %3407 = vmatmul.mubr.msk.bf16.gmra.mrb[20].mxu0 %vm377_vm0, %v4250_v18  ;;  %v2100_v22 = vor.u32 %v2099_v60, %v2096_v0  ;;  %v4728_v18 = vld [vmem:[#allocation10_spill] sm:$0xff] }
  0xe4   : > { %3410 = vmatprep.mubr.msk.bf16.mxu0 %vm377_vm0, %v4268_v40  ;;  %v1110_v40 = vsel %vm237_vm2, %v4728_v18, %v1109_v3 }
  0xe5   : > { %3457 = vmatpush3.bf16.msra.mxu1 %v3789_v2  ;;  %v2101_v2 = vsel %vm1546_vm3, %v4279_v30, %v2100_v22  ;;  %v2332_v30 = vsel %vm2315_vm4, %v2329_v56, %v2331_v7  ;;  %v4571_v22 = vld [vmem:[%s4683_s2] ss:$0 sm:$0xff] }
  0xe8   : > { %3247 = vmatmul.mubr.msk.bf16.gmra.mrb[4].mxu1 %vm377_vm0, %v3952_v27  ;;  %v4721_v27 = vld [vmem:[#allocation2_spill] sm:$0xff] }
  0xe9   : > { %3250 = vmatprep.mubr.msk.bf16.mxu1 %vm377_vm0, %v3992_v25  ;;  %v2318_v25 = vsel %vm2315_vm4, %v2316_v31, %v2317_v20 }
  0xeb   : > { %3411 = vmatmul.mubr.msk.bf16.gmra.mrb[24].mxu0 %vm377_vm0, %v4273_v19  ;;  %v4729_v19 = vld [vmem:[#allocation9_spill] sm:$0xff] }
  0xec   : > { %3414 = vmatprep.mubr.msk.bf16.mxu0 %vm377_vm0, %v4285_v55  ;;  %v1113_v55 = vor.u32 %v1111_v46, %v1109_v3  ;;  %v2339_v46 = vrot.slane %v4123_v57, 2  ;;  %v2345_v57 = vrot.slane %v4244_v37, 2 }
  0xee   : > { %v2340_v42 = vsel %vm2315_vm4, %v2337_v34, %v2339_v46  ;;  %v2342_v23 = vsel %vm2315_vm4, %v2339_v46, %v2341_v24 }
  0xf0   : > { %3251 = vmatmul.mubr.msk.bf16.gmra.mrb[8].mxu1 %vm377_vm0, %v3998_v54  ;;  %v2320_v54 = vsel %vm2315_vm4, %v2317_v20, %v2319_v13 }
  0xf1   : > { %3254 = vmatprep.mubr.msk.bf16.mxu1 %vm377_vm0, %v4721_v27 }
  0xf3   : > { %3415 = vmatmul.mubr.msk.bf16.gmra.mrb[28].mxu0 %vm377_vm0, %v2101_v2 }
  0xf4   : > { %3422 = vmatprep.mubr.msk.bf16.mxu0 %vm377_vm0, %v2318_v25 }
  0xf8   : > { %3255 = vmatmul.mubr.msk.bf16.gmra.mrb[12].mxu1 %vm377_vm0, %v4722_v9 }
  0xf9   : > { %3258 = vmatprep.mubr.msk.bf16.mxu1 %vm377_vm0, %v4723_v47 }
  0xfb   : > { %3423 = vmatmul.mubr.msk.bf16.vlgmr.msra.gmra.mrb[0].mxu0 %vm377_vm0, %v2320_v54 }
  0xfc   : > { %3426 = vmatprep.mubr.msk.bf16.mxu0 %vm377_vm0, %v2322_v53 }
 0x100   : > { %3259 = vmatmul.mubr.msk.bf16.gmra.mrb[16].mxu1 %vm377_vm0, %v4724_v11 }
 0x101   : > { %3262 = vmatprep.mubr.msk.bf16.mxu1 %vm377_vm0, %v4725_v28 }
 0x103   : > { %3427 = vmatmul.mubr.msk.bf16.gmra.mrb[4].mxu0 %vm377_vm0, %v2324_v39 }
 0x104   : > { %3430 = vmatprep.mubr.msk.bf16.mxu0 %vm377_vm0, %v2326_v52 }
 0x108   : > { %3263 = vmatmul.mubr.msk.bf16.gmra.mrb[20].mxu1 %vm377_vm0, %v4726_v43 }
 0x109   : > { %3266 = vmatprep.mubr.msk.bf16.mxu1 %vm377_vm0, %v4727_v1 }
 0x10b   : > { %3431 = vmatmul.mubr.msk.bf16.gmra.mrb[8].mxu0 %vm377_vm0, %v2328_v5 }
 0x10c   : > { %3434 = vmatprep.mubr.msk.bf16.mxu0 %vm377_vm0, %v2330_v50 }
 0x110   : > { %3267 = vmatmul.mubr.msk.bf16.gmra.mrb[24].mxu1 %vm377_vm0, %v4729_v19 }
 0x111   : > { %3270 = vmatprep.mubr.msk.bf16.mxu1 %vm377_vm0, %v1110_v40 }
 0x113   : > { %3435 = vmatmul.mubr.msk.bf16.gmra.mrb[12].mxu0 %vm377_vm0, %v2332_v30 }
 0x114   : > { %3438 = vmatprep.mubr.msk.bf16.mxu0 %vm377_vm0, %v2334_v21 }
 0x118   : > { %3271 = vmatmul.mubr.msk.bf16.gmra.mrb[28].mxu1 %vm377_vm0, %v1113_v55 }
 0x119   : > { %3294 = vmatprep.mubr.msk.bf16.mxu1 %vm377_vm0, %v4137_v29  ;;  %v2343_v29 = vrot.slane %v4226_v38, 2 }
 0x11b   : > { %3439 = vmatmul.mubr.msk.bf16.gmra.mrb[16].mxu0 %vm377_vm0, %v2336_v44  ;;  %v2344_v16 = vsel %vm2315_vm4, %v2341_v24, %v2343_v29 }
 0x11c   : > { %3442 = vmatprep.mubr.msk.bf16.mxu0 %vm377_vm0, %v2338_v6 }
 0x120   : > { %3295 = vmatmul.mubr.msk.bf16.vlgmr.msra.gmra.mrb[16].mxu1 %vm377_vm0, %v4332_v10  ;;  %v2346_v10 = vsel %vm2315_vm4, %v2343_v29, %v2345_v57 }
 0x121   : > { %3298 = vmatprep.mubr.msk.bf16.mxu1 %vm377_vm0, %v4343_v61  ;;  %v2347_v61 = vrot.slane %v4382_v51, 2 }
 0x123   : > { %3443 = vmatmul.mubr.msk.bf16.gmra.mrb[20].mxu0 %vm377_vm0, %v2340_v42  ;;  %v2348_v38 = vsel %vm2315_vm4, %v2345_v57, %v2347_v61 }
 0x124   : > { %3446 = vmatprep.mubr.msk.bf16.mxu0 %vm377_vm0, %v2342_v23 }
 0x128   : > { %3299 = vmatmul.mubr.msk.bf16.gmra.mrb[20].mxu1 %vm377_vm0, %v4348_v17 }
 0x129   : > { %3302 = vmatprep.mubr.msk.bf16.mxu1 %vm377_vm0, %v4362_v62 }
 0x12b   : > { %3447 = vmatmul.mubr.msk.bf16.gmra.mrb[24].mxu0 %vm377_vm0, %v2344_v16 }
 0x12c   : > { %3450 = vmatprep.mubr.msk.bf16.mxu0 %vm377_vm0, %v2346_v10 }
 0x130   : > { %3303 = vmatmul.mubr.msk.bf16.gmra.mrb[24].mxu1 %vm377_vm0, %v4367_v58 }
 0x131   : > { %3306 = vmatprep.mubr.msk.bf16.mxu1 %vm377_vm0, %v4380_v33 }
 0x133   : > { %3451 = vmatmul.mubr.msk.bf16.gmra.mrb[28].mxu0 %vm377_vm0, %v2348_v38 }
 0x138   : > { %3307 = vmatmul.mubr.msk.bf16.gmra.mrb[28].mxu1 %vm377_vm0, %v4387_v35 }
 0x1b3   : > { %v3244_v37 = vpop.f32.mrb[0].mxu1 }
 0x1b4   : > { %v1166_v17 = vpop.f32.mrb[1].mxu1 }
 0x1b5   : > { %v3245_v62 = vpop.f32.mrb[2].mxu1 }
 0x1b6   : > { %v1169_v48 = vpop.f32.mrb[3].mxu1 }
 0x1bb   : > { %v3248_v32 = vpop.f32.mrb[4].mxu1 }
 0x1bc   : > { %v1182_v4 = vpop.f32.mrb[5].mxu1 }
 0x1bd   : > { %v3249_v51 = vpop.f32.mrb[6].mxu1 }
 0x1be   : > { %v1185_v45 = vpop.f32.mrb[7].mxu1 }
 0x1c3   : > { %v3252_v58 = vpop.f32.mrb[8].mxu1 }
 0x1c4   : > { %v1198_v41 = vpop.f32.mrb[9].mxu1 }
 0x1c5   : > { %v3253_v63 = vpop.f32.mrb[10].mxu1 }
 0x1c6   : > { %v1201_v49 = vpop.f32.mrb[11].mxu1 }
 0x1cb   : > { %v4560_v8 = vpop.f32.mrb[12].mxu1 }
 0x1cc   : > { %v4562_v33 = vpop.f32.mrb[13].mxu1 }
 0x1cd   : > { %v4564_v0 = vpop.f32.mrb[14].mxu1 }
 0x1ce   : > { %v4566_v35 = vpop.f32.mrb[15].mxu1  ;;  %v3424_v60 = vpop.f32.mrb[0].mxu0 }
 0x1cf   : > { %v3458_v31 = vadd.f32 %v3424_v60, %v3244_v37  ;;  %v2443_v20 = vpop.f32.mrb[1].mxu0 }
 0x1d0   : > { %v3459_v2 = vadd.f32 %v2443_v20, %v1166_v17  ;;  %v3425_v27 = vpop.f32.mrb[2].mxu0 }
 0x1d1   : > { %v2611_v25 = vadd.f32 %v3458_v31, %v4571_v22  ;;  %v3460_v13 = vadd.f32 %v3425_v27, %v3245_v62  ;;  %v2446_v14 = vpop.f32.mrb[3].mxu0 }
 0x1d2   : > { %v2609_v9 = vadd.f32 %v3459_v2, %v4571_v22  ;;  %v3461_v54 = vadd.f32 %v2446_v14, %v1169_v48 }
 0x1d3   : > { %v2643_v47 = vmax.f32 %v2611_v25, 0.0  ;;  %v2612_v53 = vadd.f32 %v3460_v13, %v4571_v22 }
 0x1d4   : > { %v2641_v15 = vmax.f32 %v2609_v9, 0.0  ;;  %v2610_v26 = vadd.f32 %v3461_v54, %v4571_v22 }
 0x1d5   : > { %2676 = vst.msk [vmem:[%s4578_s7 + $0x10] sm:$0xff] %vm2673_vm5, %v2643_v47  ;;  %v2644_v11 = vmax.f32 %v2612_v53, 0.0 }
 0x1d6   : > { %2674 = vst.msk [vmem:[%s4578_s7] sm:$0xff] %vm2673_vm5, %v2641_v15  ;;  %v2642_v39 = vmax.f32 %v2610_v26, 0.0  ;;  %v3428_v28 = vpop.f32.mrb[4].mxu0 }
 0x1d7   : > { %2677 = vst.msk [vmem:[%s4578_s7 + $0x18] sm:$0xff] %vm2673_vm5, %v2644_v11  ;;  %v3462_v52 = vadd.f32 %v3428_v28, %v3248_v32  ;;  %v2459_v59 = vpop.f32.mrb[5].mxu0 }
 0x1d8   : > { %2675 = vst.msk [vmem:[%s4578_s7 + $0x8] sm:$0xff] %vm2673_vm5, %v2642_v39  ;;  %v3463_v56 = vadd.f32 %v2459_v59, %v1182_v4  ;;  %v3429_v43 = vpop.f32.mrb[6].mxu0 }
 0x1d9   : > { %v2615_v5 = vadd.f32 %v3462_v52, %v4571_v22  ;;  %v3464_v1 = vadd.f32 %v3429_v43, %v3249_v51  ;;  %v2462_v50 = vpop.f32.mrb[7].mxu0 }
 0x1da   : > { %v2613_v3 = vadd.f32 %v3463_v56, %v4571_v22  ;;  %v3465_v7 = vadd.f32 %v2462_v50, %v1185_v45 }
 0x1db   : > { %v2647_v36 = vmax.f32 %v2615_v5, 0.0  ;;  %v2616_v18 = vadd.f32 %v3464_v1, %v4571_v22 }
 0x1dc   : > { %v2645_v40 = vmax.f32 %v2613_v3, 0.0  ;;  %v2614_v19 = vadd.f32 %v3465_v7, %v4571_v22 }
 0x1dd   : > { %2680 = vst.msk [vmem:[%s4578_s7 + $0x30] sm:$0xff] %vm2673_vm5, %v2647_v36  ;;  %v2648_v30 = vmax.f32 %v2616_v18, 0.0 }
 0x1de   : > { %2678 = vst.msk [vmem:[%s4578_s7 + $0x20] sm:$0xff] %vm2673_vm5, %v2645_v40  ;;  %v2646_v21 = vmax.f32 %v2614_v19, 0.0  ;;  %v3432_v55 = vpop.f32.mrb[8].mxu0 }
 0x1df   : > { %2681 = vst.msk [vmem:[%s4578_s7 + $0x38] sm:$0xff] %vm2673_vm5, %v2648_v30  ;;  %v3466_v12 = vadd.f32 %v3432_v55, %v3252_v58  ;;  %v2475_v34 = vpop.f32.mrb[9].mxu0 }
 0x1e0   : > { %2679 = vst.msk [vmem:[%s4578_s7 + $0x28] sm:$0xff] %vm2673_vm5, %v2646_v21  ;;  %v3467_v44 = vadd.f32 %v2475_v34, %v1198_v41  ;;  %v3433_v6 = vpop.f32.mrb[10].mxu0 }
 0x1e1   : > { %v2619_v46 = vadd.f32 %v3466_v12, %v4571_v22  ;;  %v3468_v24 = vadd.f32 %v3433_v6, %v3253_v63  ;;  %v2478_v42 = vpop.f32.mrb[11].mxu0 }
 0x1e2   : > { %v2617_v23 = vadd.f32 %v3467_v44, %v4571_v22  ;;  %v3469_v29 = vadd.f32 %v2478_v42, %v1201_v49 }
 0x1e3   : > { %v2651_v57 = vmax.f32 %v2619_v46, 0.0  ;;  %v2620_v16 = vadd.f32 %v3468_v24, %v4571_v22 }
 0x1e4   : > { %v2649_v10 = vmax.f32 %v2617_v23, 0.0  ;;  %v2618_v61 = vadd.f32 %v3469_v29, %v4571_v22 }
 0x1e5   : > { %2684 = vst.msk [vmem:[%s4578_s7 + $0x50] sm:$0xff] %vm2673_vm5, %v2651_v57  ;;  %v2652_v38 = vmax.f32 %v2620_v16, 0.0 }
 0x1e6   : > { %2682 = vst.msk [vmem:[%s4578_s7 + $0x40] sm:$0xff] %vm2673_vm5, %v2649_v10  ;;  %v2650_v37 = vmax.f32 %v2618_v61, 0.0  ;;  %v3436_v17 = vpop.f32.mrb[12].mxu0 }
 0x1e7   : > { %2685 = vst.msk [vmem:[%s4578_s7 + $0x58] sm:$0xff] %vm2673_vm5, %v2652_v38  ;;  %v3470_v62 = vadd.f32 %v3436_v17, %v4560_v8  ;;  %v2491_v48 = vpop.f32.mrb[13].mxu0 }
 0x1e8   : > { %2683 = vst.msk [vmem:[%s4578_s7 + $0x48] sm:$0xff] %vm2673_vm5, %v2650_v37  ;;  %v3471_v32 = vadd.f32 %v2491_v48, %v4562_v33  ;;  %v3437_v4 = vpop.f32.mrb[14].mxu0 }
 0x1e9   : > { %v2623_v51 = vadd.f32 %v3470_v62, %v4571_v22  ;;  %v3472_v45 = vadd.f32 %v3437_v4, %v4564_v0  ;;  %v2494_v58 = vpop.f32.mrb[15].mxu0 }
 0x1ea   : > { %v2621_v41 = vadd.f32 %v3471_v32, %v4571_v22  ;;  %v3473_v63 = vadd.f32 %v2494_v58, %v4566_v35 }
 0x1eb   : > { %v2655_v49 = vmax.f32 %v2623_v51, 0.0  ;;  %v2624_v8 = vadd.f32 %v3472_v45, %v4571_v22 }
 0x1ec   : > { %v2653_v60 = vmax.f32 %v2621_v41, 0.0  ;;  %v2622_v31 = vadd.f32 %v3473_v63, %v4571_v22 }
 0x1ed   : > { %2688 = vst.msk [vmem:[%s4578_s7 + $0x70] sm:$0xff] %vm2673_vm5, %v2655_v49  ;;  %v2656_v33 = vmax.f32 %v2624_v8, 0.0 }
 0x1ee   : > { %2686 = vst.msk [vmem:[%s4578_s7 + $0x60] sm:$0xff] %vm2673_vm5, %v2653_v60  ;;  %v2654_v20 = vmax.f32 %v2622_v31, 0.0  ;;  %v3440_v2 = vpop.f32.mrb[16].mxu0 }
 0x1ef   : > { %2689 = vst.msk [vmem:[%s4578_s7 + $0x78] sm:$0xff] %vm2673_vm5, %v2656_v33  ;;  %v2507_v0 = vpop.f32.mrb[17].mxu0 }
 0x1f0   : > { %2687 = vst.msk [vmem:[%s4578_s7 + $0x68] sm:$0xff] %vm2673_vm5, %v2654_v20  ;;  %v3441_v27 = vpop.f32.mrb[18].mxu0 }
 0x1f1   : > { %v2510_v35 = vpop.f32.mrb[19].mxu0 }
 0x1f3   : > { %v3296_v25 = vpop.f32.mrb[16].mxu1 }
 0x1f4   : > { %v3474_v13 = vadd.f32 %v3440_v2, %v3296_v25  ;;  %v1446_v14 = vpop.f32.mrb[17].mxu1 }
 0x1f5   : > { %v3475_v9 = vadd.f32 %v2507_v0, %v1446_v14  ;;  %v3297_v54 = vpop.f32.mrb[18].mxu1 }
 0x1f6   : > { %v2627_v47 = vadd.f32 %v3474_v13, %v4571_v22  ;;  %v3476_v53 = vadd.f32 %v3441_v27, %v3297_v54  ;;  %v1449_v15 = vpop.f32.mrb[19].mxu1  ;;  %v3444_v26 = vpop.f32.mrb[20].mxu0 }
 0x1f7   : > { %v2625_v11 = vadd.f32 %v3475_v9, %v4571_v22  ;;  %v3477_v39 = vadd.f32 %v2510_v35, %v1449_v15  ;;  %v2523_v28 = vpop.f32.mrb[21].mxu0 }
 0x1f8   : > { %v2659_v52 = vmax.f32 %v2627_v47, 0.0  ;;  %v2628_v59 = vadd.f32 %v3476_v53, %v4571_v22  ;;  %v3445_v56 = vpop.f32.mrb[22].mxu0 }
 0x1f9   : > { %v2657_v43 = vmax.f32 %v2625_v11, 0.0  ;;  %v2626_v5 = vadd.f32 %v3477_v39, %v4571_v22  ;;  %v2526_v1 = vpop.f32.mrb[23].mxu0 }
 0x1fa   : > { %2692 = vst.msk [vmem:[%s4578_s7 + $0x90] sm:$0xff] %vm2673_vm5, %v2659_v52  ;;  %v2660_v50 = vmax.f32 %v2628_v59, 0.0 }
 0x1fb   : > { %2690 = vst.msk [vmem:[%s4578_s7 + $0x80] sm:$0xff] %vm2673_vm5, %v2657_v43  ;;  %v2658_v3 = vmax.f32 %v2626_v5, 0.0  ;;  %v3300_v7 = vpop.f32.mrb[20].mxu1 }
 0x1fc   : > { %2693 = vst.msk [vmem:[%s4578_s7 + $0x98] sm:$0xff] %vm2673_vm5, %v2660_v50  ;;  %v3478_v36 = vadd.f32 %v3444_v26, %v3300_v7  ;;  %v1462_v18 = vpop.f32.mrb[21].mxu1 }
 0x1fd   : > { %2691 = vst.msk [vmem:[%s4578_s7 + $0x88] sm:$0xff] %vm2673_vm5, %v2658_v3  ;;  %v3479_v40 = vadd.f32 %v2523_v28, %v1462_v18  ;;  %v3301_v19 = vpop.f32.mrb[22].mxu1 }
 0x1fe   : > { %v2631_v30 = vadd.f32 %v3478_v36, %v4571_v22  ;;  %v3480_v21 = vadd.f32 %v3445_v56, %v3301_v19  ;;  %v1465_v55 = vpop.f32.mrb[23].mxu1  ;;  %v3448_v12 = vpop.f32.mrb[24].mxu0 }
 0x1ff   : > { %v2629_v34 = vadd.f32 %v3479_v40, %v4571_v22  ;;  %v3481_v44 = vadd.f32 %v2526_v1, %v1465_v55  ;;  %v2539_v6 = vpop.f32.mrb[25].mxu0 }
 0x200   : > { %v2663_v46 = vmax.f32 %v2631_v30, 0.0  ;;  %v2632_v24 = vadd.f32 %v3480_v21, %v4571_v22  ;;  %v3449_v42 = vpop.f32.mrb[26].mxu0 }
 0x201   : > { %v2661_v23 = vmax.f32 %v2629_v34, 0.0  ;;  %v2630_v29 = vadd.f32 %v3481_v44, %v4571_v22  ;;  %v2542_v57 = vpop.f32.mrb[27].mxu0 }
 0x202   : > { %2696 = vst.msk [vmem:[%s4578_s7 + $0xb0] sm:$0xff] %vm2673_vm5, %v2663_v46  ;;  %v2664_v16 = vmax.f32 %v2632_v24, 0.0 }
 0x203   : > { %2694 = vst.msk [vmem:[%s4578_s7 + $0xa0] sm:$0xff] %vm2673_vm5, %v2661_v23  ;;  %v2662_v10 = vmax.f32 %v2630_v29, 0.0  ;;  %v3304_v61 = vpop.f32.mrb[24].mxu1 }
 0x204   : > { %2697 = vst.msk [vmem:[%s4578_s7 + $0xb8] sm:$0xff] %vm2673_vm5, %v2664_v16  ;;  %v3482_v38 = vadd.f32 %v3448_v12, %v3304_v61  ;;  %v1478_v37 = vpop.f32.mrb[25].mxu1 }
 0x205   : > { %2695 = vst.msk [vmem:[%s4578_s7 + $0xa8] sm:$0xff] %vm2673_vm5, %v2662_v10  ;;  %v3483_v17 = vadd.f32 %v2539_v6, %v1478_v37  ;;  %v3305_v62 = vpop.f32.mrb[26].mxu1 }
 0x206   : > { %v2635_v48 = vadd.f32 %v3482_v38, %v4571_v22  ;;  %v3484_v32 = vadd.f32 %v3449_v42, %v3305_v62  ;;  %v1481_v4 = vpop.f32.mrb[27].mxu1  ;;  %v3452_v51 = vpop.f32.mrb[28].mxu0 }
 0x207   : > { %v2633_v45 = vadd.f32 %v3483_v17, %v4571_v22  ;;  %v3485_v58 = vadd.f32 %v2542_v57, %v1481_v4  ;;  %v2555_v41 = vpop.f32.mrb[29].mxu0 }
 0x208   : > { %v2667_v63 = vmax.f32 %v2635_v48, 0.0  ;;  %v2636_v49 = vadd.f32 %v3484_v32, %v4571_v22  ;;  %v3453_v8 = vpop.f32.mrb[30].mxu0 }
 0x209   : > { %v2665_v60 = vmax.f32 %v2633_v45, 0.0  ;;  %v2634_v31 = vadd.f32 %v3485_v58, %v4571_v22  ;;  %v2558_v33 = vpop.f32.mrb[31].mxu0 }
 0x20a   : > { %2700 = vst.msk [vmem:[%s4578_s7 + $0xd0] sm:$0xff] %vm2673_vm5, %v2667_v63  ;;  %v2668_v20 = vmax.f32 %v2636_v49, 0.0 }
 0x20b   : > { %2698 = vst.msk [vmem:[%s4578_s7 + $0xc0] sm:$0xff] %vm2673_vm5, %v2665_v60  ;;  %v2666_v2 = vmax.f32 %v2634_v31, 0.0  ;;  %v3308_v0 = vpop.f32.mrb[28].mxu1 }
 0x20c   : > { %2701 = vst.msk [vmem:[%s4578_s7 + $0xd8] sm:$0xff] %vm2673_vm5, %v2668_v20  ;;  %v3486_v27 = vadd.f32 %v3452_v51, %v3308_v0  ;;  %v1494_v35 = vpop.f32.mrb[29].mxu1 }
 0x20d   : > { %2699 = vst.msk [vmem:[%s4578_s7 + $0xc8] sm:$0xff] %vm2673_vm5, %v2666_v2  ;;  %v3487_v25 = vadd.f32 %v2555_v41, %v1494_v35  ;;  %v3309_v13 = vpop.f32.mrb[30].mxu1 }
 0x20e   : > { %v2639_v14 = vadd.f32 %v3486_v27, %v4571_v22  ;;  %v3488_v9 = vadd.f32 %v3453_v8, %v3309_v13  ;;  %v1497_v54 = vpop.f32.mrb[31].mxu1 }
 0x20f   : > { %v2637_v47 = vadd.f32 %v3487_v25, %v4571_v22  ;;  %v3489_v53 = vadd.f32 %v2558_v33, %v1497_v54 }
 0x210   : > { %v2671_v15 = vmax.f32 %v2639_v14, 0.0  ;;  %v2640_v26 = vadd.f32 %v3488_v9, %v4571_v22 }
 0x211   : > { %v2669_v11 = vmax.f32 %v2637_v47, 0.0  ;;  %v2638_v39 = vadd.f32 %v3489_v53, %v4571_v22 }
 0x212   : > { %2704 = vst.msk [vmem:[%s4578_s7 + $0xf0] sm:$0xff] %vm2673_vm5, %v2671_v15  ;;  %v2672_v28 = vmax.f32 %v2640_v26, 0.0 }
 0x213   : > { %2702 = vst.msk [vmem:[%s4578_s7 + $0xe0] sm:$0xff] %vm2673_vm5, %v2669_v11  ;;  %v2670_v52 = vmax.f32 %v2638_v39, 0.0 }
 0x214   : > { %2706 = vst.msk [vmem:[%s4578_s7 + $0xf8] sm:$0x7f] %vm2705_vm6, %v2672_v28 }
 0x215   : > { %2703 = vst.msk [vmem:[%s4578_s7 + $0xe8] sm:$0xff] %vm2673_vm5, %v2670_v52 }
 0x216 PF: > { %s13_s12 = sadd.s32 1, %s3747_s12  }
 0x217   : > { %p10_p4 = scmp.ge.s32.totalorder %s13_s12, 4  }
 0x219   :  { %12 = sbr.rel (!%p10_p4) target bundleno = 1 (0x1), region = 70 }

// kernel: cnn_forward.11
= control target key start
LH: loop header
LB: loop body
LE: loop exit
PB: predicated region body
PF: predicated region fallthrough
CT: control target
= control target key end

     0   :  { %s1957_s12 = smov 0   ;;  %s2266_s0 = inlined_call_operand.vmem [shape: f32[2,83,64], index: 0, kind: input, shape index: {}]   ;;  %s2267_s1 = inlined_call_operand.vmem [shape: bf16[9,64,128], index: 1, kind: input, shape index: {}]   ;;  %s2268_s2 = inlined_call_operand.vmem [shape: f32[1,128], index: 2, kind: input, shape index: {}]   ;;  %s2269_s3 = inlined_call_operand.vmem [shape: f32[2,63,128], index: 3, kind: output, shape index: {}]  }
   0x1 LB: > { %s1448_s13 = sadd.s32 4294967295, %s1935_s12   ;;  %p1452_p0 = scmp.ge.s32.totalorder %s1935_s12, 1  ;;  %s1935_s12 = sphi %s1957_s12, %s13_s12  }
   0x2   : > { %p137_p1 = scmp.lt.s32.totalorder %s1935_s12, 3 }
   0x4   : > { %p138_p2 = pnand %p1452_p0, %p137_p1 }
   0x5   : > { %v1893_v0 = vld [vmem:[%s2267_s1 + $0x20] sm:$0xff] (!%p138_p2)   ;;  %p161_p3 = scmp.lt.s32.totalorder (!%p138_p2), %s1448_s13, 1  ;;  %v1895_v2 = vld [vmem:[%s2267_s1 + $0x28] sm:$0xff] (!%p138_p2)   ;;  %v1897_v4 = vld [vmem:[%s2267_s1 + $0x30] sm:$0xff] (!%p138_p2)   ;;  %vm262_vm0 = vcmask (!%p138_p2), 523264   ;;  %vm722_vm1 = vcmask (!%p138_p2), 1042432  }
   0x6   : > { %141 = sbr.rel (%p138_p2) target bundleno = 314 (0x13a), region = 32  ;;  %v1894_v1 = vld [vmem:[%s2267_s1 + $0x80] sm:$0xff] (!%p138_p2)   ;;  %1668 = vmatprep.subr.bf16.mxu1 (!%p138_p2), %v1893_v0  ;;  %v1896_v3 = vld [vmem:[%s2267_s1 + $0x88] sm:$0xff] (!%p138_p2)   ;;  %v1898_v5 = vld [vmem:[%s2267_s1 + $0x90] sm:$0xff] (!%p138_p2)   ;;  %vm206_vm2 = vsmask.f32 (!%p138_p2), 7424 }
   0x7   : > { %1732 = vmatprep.subr.bf16.mxu0 (!%p138_p2), %v1894_v1  ;;  %1669 = vmatpush3.bf16.msra.mxu1 (!%p138_p2), %v1893_v0  ;;  %v1899_v6 = vld [vmem:[%s2267_s1 + $0x38] sm:$0xff] (!%p138_p2)   ;;  %v1901_v17 = vld [vmem:[%s2267_s1] sm:$0xff] (!%p138_p2)   ;;  %v1903_v32 = vld [vmem:[%s2267_s1 + $0x8] sm:$0xff] (!%p138_p2)   ;;  %vm850_vm3 = vsmask.f32 (!%p138_p2), 2304  ;;  %vm451_vm4 = vcmask (!%p138_p2), 1046528  }
   0x8   : > { %1733 = vmatpush3.bf16.msra.mxu0 (!%p138_p2), %v1894_v1  ;;  %1670 = vmatprep.subr.bf16.mxu1 (!%p138_p2), %v1895_v2  ;;  %v1900_v7 = vld [vmem:[%s2267_s1 + $0x98] sm:$0xff] (!%p138_p2)   ;;  %v1902_v21 = vld [vmem:[%s2267_s1 + $0xa0] sm:$0xff] (!%p138_p2)   ;;  %v1904_v38 = vld [vmem:[%s2267_s1 + $0xa8] sm:$0xff] (!%p138_p2)   ;;  %vm579_vm5 = vsmask.f32 (!%p138_p2), 3328  ;;  %vm1243_vm7 = vcmask (!%p138_p2), 1045504  }
   0x9   : > { %1734 = vmatprep.subr.bf16.mxu0 (!%p138_p2), %v1896_v3  ;;  %v1905_v55 = vld [vmem:[%s2267_s1 + $0x10] sm:$0xff] (!%p138_p2)   ;;  %v1907_v60 = vld [vmem:[%s2267_s1 + $0x18] sm:$0xff] (!%p138_p2)   ;;  %vm1100_vm6 = vsmask.f32 (!%p138_p2), 6400 }
   0xa   : > { %v1906_v57 = vld [vmem:[%s2267_s1 + $0xb0] sm:$0xff] (!%p138_p2)  }
   0xb   : > { %1671 = vmatpush3.bf16.msra.mxu1 (!%p138_p2), %v1895_v2  ;;  %v1908_v2 = vld [vmem:[%s2267_s1 + $0xb8] sm:$0xff] (!%p138_p2)  }
   0xc   : > { %1735 = vmatpush3.bf16.msra.mxu0 (!%p138_p2), %v1896_v3  ;;  %1672 = vmatprep.subr.bf16.mxu1 (!%p138_p2), %v1897_v4 }
   0xd   : > { %s2271_s13 = smov (!%p161_p3, %s1448_s13), 1  ;;  %1736 = vmatprep.subr.bf16.mxu0 %v1898_v5 }
   0xe   : > { %s1884_s24 = smul.u32 88, %s2271_s13  ;;  %s1595_s18 = sshll.u32 %s2271_s13, 6 }
   0xf   : > { %1673 = vmatpush3.bf16.msra.mxu1 %v1897_v4 }
  0x10   : > { %s1992_s4 = scalar_lea.vmem %s2266_s0, %s1884_s24  ;;  %1737 = vmatpush3.bf16.msra.mxu0 %v1898_v5  ;;  %1674 = vmatprep.subr.bf16.mxu1 %v1899_v6 }
  0x11   : > { %v172_v8 = vld [vmem:[%s1992_s4] sm:$0xff]  ;;  %v173_v9 = vld [vmem:[%s1992_s4 + $0x8] sm:$0xff]  ;;  %v174_v10 = vld [vmem:[%s1992_s4 + $0x10] sm:$0xff]  ;;  %1738 = vmatprep.subr.bf16.mxu0 %v1900_v7 }
  0x12   : > { %v175_v11 = vld [vmem:[%s1992_s4 + $0x18] sm:$0xff]  ;;  %v2001_v12 = vpack.c.bf16 %v173_v9, %v172_v8  ;;  %v176_v13 = vld [vmem:[%s1992_s4 + $0x20] sm:$0xff]  ;;  %v177_v14 = vld [vmem:[%s1992_s4 + $0x28] sm:$0xff] }
  0x13   : > { %v2005_v15 = vpack.c.bf16 %v175_v11, %v174_v10  ;;  %v2007_v16 = vpack.c.bf16 %v177_v14, %v176_v13  ;;  %1675 = vmatpush3.bf16.msra.mxu1 %v1899_v6  ;;  %v178_v33 = vld [vmem:[%s1992_s4 + $0x30] sm:$0xff]  ;;  %v179_v34 = vld [vmem:[%s1992_s4 + $0x38] sm:$0xff]  ;;  %v180_v42 = vld [vmem:[%s1992_s4 + $0x40] sm:$0xff] }
  0x14   : > { %v2013_v18 = vshrl.u32 %v2001_v12, 16  ;;  %v2016_v19 = vshll.u32 %v2001_v12, 16  ;;  %v723_v20 = vrot.slane %v2001_v12, 5  ;;  %1739 = vmatpush3.bf16.msra.mxu0 %v1900_v7  ;;  %1684 = vmatprep.subr.bf16.mxu1 %v1901_v17  ;;  %v2052_v39 = vpack.c.bf16 %v179_v34, %v178_v33  ;;  %v181_v43 = vld [vmem:[%s1992_s4 + $0x48] sm:$0xff]  ;;  %v1909_v9 = vld [vmem:[%s2267_s1 + $0x40] sm:$0xff]   ;;  %v1915_v33 = vld [vmem:[%s2267_s1 + $0x58] sm:$0xff]  }
  0x15   : > { %v2023_v22 = vshll.u32 %v2005_v15, 16  ;;  %v2026_v23 = vshrl.u32 %v2005_v15, 16  ;;  %v724_v24 = vrot.slane %v2005_v15, 5  ;;  %v2030_v25 = vshll.u32 %v2007_v16, 16  ;;  %1748 = vmatprep.subr.bf16.mxu0 %v1902_v21  ;;  %v1910_v10 = vld [vmem:[%s2267_s1 + $0xc0] sm:$0xff]   ;;  %v1911_v11 = vld [vmem:[%s2267_s1 + $0x48] sm:$0xff]  }
  0x16   : > { %v212_v26 = vrot.slane %v2016_v19, 1  ;;  %v726_v27 = vrot.slane %v2007_v16, 5  ;;  %v2045_v35 = vshrl.u32 %v2007_v16, 16  ;;  %v851_v44 = vrot.slane %v2013_v18, 5  ;;  %v1916_v34 = vld [vmem:[%s2267_s1 + $0xd8] sm:$0xff]  }
  0x17   : > { %v217_v28 = vrot.slane %v2023_v22, 1  ;;  %v725_v29 = vsel %vm722_vm1, %v723_v20, %v724_v24  ;;  %v225_v30 = vrot.slane %v2030_v25, 1  ;;  %v852_v45 = vrot.slane %v2016_v19, 6 }
  0x18   : > { %v213_v31 = vor.u32 %v212_v26, %v2013_v18  ;;  %1740 = vmatprep.mubr.msk.bf16.mxu0 %vm262_vm0, %v725_v29  ;;  %v727_v37 = vsel %vm722_vm1, %v724_v24, %v726_v27  ;;  %v2063_v47 = vshll.u32 %v2052_v39, 16  ;;  %v728_v48 = vrot.slane %v2052_v39, 5 }
  0x19   : > { %v221_v36 = vor.u32 %v2026_v23, %v217_v28  ;;  %v229_v41 = vor.u32 %v2045_v35, %v225_v30  ;;  %v854_v49 = vrot.slane %v2026_v23, 5  ;;  %1741 = vmatmul.mubr.msk.bf16.vlgmr.msra.gmra.mrb[0].mxu0 %vm262_vm0, %v727_v37  ;;  %v2070_v50 = vshrl.u32 %v2052_v39, 16  ;;  %v182_v37 = vld [vmem:[%s1992_s4 + $0x50] sm:$0x7]  ;;  %s170_s4 = scalar_lea.vmem %s2269_s3, %s1595_s18 }
  0x1a   : > { %v218_v40 = vsel %vm206_vm2, %v213_v31, %v217_v28  ;;  %v2072_v51 = vpack.c.bf16 %v181_v43, %v180_v42  ;;  %v855_v52 = vrot.slane %v2023_v22, 6  ;;  %1749 = vmatpush3.bf16.msra.mxu0 %v1902_v21  ;;  %v233_v53 = vrot.slane %v2063_v47, 1  ;;  %v1912_v21 = vld [vmem:[%s2267_s1 + $0xc8] sm:$0xff]   ;;  %v1914_v28 = vld [vmem:[%s2267_s1 + $0xd0] sm:$0xff]  }
  0x1b   : > { %1676 = vmatprep.mubr.msk.bf16.mxu1 %vm262_vm0, %v218_v40  ;;  %v226_v46 = vsel %vm206_vm2, %v221_v36, %v225_v30  ;;  %v729_v54 = vsel %vm722_vm1, %v726_v27, %v728_v48  ;;  %1750 = vmatprep.subr.bf16.mxu0 %v1904_v38  ;;  %v853_v61 = vor.u32 %v852_v45, %v851_v44  ;;  %v858_v0 = vrot.slane %v2045_v35, 5  ;;  %v1913_v27 = vld [vmem:[%s2267_s1 + $0x50] sm:$0xff]   ;;  %v1917_v40 = vld [vmem:[%s2267_s1 + $0x60] sm:$0xff]   ;;  %v1919_v45 = vld [vmem:[%s2267_s1 + $0x68] sm:$0xff]  }
  0x1c   : > { %1677 = vmatmul.mubr.msk.bf16.vlgmr.msra.gmra.mrb[0].mxu1 %vm262_vm0, %v226_v46  ;;  %v730_v56 = vrot.slane %v2072_v51, 5  ;;  %v234_v58 = vsel %vm206_vm2, %v229_v41, %v233_v53  ;;  %1744 = vmatprep.mubr.msk.bf16.mxu0 %vm262_vm0, %v729_v54  ;;  %v237_v59 = vor.u32 %v2070_v50, %v233_v53  ;;  %v856_v62 = vor.u32 %v855_v52, %v854_v49  ;;  %v1918_v41 = vld [vmem:[%s2267_s1 + $0xe0] sm:$0xff]   ;;  %v1920_v46 = vld [vmem:[%s2267_s1 + $0xe8] sm:$0xff]  }
  0x1d   : > { %1685 = vmatpush3.bf16.msra.mxu1 %v1901_v17  ;;  %1680 = vmatprep.mubr.msk.bf16.mxu1 %vm262_vm0, %v234_v58  ;;  %v859_v1 = vrot.slane %v2030_v25, 6  ;;  %v862_v4 = vrot.slane %v2070_v50, 5  ;;  %v863_v5 = vrot.slane %v2063_v47, 6  ;;  %v2103_v7 = vshrl.u32 %v2072_v51, 16 }
  0x1e   : > { %1686 = vmatprep.subr.bf16.mxu1 %v1903_v32  ;;  %1751 = vmatpush3.bf16.msra.mxu0 %v1904_v38  ;;  %v731_v63 = vsel %vm722_vm1, %v728_v48, %v730_v56  ;;  %v857_v3 = vsel %vm850_vm3, %v853_v61, %v856_v62  ;;  %v2106_v8 = vshll.u32 %v2072_v51, 16  ;;  %v452_v29 = vrot.slane %v2001_v12, 1 }
  0x1f   : > { %1752 = vmatprep.subr.bf16.mxu0 %v1906_v57  ;;  %v860_v6 = vor.u32 %v859_v1, %v858_v0  ;;  %v864_v13 = vor.u32 %v863_v5, %v862_v4  ;;  %v866_v17 = vrot.slane %v2103_v7, 5  ;;  %v453_v30 = vrot.slane %v2005_v15, 1  ;;  %v1924_v4 = vld [vmem:[%s2267_s1 + $0xf8] sm:$0xff]  }
  0x20   : > { %v867_v20 = vrot.slane %v2106_v8, 6  ;;  %v455_v31 = vrot.slane %v2007_v16, 1  ;;  %v457_v38 = vrot.slane %v2052_v39, 1  ;;  %v459_v42 = vrot.slane %v2072_v51, 1 }
  0x21   : > { %1687 = vmatpush3.bf16.msra.mxu1 %v1903_v32  ;;  %1745 = vmatmul.mubr.msk.bf16.gmra.mrb[4].mxu0 %vm262_vm0, %v731_v63  ;;  %v861_v14 = vsel %vm850_vm3, %v856_v62, %v860_v6  ;;  %v865_v24 = vsel %vm850_vm3, %v860_v6, %v864_v13  ;;  %v2165_v43 = vpack.c.bf16 %v182_v37, %v182_v37  ;;  %v580_v49 = vrot.slane %v2013_v18, 4 }
  0x22   : > { %1688 = vmatprep.subr.bf16.mxu1 %v1905_v55  ;;  %1753 = vmatpush3.bf16.msra.mxu0 %v1906_v57  ;;  %v868_v26 = vor.u32 %v867_v20, %v866_v17  ;;  %v456_v36 = vsel %vm451_vm4, %v453_v30, %v455_v31  ;;  %v458_v44 = vsel %vm451_vm4, %v455_v31, %v457_v38  ;;  %v581_v53 = vrot.slane %v2016_v19, 5  ;;  %v1921_v19 = vld [vmem:[%s2267_s1 + $0x70] sm:$0xff]   ;;  %v1925_v17 = vld [vmem:[%s2267_s1 + $0x100] sm:$0xff]  }
  0x23   : > { %1754 = vmatprep.subr.bf16.mxu0 %v1908_v2  ;;  %1756 = vmatprep.mubr.msk.bf16.mxu0 %vm262_vm0, %v857_v3  ;;  %v460_v48 = vsel %vm451_vm4, %v457_v38, %v459_v42  ;;  %v989_v52 = vrot.slane %v2165_v43, 1  ;;  %v583_v54 = vrot.slane %v2026_v23, 4  ;;  %v1101_v56 = vrot.slane %v2026_v23, 1  ;;  %v1923_v3 = vld [vmem:[%s2267_s1 + $0x78] sm:$0xff]  }
  0x24   : > { %1681 = vmatmul.mubr.msk.bf16.gmra.mrb[4].mxu1 %vm262_vm0, %v237_v59  ;;  %v869_v32 = vsel %vm850_vm3, %v864_v13, %v868_v26  ;;  %v1102_v57 = vrot.slane %v2023_v22, 2  ;;  %v1104_v58 = vrot.slane %v2045_v35, 1  ;;  %v1105_v18 = vrot.slane %v2030_v25, 2  ;;  %v1922_v59 = vld [vmem:[%s2267_s1 + $0xf0] sm:$0xff]  }
  0x25   : > { %1689 = vmatpush3.bf16.msra.mxu1 %v1905_v55  ;;  %1692 = vmatprep.mubr.msk.bf16.mxu1 %vm262_vm0, %v2001_v12  ;;  %v454_v12 = vsel %vm451_vm4, %v452_v29, %v453_v30  ;;  %v584_v55 = vrot.slane %v2023_v22, 5  ;;  %v582_v22 = vor.u32 %v581_v53, %v580_v49  ;;  %v587_v63 = vrot.slane %v2045_v35, 4  ;;  %v1926_v30 = vld [vmem:[%s2267_s1 + $0x108] sm:$0xff]  }
  0x26   : > { %1690 = vmatprep.subr.bf16.mxu1 %v1907_v60  ;;  %1755 = vmatpush3.bf16.msra.mxu0 %v1908_v2  ;;  %v1103_v61 = vor.u32 %v1102_v57, %v1101_v56  ;;  %v1106_v62 = vor.u32 %v1105_v18, %v1104_v58  ;;  %v588_v0 = vrot.slane %v2030_v25, 5  ;;  %v1108_v1 = vrot.slane %v2070_v50, 1 }
  0x27   : > { %1764 = vmatprep.subr.bf16.mxu0 %v1910_v10  ;;  %v585_v23 = vor.u32 %v584_v55, %v583_v54  ;;  %v1109_v2 = vrot.slane %v2063_v47, 2  ;;  %v591_v35 = vrot.slane %v2070_v50, 4  ;;  %v592_v6 = vrot.slane %v2063_v47, 5 }
  0x28   : > { %v1107_v25 = vsel %vm1100_vm6, %v1103_v61, %v1106_v62  ;;  %v1120_v50 = vshll.u32 %v2165_v43, 16  ;;  %v1249_v37 = vrot.slane %v2072_v51, 2 }
  0x29   : > { %1691 = vmatpush3.bf16.msra.mxu1 %v1907_v60  ;;  %1757 = vmatmul.mubr.msk.bf16.vlgmr.msra.gmra.mrb[0].mxu0 %vm262_vm0, %v861_v14  ;;  %v990_v60 = vsel %vm451_vm4, %v459_v42, %v989_v52  ;;  %v586_v5 = vsel %vm579_vm5, %v582_v22, %v585_v23  ;;  %v1110_v13 = vor.u32 %v1109_v2, %v1108_v1  ;;  %v1117_v14 = vshrl.u32 %v2165_v43, 16 }
  0x2a   : > { %1700 = vmatprep.subr.bf16.mxu1 %v1909_v9  ;;  %1765 = vmatpush3.bf16.msra.mxu0 %v1910_v10  ;;  %v1113_v10 = vrot.slane %v2106_v8, 2  ;;  %v593_v47 = vor.u32 %v592_v6, %v591_v35  ;;  %v1122_v29 = vrot.slane %v1120_v50, 2 }
  0x2b   : > { %1766 = vmatprep.subr.bf16.mxu0 %v1912_v21  ;;  %1760 = vmatprep.mubr.msk.bf16.mxu0 %vm262_vm0, %v865_v24  ;;  %v601_v24 = vrot.slane %v2106_v8, 5 }
  0x2c   : > { %1693 = vmatmul.mubr.msk.bf16.vlgmr.msra.gmra.mrb[0].mxu1 %vm262_vm0, %v2005_v15 }
  0x2d   : > { %1701 = vmatpush3.bf16.msra.mxu1 %v1909_v9  ;;  %1696 = vmatprep.mubr.msk.bf16.mxu1 %vm262_vm0, %v2007_v16  ;;  %v1112_v9 = vrot.slane %v2103_v7, 1 }
  0x2e   : > { %1702 = vmatprep.subr.bf16.mxu1 %v1911_v11  ;;  %1767 = vmatpush3.bf16.msra.mxu0 %v1912_v21  ;;  %v598_v21 = vrot.slane %v2103_v7, 4 }
  0x2f   : > { %1768 = vmatprep.subr.bf16.mxu0 %v1914_v28  ;;  %v1114_v20 = vor.u32 %v1113_v10, %v1112_v9 }
  0x30   : > { %v602_v31 = vor.u32 %v601_v24, %v598_v21 }
  0x31   : > { %1703 = vmatpush3.bf16.msra.mxu1 %v1911_v11  ;;  %1761 = vmatmul.mubr.msk.bf16.gmra.mrb[4].mxu0 %vm262_vm0, %v869_v32  ;;  %v589_v11 = vor.u32 %v588_v0, %v587_v63  ;;  %v1115_v8 = vsel %vm1100_vm6, %v1110_v13, %v1114_v20 }
  0x32   : > { %1704 = vmatprep.subr.bf16.mxu1 %v1913_v27  ;;  %1769 = vmatpush3.bf16.msra.mxu0 %v1914_v28  ;;  %v1119_v28 = vrot.slane %v1117_v14, 1  ;;  %v603_v38 = vsel %vm579_vm5, %v593_v47, %v602_v31 }
  0x33   : > { %1770 = vmatprep.subr.bf16.mxu0 %v1916_v34  ;;  %1772 = vmatprep.mubr.msk.bf16.mxu0 %vm262_vm0, %v456_v36  ;;  %v590_v26 = vsel %vm579_vm5, %v585_v23, %v589_v11  ;;  %v594_v7 = vsel %vm579_vm5, %v589_v11, %v593_v47  ;;  %v1592_v23 = vld [vmem:[%s2268_s2] ss:$0 sm:$0xff] }
  0x34   : > { %1697 = vmatmul.mubr.msk.bf16.gmra.mrb[4].mxu1 %vm262_vm0, %v2052_v39  ;;  %v1123_v32 = vor.u32 %v1122_v29, %v1119_v28 }
  0x35   : > { %1705 = vmatpush3.bf16.msra.mxu1 %v1913_v27  ;;  %1708 = vmatprep.mubr.msk.bf16.mxu1 %vm262_vm0, %v454_v12  ;;  %v1111_v27 = vsel %vm1100_vm6, %v1106_v62, %v1110_v13  ;;  %v1245_v12 = vrot.slane %v2007_v16, 2 }
  0x36   : > { %1706 = vmatprep.subr.bf16.mxu1 %v1915_v33  ;;  %1771 = vmatpush3.bf16.msra.mxu0 %v1916_v34  ;;  %v1244_v34 = vrot.slane %v2005_v15, 2 }
  0x37   : > { %1780 = vmatprep.subr.bf16.mxu0 %v1918_v41 }
  0x38   : > { %v1246_v15 = vsel %vm1243_vm7, %v1244_v34, %v1245_v12 }
  0x39   : > { %1707 = vmatpush3.bf16.msra.mxu1 %v1915_v33  ;;  %1773 = vmatmul.mubr.msk.bf16.vlgmr.msra.gmra.mrb[0].mxu0 %vm262_vm0, %v458_v44  ;;  %v1927_v33 = vld [vmem:[%s2267_s1 + $0x110] sm:$0xff]  }
  0x3a   : > { %1716 = vmatprep.subr.bf16.mxu1 %v1917_v40  ;;  %1781 = vmatpush3.bf16.msra.mxu0 %v1918_v41  ;;  %v1928_v41 = vld [vmem:[%s2267_s1 + $0x118] sm:$0xff]  }
  0x3b   : > { %1782 = vmatprep.subr.bf16.mxu0 %v1920_v46  ;;  %1776 = vmatprep.mubr.msk.bf16.mxu0 %vm262_vm0, %v460_v48 }
  0x3c   : > { %1709 = vmatmul.mubr.msk.bf16.vlgmr.msra.gmra.mrb[0].mxu1 %vm262_vm0, %v456_v36  ;;  %v1247_v36 = vrot.slane %v2052_v39, 2  ;;  %v1251_v39 = vrot.slane %v2165_v43, 2 }
  0x3d   : > { %1717 = vmatpush3.bf16.msra.mxu1 %v1917_v40  ;;  %1712 = vmatprep.mubr.msk.bf16.mxu1 %vm262_vm0, %v458_v44  ;;  %v1124_v40 = vsel %vm1100_vm6, %v1114_v20, %v1123_v32 }
  0x3e   : > { %1718 = vmatprep.subr.bf16.mxu1 %v1919_v45  ;;  %1783 = vmatpush3.bf16.msra.mxu0 %v1920_v46  ;;  %v1250_v16 = vsel %vm1243_vm7, %v1247_v36, %v1249_v37  ;;  %v1248_v51 = vsel %vm1243_vm7, %v1245_v12, %v1247_v36  ;;  %v1252_v42 = vsel %vm1243_vm7, %v1249_v37, %v1251_v39 }
  0x3f   : > { %1784 = vmatprep.subr.bf16.mxu0 %v1922_v59 }
  0x41   : > { %1719 = vmatpush3.bf16.msra.mxu1 %v1919_v45  ;;  %1777 = vmatmul.mubr.msk.bf16.gmra.mrb[4].mxu0 %vm262_vm0, %v990_v60 }
  0x42   : > { %1720 = vmatprep.subr.bf16.mxu1 %v1921_v19  ;;  %1785 = vmatpush3.bf16.msra.mxu0 %v1922_v59 }
  0x43   : > { %1786 = vmatprep.subr.bf16.mxu0 %v1924_v4  ;;  %1788 = vmatprep.mubr.msk.bf16.mxu0 %vm262_vm0, %v1107_v25 }
  0x44   : > { %1713 = vmatmul.mubr.msk.bf16.gmra.mrb[4].mxu1 %vm262_vm0, %v460_v48 }
  0x45   : > { %1721 = vmatpush3.bf16.msra.mxu1 %v1921_v19  ;;  %1724 = vmatprep.mubr.msk.bf16.mxu1 %vm262_vm0, %v586_v5 }
  0x46   : > { %1722 = vmatprep.subr.bf16.mxu1 %v1923_v3  ;;  %1787 = vmatpush3.bf16.msra.mxu0 %v1924_v4 }
  0x47   : > { %1796 = vmatprep.subr.bf16.mxu0 %v1925_v17 }
  0x49   : > { %1723 = vmatpush3.bf16.msra.mxu1 %v1923_v3  ;;  %1789 = vmatmul.mubr.msk.bf16.vlgmr.msra.gmra.mrb[0].mxu0 %vm262_vm0, %v1111_v27 }
  0x4a   : > { %1812 = vmatprep.subr.bf16.mxu1 %v1925_v17  ;;  %1797 = vmatpush3.bf16.msra.mxu0 %v1925_v17 }
  0x4b   : > { %1798 = vmatprep.subr.bf16.mxu0 %v1926_v30  ;;  %1792 = vmatprep.mubr.msk.bf16.mxu0 %vm262_vm0, %v1115_v8 }
  0x4c   : > { %1725 = vmatmul.mubr.msk.bf16.vlgmr.msra.gmra.mrb[0].mxu1 %vm262_vm0, %v590_v26 }
  0x4d   : > { %1816 = vmatpush3.bf16.msra.mxu1 %v1925_v17  ;;  %1728 = vmatprep.mubr.msk.bf16.mxu1 %vm262_vm0, %v594_v7 }
  0x4e   : > { %1813 = vmatprep.subr.bf16.mxu1 %v1926_v30  ;;  %1799 = vmatpush3.bf16.msra.mxu0 %v1926_v30 }
  0x4f   : > { %1800 = vmatprep.subr.bf16.mxu0 %v1927_v33 }
  0x51   : > { %1817 = vmatpush3.bf16.msra.mxu1 %v1926_v30  ;;  %1793 = vmatmul.mubr.msk.bf16.gmra.mrb[4].mxu0 %vm262_vm0, %v1124_v40 }
  0x52   : > { %1814 = vmatprep.subr.bf16.mxu1 %v1927_v33  ;;  %1801 = vmatpush3.bf16.msra.mxu0 %v1927_v33 }
  0x53   : > { %1802 = vmatprep.subr.bf16.mxu0 %v1928_v41  ;;  %1804 = vmatprep.mubr.msk.bf16.mxu0 %vm262_vm0, %v1246_v15 }
  0x54   : > { %1729 = vmatmul.mubr.msk.bf16.gmra.mrb[4].mxu1 %vm262_vm0, %v603_v38 }
  0x55   : > { %1818 = vmatpush3.bf16.msra.mxu1 %v1927_v33  ;;  %1808 = vmatprep.mubr.msk.bf16.mxu1 %vm262_vm0, %v1250_v16 }
  0x56   : > { %1815 = vmatprep.subr.bf16.mxu1 %v1928_v41  ;;  %1803 = vmatpush3.bf16.msra.mxu0 %v1928_v41 }
  0x59   : > { %1819 = vmatpush3.bf16.msra.mxu1 %v1928_v41  ;;  %1805 = vmatmul.mubr.msk.bf16.vlgmr.msra.gmra.mrb[0].mxu0 %vm262_vm0, %v1248_v51 }
  0x5c   : > { %1809 = vmatmul.mubr.msk.bf16.vlgmr.msra.gmra.mrb[8].mxu1 %vm262_vm0, %v1252_v42 }
 0x11f   : > { %v1726_v44 = vpop.f32.mrb[0].mxu1 }
 0x120   : > { %v674_v45 = vpop.f32.mrb[1].mxu1 }
 0x121   : > { %v1727_v46 = vpop.f32.mrb[2].mxu1 }
 0x122   : > { %v677_v43 = vpop.f32.mrb[3].mxu1 }
 0x124   : > { %v1794_v49 = vpop.f32.mrb[4].mxu0 }
 0x125   : > { %v1211_v54 = vpop.f32.mrb[5].mxu0 }
 0x126   : > { %v1795_v57 = vpop.f32.mrb[6].mxu0 }
 0x127   : > { %v1730_v48 = vpop.f32.mrb[4].mxu1  ;;  %v1214_v19 = vpop.f32.mrb[7].mxu0 }
 0x128   : > { %v1824_v52 = vadd.f32 %v1794_v49, %v1730_v48  ;;  %v690_v53 = vpop.f32.mrb[5].mxu1 }
 0x129   : > { %v1826_v55 = vadd.f32 %v1211_v54, %v690_v53  ;;  %v1731_v56 = vpop.f32.mrb[6].mxu1 }
 0x12a   : > { %v1828_v58 = vadd.f32 %v1795_v57, %v1731_v56  ;;  %v693_v18 = vpop.f32.mrb[7].mxu1 }
 0x12b   : > { %v1830_v59 = vadd.f32 %v1214_v19, %v693_v18 }
 0x12c   : > { %v1806_v22 = vpop.f32.mrb[0].mxu0 }
 0x12d   : > { %v1820_v61 = vadd.f32 %v1806_v22, %v1726_v44  ;;  %v1323_v63 = vpop.f32.mrb[1].mxu0 }
 0x12e   : > { %v1821_v1 = vadd.f32 %v1323_v63, %v674_v45  ;;  %v1807_v3 = vpop.f32.mrb[2].mxu0 }
 0x12f   : > { %v1810_v60 = vpop.f32.mrb[8].mxu1  ;;  %v1371_v5 = vadd.f32 %v1820_v61, %v1592_v23  ;;  %v1822_v25 = vadd.f32 %v1807_v3, %v1727_v46  ;;  %v1326_v9 = vpop.f32.mrb[3].mxu0 }
 0x130   : > { %v1825_v62 = vadd.f32 %v1824_v52, %v1810_v60  ;;  %v1339_v0 = vpop.f32.mrb[9].mxu1  ;;  %v1369_v11 = vadd.f32 %v1821_v1, %v1592_v23  ;;  %v1823_v14 = vadd.f32 %v1326_v9, %v677_v43 }
 0x131   : > { %v1827_v2 = vadd.f32 %v1826_v55, %v1339_v0  ;;  %v1811_v4 = vpop.f32.mrb[10].mxu1  ;;  %v1379_v17 = vmax.f32 %v1371_v5, 0.0  ;;  %v1372_v20 = vadd.f32 %v1822_v25, %v1592_v23 }
 0x132   : > { %v1375_v35 = vadd.f32 %v1825_v62, %v1592_v23  ;;  %v1829_v6 = vadd.f32 %v1828_v58, %v1811_v4  ;;  %v1342_v10 = vpop.f32.mrb[11].mxu1  ;;  %v1377_v24 = vmax.f32 %v1369_v11, 0.0  ;;  %v1370_v27 = vadd.f32 %v1823_v14, %v1592_v23 }
 0x133   : > { %v1373_v13 = vadd.f32 %v1827_v2, %v1592_v23  ;;  %v1831_v50 = vadd.f32 %v1830_v59, %v1342_v10  ;;  %1387 = vst [vmem:[%s170_s4 + $0x10] sm:$0xff] %v1379_v17  ;;  %v1380_v29 = vmax.f32 %v1372_v20, 0.0 }
 0x134   : > { %v1383_v47 = vmax.f32 %v1375_v35, 0.0  ;;  %v1376_v21 = vadd.f32 %v1829_v6, %v1592_v23  ;;  %1385 = vst [vmem:[%s170_s4] sm:$0xff] %v1377_v24  ;;  %v1378_v7 = vmax.f32 %v1370_v27, 0.0 }
 0x135   : > { %v1381_v26 = vmax.f32 %v1373_v13, 0.0  ;;  %v1374_v28 = vadd.f32 %v1831_v50, %v1592_v23  ;;  %1388 = vst [vmem:[%s170_s4 + $0x18] sm:$0xff] %v1380_v29 }
 0x136   : > { %1391 = vst [vmem:[%s170_s4 + $0x30] sm:$0xff] %v1383_v47  ;;  %v1384_v30 = vmax.f32 %v1376_v21, 0.0  ;;  %1386 = vst [vmem:[%s170_s4 + $0x8] sm:$0xff] %v1378_v7 }
 0x137   : > { %1389 = vst [vmem:[%s170_s4 + $0x20] sm:$0xff] %v1381_v26  ;;  %v1382_v8 = vmax.f32 %v1374_v28, 0.0 }
 0x138   : > { %1392 = vst [vmem:[%s170_s4 + $0x38] sm:$0x7f] %v1384_v30 }
 0x139   : > { %1390 = vst [vmem:[%s170_s4 + $0x28] sm:$0xff] %v1382_v8 }
 0x13a PF: > { %s13_s12 = sadd.s32 1, %s1935_s12  }
 0x13b   : > { %p10_p4 = scmp.ge.s32.totalorder %s13_s12, 4  }
 0x13d   :  { %12 = sbr.rel (!%p10_p4) target bundleno = 1 (0x1), region = 70 }

// kernel: cnn_forward.12
= control target key start
LH: loop header
LB: loop body
LE: loop exit
PB: predicated region body
PF: predicated region fallthrough
CT: control target
= control target key end

     0   :  { %s444_s15 = smov 0   ;;  %s470_s0 = inlined_call_operand.vmem [shape: f32[2,4,4,128], index: 0, kind: input, shape index: {}]   ;;  %s471_s1 = inlined_call_operand.vmem [shape: f32[2,4,4,128], index: 1, kind: input, shape index: {}]   ;;  %s472_s2 = inlined_call_operand.vmem [shape: f32[2,4,4,128], index: 2, kind: input, shape index: {}]   ;;  %s473_s3 = inlined_call_operand.vmem [shape: f32[2,4,4,128], index: 3, kind: input, shape index: {}]   ;;  %s474_s4 = inlined_call_operand.vmem [shape: f32[2,4,4,128], index: 4, kind: output, shape index: {}]  }
   0x1 LB: > { %s381_s16 = sadd.s32 4294967295, %s417_s15   ;;  %p385_p0 = scmp.ge.s32.totalorder %s417_s15, 1  ;;  %s417_s15 = sphi %s444_s15, %s14_s15  }
   0x2   : > { %p192_p1 = scmp.lt.s32.totalorder %s417_s15, 3 }
   0x4   : > { %p193_p2 = pnand %p385_p0, %p192_p1 }
   0x5   : > { %p233_p3 = scmp.lt.s32.totalorder (!%p193_p2), %s381_s16, 1 }
   0x6   : > { %196 = sbr.rel (%p193_p2) target bundleno = 28 (0x1c), region = 36 }
   0xd   : > { %s476_s16 = smov (!%p233_p3, %s381_s16), 1 }
   0xe   : > { %s398_s17 = sshll.u32 %s476_s16, 4 }
   0xf   : > { %s237_s20 = scalar_lea.vmem %s470_s0, %s398_s17  ;;  %s242_s23 = scalar_lea.vmem %s471_s1, %s398_s17 }
  0x10   : > { %s247_s26 = scalar_lea.vmem %s472_s2, %s398_s17  ;;  %s252_s29 = scalar_lea.vmem %s473_s3, %s398_s17  ;;  %v258_v0 = vld [vmem:[%s237_s20] sm:$0xf]  ;;  %v259_v2 = vld [vmem:[%s237_s20 + $0x4] sm:$0xf]  ;;  %v260_v9 = vld [vmem:[%s237_s20 + $0x8] sm:$0xf] }
  0x11   : > { %v262_v1 = vld [vmem:[%s242_s23] sm:$0xf]  ;;  %v263_v5 = vld [vmem:[%s242_s23 + $0x4] sm:$0xf]  ;;  %v264_v12 = vld [vmem:[%s242_s23 + $0x8] sm:$0xf]  ;;  %s257_s6 = scalar_lea.vmem %s474_s4, %s398_s17 }
  0x12   : > { %v266_v3 = vld [vmem:[%s247_s26] sm:$0xf]  ;;  %v274_v4 = vmax.f32 %v258_v0, %v262_v1  ;;  %v267_v7 = vld [vmem:[%s247_s26 + $0x4] sm:$0xf]  ;;  %v275_v8 = vmax.f32 %v259_v2, %v263_v5  ;;  %v268_v13 = vld [vmem:[%s247_s26 + $0x8] sm:$0xf]  ;;  %v276_v15 = vmax.f32 %v260_v9, %v264_v12 }
  0x13   : > { %v270_v6 = vld [vmem:[%s252_s29] sm:$0xf]  ;;  %v271_v11 = vld [vmem:[%s252_s29 + $0x4] sm:$0xf]  ;;  %v261_v16 = vld [vmem:[%s237_s20 + $0xc] sm:$0xf] }
  0x14   : > { %v278_v10 = vmax.f32 %v274_v4, %v266_v3  ;;  %v279_v14 = vmax.f32 %v275_v8, %v267_v7  ;;  %v265_v17 = vld [vmem:[%s242_s23 + $0xc] sm:$0xf]  ;;  %v272_v20 = vld [vmem:[%s252_s29 + $0x8] sm:$0xf]  ;;  %v280_v23 = vmax.f32 %v276_v15, %v268_v13 }
  0x15   : > { %v269_v18 = vld [vmem:[%s247_s26 + $0xc] sm:$0xf]  ;;  %v277_v21 = vmax.f32 %v261_v16, %v265_v17 }
  0x16   : > { %v282_v19 = vmax.f32 %v278_v10, %v270_v6  ;;  %v283_v22 = vmax.f32 %v279_v14, %v271_v11  ;;  %v273_v24 = vld [vmem:[%s252_s29 + $0xc] sm:$0xf]  ;;  %v284_v26 = vmax.f32 %v280_v23, %v272_v20 }
  0x17   : > { %v281_v25 = vmax.f32 %v277_v21, %v269_v18 }
  0x18   : > { %286 = vst [vmem:[%s257_s6] sm:$0xf] %v282_v19  ;;  %287 = vst [vmem:[%s257_s6 + $0x4] sm:$0xf] %v283_v22 }
  0x19   : > { %v285_v27 = vmax.f32 %v281_v25, %v273_v24  ;;  %288 = vst [vmem:[%s257_s6 + $0x8] sm:$0xf] %v284_v26 }
  0x1b   : > { %289 = vst [vmem:[%s257_s6 + $0xc] sm:$0xf] %v285_v27 }
  0x1c PF: > { %s14_s15 = sadd.s32 1, %s417_s15  }
  0x1d   : > { %p11_p4 = scmp.ge.s32.totalorder %s14_s15, 4  }
  0x1f   :  { %13 = sbr.rel (!%p11_p4) target bundleno = 1 (0x1), region = 75 }

// kernel: cnn_forward.7
= control target key start
LH: loop header
LB: loop body
LE: loop exit
PB: predicated region body
PF: predicated region fallthrough
CT: control target
= control target key end

     0   :  { %s13669_s12 = smov 0   ;;  %s17333_s0 = inlined_call_operand.vmem [shape: f32[2,1158,3], index: 0, kind: input, shape index: {}]   ;;  %s17334_s1 = inlined_call_operand.vmem [shape: bf16[9,3,32], index: 1, kind: input, shape index: {}]   ;;  %s17335_s2 = inlined_call_operand.vmem [shape: f32[1,32], index: 2, kind: input, shape index: {}]   ;;  %s17336_s3 = inlined_call_operand.vmem [shape: f32[2,1088,32], index: 3, kind: output, shape index: {}]  }
   0x1 LB: > { %s10045_s13 = sadd.s32 4294967295, %s13646_s12   ;;  %p10049_p0 = scmp.ge.s32.totalorder %s13646_s12, 1  ;;  %s13646_s12 = sphi %s13669_s12, %s13_s12  }
   0x2   : > { %p137_p1 = scmp.lt.s32.totalorder %s13646_s12, 3 }
   0x4   : > { %p138_p2 = pnand %p10049_p0, %p137_p1 }
   0x6   : > { %141 = sbr.rel (%p138_p2) target bundleno = 1472 (0x5c0), region = 32 }
   0xd   : > { %v10052_v0 = vld [vmem:[%s17334_s1 + $0x2] sm:$0x3]  ;;  %vm1147_vm0 = vcmask 1040384   ;;  %vm1148_vm1 = vcmask 1041408   ;;  %p161_p3 = scmp.lt.s32.totalorder %s10045_s13, 1  ;;  %v13648_v1 = vmov 65535  }
   0xe   : > { %v1149_v2 = vsel %vm1147_vm0, 4294967295, %v13648_v1  ;;  %v10327_v3 = vld [vmem:[%s17334_s1 + $0x8] sm:$0x3]  ;;  %v390_v5 = vld [vmem:[%s17334_s1] sm:$0x3]  ;;  %vm942_vm3 = vcmask 23552  }
   0xf   : > { %v13683_v4 = vsel %vm1148_vm1, %v1149_v2, 0  ;;  %s18446_s13 = smov (!%p161_p3, %s10045_s13), 1  ;;  %v10396_v9 = vld [vmem:[%s17334_s1 + $0xa] sm:$0x3]  ;;  %vm393_vm2 = vsmask.f32 7424 }
  0x10   : > { %v1152_v6 = vand.u32 %v10052_v0, %v13683_v4  ;;  %v13692_v7 = vand.u32 %v10327_v3, %v13683_v4  ;;  %v13695_v8 = vand.u32 %v13683_v4, %v390_v5  ;;  %s13628_s22 = smul.u32 1160, %s18446_s13  ;;  %v13702_v10 = vand.u32 %v10396_v9, %v13683_v4 }
  0x11   : > { %vm4308_vm4 = vsmask.f32 6400  ;;  %vm5518_vm5 = vcmask 1045504   ;;  %vm2518_vm6 = vcmask 1046528   ;;  %vm7308_vm7 = vsmask.f32 5376 }
  0x12   : > { %17716 = vst [vmem:[#allocation2_spill] sm:$0xff] %v13692_v7  ;;  %11296 = vmatprep.subr.bf16.mxu1 %v1152_v6  ;;  %11848 = vmatprep.subr.bf16.mxu0 %v13692_v7  ;;  %s13709_s25 = scalar_lea.vmem %s17333_s0, %s13628_s22  ;;  %vm8516_vm8 = vcmask 1044480   ;;  %s13629_s9 = smul.u32 1088, %s18446_s13  ;;  %vm9853_vm9 = vcmask 261120  }
  0x13   : > { %11297 = vmatpush3.bf16.msra.mxu1 %v1152_v6  ;;  %11849 = vmatpush3.bf16.msra.mxu0 %v13692_v7  ;;  %v172_v11 = vld [vmem:[%s13709_s25] sm:$0xff]  ;;  %v173_v12 = vld [vmem:[%s13709_s25 + $0x8] sm:$0xff]  ;;  %v174_v13 = vld [vmem:[%s13709_s25 + $0x10] sm:$0xff] }
  0x14   : > { %11434 = vmatprep.subr.bf16.mxu1 %v13695_v8  ;;  %11986 = vmatprep.subr.bf16.mxu0 %v13702_v10  ;;  %v175_v14 = vld [vmem:[%s13709_s25 + $0x18] sm:$0xff]  ;;  %v13717_v15 = vpack.c.bf16 %v173_v12, %v172_v11  ;;  %v176_v16 = vld [vmem:[%s13709_s25 + $0x20] sm:$0xff]  ;;  %v177_v17 = vld [vmem:[%s13709_s25 + $0x28] sm:$0xff]  ;;  %s16771_s15 = scalar_lea.vmem %s17336_s3, %s13629_s9 }
  0x15   : > { %v13721_v18 = vpack.c.bf16 %v175_v14, %v174_v13  ;;  %v178_v19 = vld [vmem:[%s13709_s25 + $0x30] sm:$0xff]  ;;  %v179_v20 = vld [vmem:[%s13709_s25 + $0x38] sm:$0xff]  ;;  %v13725_v21 = vpack.c.bf16 %v177_v17, %v176_v16  ;;  %v180_v22 = vld [vmem:[%s13709_s25 + $0x40] sm:$0xff] }
  0x16   : > { %v395_v23 = vshrl.u32 %v13717_v15, 16  ;;  %v397_v24 = vshll.u32 %v13717_v15, 16  ;;  %v13730_v25 = vpack.c.bf16 %v179_v20, %v178_v19  ;;  %v181_v26 = vld [vmem:[%s13709_s25 + $0x48] sm:$0xff]  ;;  %v182_v43 = vld [vmem:[%s13709_s25 + $0x50] sm:$0xff]  ;;  %v183_v44 = vld [vmem:[%s13709_s25 + $0x58] sm:$0xff] }
  0x17   : > { %v402_v27 = vshll.u32 %v13721_v18, 16  ;;  %v406_v28 = vshrl.u32 %v13721_v18, 16  ;;  %v410_v29 = vshll.u32 %v13725_v21, 16  ;;  %v414_v30 = vshrl.u32 %v13725_v21, 16  ;;  %v184_v49 = vld [vmem:[%s13709_s25 + $0x60] sm:$0xff]  ;;  %v185_v50 = vld [vmem:[%s13709_s25 + $0x68] sm:$0xff] }
  0x18   : > { %v399_v31 = vrot.slane %v397_v24, 1  ;;  %v418_v32 = vshll.u32 %v13730_v25, 16  ;;  %v422_v33 = vshrl.u32 %v13730_v25, 16  ;;  %v13739_v34 = vpack.c.bf16 %v181_v26, %v180_v22  ;;  %v186_v59 = vld [vmem:[%s13709_s25 + $0x70] sm:$0xff]  ;;  %v187_v60 = vld [vmem:[%s13709_s25 + $0x78] sm:$0xff]  ;;  %v188_v16 = vld [vmem:[%s13709_s25 + $0x80] sm:$0xff] }
  0x19   : > { %v404_v35 = vrot.slane %v402_v27, 1  ;;  %v4309_v36 = vrot.slane %v414_v30, 1  ;;  %v4310_v37 = vrot.slane %v410_v29, 2  ;;  %v412_v38 = vrot.slane %v410_v29, 1  ;;  %v189_v17 = vld [vmem:[%s13709_s25 + $0x88] sm:$0xff] }
  0x1a   : > { %17717 = vst [vmem:[#allocation3_spill] sm:$0xff] %v13739_v34  ;;  %v400_v39 = vor.u32 %v399_v31, %v395_v23  ;;  %v4312_v40 = vrot.slane %v422_v33, 1  ;;  %v4313_v41 = vrot.slane %v418_v32, 2  ;;  %v13742_v42 = vshll.u32 %v13739_v34, 16 }
  0x1b   : > { %v408_v45 = vor.u32 %v406_v28, %v404_v35  ;;  %v4311_v46 = vor.u32 %v4310_v37, %v4309_v36  ;;  %v13747_v47 = vshrl.u32 %v13739_v34, 16  ;;  %v416_v48 = vor.u32 %v414_v30, %v412_v38  ;;  %v190_v28 = vld [vmem:[%s13709_s25 + $0x90] sm:$0xff]  ;;  %v193_v36 = vld [vmem:[%s13709_s25 + $0xa8] sm:$0xff] }
  0x1c   : > { %17718 = vst [vmem:[#allocation4_spill] sm:$0xff] %v13742_v42  ;;  %v405_v51 = vsel %vm393_vm2, %v400_v39, %v404_v35  ;;  %v4314_v52 = vor.u32 %v4313_v41, %v4312_v40  ;;  %v4317_v53 = vrot.slane %v13742_v42, 2  ;;  %v420_v54 = vrot.slane %v418_v32, 1  ;;  %v192_v35 = vld [vmem:[%s13709_s25 + $0xa0] sm:$0xff] }
  0x1d   : > { %17719 = vst [vmem:[#allocation5_spill] sm:$0xff] %v13747_v47  ;;  %11298 = vmatprep.mubr.msk.bf16.mxu1 %vm942_vm3, %v405_v51  ;;  %v413_v55 = vsel %vm393_vm2, %v408_v45, %v412_v38  ;;  %v4316_v56 = vrot.slane %v13747_v47, 1  ;;  %v13756_v57 = vpack.c.bf16 %v183_v44, %v182_v43  ;;  %v428_v58 = vrot.slane %v13742_v42, 1 }
  0x1e   : > { %v4315_v61 = vsel %vm4308_vm4, %v4311_v46, %v4314_v52  ;;  %11299 = vmatmul.mubr.msk.bf16.vlgmr.msra.gmra.mrb[0].mxu1 %vm942_vm3, %v413_v55  ;;  %v421_v62 = vsel %vm393_vm2, %v416_v48, %v420_v54  ;;  %v424_v63 = vor.u32 %v422_v33, %v420_v54  ;;  %v13764_v0 = vpack.c.bf16 %v185_v50, %v184_v49  ;;  %v191_v33 = vld [vmem:[%s13709_s25 + $0x98] sm:$0xff]  ;;  %v194_v48 = vld [vmem:[%s13709_s25 + $0xb0] sm:$0xff] }
  0x1f   : > { %17720 = vst [vmem:[#allocation6_spill] sm:$0xff] %v13756_v57  ;;  %11850 = vmatprep.mubr.msk.bf16.mxu0 %vm942_vm3, %v4315_v61  ;;  %11435 = vmatpush3.bf16.msra.mxu1 %v13695_v8  ;;  %v4318_v1 = vor.u32 %v4317_v53, %v4316_v56  ;;  %v13769_v2 = vshll.u32 %v13756_v57, 16  ;;  %v13772_v3 = vshrl.u32 %v13756_v57, 16  ;;  %v432_v5 = vor.u32 %v13747_v47, %v428_v58  ;;  %v195_v49 = vld [vmem:[%s13709_s25 + $0xb8] sm:$0xff] }
  0x20   : > { %17721 = vst [vmem:[#allocation7_spill] sm:$0xff] %v13764_v0  ;;  %11302 = vmatprep.mubr.msk.bf16.mxu1 %vm942_vm3, %v421_v62  ;;  %v13777_v6 = vshll.u32 %v13764_v0, 16  ;;  %v13780_v9 = vshrl.u32 %v13764_v0, 16  ;;  %v13782_v11 = vpack.c.bf16 %v187_v60, %v186_v59  ;;  %v429_v26 = vsel %vm393_vm2, %v424_v63, %v428_v58 }
  0x21   : > { %17722 = vst [vmem:[#allocation8_spill] sm:$0xff] %v13769_v2  ;;  %17723 = vst [vmem:[#allocation9_spill] sm:$0xff] %v13772_v3  ;;  %v4319_v8 = vsel %vm4308_vm4, %v4314_v52, %v4318_v1  ;;  %v4320_v12 = vrot.slane %v13772_v3, 1  ;;  %v4321_v13 = vrot.slane %v13769_v2, 2  ;;  %v436_v14 = vrot.slane %v13769_v2, 1  ;;  %v235_v2 = vld [vmem:[%s13709_s25 + $0x1f8] sm:$0xff] }
  0x22   : > { %17724 = vst [vmem:[#allocation10_spill] sm:$0xff] %v13777_v6  ;;  %17725 = vst [vmem:[#allocation11_spill] sm:$0xff] %v13780_v9  ;;  %11851 = vmatmul.mubr.msk.bf16.vlgmr.msra.gmra.mrb[0].mxu0 %vm942_vm3, %v4319_v8  ;;  %v4324_v19 = vrot.slane %v13780_v9, 1  ;;  %v4325_v20 = vrot.slane %v13777_v6, 2  ;;  %v13794_v22 = vshll.u32 %v13782_v11, 16  ;;  %v13797_v23 = vshrl.u32 %v13782_v11, 16 }
  0x23   : > { %17726 = vst [vmem:[#allocation12_spill] sm:$0xff] %v13782_v11  ;;  %11987 = vmatpush3.bf16.msra.mxu0 %v13702_v10  ;;  %v4322_v24 = vor.u32 %v4321_v13, %v4320_v12  ;;  %v437_v27 = vsel %vm393_vm2, %v432_v5, %v436_v14  ;;  %v13805_v32 = vpack.c.bf16 %v189_v17, %v188_v16  ;;  %v444_v37 = vrot.slane %v13777_v6, 1  ;;  %v197_v5 = vld [vmem:[%s13709_s25 + $0xc8] sm:$0xff] }
  0x24   : > { %17727 = vst [vmem:[#allocation13_spill] sm:$0xff] %v13794_v22  ;;  %17728 = vst [vmem:[#allocation14_spill] sm:$0xff] %v13797_v23  ;;  %v4326_v29 = vor.u32 %v4325_v20, %v4324_v19  ;;  %v4328_v30 = vrot.slane %v13797_v23, 1  ;;  %v4329_v31 = vrot.slane %v13794_v22, 2  ;;  %v440_v39 = vor.u32 %v13772_v3, %v436_v14  ;;  %v198_v20 = vld [vmem:[%s13709_s25 + $0xd0] sm:$0xff] }
  0x25   : > { %17729 = vst [vmem:[#allocation15_spill] sm:$0xff] %v13805_v32  ;;  %v4323_v10 = vsel %vm4308_vm4, %v4318_v1, %v4322_v24  ;;  %v13816_v40 = vshll.u32 %v13805_v32, 16  ;;  %v13819_v41 = vshrl.u32 %v13805_v32, 16  ;;  %v448_v44 = vor.u32 %v13780_v9, %v444_v37  ;;  %v196_v1 = vld [vmem:[%s13709_s25 + $0xc0] sm:$0xff]  ;;  %v234_v9 = vld [vmem:[%s13709_s25 + $0x1f0] sm:$0xff] }
  0x26   : > { %11854 = vmatprep.mubr.msk.bf16.mxu0 %vm942_vm3, %v4323_v10  ;;  %11303 = vmatmul.mubr.msk.bf16.gmra.mrb[4].mxu1 %vm942_vm3, %v429_v26  ;;  %v4330_v38 = vor.u32 %v4329_v31, %v4328_v30  ;;  %v4327_v43 = vsel %vm4308_vm4, %v4322_v24, %v4326_v29  ;;  %v13824_v45 = vpack.c.bf16 %v191_v33, %v190_v28  ;;  %v452_v53 = vrot.slane %v13794_v22, 1  ;;  %v199_v24 = vld [vmem:[%s13709_s25 + $0xd8] sm:$0xff] }
  0x27   : > { %17730 = vst [vmem:[#allocation16_spill] sm:$0xff] %v13816_v40  ;;  %17731 = vst [vmem:[#allocation17_spill] sm:$0xff] %v13819_v41  ;;  %11306 = vmatprep.mubr.msk.bf16.mxu1 %vm942_vm3, %v437_v27  ;;  %v13826_v46 = vpack.c.bf16 %v193_v36, %v192_v35  ;;  %v4332_v51 = vrot.slane %v13819_v41, 1  ;;  %v4333_v52 = vrot.slane %v13816_v40, 2  ;;  %v445_v56 = vsel %vm393_vm2, %v440_v39, %v444_v37 }
  0x28   : > { %17732 = vst [vmem:[#allocation18_spill] sm:$0xff] %v13824_v45  ;;  %v4331_v50 = vsel %vm4308_vm4, %v4326_v29, %v4330_v38  ;;  %v13835_v54 = vshll.u32 %v13824_v45, 16  ;;  %v13838_v55 = vshrl.u32 %v13824_v45, 16  ;;  %v13845_v59 = vpack.c.bf16 %v195_v49, %v194_v48 }
  0x29   : > { %17733 = vst [vmem:[#allocation19_spill] sm:$0xff] %v13826_v46  ;;  %v13843_v58 = vshll.u32 %v13826_v46, 16  ;;  %v4334_v60 = vor.u32 %v4333_v52, %v4332_v51  ;;  %v13851_v63 = vshrl.u32 %v13826_v46, 16  ;;  %v453_v8 = vsel %vm393_vm2, %v448_v44, %v452_v53  ;;  %v201_v51 = vld [vmem:[%s13709_s25 + $0xe8] sm:$0xff] }
  0x2a   : > { %17734 = vst [vmem:[#allocation20_spill] sm:$0xff] %v13835_v54  ;;  %17735 = vst [vmem:[#allocation21_spill] sm:$0xff] %v13838_v55  ;;  %11855 = vmatmul.mubr.msk.bf16.gmra.mrb[4].mxu0 %vm942_vm3, %v4327_v43  ;;  %v4336_v61 = vrot.slane %v13838_v55, 1  ;;  %v4337_v62 = vrot.slane %v13835_v54, 2  ;;  %v13857_v12 = vshll.u32 %v13845_v59, 16  ;;  %v13860_v13 = vshrl.u32 %v13845_v59, 16 }
  0x2b   : > { %17736 = vst [vmem:[#allocation22_spill] sm:$0xff] %v13843_v58  ;;  %17737 = vst [vmem:[#allocation23_spill] sm:$0xff] %v13845_v59  ;;  %11858 = vmatprep.mubr.msk.bf16.mxu0 %vm942_vm3, %v4331_v50  ;;  %v460_v16 = vrot.slane %v13816_v40, 1  ;;  %v456_v17 = vor.u32 %v13797_v23, %v452_v53  ;;  %v13865_v19 = vpack.c.bf16 %v197_v5, %v196_v1  ;;  %v4340_v27 = vrot.slane %v13851_v63, 1  ;;  %v200_v50 = vld [vmem:[%s13709_s25 + $0xe0] sm:$0xff]  ;;  %v202_v53 = vld [vmem:[%s13709_s25 + $0xf0] sm:$0xff] }
  0x2c   : > { %17738 = vst [vmem:[#allocation24_spill] sm:$0xff] %v13851_v63  ;;  %17739 = vst [vmem:[#allocation25_spill] sm:$0xff] %v13857_v12  ;;  %v4338_v14 = vor.u32 %v4337_v62, %v4336_v61  ;;  %v4335_v26 = vsel %vm4308_vm4, %v4330_v38, %v4334_v60  ;;  %v4341_v28 = vrot.slane %v13843_v58, 2  ;;  %v468_v31 = vrot.slane %v13835_v54, 1  ;;  %v229_v40 = vld [vmem:[%s13709_s25 + $0x1c8] sm:$0xff] }
  0x2d   : > { %17740 = vst [vmem:[#allocation26_spill] sm:$0xff] %v13860_v13  ;;  %17741 = vst [vmem:[#allocation27_spill] sm:$0xff] %v13865_v19  ;;  %v464_v29 = vor.u32 %v13819_v41, %v460_v16  ;;  %v4344_v33 = vrot.slane %v13860_v13, 1  ;;  %v4345_v35 = vrot.slane %v13857_v12, 2  ;;  %v13878_v36 = vpack.c.bf16 %v199_v24, %v198_v20 }
  0x2e   : > { %11307 = vmatmul.mubr.msk.bf16.gmra.mrb[8].mxu1 %vm942_vm3, %v445_v56  ;;  %v4339_v30 = vsel %vm4308_vm4, %v4334_v60, %v4338_v14  ;;  %v13882_v10 = vshll.u32 %v13865_v19, 16  ;;  %v13885_v37 = vshrl.u32 %v13865_v19, 16  ;;  %v461_v38 = vsel %vm393_vm2, %v456_v17, %v460_v16  ;;  %v203_v56 = vld [vmem:[%s13709_s25 + $0xf8] sm:$0xff] }
  0x2f   : > { %11310 = vmatprep.mubr.msk.bf16.mxu1 %vm942_vm3, %v453_v8  ;;  %17742 = vst [vmem:[#allocation28_spill] sm:$0xff] %v13878_v36  ;;  %v4342_v39 = vor.u32 %v4341_v28, %v4340_v27  ;;  %v469_v43 = vsel %vm393_vm2, %v464_v29, %v468_v31  ;;  %v4346_v44 = vor.u32 %v4345_v35, %v4344_v33  ;;  %v13891_v48 = vshll.u32 %v13878_v36, 16 }
  0x30   : > { %17743 = vst [vmem:[#allocation29_spill] sm:$0xff] %v13882_v10  ;;  %17744 = vst [vmem:[#allocation30_spill] sm:$0xff] %v13885_v37  ;;  %v13894_v49 = vshrl.u32 %v13878_v36, 16  ;;  %v476_v52 = vrot.slane %v13843_v58, 1  ;;  %v472_v60 = vor.u32 %v13838_v55, %v468_v31  ;;  %v4348_v61 = vrot.slane %v13885_v37, 1  ;;  %v218_v58 = vld [vmem:[%s13709_s25 + $0x170] sm:$0xff] }
  0x31   : > { %17745 = vst [vmem:[#allocation31_spill] sm:$0xff] %v13891_v48  ;;  %v4349_v62 = vrot.slane %v13882_v10, 2  ;;  %v4343_v1 = vsel %vm4308_vm4, %v4338_v14, %v4342_v39  ;;  %v484_v8 = vrot.slane %v13857_v12, 1  ;;  %v13909_v16 = vpack.c.bf16 %v201_v51, %v200_v50  ;;  %v206_v50 = vld [vmem:[%s13709_s25 + $0x110] sm:$0xff]  ;;  %v207_v51 = vld [vmem:[%s13709_s25 + $0x118] sm:$0xff] }
  0x32   : > { %11859 = vmatmul.mubr.msk.bf16.gmra.mrb[8].mxu0 %vm942_vm3, %v4335_v26  ;;  %17746 = vst [vmem:[#allocation32_spill] sm:$0xff] %v13894_v49  ;;  %v480_v5 = vor.u32 %v13851_v63, %v476_v52  ;;  %v4347_v17 = vsel %vm4308_vm4, %v4342_v39, %v4346_v44  ;;  %v4352_v20 = vrot.slane %v13894_v49, 1  ;;  %v4353_v24 = vrot.slane %v13891_v48, 2  ;;  %v204_v39 = vld [vmem:[%s13709_s25 + $0x100] sm:$0xff]  ;;  %v219_v63 = vld [vmem:[%s13709_s25 + $0x178] sm:$0xff] }
  0x33   : > { %11862 = vmatprep.mubr.msk.bf16.mxu0 %vm942_vm3, %v4339_v30  ;;  %17747 = vst [vmem:[#allocation33_spill] sm:$0xff] %v13909_v16  ;;  %v13914_v26 = vpack.c.bf16 %v203_v56, %v202_v53  ;;  %v4350_v14 = vor.u32 %v4349_v62, %v4348_v61  ;;  %v477_v27 = vsel %vm393_vm2, %v472_v60, %v476_v52  ;;  %v492_v28 = vrot.slane %v13882_v10, 1  ;;  %v213_v10 = vld [vmem:[%s13709_s25 + $0x148] sm:$0xff] }
  0x34   : > { %v13921_v29 = vshll.u32 %v13909_v16, 16  ;;  %v13924_v30 = vshrl.u32 %v13909_v16, 16  ;;  %v485_v31 = vsel %vm393_vm2, %v480_v5, %v484_v8  ;;  %v4354_v33 = vor.u32 %v4353_v24, %v4352_v20 }
  0x35   : > { %17748 = vst [vmem:[#allocation34_spill] sm:$0xff] %v13914_v26  ;;  %v13928_v35 = vshll.u32 %v13914_v26, 16  ;;  %v4351_v52 = vsel %vm4308_vm4, %v4346_v44, %v4350_v14  ;;  %v488_v53 = vor.u32 %v13860_v13, %v484_v8  ;;  %v496_v56 = vor.u32 %v13885_v37, %v492_v28 }
  0x36   : > { %11311 = vmatmul.mubr.msk.bf16.gmra.mrb[12].mxu1 %vm942_vm3, %v461_v38  ;;  %17749 = vst [vmem:[#allocation35_spill] sm:$0xff] %v13921_v29  ;;  %17750 = vst [vmem:[#allocation36_spill] sm:$0xff] %v13924_v30  ;;  %v13931_v38 = vshrl.u32 %v13914_v26, 16  ;;  %v4356_v60 = vrot.slane %v13924_v30, 1  ;;  %v4357_v61 = vrot.slane %v13921_v29, 2  ;;  %v500_v62 = vrot.slane %v13891_v48, 1 }
  0x37   : > { %11314 = vmatprep.mubr.msk.bf16.mxu1 %vm942_vm3, %v469_v43  ;;  %17751 = vst [vmem:[#allocation37_spill] sm:$0xff] %v13928_v35  ;;  %v205_v43 = vld [vmem:[%s13709_s25 + $0x108] sm:$0xff]  ;;  %v4355_v5 = vsel %vm4308_vm4, %v4350_v14, %v4354_v33  ;;  %v4361_v8 = vrot.slane %v13928_v35, 2  ;;  %v493_v20 = vsel %vm393_vm2, %v488_v53, %v492_v28  ;;  %v208_v28 = vld [vmem:[%s13709_s25 + $0x120] sm:$0xff]  ;;  %v210_v53 = vld [vmem:[%s13709_s25 + $0x130] sm:$0xff] }
  0x38   : > { %17752 = vst [vmem:[#allocation38_spill] sm:$0xff] %v13931_v38  ;;  %v4360_v44 = vrot.slane %v13931_v38, 1  ;;  %v4358_v24 = vor.u32 %v4357_v61, %v4356_v60  ;;  %v211_v60 = vld [vmem:[%s13709_s25 + $0x138] sm:$0xff] }
  0x3a   : > { %11863 = vmatmul.mubr.msk.bf16.gmra.mrb[12].mxu0 %vm942_vm3, %v4343_v1  ;;  %v13945_v1 = vpack.c.bf16 %v205_v43, %v204_v39  ;;  %v4362_v39 = vor.u32 %v4361_v8, %v4360_v44  ;;  %v508_v43 = vrot.slane %v13921_v29, 1  ;;  %v4359_v44 = vsel %vm4308_vm4, %v4354_v33, %v4358_v24 }
  0x3b   : > { %11866 = vmatprep.mubr.msk.bf16.mxu0 %vm942_vm3, %v4347_v17  ;;  %v13950_v17 = vpack.c.bf16 %v207_v51, %v206_v50 }
  0x3c   : > { %17753 = vst [vmem:[#allocation39_spill] sm:$0xff] %v13945_v1  ;;  %v13957_v14 = vshll.u32 %v13945_v1, 16  ;;  %v512_v61 = vor.u32 %v13924_v30, %v508_v43 }
  0x3d   : > { %17754 = vst [vmem:[#allocation40_spill] sm:$0xff] %v13950_v17  ;;  %v13964_v50 = vshll.u32 %v13950_v17, 16  ;;  %v13967_v51 = vshrl.u32 %v13950_v17, 16 }
  0x3e   : > { %11315 = vmatmul.mubr.msk.bf16.gmra.mrb[16].mxu1 %vm942_vm3, %v477_v27  ;;  %v501_v27 = vsel %vm393_vm2, %v496_v56, %v500_v62  ;;  %17755 = vst [vmem:[#allocation41_spill] sm:$0xff] %v13957_v14  ;;  %v504_v56 = vor.u32 %v13894_v49, %v500_v62  ;;  %v4365_v29 = vrot.slane %v13957_v14, 2  ;;  %v212_v49 = vld [vmem:[%s13709_s25 + $0x140] sm:$0xff] }
  0x3f   : > { %11318 = vmatprep.mubr.msk.bf16.mxu1 %vm942_vm3, %v485_v31  ;;  %v13960_v31 = vshrl.u32 %v13945_v1, 16  ;;  %17757 = vst [vmem:[#allocation43_spill] sm:$0xff] %v13964_v50  ;;  %17758 = vst [vmem:[#allocation44_spill] sm:$0xff] %v13967_v51  ;;  %v4368_v62 = vrot.slane %v13967_v51, 1  ;;  %v4369_v30 = vrot.slane %v13964_v50, 2 }
  0x40   : > { %v509_v33 = vsel %vm393_vm2, %v504_v56, %v508_v43  ;;  %v215_v56 = vld [vmem:[%s13709_s25 + $0x158] sm:$0xff] }
  0x41   : > { %17756 = vst [vmem:[#allocation42_spill] sm:$0xff] %v13960_v31  ;;  %v4364_v8 = vrot.slane %v13960_v31, 1  ;;  %v4370_v37 = vor.u32 %v4369_v30, %v4368_v62 }
  0x42   : > { %11867 = vmatmul.mubr.msk.bf16.gmra.mrb[16].mxu0 %vm942_vm3, %v4351_v52  ;;  %v209_v52 = vld [vmem:[%s13709_s25 + $0x128] sm:$0xff] }
  0x43   : > { %11870 = vmatprep.mubr.msk.bf16.mxu0 %vm942_vm3, %v4355_v5  ;;  %v516_v5 = vrot.slane %v13928_v35, 1  ;;  %v13981_v48 = vpack.c.bf16 %v209_v52, %v208_v28  ;;  %v13986_v35 = vpack.c.bf16 %v211_v60, %v210_v53  ;;  %v524_v53 = vrot.slane %v13957_v14, 1 }
  0x44   : > { %v532_v14 = vrot.slane %v13964_v50, 1 }
  0x45   : > { %17759 = vst [vmem:[#allocation45_spill] sm:$0xff] %v13981_v48  ;;  %17760 = vst [vmem:[#allocation46_spill] sm:$0xff] %v13986_v35  ;;  %v517_v28 = vsel %vm393_vm2, %v512_v61, %v516_v5  ;;  %v13993_v52 = vshll.u32 %v13981_v48, 16  ;;  %v14002_v60 = vshll.u32 %v13986_v35, 16  ;;  %v14005_v43 = vshrl.u32 %v13986_v35, 16 }
  0x46   : > { %11319 = vmatmul.mubr.msk.bf16.gmra.mrb[20].mxu1 %vm942_vm3, %v493_v20  ;;  %v4363_v20 = vsel %vm4308_vm4, %v4358_v24, %v4362_v39  ;;  %v13996_v24 = vshrl.u32 %v13981_v48, 16  ;;  %v520_v61 = vor.u32 %v13931_v38, %v516_v5 }
  0x47   : > { %11322 = vmatprep.mubr.msk.bf16.mxu1 %vm942_vm3, %v501_v27  ;;  %v4366_v27 = vor.u32 %v4365_v29, %v4364_v8  ;;  %17761 = vst [vmem:[#allocation47_spill] sm:$0xff] %v13993_v52  ;;  %17763 = vst [vmem:[#allocation49_spill] sm:$0xff] %v14002_v60  ;;  %v214_v29 = vld [vmem:[%s13709_s25 + $0x150] sm:$0xff]  ;;  %v14012_v8 = vpack.c.bf16 %v213_v10, %v212_v49  ;;  %v4373_v62 = vrot.slane %v13993_v52, 2  ;;  %v4376_v5 = vrot.slane %v14005_v43, 1 }
  0x48   : > { %17762 = vst [vmem:[#allocation48_spill] sm:$0xff] %v13996_v24  ;;  %17764 = vst [vmem:[#allocation50_spill] sm:$0xff] %v14005_v43  ;;  %v4377_v10 = vrot.slane %v14002_v60, 2  ;;  %v14022_v49 = vpack.c.bf16 %v215_v56, %v214_v29  ;;  %v216_v56 = vld [vmem:[%s13709_s25 + $0x160] sm:$0xff]  ;;  %v540_v13 = vrot.slane %v13993_v52, 1  ;;  %v14058_v52 = vpack.c.bf16 %v219_v63, %v218_v58 }
  0x49   : > { %17765 = vst [vmem:[#allocation51_spill] sm:$0xff] %v14012_v8  ;;  %v4367_v30 = vsel %vm4308_vm4, %v4362_v39, %v4366_v27  ;;  %v14026_v39 = vshll.u32 %v14012_v8, 16 }
  0x4a   : > { %11871 = vmatmul.mubr.msk.bf16.gmra.mrb[20].mxu0 %vm942_vm3, %v4359_v44  ;;  %v528_v44 = vor.u32 %v13960_v31, %v524_v53  ;;  %17766 = vst [vmem:[#allocation52_spill] sm:$0xff] %v14022_v49  ;;  %v4378_v38 = vor.u32 %v4377_v10, %v4376_v5  ;;  %v14035_v12 = vshll.u32 %v14022_v49, 16  ;;  %v14038_v29 = vshrl.u32 %v14022_v49, 16  ;;  %17772 = vst [vmem:[#allocation58_spill] sm:$0xff] %v14058_v52 }
  0x4b   : > { %11874 = vmatprep.mubr.msk.bf16.mxu0 %vm942_vm3, %v4363_v20  ;;  %v4372_v20 = vrot.slane %v13996_v24, 1  ;;  %17767 = vst [vmem:[#allocation53_spill] sm:$0xff] %v14026_v39  ;;  %v14072_v58 = vshll.u32 %v14058_v52, 16  ;;  %v14075_v63 = vshrl.u32 %v14058_v52, 16 }
  0x4c   : > { %v533_v31 = vsel %vm393_vm2, %v528_v44, %v532_v14  ;;  %17769 = vst [vmem:[#allocation55_spill] sm:$0xff] %v14035_v12  ;;  %17770 = vst [vmem:[#allocation56_spill] sm:$0xff] %v14038_v29  ;;  %v4381_v44 = vrot.slane %v14026_v39, 2 }
  0x4d   : > { %v4374_v50 = vor.u32 %v4373_v62, %v4372_v20  ;;  %v544_v62 = vor.u32 %v13996_v24, %v540_v13  ;;  %17775 = vst [vmem:[#allocation61_spill] sm:$0xff] %v14072_v58  ;;  %17776 = vst [vmem:[#allocation62_spill] sm:$0xff] %v14075_v63 }
  0x4e   : > { %11323 = vmatmul.mubr.msk.bf16.gmra.mrb[24].mxu1 %vm942_vm3, %v509_v33  ;;  %v4371_v33 = vsel %vm4308_vm4, %v4366_v27, %v4370_v37  ;;  %v525_v27 = vsel %vm393_vm2, %v520_v61, %v524_v53  ;;  %v536_v53 = vor.u32 %v13967_v51, %v532_v14  ;;  %v4384_v14 = vrot.slane %v14038_v29, 1 }
  0x4f   : > { %11326 = vmatprep.mubr.msk.bf16.mxu1 %vm942_vm3, %v517_v28  ;;  %v14029_v28 = vshrl.u32 %v14012_v8, 16  ;;  %v4375_v20 = vsel %vm4308_vm4, %v4370_v37, %v4374_v50  ;;  %v4379_v10 = vsel %vm4308_vm4, %v4374_v50, %v4378_v38 }
  0x51   : > { %17768 = vst [vmem:[#allocation54_spill] sm:$0xff] %v14029_v28  ;;  %v4380_v61 = vrot.slane %v14029_v28, 1 }
  0x52   : > { %11875 = vmatmul.mubr.msk.bf16.gmra.mrb[24].mxu0 %vm942_vm3, %v4367_v30  ;;  %v217_v30 = vld [vmem:[%s13709_s25 + $0x168] sm:$0xff] }
  0x53   : > { %11878 = vmatprep.mubr.msk.bf16.mxu0 %vm942_vm3, %v4371_v33  ;;  %v548_v33 = vrot.slane %v14002_v60, 1  ;;  %v14053_v5 = vpack.c.bf16 %v217_v30, %v216_v56  ;;  %v4382_v37 = vor.u32 %v4381_v44, %v4380_v61  ;;  %v556_v56 = vrot.slane %v14026_v39, 1  ;;  %v220_v61 = vld [vmem:[%s13709_s25 + $0x180] sm:$0xff]  ;;  %v221_v44 = vld [vmem:[%s13709_s25 + $0x188] sm:$0xff] }
  0x54   : > { %v14089_v51 = vpack.c.bf16 %v221_v44, %v220_v61 }
  0x55   : > { %17771 = vst [vmem:[#allocation57_spill] sm:$0xff] %v14053_v5  ;;  %v14065_v50 = vshll.u32 %v14053_v5, 16  ;;  %v14068_v30 = vshrl.u32 %v14053_v5, 16  ;;  %v549_v60 = vsel %vm393_vm2, %v544_v62, %v548_v33  ;;  %v560_v39 = vor.u32 %v14029_v28, %v556_v56 }
  0x56   : > { %11327 = vmatmul.mubr.msk.bf16.gmra.mrb[28].mxu1 %vm942_vm3, %v525_v27  ;;  %v4385_v27 = vrot.slane %v14035_v12, 2  ;;  %17777 = vst [vmem:[#allocation63_spill] sm:$0xff] %v14089_v51 }
  0x57   : > { %11330 = vmatprep.mubr.msk.bf16.mxu1 %vm942_vm3, %v533_v31  ;;  %v541_v31 = vsel %vm393_vm2, %v536_v53, %v540_v13  ;;  %17773 = vst [vmem:[#allocation59_spill] sm:$0xff] %v14065_v50  ;;  %17774 = vst [vmem:[#allocation60_spill] sm:$0xff] %v14068_v30  ;;  %v222_v13 = vld [vmem:[%s13709_s25 + $0x190] sm:$0xff]  ;;  %v223_v53 = vld [vmem:[%s13709_s25 + $0x198] sm:$0xff]  ;;  %v4388_v62 = vrot.slane %v14068_v30, 1 }
  0x58   : > { %v4386_v24 = vor.u32 %v4385_v27, %v4384_v14  ;;  %v4389_v14 = vrot.slane %v14065_v50, 2  ;;  %v564_v27 = vrot.slane %v14035_v12, 1  ;;  %v14104_v12 = vshrl.u32 %v14089_v51, 16 }
  0x5a   : > { %11879 = vmatmul.mubr.msk.bf16.gmra.mrb[28].mxu0 %vm942_vm3, %v4375_v20  ;;  %v4383_v20 = vsel %vm4308_vm4, %v4378_v38, %v4382_v37  ;;  %v4387_v54 = vsel %vm4308_vm4, %v4382_v37, %v4386_v24  ;;  %v4392_v38 = vrot.slane %v14075_v63, 1  ;;  %v4390_v61 = vor.u32 %v4389_v14, %v4388_v62  ;;  %17780 = vst [vmem:[#allocation66_spill] sm:$0xff] %v14104_v12 }
  0x5b   : > { %11882 = vmatprep.mubr.msk.bf16.mxu0 %vm942_vm3, %v4379_v10  ;;  %v552_v10 = vor.u32 %v14005_v43, %v548_v33  ;;  %v4393_v33 = vrot.slane %v14072_v58, 2  ;;  %v565_v44 = vsel %vm393_vm2, %v560_v39, %v564_v27  ;;  %v14101_v37 = vshll.u32 %v14089_v51, 16 }
  0x5c   : > { %v572_v43 = vrot.slane %v14065_v50, 1  ;;  %v568_v39 = vor.u32 %v14038_v29, %v564_v27  ;;  %v580_v14 = vrot.slane %v14072_v58, 1  ;;  %v228_v29 = vld [vmem:[%s13709_s25 + $0x1c0] sm:$0xff] }
  0x5d   : > { %17779 = vst [vmem:[#allocation65_spill] sm:$0xff] %v14101_v37  ;;  %v4394_v28 = vor.u32 %v4393_v33, %v4392_v38  ;;  %v4391_v38 = vsel %vm4308_vm4, %v4386_v24, %v4390_v61  ;;  %v4396_v33 = vrot.slane %v14104_v12, 1  ;;  %v4397_v50 = vrot.slane %v14101_v37, 2 }
  0x5e   : > { %11331 = vmatmul.mubr.msk.bf16.gmra.mrb[32].mxu1 %vm942_vm3, %v541_v31  ;;  %v14094_v31 = vpack.c.bf16 %v223_v53, %v222_v13  ;;  %v576_v62 = vor.u32 %v14068_v30, %v572_v43  ;;  %v573_v24 = vsel %vm393_vm2, %v568_v39, %v572_v43  ;;  %v588_v43 = vrot.slane %v14101_v37, 1 }
  0x5f   : > { %11334 = vmatprep.mubr.msk.bf16.mxu1 %vm942_vm3, %v549_v60  ;;  %v557_v60 = vsel %vm393_vm2, %v552_v10, %v556_v56  ;;  %v224_v56 = vld [vmem:[%s13709_s25 + $0x1a0] sm:$0xff]  ;;  %v227_v10 = vld [vmem:[%s13709_s25 + $0x1b8] sm:$0xff]  ;;  %v14159_v41 = vpack.c.bf16 %v229_v40, %v228_v29 }
  0x60   : > { %17778 = vst [vmem:[#allocation64_spill] sm:$0xff] %v14094_v31  ;;  %v14108_v13 = vshll.u32 %v14094_v31, 16  ;;  %v14111_v53 = vshrl.u32 %v14094_v31, 16 }
  0x61   : > { %17789 = vst [vmem:[#allocation75_spill] sm:$0xff] %v14159_v41 }
  0x62   : > { %11883 = vmatmul.mubr.msk.bf16.gmra.mrb[32].mxu0 %vm942_vm3, %v4383_v20  ;;  %17781 = vst [vmem:[#allocation67_spill] sm:$0xff] %v14108_v13  ;;  %17782 = vst [vmem:[#allocation68_spill] sm:$0xff] %v14111_v53  ;;  %v226_v20 = vld [vmem:[%s13709_s25 + $0x1b0] sm:$0xff]  ;;  %v4400_v27 = vrot.slane %v14111_v53, 1  ;;  %v4401_v30 = vrot.slane %v14108_v13, 2  ;;  %v596_v23 = vrot.slane %v14108_v13, 1 }
  0x63   : > { %11886 = vmatprep.mubr.msk.bf16.mxu0 %vm942_vm3, %v4387_v54  ;;  %v225_v54 = vld [vmem:[%s13709_s25 + $0x1a8] sm:$0xff]  ;;  %v14130_v58 = vpack.c.bf16 %v227_v10, %v226_v20 }
  0x64   : > { %v14125_v55 = vpack.c.bf16 %v225_v54, %v224_v56  ;;  %v581_v56 = vsel %vm393_vm2, %v576_v62, %v580_v14  ;;  %v10465_v20 = vld [vmem:[%s17334_s1 + $0xc] sm:$0x3]  ;;  %v4402_v10 = vor.u32 %v4401_v30, %v4400_v27  ;;  %v230_v62 = vld [vmem:[%s13709_s25 + $0x1d0] sm:$0xff] }
  0x65   : > { %17784 = vst [vmem:[#allocation70_spill] sm:$0xff] %v14130_v58  ;;  %v14149_v39 = vshll.u32 %v14130_v58, 16  ;;  %v14162_v30 = vand.u32 %v10465_v20, %v13683_v4 }
  0x66   : > { %11335 = vmatmul.mubr.msk.bf16.gmra.mrb[36].mxu1 %vm942_vm3, %v557_v60  ;;  %17783 = vst [vmem:[#allocation69_spill] sm:$0xff] %v14125_v55  ;;  %v4395_v60 = vsel %vm4308_vm4, %v4390_v61, %v4394_v28  ;;  %v14137_v54 = vshll.u32 %v14125_v55, 16  ;;  %v14140_v61 = vshrl.u32 %v14125_v55, 16 }
  0x67   : > { %11338 = vmatprep.mubr.msk.bf16.mxu1 %vm942_vm3, %v565_v44  ;;  %v4398_v44 = vor.u32 %v4397_v50, %v4396_v33  ;;  %17787 = vst [vmem:[#allocation73_spill] sm:$0xff] %v14149_v39  ;;  %v14152_v50 = vshrl.u32 %v14130_v58, 16  ;;  %v584_v33 = vor.u32 %v14075_v63, %v580_v14  ;;  %v4409_v29 = vrot.slane %v14149_v39, 2  ;;  %12124 = vmatprep.subr.bf16.mxu0 %v14162_v30  ;;  %v233_v63 = vld [vmem:[%s13709_s25 + $0x1e8] sm:$0xff] }
  0x68   : > { %17785 = vst [vmem:[#allocation71_spill] sm:$0xff] %v14137_v54  ;;  %17786 = vst [vmem:[#allocation72_spill] sm:$0xff] %v14140_v61  ;;  %v4404_v37 = vrot.slane %v14140_v61, 1  ;;  %v4405_v22 = vrot.slane %v14137_v54, 2  ;;  %v604_v6 = vrot.slane %v14137_v54, 1  ;;  %v14209_v54 = vpack.c.bf16 %v235_v2, %v234_v9 }
  0x69   : > { %17788 = vst [vmem:[#allocation74_spill] sm:$0xff] %v14152_v50  ;;  %v4399_v27 = vsel %vm4308_vm4, %v4394_v28, %v4398_v44  ;;  %v4403_v14 = vsel %vm4308_vm4, %v4398_v44, %v4402_v10  ;;  %v4408_v40 = vrot.slane %v14152_v50, 1  ;;  %v14177_v28 = vshll.u32 %v14159_v41, 16 }
  0x6a   : > { %11887 = vmatmul.mubr.msk.bf16.gmra.mrb[36].mxu0 %vm942_vm3, %v4391_v38  ;;  %v231_v38 = vld [vmem:[%s13709_s25 + $0x1d8] sm:$0xff]  ;;  %v589_v44 = vsel %vm393_vm2, %v584_v33, %v588_v43  ;;  %v4406_v20 = vor.u32 %v4405_v22, %v4404_v37  ;;  %17796 = vst [vmem:[#allocation82_spill] sm:$0xff] %v14209_v54  ;;  %v14223_v2 = vshll.u32 %v14209_v54, 16  ;;  %v14226_v9 = vshrl.u32 %v14209_v54, 16 }
  0x6b   : > { %11890 = vmatprep.mubr.msk.bf16.mxu0 %vm942_vm3, %v4395_v60  ;;  %v592_v60 = vor.u32 %v14104_v12, %v588_v43  ;;  %17791 = vst [vmem:[#allocation77_spill] sm:$0xff] %v14177_v28  ;;  %v600_v43 = vor.u32 %v14111_v53, %v596_v23  ;;  %v4413_v37 = vrot.slane %v14177_v28, 2 }
  0x6c   : > { %v4407_v33 = vsel %vm4308_vm4, %v4402_v10, %v4406_v20  ;;  %v620_v10 = vrot.slane %v14177_v28, 1  ;;  %17799 = vst [vmem:[#allocation85_spill] sm:$0xff] %v14223_v2  ;;  %17800 = vst [vmem:[#allocation86_spill] sm:$0xff] %v14226_v9 }
  0x6d   : > { %v597_v13 = vsel %vm393_vm2, %v592_v60, %v596_v23  ;;  %v608_v60 = vor.u32 %v14140_v61, %v604_v6 }
  0x6e   : > { %11339 = vmatmul.mubr.msk.bf16.gmra.mrb[40].mxu1 %vm942_vm3, %v573_v24  ;;  %v14172_v24 = vpack.c.bf16 %v231_v38, %v230_v62  ;;  %v4410_v62 = vor.u32 %v4409_v29, %v4408_v40 }
  0x6f   : > { %11342 = vmatprep.mubr.msk.bf16.mxu1 %vm942_vm3, %v581_v56  ;;  %v14180_v56 = vshrl.u32 %v14159_v41, 16 }
  0x70   : > { %17790 = vst [vmem:[#allocation76_spill] sm:$0xff] %v14172_v24  ;;  %v14186_v38 = vshll.u32 %v14172_v24, 16  ;;  %v14189_v12 = vshrl.u32 %v14172_v24, 16  ;;  %v4411_v29 = vsel %vm4308_vm4, %v4406_v20, %v4410_v62 }
  0x71   : > { %17792 = vst [vmem:[#allocation78_spill] sm:$0xff] %v14180_v56  ;;  %v4412_v22 = vrot.slane %v14180_v56, 1  ;;  %v624_v28 = vor.u32 %v14180_v56, %v620_v10 }
  0x72   : > { %11891 = vmatmul.mubr.msk.bf16.gmra.mrb[40].mxu0 %vm942_vm3, %v4399_v27  ;;  %17793 = vst [vmem:[#allocation79_spill] sm:$0xff] %v14186_v38  ;;  %17794 = vst [vmem:[#allocation80_spill] sm:$0xff] %v14189_v12  ;;  %v232_v27 = vld [vmem:[%s13709_s25 + $0x1e0] sm:$0xff]  ;;  %v4416_v23 = vrot.slane %v14189_v12, 1 }
  0x73   : > { %11894 = vmatprep.mubr.msk.bf16.mxu0 %vm942_vm3, %v4403_v14  ;;  %v612_v14 = vrot.slane %v14149_v39, 1  ;;  %v14204_v40 = vpack.c.bf16 %v233_v63, %v232_v27  ;;  %v605_v63 = vsel %vm393_vm2, %v600_v43, %v604_v6  ;;  %v238_v6 = vld [vmem:[%s13709_s25 + $0x210] sm:$0xff]  ;;  %v239_v43 = vld [vmem:[%s13709_s25 + $0x218] sm:$0xff] }
  0x75   : > { %17795 = vst [vmem:[#allocation81_spill] sm:$0xff] %v14204_v40  ;;  %v14216_v20 = vshll.u32 %v14204_v40, 16  ;;  %v14219_v27 = vshrl.u32 %v14204_v40, 16  ;;  %v613_v39 = vsel %vm393_vm2, %v608_v60, %v612_v14 }
  0x76   : > { %11343 = vmatmul.mubr.msk.bf16.gmra.mrb[44].mxu1 %vm942_vm3, %v589_v44  ;;  %v4417_v44 = vrot.slane %v14186_v38, 2 }
  0x77   : > { %11346 = vmatprep.mubr.msk.bf16.mxu1 %vm942_vm3, %v597_v13  ;;  %v4414_v13 = vor.u32 %v4413_v37, %v4412_v22  ;;  %17797 = vst [vmem:[#allocation83_spill] sm:$0xff] %v14216_v20  ;;  %17798 = vst [vmem:[#allocation84_spill] sm:$0xff] %v14219_v27  ;;  %v236_v22 = vld [vmem:[%s13709_s25 + $0x200] sm:$0xff]  ;;  %v237_v37 = vld [vmem:[%s13709_s25 + $0x208] sm:$0xff]  ;;  %v4420_v60 = vrot.slane %v14219_v27, 1 }
  0x78   : > { %v4418_v61 = vor.u32 %v4417_v44, %v4416_v23  ;;  %v4421_v23 = vrot.slane %v14216_v20, 2  ;;  %v628_v44 = vrot.slane %v14186_v38, 1  ;;  %v14240_v53 = vpack.c.bf16 %v237_v37, %v236_v22 }
  0x7a   : > { %11895 = vmatmul.mubr.msk.bf16.gmra.mrb[44].mxu0 %vm942_vm3, %v4407_v33  ;;  %v4415_v33 = vsel %vm4308_vm4, %v4410_v62, %v4414_v13  ;;  %17801 = vst [vmem:[#allocation87_spill] sm:$0xff] %v14240_v53  ;;  %v4419_v3 = vsel %vm4308_vm4, %v4414_v13, %v4418_v61  ;;  %v4424_v62 = vrot.slane %v14226_v9, 1  ;;  %v4422_v22 = vor.u32 %v4421_v23, %v4420_v60 }
  0x7b   : > { %11898 = vmatprep.mubr.msk.bf16.mxu0 %vm942_vm3, %v4411_v29  ;;  %v616_v29 = vor.u32 %v14152_v50, %v612_v14  ;;  %v4425_v14 = vrot.slane %v14223_v2, 2  ;;  %v629_v37 = vsel %vm393_vm2, %v624_v28, %v628_v44  ;;  %v14252_v13 = vshll.u32 %v14240_v53, 16 }
  0x7c   : > { %v14255_v38 = vshrl.u32 %v14240_v53, 16  ;;  %v636_v50 = vrot.slane %v14216_v20, 1  ;;  %v632_v28 = vor.u32 %v14189_v12, %v628_v44  ;;  %v644_v23 = vrot.slane %v14223_v2, 1 }
  0x7d   : > { %17803 = vst [vmem:[#allocation89_spill] sm:$0xff] %v14252_v13  ;;  %v4426_v56 = vor.u32 %v4425_v14, %v4424_v62  ;;  %v4423_v62 = vsel %vm4308_vm4, %v4418_v61, %v4422_v22  ;;  %v4429_v20 = vrot.slane %v14252_v13, 2  ;;  %v652_v12 = vrot.slane %v14252_v13, 1 }
  0x7e   : > { %11347 = vmatmul.mubr.msk.bf16.gmra.mrb[48].mxu1 %vm942_vm3, %v605_v63  ;;  %v14245_v63 = vpack.c.bf16 %v239_v43, %v238_v6  ;;  %17804 = vst [vmem:[#allocation90_spill] sm:$0xff] %v14255_v38  ;;  %v640_v60 = vor.u32 %v14219_v27, %v636_v50  ;;  %v4428_v14 = vrot.slane %v14255_v38, 1  ;;  %v637_v61 = vsel %vm393_vm2, %v632_v28, %v636_v50  ;;  %v244_v50 = vld [vmem:[%s13709_s25 + $0x240] sm:$0xff] }
  0x7f   : > { %11350 = vmatprep.mubr.msk.bf16.mxu1 %vm942_vm3, %v613_v39  ;;  %v621_v39 = vsel %vm393_vm2, %v616_v29, %v620_v10  ;;  %v240_v10 = vld [vmem:[%s13709_s25 + $0x220] sm:$0xff]  ;;  %v243_v29 = vld [vmem:[%s13709_s25 + $0x238] sm:$0xff]  ;;  %v4427_v47 = vsel %vm4308_vm4, %v4422_v22, %v4426_v56  ;;  %v656_v28 = vor.u32 %v14255_v38, %v652_v12 }
  0x80   : > { %17802 = vst [vmem:[#allocation88_spill] sm:$0xff] %v14245_v63  ;;  %v14259_v6 = vshll.u32 %v14245_v63, 16  ;;  %v14262_v43 = vshrl.u32 %v14245_v63, 16 }
  0x82   : > { %11899 = vmatmul.mubr.msk.bf16.gmra.mrb[48].mxu0 %vm942_vm3, %v4415_v33  ;;  %17805 = vst [vmem:[#allocation91_spill] sm:$0xff] %v14259_v6  ;;  %17806 = vst [vmem:[#allocation92_spill] sm:$0xff] %v14262_v43  ;;  %v242_v33 = vld [vmem:[%s13709_s25 + $0x230] sm:$0xff]  ;;  %v4432_v44 = vrot.slane %v14262_v43, 1 }
  0x83   : > { %11902 = vmatprep.mubr.msk.bf16.mxu0 %vm942_vm3, %v4419_v3  ;;  %v241_v3 = vld [vmem:[%s13709_s25 + $0x228] sm:$0xff]  ;;  %v14281_v27 = vpack.c.bf16 %v243_v29, %v242_v33 }
  0x84   : > { %v14276_v42 = vpack.c.bf16 %v241_v3, %v240_v10  ;;  %v645_v10 = vsel %vm393_vm2, %v640_v60, %v644_v23 }
  0x85   : > { %17808 = vst [vmem:[#allocation94_spill] sm:$0xff] %v14281_v27  ;;  %v14295_v33 = vshll.u32 %v14281_v27, 16  ;;  %v14298_v29 = vshrl.u32 %v14281_v27, 16 }
  0x86   : > { %11351 = vmatmul.mubr.msk.bf16.gmra.mrb[52].mxu1 %vm942_vm3, %v621_v39  ;;  %17807 = vst [vmem:[#allocation93_spill] sm:$0xff] %v14276_v42  ;;  %v4433_v39 = vrot.slane %v14259_v6, 2  ;;  %v14288_v3 = vshll.u32 %v14276_v42, 16  ;;  %v14291_v22 = vshrl.u32 %v14276_v42, 16 }
  0x87   : > { %11354 = vmatprep.mubr.msk.bf16.mxu1 %vm942_vm3, %v629_v37  ;;  %v4430_v37 = vor.u32 %v4429_v20, %v4428_v14  ;;  %17811 = vst [vmem:[#allocation97_spill] sm:$0xff] %v14295_v33  ;;  %17812 = vst [vmem:[#allocation98_spill] sm:$0xff] %v14298_v29  ;;  %v648_v20 = vor.u32 %v14226_v9, %v644_v23  ;;  %v4440_v23 = vrot.slane %v14298_v29, 1  ;;  %v4441_v13 = vrot.slane %v14295_v33, 2  ;;  %v247_v9 = vld [vmem:[%s13709_s25 + $0x258] sm:$0xff] }
  0x88   : > { %17809 = vst [vmem:[#allocation95_spill] sm:$0xff] %v14288_v3  ;;  %17810 = vst [vmem:[#allocation96_spill] sm:$0xff] %v14291_v22  ;;  %v4434_v2 = vor.u32 %v4433_v39, %v4432_v44  ;;  %v4437_v14 = vrot.slane %v14288_v3, 2 }
  0x89   : > { %v4431_v60 = vsel %vm4308_vm4, %v4426_v56, %v4430_v37  ;;  %v653_v56 = vsel %vm393_vm2, %v648_v20, %v652_v12 }
  0x8a   : > { %11903 = vmatmul.mubr.msk.bf16.gmra.mrb[52].mxu0 %vm942_vm3, %v4423_v62  ;;  %v4436_v62 = vrot.slane %v14291_v22, 1  ;;  %v4435_v39 = vsel %vm4308_vm4, %v4430_v37, %v4434_v2 }
  0x8b   : > { %11906 = vmatprep.mubr.msk.bf16.mxu0 %vm942_vm3, %v4427_v47  ;;  %v245_v47 = vld [vmem:[%s13709_s25 + $0x248] sm:$0xff] }
  0x8c   : > { %v14309_v44 = vpack.c.bf16 %v245_v47, %v244_v50  ;;  %v4442_v47 = vor.u32 %v4441_v13, %v4440_v23 }
  0x8e   : > { %11355 = vmatmul.mubr.msk.bf16.gmra.mrb[56].mxu1 %vm942_vm3, %v637_v61  ;;  %17813 = vst [vmem:[#allocation99_spill] sm:$0xff] %v14309_v44  ;;  %v660_v61 = vrot.slane %v14259_v6, 1  ;;  %v14319_v38 = vshll.u32 %v14309_v44, 16  ;;  %v14322_v50 = vshrl.u32 %v14309_v44, 16  ;;  %v246_v6 = vld [vmem:[%s13709_s25 + $0x250] sm:$0xff] }
  0x8f   : > { %11358 = vmatprep.mubr.msk.bf16.mxu1 %vm942_vm3, %v645_v10  ;;  %v4438_v10 = vor.u32 %v4437_v14, %v4436_v62  ;;  %v14337_v23 = vpack.c.bf16 %v247_v9, %v246_v6  ;;  %v250_v9 = vld [vmem:[%s13709_s25 + $0x270] sm:$0xff]  ;;  %v251_v6 = vld [vmem:[%s13709_s25 + $0x278] sm:$0xff] }
  0x90   : > { %17814 = vst [vmem:[#allocation100_spill] sm:$0xff] %v14319_v38  ;;  %17815 = vst [vmem:[#allocation101_spill] sm:$0xff] %v14322_v50  ;;  %v661_v37 = vsel %vm393_vm2, %v656_v28, %v660_v61  ;;  %v664_v20 = vor.u32 %v14262_v43, %v660_v61  ;;  %v4444_v62 = vrot.slane %v14322_v50, 1  ;;  %v4445_v14 = vrot.slane %v14319_v38, 2 }
  0x91   : > { %v4439_v12 = vsel %vm4308_vm4, %v4434_v2, %v4438_v10  ;;  %v4443_v13 = vsel %vm4308_vm4, %v4438_v10, %v4442_v47  ;;  %17816 = vst [vmem:[#allocation102_spill] sm:$0xff] %v14337_v23  ;;  %v5519_v10 = vrot.slane %v13725_v21, 2 }
  0x92   : > { %11907 = vmatmul.mubr.msk.bf16.gmra.mrb[56].mxu0 %vm942_vm3, %v4431_v60  ;;  %v668_v60 = vrot.slane %v14288_v3, 1  ;;  %v14342_v61 = vor.u32 %v4445_v14, %v4444_v62 }
  0x93   : > { %11910 = vmatprep.mubr.msk.bf16.mxu0 %vm942_vm3, %v4435_v39  ;;  %v676_v39 = vrot.slane %v14295_v33, 1  ;;  %v14350_v33 = vshll.u32 %v14337_v23, 16 }
  0x94   : > { %v672_v28 = vor.u32 %v14291_v22, %v668_v60  ;;  %v669_v2 = vsel %vm393_vm2, %v664_v20, %v668_v60  ;;  %17817 = vst [vmem:[#allocation103_spill] sm:$0xff] %v14342_v61  ;;  %v5520_v22 = vrot.slane %v13730_v25, 2  ;;  %v684_v60 = vrot.slane %v14319_v38, 1 }
  0x95   : > { %17818 = vst [vmem:[#allocation104_spill] sm:$0xff] %v14350_v33  ;;  %v4447_v20 = vsel %vm4308_vm4, %v4442_v47, %v14342_v61  ;;  %v680_v62 = vor.u32 %v14298_v29, %v676_v39  ;;  %v5522_v47 = vrot.slane %v13739_v34, 2 }
  0x96   : > { %11359 = vmatmul.mubr.msk.bf16.gmra.mrb[60].mxu1 %vm942_vm3, %v653_v56  ;;  %v248_v56 = vld [vmem:[%s13709_s25 + $0x260] sm:$0xff]  ;;  %v677_v3 = vsel %vm393_vm2, %v672_v28, %v676_v39  ;;  %v5521_v14 = vsel %vm5518_vm5, %v5519_v10, %v5520_v22  ;;  %v692_v28 = vrot.slane %v14350_v33, 1  ;;  %v14375_v39 = vshrl.u32 %v14337_v23, 16  ;;  %v253_v10 = vld [vmem:[%s13709_s25 + $0x288] sm:$0xff]  ;;  %v255_v33 = vld [vmem:[%s13709_s25 + $0x298] sm:$0xff] }
  0x97   : > { %11362 = vmatprep.mubr.msk.bf16.mxu1 %vm942_vm3, %v661_v37  ;;  %v249_v37 = vld [vmem:[%s13709_s25 + $0x268] sm:$0xff] }
  0x98   : > { %17822 = vst [vmem:[#allocation108_spill] sm:$0xff] %v14375_v39  ;;  %v696_v38 = vor.u32 %v14375_v39, %v692_v28 }
  0x9a   : > { %11911 = vmatmul.mubr.msk.bf16.gmra.mrb[60].mxu0 %vm942_vm3, %v4439_v12  ;;  %v14356_v12 = vpack.c.bf16 %v249_v37, %v248_v56  ;;  %v252_v37 = vld [vmem:[%s13709_s25 + $0x280] sm:$0xff] }
  0x9b   : > { %11914 = vmatprep.mubr.msk.bf16.mxu0 %vm942_vm3, %v4443_v13  ;;  %v688_v13 = vor.u32 %v14322_v50, %v684_v60 }
  0x9c   : > { %17819 = vst [vmem:[#allocation105_spill] sm:$0xff] %v14356_v12  ;;  %v14369_v56 = vshll.u32 %v14356_v12, 16 }
  0x9d   : > { %v693_v61 = vsel %vm393_vm2, %v688_v13, %v692_v28  ;;  %v5523_v13 = vsel %vm5518_vm5, %v5520_v22, %v5522_v47 }
  0x9e   : > { %11363 = vmatmul.mubr.msk.bf16.gmra.mrb[64].mxu1 %vm942_vm3, %v669_v2  ;;  %v14365_v2 = vpack.c.bf16 %v251_v6, %v250_v9  ;;  %17821 = vst [vmem:[#allocation107_spill] sm:$0xff] %v14369_v56  ;;  %v5524_v9 = vrot.slane %v13756_v57, 2  ;;  %v14382_v6 = vshrl.u32 %v14356_v12, 16 }
  0x9f   : > { %11366 = vmatprep.mubr.msk.bf16.mxu1 %vm942_vm3, %v677_v3  ;;  %v685_v3 = vsel %vm393_vm2, %v680_v62, %v684_v60  ;;  %v700_v60 = vrot.slane %v14369_v56, 1  ;;  %v14391_v62 = vpack.c.bf16 %v253_v10, %v252_v37 }
  0xa0   : > { %17820 = vst [vmem:[#allocation106_spill] sm:$0xff] %v14365_v2  ;;  %17823 = vst [vmem:[#allocation109_spill] sm:$0xff] %v14382_v6  ;;  %v14397_v50 = vsel %vm5518_vm5, %v5522_v47, %v5524_v9  ;;  %v14413_v28 = vshrl.u32 %v14365_v2, 16  ;;  %v257_v47 = vld [vmem:[%s13709_s25 + $0x2a8] sm:$0xff] }
  0xa1   : > { %17825 = vst [vmem:[#allocation111_spill] sm:$0xff] %v14391_v62  ;;  %17826 = vst [vmem:[#allocation112_spill] sm:$0xff] %v14397_v50  ;;  %v704_v29 = vor.u32 %v14382_v6, %v700_v60  ;;  %v14405_v37 = vshll.u32 %v14391_v62, 16  ;;  %v701_v22 = vsel %vm393_vm2, %v696_v38, %v700_v60  ;;  %v10189_v38 = vld [vmem:[%s17334_s1 + $0x4] sm:$0x3]  ;;  %v258_v60 = vld [vmem:[%s13709_s25 + $0x2b0] sm:$0xff] }
  0xa2   : > { %11915 = vmatmul.mubr.msk.bf16.gmra.mrb[64].mxu0 %vm942_vm3, %v4447_v20  ;;  %v14385_v20 = vshll.u32 %v14365_v2, 16  ;;  %17829 = vst [vmem:[#allocation115_spill] sm:$0xff] %v14413_v28  ;;  %v14440_v7 = vand.u32 %v10189_v38, %v13683_v4  ;;  %v261_v38 = vld [vmem:[%s13709_s25 + $0x2c8] sm:$0xff] }
  0xa3   : > { %11988 = vmatprep.mubr.msk.bf16.mxu0 %vm942_vm3, %v5521_v14  ;;  %v254_v14 = vld [vmem:[%s13709_s25 + $0x290] sm:$0xff]  ;;  %17828 = vst [vmem:[#allocation114_spill] sm:$0xff] %v14405_v37  ;;  %v716_v56 = vrot.slane %v14405_v37, 1 }
  0xa4   : > { %17824 = vst [vmem:[#allocation110_spill] sm:$0xff] %v14385_v20  ;;  %v708_v43 = vrot.slane %v14385_v20, 1  ;;  %v259_v20 = vld [vmem:[%s13709_s25 + $0x2b8] sm:$0xff]  ;;  %11572 = vmatprep.subr.bf16.mxu1 %v14440_v7 }
  0xa6   : > { %11367 = vmatmul.mubr.msk.bf16.gmra.mrb[68].mxu1 %vm942_vm3, %v685_v3  ;;  %v14401_v3 = vpack.c.bf16 %v255_v33, %v254_v14  ;;  %v256_v33 = vld [vmem:[%s13709_s25 + $0x2a0] sm:$0xff]  ;;  %v709_v10 = vsel %vm393_vm2, %v704_v29, %v708_v43  ;;  %v5528_v14 = vrot.slane %v13782_v11, 2  ;;  %v712_v39 = vor.u32 %v14413_v28, %v708_v43  ;;  %v262_v28 = vld [vmem:[%s13709_s25 + $0x2d0] sm:$0xff] }
  0xa7   : > { %11370 = vmatprep.mubr.msk.bf16.mxu1 %vm942_vm3, %v693_v61  ;;  %v5526_v61 = vrot.slane %v13764_v0, 2  ;;  %v14432_v6 = vpack.c.bf16 %v257_v47, %v256_v33  ;;  %v14447_v47 = vpack.c.bf16 %v259_v20, %v258_v60  ;;  %v260_v20 = vld [vmem:[%s13709_s25 + $0x2c0] sm:$0xff] }
  0xa8   : > { %17827 = vst [vmem:[#allocation113_spill] sm:$0xff] %v14401_v3 }
  0xa9   : > { %17832 = vst [vmem:[#allocation118_spill] sm:$0xff] %v14432_v6  ;;  %v14435_v29 = vsel %vm5518_vm5, %v5524_v9, %v5526_v61  ;;  %17835 = vst [vmem:[#allocation121_spill] sm:$0xff] %v14447_v47  ;;  %v14453_v43 = vshll.u32 %v14432_v6, 16  ;;  %v717_v9 = vsel %vm393_vm2, %v712_v39, %v716_v56  ;;  %v14467_v37 = vshrl.u32 %v14432_v6, 16 }
  0xaa   : > { %11989 = vmatmul.mubr.msk.bf16.vlgmr.msra.gmra.mrb[0].mxu0 %vm942_vm3, %v5523_v13  ;;  %v14420_v13 = vshrl.u32 %v14391_v62, 16  ;;  %17833 = vst [vmem:[#allocation119_spill] sm:$0xff] %v14435_v29  ;;  %v14476_v39 = vpack.c.bf16 %v261_v38, %v260_v20  ;;  %v14500_v20 = vshrl.u32 %v14447_v47, 16  ;;  %v264_v38 = vld [vmem:[%s13709_s25 + $0x2e0] sm:$0xff] }
  0xab   : > { %12125 = vmatpush3.bf16.msra.mxu0 %v14162_v30  ;;  %11992 = vmatprep.mubr.msk.bf16.mxu0 %vm942_vm3, %v14397_v50  ;;  %v14423_v30 = vshll.u32 %v14401_v3, 16  ;;  %v14443_v50 = vsel %vm5518_vm5, %v5526_v61, %v5528_v14  ;;  %17836 = vst [vmem:[#allocation122_spill] sm:$0xff] %v14453_v43  ;;  %v5530_v61 = vrot.slane %v13805_v32, 2  ;;  %17838 = vst [vmem:[#allocation124_spill] sm:$0xff] %v14467_v37 }
  0xac   : > { %17830 = vst [vmem:[#allocation116_spill] sm:$0xff] %v14420_v13  ;;  %17834 = vst [vmem:[#allocation120_spill] sm:$0xff] %v14443_v50 }
  0xad   : > { %17831 = vst [vmem:[#allocation117_spill] sm:$0xff] %v14423_v30  ;;  %v724_v33 = vrot.slane %v14423_v30, 1  ;;  %v5532_v30 = vrot.slane %v13824_v45, 2  ;;  %17840 = vst [vmem:[#allocation126_spill] sm:$0xff] %v14476_v39 }
  0xae   : > { %11371 = vmatmul.mubr.msk.bf16.gmra.mrb[72].mxu1 %vm942_vm3, %v701_v22  ;;  %v720_v22 = vor.u32 %v14420_v13, %v716_v56  ;;  %v14470_v13 = vshll.u32 %v14447_v47, 16  ;;  %v732_v56 = vrot.slane %v14453_v43, 1  ;;  %17845 = vst [vmem:[#allocation131_spill] sm:$0xff] %v14500_v20 }
  0xaf   : > { %11374 = vmatprep.mubr.msk.bf16.mxu1 %vm942_vm3, %v709_v10  ;;  %v14460_v10 = vshrl.u32 %v14401_v3, 16  ;;  %v14484_v45 = vsel %vm5518_vm5, %v5530_v61, %v5532_v30 }
  0xb0   : > { %v725_v60 = vsel %vm393_vm2, %v720_v22, %v724_v33  ;;  %17839 = vst [vmem:[#allocation125_spill] sm:$0xff] %v14470_v13  ;;  %v14479_v22 = vsel %vm5518_vm5, %v5528_v14, %v5530_v61  ;;  %17842 = vst [vmem:[#allocation128_spill] sm:$0xff] %v14484_v45  ;;  %v736_v32 = vor.u32 %v14467_v37, %v732_v56  ;;  %v14493_v14 = vshll.u32 %v14476_v39, 16 }
  0xb1   : > { %17837 = vst [vmem:[#allocation123_spill] sm:$0xff] %v14460_v10  ;;  %17841 = vst [vmem:[#allocation127_spill] sm:$0xff] %v14479_v22  ;;  %v5534_v61 = vrot.slane %v13826_v46, 2 }
  0xb2   : > { %11993 = vmatmul.mubr.msk.bf16.gmra.mrb[4].mxu0 %vm942_vm3, %v14435_v29  ;;  %v728_v29 = vor.u32 %v14460_v10, %v724_v33  ;;  %17844 = vst [vmem:[#allocation130_spill] sm:$0xff] %v14493_v14  ;;  %v266_v10 = vld [vmem:[%s13709_s25 + $0x2f0] sm:$0xff] }
  0xb3   : > { %11996 = vmatprep.mubr.msk.bf16.mxu0 %vm942_vm3, %v14443_v50  ;;  %v263_v50 = vld [vmem:[%s13709_s25 + $0x2d8] sm:$0xff] }
  0xb4   : > { %v14488_v43 = vpack.c.bf16 %v263_v50, %v262_v28  ;;  %v733_v33 = vsel %vm393_vm2, %v728_v29, %v732_v56  ;;  %v5536_v28 = vrot.slane %v13845_v59, 2  ;;  %v748_v29 = vrot.slane %v14493_v14, 1 }
  0xb6   : > { %11375 = vmatmul.mubr.msk.bf16.gmra.mrb[76].mxu1 %vm942_vm3, %v717_v9  ;;  %v740_v9 = vrot.slane %v14470_v13, 1  ;;  %17843 = vst [vmem:[#allocation129_spill] sm:$0xff] %v14488_v43  ;;  %v14507_v13 = vshrl.u32 %v14476_v39, 16  ;;  %v14510_v37 = vshll.u32 %v14488_v43, 16  ;;  %v14524_v59 = vsel %vm5518_vm5, %v5534_v61, %v5536_v28 }
  0xb7   : > { %11378 = vmatprep.mubr.msk.bf16.mxu1 %vm942_vm3, %v725_v60  ;;  %v265_v60 = vld [vmem:[%s13709_s25 + $0x2e8] sm:$0xff]  ;;  %17850 = vst [vmem:[#allocation136_spill] sm:$0xff] %v14524_v59 }
  0xb8   : > { %v741_v50 = vsel %vm393_vm2, %v736_v32, %v740_v9  ;;  %17846 = vst [vmem:[#allocation132_spill] sm:$0xff] %v14507_v13  ;;  %17847 = vst [vmem:[#allocation133_spill] sm:$0xff] %v14510_v37  ;;  %v14516_v56 = vpack.c.bf16 %v265_v60, %v264_v38  ;;  %v14519_v32 = vsel %vm5518_vm5, %v5532_v30, %v5534_v61  ;;  %v5538_v61 = vrot.slane %v13865_v19, 2  ;;  %v268_v60 = vld [vmem:[%s13709_s25 + $0x300] sm:$0xff] }
  0xb9   : > { %17849 = vst [vmem:[#allocation135_spill] sm:$0xff] %v14519_v32  ;;  %v752_v46 = vor.u32 %v14507_v13, %v748_v29  ;;  %v14540_v38 = vshrl.u32 %v14488_v43, 16 }
  0xba   : > { %11997 = vmatmul.mubr.msk.bf16.gmra.mrb[8].mxu0 %vm942_vm3, %v14479_v22  ;;  %17848 = vst [vmem:[#allocation134_spill] sm:$0xff] %v14516_v56  ;;  %v744_v22 = vor.u32 %v14500_v20, %v740_v9  ;;  %v14533_v30 = vshll.u32 %v14516_v56, 16  ;;  %v270_v20 = vld [vmem:[%s13709_s25 + $0x310] sm:$0xff] }
  0xbb   : > { %12000 = vmatprep.mubr.msk.bf16.mxu0 %vm942_vm3, %v14484_v45  ;;  %v267_v45 = vld [vmem:[%s13709_s25 + $0x2f8] sm:$0xff]  ;;  %17853 = vst [vmem:[#allocation139_spill] sm:$0xff] %v14540_v38 }
  0xbc   : > { %v14528_v14 = vpack.c.bf16 %v267_v45, %v266_v10  ;;  %17852 = vst [vmem:[#allocation138_spill] sm:$0xff] %v14533_v30  ;;  %v749_v9 = vsel %vm393_vm2, %v744_v22, %v748_v29  ;;  %v5540_v10 = vrot.slane %v13878_v36, 2  ;;  %v764_v22 = vrot.slane %v14533_v30, 1 }
  0xbe   : > { %11379 = vmatmul.mubr.msk.bf16.gmra.mrb[80].mxu1 %vm942_vm3, %v733_v33  ;;  %v756_v33 = vrot.slane %v14510_v37, 1  ;;  %17851 = vst [vmem:[#allocation137_spill] sm:$0xff] %v14528_v14  ;;  %v14547_v37 = vshrl.u32 %v14516_v56, 16  ;;  %v14550_v13 = vshll.u32 %v14528_v14, 16  ;;  %v14564_v36 = vsel %vm5518_vm5, %v5538_v61, %v5540_v10 }
  0xbf   : > { %11382 = vmatprep.mubr.msk.bf16.mxu1 %vm942_vm3, %v741_v50  ;;  %v269_v50 = vld [vmem:[%s13709_s25 + $0x308] sm:$0xff]  ;;  %17858 = vst [vmem:[#allocation144_spill] sm:$0xff] %v14564_v36 }
  0xc0   : > { %v757_v45 = vsel %vm393_vm2, %v752_v46, %v756_v33  ;;  %17854 = vst [vmem:[#allocation140_spill] sm:$0xff] %v14547_v37  ;;  %17855 = vst [vmem:[#allocation141_spill] sm:$0xff] %v14550_v13  ;;  %v14556_v29 = vpack.c.bf16 %v269_v50, %v268_v60  ;;  %v14559_v46 = vsel %vm5518_vm5, %v5536_v28, %v5538_v61  ;;  %v5542_v61 = vrot.slane %v13909_v16, 2  ;;  %v272_v50 = vld [vmem:[%s13709_s25 + $0x320] sm:$0xff] }
  0xc1   : > { %17857 = vst [vmem:[#allocation143_spill] sm:$0xff] %v14559_v46  ;;  %v768_v19 = vor.u32 %v14547_v37, %v764_v22  ;;  %v14580_v60 = vshrl.u32 %v14528_v14, 16 }
  0xc2   : > { %12001 = vmatmul.mubr.msk.bf16.gmra.mrb[12].mxu0 %vm942_vm3, %v14519_v32  ;;  %17856 = vst [vmem:[#allocation142_spill] sm:$0xff] %v14556_v29  ;;  %v760_v32 = vor.u32 %v14540_v38, %v756_v33  ;;  %v14573_v28 = vshll.u32 %v14556_v29, 16  ;;  %v274_v38 = vld [vmem:[%s13709_s25 + $0x330] sm:$0xff] }
  0xc3   : > { %12004 = vmatprep.mubr.msk.bf16.mxu0 %vm942_vm3, %v14524_v59  ;;  %v271_v59 = vld [vmem:[%s13709_s25 + $0x318] sm:$0xff]  ;;  %17861 = vst [vmem:[#allocation147_spill] sm:$0xff] %v14580_v60 }
  0xc4   : > { %v14568_v30 = vpack.c.bf16 %v271_v59, %v270_v20  ;;  %17860 = vst [vmem:[#allocation146_spill] sm:$0xff] %v14573_v28  ;;  %v765_v33 = vsel %vm393_vm2, %v760_v32, %v764_v22  ;;  %v5544_v20 = vrot.slane %v13914_v26, 2  ;;  %v780_v32 = vrot.slane %v14573_v28, 1 }
  0xc6   : > { %11383 = vmatmul.mubr.msk.bf16.gmra.mrb[84].mxu1 %vm942_vm3, %v749_v9  ;;  %v772_v9 = vrot.slane %v14550_v13, 1  ;;  %17859 = vst [vmem:[#allocation145_spill] sm:$0xff] %v14568_v30  ;;  %v14587_v13 = vshrl.u32 %v14556_v29, 16  ;;  %v14590_v37 = vshll.u32 %v14568_v30, 16  ;;  %v14604_v26 = vsel %vm5518_vm5, %v5542_v61, %v5544_v20 }
  0xc7   : > { %11386 = vmatprep.mubr.msk.bf16.mxu1 %vm942_vm3, %v757_v45  ;;  %v273_v45 = vld [vmem:[%s13709_s25 + $0x328] sm:$0xff]  ;;  %17866 = vst [vmem:[#allocation152_spill] sm:$0xff] %v14604_v26 }
  0xc8   : > { %v773_v59 = vsel %vm393_vm2, %v768_v19, %v772_v9  ;;  %17862 = vst [vmem:[#allocation148_spill] sm:$0xff] %v14587_v13  ;;  %17863 = vst [vmem:[#allocation149_spill] sm:$0xff] %v14590_v37  ;;  %v14596_v22 = vpack.c.bf16 %v273_v45, %v272_v50  ;;  %v14599_v19 = vsel %vm5518_vm5, %v5540_v10, %v5542_v61  ;;  %v5546_v61 = vrot.slane %v13945_v1, 2  ;;  %v276_v45 = vld [vmem:[%s13709_s25 + $0x340] sm:$0xff] }
  0xc9   : > { %17865 = vst [vmem:[#allocation151_spill] sm:$0xff] %v14599_v19  ;;  %v784_v16 = vor.u32 %v14587_v13, %v780_v32  ;;  %v14620_v50 = vshrl.u32 %v14568_v30, 16 }
  0xca   : > { %12005 = vmatmul.mubr.msk.bf16.gmra.mrb[16].mxu0 %vm942_vm3, %v14559_v46  ;;  %17864 = vst [vmem:[#allocation150_spill] sm:$0xff] %v14596_v22  ;;  %v776_v46 = vor.u32 %v14580_v60, %v772_v9  ;;  %v14613_v10 = vshll.u32 %v14596_v22, 16  ;;  %v278_v60 = vld [vmem:[%s13709_s25 + $0x350] sm:$0xff] }
  0xcb   : > { %12008 = vmatprep.mubr.msk.bf16.mxu0 %vm942_vm3, %v14564_v36  ;;  %v275_v36 = vld [vmem:[%s13709_s25 + $0x338] sm:$0xff]  ;;  %17869 = vst [vmem:[#allocation155_spill] sm:$0xff] %v14620_v50 }
  0xcc   : > { %v14608_v28 = vpack.c.bf16 %v275_v36, %v274_v38  ;;  %17868 = vst [vmem:[#allocation154_spill] sm:$0xff] %v14613_v10  ;;  %v781_v9 = vsel %vm393_vm2, %v776_v46, %v780_v32  ;;  %v5548_v38 = vrot.slane %v13950_v17, 2  ;;  %v796_v46 = vrot.slane %v14613_v10, 1 }
  0xce   : > { %11387 = vmatmul.mubr.msk.bf16.gmra.mrb[88].mxu1 %vm942_vm3, %v765_v33  ;;  %v788_v33 = vrot.slane %v14590_v37, 1  ;;  %17867 = vst [vmem:[#allocation153_spill] sm:$0xff] %v14608_v28  ;;  %v14627_v37 = vshrl.u32 %v14596_v22, 16  ;;  %v14630_v13 = vshll.u32 %v14608_v28, 16  ;;  %v14644_v17 = vsel %vm5518_vm5, %v5546_v61, %v5548_v38 }
  0xcf   : > { %11390 = vmatprep.mubr.msk.bf16.mxu1 %vm942_vm3, %v773_v59  ;;  %v277_v59 = vld [vmem:[%s13709_s25 + $0x348] sm:$0xff]  ;;  %17874 = vst [vmem:[#allocation160_spill] sm:$0xff] %v14644_v17 }
  0xd0   : > { %v789_v36 = vsel %vm393_vm2, %v784_v16, %v788_v33  ;;  %17870 = vst [vmem:[#allocation156_spill] sm:$0xff] %v14627_v37  ;;  %17871 = vst [vmem:[#allocation157_spill] sm:$0xff] %v14630_v13  ;;  %v14636_v32 = vpack.c.bf16 %v277_v59, %v276_v45  ;;  %v14639_v16 = vsel %vm5518_vm5, %v5544_v20, %v5546_v61  ;;  %v5550_v61 = vrot.slane %v13981_v48, 2  ;;  %v280_v59 = vld [vmem:[%s13709_s25 + $0x360] sm:$0xff] }
  0xd1   : > { %17873 = vst [vmem:[#allocation159_spill] sm:$0xff] %v14639_v16  ;;  %v800_v1 = vor.u32 %v14627_v37, %v796_v46  ;;  %v14660_v45 = vshrl.u32 %v14608_v28, 16 }
  0xd2   : > { %12009 = vmatmul.mubr.msk.bf16.gmra.mrb[20].mxu0 %vm942_vm3, %v14599_v19  ;;  %17872 = vst [vmem:[#allocation158_spill] sm:$0xff] %v14636_v32  ;;  %v792_v19 = vor.u32 %v14620_v50, %v788_v33  ;;  %v14653_v20 = vshll.u32 %v14636_v32, 16  ;;  %v282_v50 = vld [vmem:[%s13709_s25 + $0x370] sm:$0xff] }
  0xd3   : > { %12012 = vmatprep.mubr.msk.bf16.mxu0 %vm942_vm3, %v14604_v26  ;;  %v279_v26 = vld [vmem:[%s13709_s25 + $0x358] sm:$0xff]  ;;  %17877 = vst [vmem:[#allocation163_spill] sm:$0xff] %v14660_v45 }
  0xd4   : > { %v14648_v10 = vpack.c.bf16 %v279_v26, %v278_v60  ;;  %17876 = vst [vmem:[#allocation162_spill] sm:$0xff] %v14653_v20  ;;  %v797_v33 = vsel %vm393_vm2, %v792_v19, %v796_v46  ;;  %v5552_v60 = vrot.slane %v13986_v35, 2  ;;  %v812_v19 = vrot.slane %v14653_v20, 1 }
  0xd6   : > { %11391 = vmatmul.mubr.msk.bf16.gmra.mrb[92].mxu1 %vm942_vm3, %v781_v9  ;;  %v804_v9 = vrot.slane %v14630_v13, 1  ;;  %17875 = vst [vmem:[#allocation161_spill] sm:$0xff] %v14648_v10  ;;  %v14667_v13 = vshrl.u32 %v14636_v32, 16  ;;  %v14670_v37 = vshll.u32 %v14648_v10, 16  ;;  %v14684_v35 = vsel %vm5518_vm5, %v5550_v61, %v5552_v60 }
  0xd7   : > { %11394 = vmatprep.mubr.msk.bf16.mxu1 %vm942_vm3, %v789_v36  ;;  %v281_v36 = vld [vmem:[%s13709_s25 + $0x368] sm:$0xff]  ;;  %17882 = vst [vmem:[#allocation168_spill] sm:$0xff] %v14684_v35 }
  0xd8   : > { %v805_v26 = vsel %vm393_vm2, %v800_v1, %v804_v9  ;;  %17878 = vst [vmem:[#allocation164_spill] sm:$0xff] %v14667_v13  ;;  %17879 = vst [vmem:[#allocation165_spill] sm:$0xff] %v14670_v37  ;;  %v14676_v46 = vpack.c.bf16 %v281_v36, %v280_v59  ;;  %v14679_v1 = vsel %vm5518_vm5, %v5548_v38, %v5550_v61  ;;  %v5554_v61 = vrot.slane %v14012_v8, 2  ;;  %v284_v36 = vld [vmem:[%s13709_s25 + $0x380] sm:$0xff] }
  0xd9   : > { %17881 = vst [vmem:[#allocation167_spill] sm:$0xff] %v14679_v1  ;;  %v816_v48 = vor.u32 %v14667_v13, %v812_v19  ;;  %v14700_v59 = vshrl.u32 %v14648_v10, 16 }
  0xda   : > { %12013 = vmatmul.mubr.msk.bf16.gmra.mrb[24].mxu0 %vm942_vm3, %v14639_v16  ;;  %17880 = vst [vmem:[#allocation166_spill] sm:$0xff] %v14676_v46  ;;  %v808_v16 = vor.u32 %v14660_v45, %v804_v9  ;;  %v14693_v38 = vshll.u32 %v14676_v46, 16  ;;  %v286_v45 = vld [vmem:[%s13709_s25 + $0x390] sm:$0xff] }
  0xdb   : > { %12016 = vmatprep.mubr.msk.bf16.mxu0 %vm942_vm3, %v14644_v17  ;;  %v283_v17 = vld [vmem:[%s13709_s25 + $0x378] sm:$0xff]  ;;  %17885 = vst [vmem:[#allocation171_spill] sm:$0xff] %v14700_v59 }
  0xdc   : > { %v14688_v20 = vpack.c.bf16 %v283_v17, %v282_v50  ;;  %17884 = vst [vmem:[#allocation170_spill] sm:$0xff] %v14693_v38  ;;  %v813_v9 = vsel %vm393_vm2, %v808_v16, %v812_v19  ;;  %v5556_v50 = vrot.slane %v14022_v49, 2  ;;  %v828_v16 = vrot.slane %v14693_v38, 1 }
  0xde   : > { %11395 = vmatmul.mubr.msk.bf16.gmra.mrb[96].mxu1 %vm942_vm3, %v797_v33  ;;  %v820_v33 = vrot.slane %v14670_v37, 1  ;;  %17883 = vst [vmem:[#allocation169_spill] sm:$0xff] %v14688_v20  ;;  %v14707_v37 = vshrl.u32 %v14676_v46, 16  ;;  %v14710_v13 = vshll.u32 %v14688_v20, 16  ;;  %v14724_v49 = vsel %vm5518_vm5, %v5554_v61, %v5556_v50 }
  0xdf   : > { %11398 = vmatprep.mubr.msk.bf16.mxu1 %vm942_vm3, %v805_v26  ;;  %v285_v26 = vld [vmem:[%s13709_s25 + $0x388] sm:$0xff]  ;;  %17890 = vst [vmem:[#allocation176_spill] sm:$0xff] %v14724_v49 }
  0xe0   : > { %v821_v17 = vsel %vm393_vm2, %v816_v48, %v820_v33  ;;  %17886 = vst [vmem:[#allocation172_spill] sm:$0xff] %v14707_v37  ;;  %17887 = vst [vmem:[#allocation173_spill] sm:$0xff] %v14710_v13  ;;  %v14716_v19 = vpack.c.bf16 %v285_v26, %v284_v36  ;;  %v14719_v48 = vsel %vm5518_vm5, %v5552_v60, %v5554_v61  ;;  %v5558_v61 = vrot.slane %v14053_v5, 2  ;;  %v288_v26 = vld [vmem:[%s13709_s25 + $0x3a0] sm:$0xff] }
  0xe1   : > { %17889 = vst [vmem:[#allocation175_spill] sm:$0xff] %v14719_v48  ;;  %v832_v8 = vor.u32 %v14707_v37, %v828_v16  ;;  %v14740_v36 = vshrl.u32 %v14688_v20, 16 }
  0xe2   : > { %12017 = vmatmul.mubr.msk.bf16.gmra.mrb[28].mxu0 %vm942_vm3, %v14679_v1  ;;  %17888 = vst [vmem:[#allocation174_spill] sm:$0xff] %v14716_v19  ;;  %v824_v1 = vor.u32 %v14700_v59, %v820_v33  ;;  %v14733_v60 = vshll.u32 %v14716_v19, 16  ;;  %v290_v59 = vld [vmem:[%s13709_s25 + $0x3b0] sm:$0xff] }
  0xe3   : > { %12020 = vmatprep.mubr.msk.bf16.mxu0 %vm942_vm3, %v14684_v35  ;;  %v287_v35 = vld [vmem:[%s13709_s25 + $0x398] sm:$0xff]  ;;  %17893 = vst [vmem:[#allocation179_spill] sm:$0xff] %v14740_v36 }
  0xe4   : > { %v14728_v38 = vpack.c.bf16 %v287_v35, %v286_v45  ;;  %17892 = vst [vmem:[#allocation178_spill] sm:$0xff] %v14733_v60  ;;  %v829_v33 = vsel %vm393_vm2, %v824_v1, %v828_v16  ;;  %v5560_v45 = vrot.slane %v14058_v52, 2  ;;  %v844_v1 = vrot.slane %v14733_v60, 1 }
  0xe6   : > { %11399 = vmatmul.mubr.msk.bf16.gmra.mrb[100].mxu1 %vm942_vm3, %v813_v9  ;;  %v836_v9 = vrot.slane %v14710_v13, 1  ;;  %17891 = vst [vmem:[#allocation177_spill] sm:$0xff] %v14728_v38  ;;  %v14747_v13 = vshrl.u32 %v14716_v19, 16  ;;  %v14750_v37 = vshll.u32 %v14728_v38, 16  ;;  %v14764_v52 = vsel %vm5518_vm5, %v5558_v61, %v5560_v45 }
  0xe7   : > { %11402 = vmatprep.mubr.msk.bf16.mxu1 %vm942_vm3, %v821_v17  ;;  %v289_v17 = vld [vmem:[%s13709_s25 + $0x3a8] sm:$0xff]  ;;  %17898 = vst [vmem:[#allocation184_spill] sm:$0xff] %v14764_v52 }
  0xe8   : > { %v837_v35 = vsel %vm393_vm2, %v832_v8, %v836_v9  ;;  %17894 = vst [vmem:[#allocation180_spill] sm:$0xff] %v14747_v13  ;;  %17895 = vst [vmem:[#allocation181_spill] sm:$0xff] %v14750_v37  ;;  %v14756_v16 = vpack.c.bf16 %v289_v17, %v288_v26  ;;  %v14759_v8 = vsel %vm5518_vm5, %v5556_v50, %v5558_v61  ;;  %v5562_v61 = vrot.slane %v14089_v51, 2  ;;  %v292_v17 = vld [vmem:[%s13709_s25 + $0x3c0] sm:$0xff] }
  0xe9   : > { %17897 = vst [vmem:[#allocation183_spill] sm:$0xff] %v14759_v8  ;;  %v848_v5 = vor.u32 %v14747_v13, %v844_v1  ;;  %v14780_v26 = vshrl.u32 %v14728_v38, 16 }
  0xea   : > { %12021 = vmatmul.mubr.msk.bf16.gmra.mrb[32].mxu0 %vm942_vm3, %v14719_v48  ;;  %17896 = vst [vmem:[#allocation182_spill] sm:$0xff] %v14756_v16  ;;  %v840_v48 = vor.u32 %v14740_v36, %v836_v9  ;;  %v14773_v50 = vshll.u32 %v14756_v16, 16  ;;  %v294_v36 = vld [vmem:[%s13709_s25 + $0x3d0] sm:$0xff] }
  0xeb   : > { %12024 = vmatprep.mubr.msk.bf16.mxu0 %vm942_vm3, %v14724_v49  ;;  %v291_v49 = vld [vmem:[%s13709_s25 + $0x3b8] sm:$0xff]  ;;  %17901 = vst [vmem:[#allocation187_spill] sm:$0xff] %v14780_v26 }
  0xec   : > { %v14768_v60 = vpack.c.bf16 %v291_v49, %v290_v59  ;;  %17900 = vst [vmem:[#allocation186_spill] sm:$0xff] %v14773_v50  ;;  %v845_v9 = vsel %vm393_vm2, %v840_v48, %v844_v1  ;;  %v5564_v59 = vrot.slane %v14094_v31, 2  ;;  %v860_v48 = vrot.slane %v14773_v50, 1 }
  0xee   : > { %11403 = vmatmul.mubr.msk.bf16.gmra.mrb[104].mxu1 %vm942_vm3, %v829_v33  ;;  %v852_v33 = vrot.slane %v14750_v37, 1  ;;  %17899 = vst [vmem:[#allocation185_spill] sm:$0xff] %v14768_v60  ;;  %v14787_v37 = vshrl.u32 %v14756_v16, 16  ;;  %v14790_v13 = vshll.u32 %v14768_v60, 16  ;;  %v14804_v31 = vsel %vm5518_vm5, %v5562_v61, %v5564_v59 }
  0xef   : > { %11406 = vmatprep.mubr.msk.bf16.mxu1 %vm942_vm3, %v837_v35  ;;  %v293_v35 = vld [vmem:[%s13709_s25 + $0x3c8] sm:$0xff]  ;;  %17906 = vst [vmem:[#allocation192_spill] sm:$0xff] %v14804_v31 }
  0xf0   : > { %v853_v49 = vsel %vm393_vm2, %v848_v5, %v852_v33  ;;  %17902 = vst [vmem:[#allocation188_spill] sm:$0xff] %v14787_v37  ;;  %17903 = vst [vmem:[#allocation189_spill] sm:$0xff] %v14790_v13  ;;  %v14796_v1 = vpack.c.bf16 %v293_v35, %v292_v17  ;;  %v14799_v5 = vsel %vm5518_vm5, %v5560_v45, %v5562_v61  ;;  %v5566_v61 = vrot.slane %v14125_v55, 2  ;;  %v296_v35 = vld [vmem:[%s13709_s25 + $0x3e0] sm:$0xff] }
  0xf1   : > { %17905 = vst [vmem:[#allocation191_spill] sm:$0xff] %v14799_v5  ;;  %v864_v51 = vor.u32 %v14787_v37, %v860_v48  ;;  %v14820_v17 = vshrl.u32 %v14768_v60, 16 }
  0xf2   : > { %12025 = vmatmul.mubr.msk.bf16.gmra.mrb[36].mxu0 %vm942_vm3, %v14759_v8  ;;  %17904 = vst [vmem:[#allocation190_spill] sm:$0xff] %v14796_v1  ;;  %v856_v8 = vor.u32 %v14780_v26, %v852_v33  ;;  %v14813_v45 = vshll.u32 %v14796_v1, 16  ;;  %v298_v26 = vld [vmem:[%s13709_s25 + $0x3f0] sm:$0xff] }
  0xf3   : > { %12028 = vmatprep.mubr.msk.bf16.mxu0 %vm942_vm3, %v14764_v52  ;;  %v295_v52 = vld [vmem:[%s13709_s25 + $0x3d8] sm:$0xff]  ;;  %17909 = vst [vmem:[#allocation195_spill] sm:$0xff] %v14820_v17 }
  0xf4   : > { %v14808_v50 = vpack.c.bf16 %v295_v52, %v294_v36  ;;  %17908 = vst [vmem:[#allocation194_spill] sm:$0xff] %v14813_v45  ;;  %v861_v33 = vsel %vm393_vm2, %v856_v8, %v860_v48  ;;  %v5568_v36 = vrot.slane %v14130_v58, 2  ;;  %v876_v8 = vrot.slane %v14813_v45, 1 }
  0xf6   : > { %11407 = vmatmul.mubr.msk.bf16.gmra.mrb[108].mxu1 %vm942_vm3, %v845_v9  ;;  %v868_v9 = vrot.slane %v14790_v13, 1  ;;  %17907 = vst [vmem:[#allocation193_spill] sm:$0xff] %v14808_v50  ;;  %v14827_v13 = vshrl.u32 %v14796_v1, 16  ;;  %v14830_v37 = vshll.u32 %v14808_v50, 16  ;;  %v14844_v58 = vsel %vm5518_vm5, %v5566_v61, %v5568_v36 }
  0xf7   : > { %11410 = vmatprep.mubr.msk.bf16.mxu1 %vm942_vm3, %v853_v49  ;;  %v297_v49 = vld [vmem:[%s13709_s25 + $0x3e8] sm:$0xff]  ;;  %17914 = vst [vmem:[#allocation200_spill] sm:$0xff] %v14844_v58 }
  0xf8   : > { %v869_v52 = vsel %vm393_vm2, %v864_v51, %v868_v9  ;;  %17910 = vst [vmem:[#allocation196_spill] sm:$0xff] %v14827_v13  ;;  %17911 = vst [vmem:[#allocation197_spill] sm:$0xff] %v14830_v37  ;;  %v14836_v48 = vpack.c.bf16 %v297_v49, %v296_v35  ;;  %v14839_v51 = vsel %vm5518_vm5, %v5564_v59, %v5566_v61  ;;  %v5570_v61 = vrot.slane %v14159_v41, 2  ;;  %v300_v49 = vld [vmem:[%s13709_s25 + $0x400] sm:$0xff] }
  0xf9   : > { %17913 = vst [vmem:[#allocation199_spill] sm:$0xff] %v14839_v51  ;;  %v880_v55 = vor.u32 %v14827_v13, %v876_v8  ;;  %v14860_v35 = vshrl.u32 %v14808_v50, 16 }
  0xfa   : > { %12029 = vmatmul.mubr.msk.bf16.gmra.mrb[40].mxu0 %vm942_vm3, %v14799_v5  ;;  %17912 = vst [vmem:[#allocation198_spill] sm:$0xff] %v14836_v48  ;;  %v872_v5 = vor.u32 %v14820_v17, %v868_v9  ;;  %v14853_v59 = vshll.u32 %v14836_v48, 16  ;;  %v302_v17 = vld [vmem:[%s13709_s25 + $0x410] sm:$0xff] }
  0xfb   : > { %12032 = vmatprep.mubr.msk.bf16.mxu0 %vm942_vm3, %v14804_v31  ;;  %v299_v31 = vld [vmem:[%s13709_s25 + $0x3f8] sm:$0xff]  ;;  %17917 = vst [vmem:[#allocation203_spill] sm:$0xff] %v14860_v35 }
  0xfc   : > { %v14848_v45 = vpack.c.bf16 %v299_v31, %v298_v26  ;;  %17916 = vst [vmem:[#allocation202_spill] sm:$0xff] %v14853_v59  ;;  %v877_v9 = vsel %vm393_vm2, %v872_v5, %v876_v8  ;;  %v5572_v26 = vrot.slane %v14172_v24, 2  ;;  %v892_v5 = vrot.slane %v14853_v59, 1 }
  0xfe   : > { %11411 = vmatmul.mubr.msk.bf16.gmra.mrb[112].mxu1 %vm942_vm3, %v861_v33  ;;  %v884_v33 = vrot.slane %v14830_v37, 1  ;;  %17915 = vst [vmem:[#allocation201_spill] sm:$0xff] %v14848_v45  ;;  %v14867_v37 = vshrl.u32 %v14836_v48, 16  ;;  %v14870_v13 = vshll.u32 %v14848_v45, 16  ;;  %v14884_v24 = vsel %vm5518_vm5, %v5570_v61, %v5572_v26 }
  0xff   : > { %11414 = vmatprep.mubr.msk.bf16.mxu1 %vm942_vm3, %v869_v52  ;;  %v301_v52 = vld [vmem:[%s13709_s25 + $0x408] sm:$0xff]  ;;  %17922 = vst [vmem:[#allocation208_spill] sm:$0xff] %v14884_v24 }
 0x100   : > { %v885_v31 = vsel %vm393_vm2, %v880_v55, %v884_v33  ;;  %17918 = vst [vmem:[#allocation204_spill] sm:$0xff] %v14867_v37  ;;  %17919 = vst [vmem:[#allocation205_spill] sm:$0xff] %v14870_v13  ;;  %v14876_v8 = vpack.c.bf16 %v301_v52, %v300_v49  ;;  %v14879_v55 = vsel %vm5518_vm5, %v5568_v36, %v5570_v61  ;;  %v5574_v61 = vrot.slane %v14204_v40, 2  ;;  %v304_v52 = vld [vmem:[%s13709_s25 + $0x420] sm:$0xff] }
 0x101   : > { %17921 = vst [vmem:[#allocation207_spill] sm:$0xff] %v14879_v55  ;;  %v896_v41 = vor.u32 %v14867_v37, %v892_v5  ;;  %v14900_v49 = vshrl.u32 %v14848_v45, 16 }
 0x102   : > { %12033 = vmatmul.mubr.msk.bf16.gmra.mrb[44].mxu0 %vm942_vm3, %v14839_v51  ;;  %17920 = vst [vmem:[#allocation206_spill] sm:$0xff] %v14876_v8  ;;  %v888_v51 = vor.u32 %v14860_v35, %v884_v33  ;;  %v14893_v36 = vshll.u32 %v14876_v8, 16  ;;  %v306_v35 = vld [vmem:[%s13709_s25 + $0x430] sm:$0xff] }
 0x103   : > { %12036 = vmatprep.mubr.msk.bf16.mxu0 %vm942_vm3, %v14844_v58  ;;  %v303_v58 = vld [vmem:[%s13709_s25 + $0x418] sm:$0xff]  ;;  %17925 = vst [vmem:[#allocation211_spill] sm:$0xff] %v14900_v49 }
 0x104   : > { %v14888_v59 = vpack.c.bf16 %v303_v58, %v302_v17  ;;  %17924 = vst [vmem:[#allocation210_spill] sm:$0xff] %v14893_v36  ;;  %v893_v33 = vsel %vm393_vm2, %v888_v51, %v892_v5  ;;  %v5576_v17 = vrot.slane %v14209_v54, 2  ;;  %v908_v51 = vrot.slane %v14893_v36, 1  ;;  %v309_v36 = vld [vmem:[%s13709_s25 + $0x448] sm:$0xff] }
 0x106   : > { %11415 = vmatmul.mubr.msk.bf16.gmra.mrb[116].mxu1 %vm942_vm3, %v877_v9  ;;  %v900_v9 = vrot.slane %v14870_v13, 1  ;;  %17923 = vst [vmem:[#allocation209_spill] sm:$0xff] %v14888_v59  ;;  %v14907_v13 = vshrl.u32 %v14876_v8, 16  ;;  %v14910_v37 = vshll.u32 %v14888_v59, 16  ;;  %v14924_v54 = vsel %vm5518_vm5, %v5574_v61, %v5576_v17 }
 0x107   : > { %11418 = vmatprep.mubr.msk.bf16.mxu1 %vm942_vm3, %v885_v31  ;;  %v305_v31 = vld [vmem:[%s13709_s25 + $0x428] sm:$0xff]  ;;  %17930 = vst [vmem:[#allocation216_spill] sm:$0xff] %v14924_v54 }
 0x108   : > { %v901_v58 = vsel %vm393_vm2, %v896_v41, %v900_v9  ;;  %17926 = vst [vmem:[#allocation212_spill] sm:$0xff] %v14907_v13  ;;  %17927 = vst [vmem:[#allocation213_spill] sm:$0xff] %v14910_v37  ;;  %v14916_v5 = vpack.c.bf16 %v305_v31, %v304_v52  ;;  %v904_v41 = vor.u32 %v14900_v49, %v900_v9  ;;  %v14940_v52 = vshrl.u32 %v14888_v59, 16 }
 0x109   : > { %v912_v40 = vor.u32 %v14907_v13, %v908_v51 }
 0x10a   : > { %12037 = vmatmul.mubr.msk.bf16.gmra.mrb[48].mxu0 %vm942_vm3, %v14879_v55  ;;  %17928 = vst [vmem:[#allocation214_spill] sm:$0xff] %v14916_v5  ;;  %v14919_v55 = vsel %vm5518_vm5, %v5572_v26, %v5574_v61  ;;  %v14933_v26 = vshll.u32 %v14916_v5, 16  ;;  %v909_v9 = vsel %vm393_vm2, %v904_v41, %v908_v51  ;;  %v5578_v61 = vrot.slane %v14240_v53, 2  ;;  %17933 = vst [vmem:[#allocation219_spill] sm:$0xff] %v14940_v52 }
 0x10b   : > { %12040 = vmatprep.mubr.msk.bf16.mxu0 %vm942_vm3, %v14884_v24  ;;  %v307_v24 = vld [vmem:[%s13709_s25 + $0x438] sm:$0xff]  ;;  %17929 = vst [vmem:[#allocation215_spill] sm:$0xff] %v14919_v55 }
 0x10c   : > { %v14928_v8 = vpack.c.bf16 %v307_v24, %v306_v35  ;;  %17932 = vst [vmem:[#allocation218_spill] sm:$0xff] %v14933_v26  ;;  %v5580_v24 = vrot.slane %v14245_v63, 2  ;;  %v14945_v35 = vshrl.u32 %v14916_v5, 16  ;;  %v924_v51 = vrot.slane %v14933_v26, 1 }
 0x10d   : > { %v14955_v41 = vsel %vm5518_vm5, %v5576_v17, %v5578_v61  ;;  %v5602_v26 = vrot.slane %v14476_v39, 2 }
 0x10e   : > { %11419 = vmatmul.mubr.msk.bf16.gmra.mrb[120].mxu1 %vm942_vm3, %v893_v33  ;;  %v916_v33 = vrot.slane %v14910_v37, 1  ;;  %17931 = vst [vmem:[#allocation217_spill] sm:$0xff] %v14928_v8  ;;  %17934 = vst [vmem:[#allocation220_spill] sm:$0xff] %v14945_v35  ;;  %v308_v37 = vld [vmem:[%s13709_s25 + $0x440] sm:$0xff]  ;;  %v14962_v49 = vsel %vm5518_vm5, %v5578_v61, %v5580_v24  ;;  %v5584_v61 = vrot.slane %v14281_v27, 2 }
 0x10f   : > { %11422 = vmatprep.mubr.msk.bf16.mxu1 %vm942_vm3, %v901_v58  ;;  %v14948_v58 = vshll.u32 %v14928_v8, 16  ;;  %v14959_v13 = vpack.c.bf16 %v309_v36, %v308_v37  ;;  %v14973_v37 = vshrl.u32 %v14928_v8, 16 }
 0x110   : > { %v917_v31 = vsel %vm393_vm2, %v912_v40, %v916_v33  ;;  %v920_v40 = vor.u32 %v14940_v52, %v916_v33  ;;  %v17943_v52 = vld [vmem:[#allocation15_spill] sm:$0xff] }
 0x111   : > { %17935 = vst [vmem:[#allocation221_spill] sm:$0xff] %v14948_v58  ;;  %17936 = vst [vmem:[#allocation222_spill] sm:$0xff] %v14973_v37  ;;  %v14976_v36 = vshll.u32 %v14959_v13, 16 }
 0x112   : > { %12041 = vmatmul.mubr.msk.bf16.gmra.mrb[52].mxu0 %vm942_vm3, %v14919_v55  ;;  %v932_v55 = vrot.slane %v14948_v58, 1  ;;  %v925_v17 = vsel %vm393_vm2, %v920_v40, %v924_v51 }
 0x113   : > { %12044 = vmatprep.mubr.msk.bf16.mxu0 %vm942_vm3, %v14924_v54  ;;  %v928_v54 = vor.u32 %v14945_v35, %v924_v51  ;;  %17937 = vst [vmem:[#allocation223_spill] sm:$0xff] %v14976_v36  ;;  %v940_v40 = vrot.slane %v14976_v36, 1  ;;  %v5604_v35 = vrot.slane %v14488_v43, 2 }
 0x114   : > { %v936_v51 = vor.u32 %v14973_v37, %v932_v55  ;;  %v5600_v37 = vrot.slane %v14447_v47, 2 }
 0x115   : > { %v933_v33 = vsel %vm393_vm2, %v928_v54, %v932_v55 }
 0x116   : > { %11423 = vmatmul.mubr.msk.bf16.gmra.mrb[124].mxu1 %vm942_vm3, %v909_v9  ;;  %v5582_v9 = vrot.slane %v14276_v42, 2  ;;  %v941_v54 = vsel %vm393_vm2, %v936_v51, %v940_v40  ;;  %v5592_v51 = vrot.slane %v14365_v2, 2 }
 0x117   : > { %11426 = vmatprep.mubr.msk.bf16.mxu1 %vm942_vm3, %v917_v31 }
 0x118   : > { %v14982_v31 = vsel %vm5518_vm5, %v5580_v24, %v5582_v9  ;;  %v14988_v58 = vsel %vm5518_vm5, %v5582_v9, %v5584_v61  ;;  %v5586_v24 = vrot.slane %v14309_v44, 2 }
 0x11a   : > { %12045 = vmatmul.mubr.msk.bf16.gmra.mrb[56].mxu0 %vm942_vm3, %v14955_v41  ;;  %v14999_v55 = vsel %vm5518_vm5, %v5584_v61, %v5586_v24 }
 0x11b   : > { %12048 = vmatprep.mubr.msk.bf16.mxu0 %vm942_vm3, %v14962_v49 }
 0x11e   : > { %11427 = vmatmul.mubr.msk.bf16.gmra.mrb[128].mxu1 %vm942_vm3, %v925_v17  ;;  %v5588_v17 = vrot.slane %v14337_v23, 2 }
 0x11f   : > { %11430 = vmatprep.mubr.msk.bf16.mxu1 %vm942_vm3, %v933_v33  ;;  %v5590_v33 = vrot.slane %v14356_v12, 2 }
 0x120   : > { %v15004_v9 = vsel %vm5518_vm5, %v5586_v24, %v5588_v17  ;;  %v5596_v24 = vrot.slane %v14401_v3, 2 }
 0x121   : > { %v15016_v61 = vsel %vm5518_vm5, %v5588_v17, %v5590_v33  ;;  %v15021_v40 = vsel %vm5518_vm5, %v5590_v33, %v5592_v51 }
 0x122   : > { %12049 = vmatmul.mubr.msk.bf16.gmra.mrb[60].mxu0 %vm942_vm3, %v14982_v31 }
 0x123   : > { %12052 = vmatprep.mubr.msk.bf16.mxu0 %vm942_vm3, %v14988_v58 }
 0x126   : > { %11431 = vmatmul.mubr.msk.bf16.gmra.mrb[132].mxu1 %vm942_vm3, %v941_v54  ;;  %v5594_v54 = vrot.slane %v14391_v62, 2 }
 0x127   : > { %11436 = vmatprep.mubr.msk.bf16.mxu1 %vm942_vm3, %v13717_v15 }
 0x128   : > { %v15039_v33 = vsel %vm5518_vm5, %v5592_v51, %v5594_v54  ;;  %v15044_v36 = vsel %vm5518_vm5, %v5594_v54, %v5596_v24 }
 0x129   : > { %17938 = vst [vmem:[#allocation224_spill] sm:$0xff] %v15039_v33  ;;  %17939 = vst [vmem:[#allocation225_spill] sm:$0xff] %v15044_v36 }
 0x12a   : > { %12053 = vmatmul.mubr.msk.bf16.gmra.mrb[64].mxu0 %vm942_vm3, %v14999_v55 }
 0x12b   : > { %12056 = vmatprep.mubr.msk.bf16.mxu0 %vm942_vm3, %v15004_v9 }
 0x12e   : > { %11437 = vmatmul.mubr.msk.bf16.vlgmr.msra.gmra.mrb[0].mxu1 %vm942_vm3, %v13721_v18 }
 0x12f   : > { %11573 = vmatpush3.bf16.msra.mxu1 %v14440_v7  ;;  %11440 = vmatprep.mubr.msk.bf16.mxu1 %vm942_vm3, %v13725_v21  ;;  %v10534_v7 = vld [vmem:[%s17334_s1 + $0xe] sm:$0x3] }
 0x130   : > { %v15033_v17 = vand.u32 %v10534_v7, %v13683_v4  ;;  %v5598_v7 = vrot.slane %v14432_v6, 2 }
 0x132   : > { %12057 = vmatmul.mubr.msk.bf16.gmra.mrb[68].mxu0 %vm942_vm3, %v15016_v61  ;;  %12262 = vmatprep.subr.bf16.mxu0 %v15033_v17  ;;  %v15055_v51 = vsel %vm5518_vm5, %v5596_v24, %v5598_v7  ;;  %v15060_v54 = vsel %vm5518_vm5, %v5598_v7, %v5600_v37  ;;  %v15071_v24 = vsel %vm5518_vm5, %v5600_v37, %v5602_v26 }
 0x133   : > { %12060 = vmatprep.mubr.msk.bf16.mxu0 %vm942_vm3, %v15021_v40  ;;  %17940 = vst [vmem:[#allocation226_spill] sm:$0xff] %v15055_v51  ;;  %17941 = vst [vmem:[#allocation227_spill] sm:$0xff] %v15060_v54  ;;  %v15076_v7 = vsel %vm5518_vm5, %v5602_v26, %v5604_v35 }
 0x134   : > { %17942 = vst [vmem:[#allocation228_spill] sm:$0xff] %v15071_v24  ;;  %17944 = vst [vmem:[#allocation229_spill] sm:$0xff] %v15076_v7 }
 0x136   : > { %11441 = vmatmul.mubr.msk.bf16.gmra.mrb[4].mxu1 %vm942_vm3, %v13730_v25 }
 0x137   : > { %11444 = vmatprep.mubr.msk.bf16.mxu1 %vm942_vm3, %v13739_v34  ;;  %v17989_v34 = vld [vmem:[#allocation82_spill] sm:$0xff] }
 0x13a   : > { %12061 = vmatmul.mubr.msk.bf16.gmra.mrb[72].mxu0 %vm942_vm3, %v15039_v33 }
 0x13b   : > { %12064 = vmatprep.mubr.msk.bf16.mxu0 %vm942_vm3, %v15044_v36  ;;  %v17986_v36 = vld [vmem:[#allocation76_spill] sm:$0xff] }
 0x13e   : > { %11445 = vmatmul.mubr.msk.bf16.gmra.mrb[8].mxu1 %vm942_vm3, %v13756_v57  ;;  %v313_v57 = vld [vmem:[%s13709_s25 + $0x468] sm:$0xff] }
 0x13f   : > { %11448 = vmatprep.mubr.msk.bf16.mxu1 %vm942_vm3, %v13764_v0  ;;  %v17982_v0 = vld [vmem:[#allocation70_spill] sm:$0xff] }
 0x142   : > { %12065 = vmatmul.mubr.msk.bf16.gmra.mrb[76].mxu0 %vm942_vm3, %v15055_v51  ;;  %v5608_v51 = vrot.slane %v14528_v14, 2 }
 0x143   : > { %12068 = vmatprep.mubr.msk.bf16.mxu0 %vm942_vm3, %v15060_v54  ;;  %v5606_v54 = vrot.slane %v14516_v56, 2 }
 0x145   : > { %v15087_v37 = vsel %vm5518_vm5, %v5604_v35, %v5606_v54  ;;  %v15092_v26 = vsel %vm5518_vm5, %v5606_v54, %v5608_v51 }
 0x146   : > { %11449 = vmatmul.mubr.msk.bf16.gmra.mrb[12].mxu1 %vm942_vm3, %v13782_v11  ;;  %v17945_v11 = vld [vmem:[#allocation18_spill] sm:$0xff]  ;;  %17946 = vst [vmem:[#allocation230_spill] sm:$0xff] %v15087_v37  ;;  %17948 = vst [vmem:[#allocation231_spill] sm:$0xff] %v15092_v26 }
 0x147   : > { %11452 = vmatprep.mubr.msk.bf16.mxu1 %vm942_vm3, %v17943_v52  ;;  %v17947_v52 = vld [vmem:[#allocation19_spill] sm:$0xff] }
 0x14a   : > { %12069 = vmatmul.mubr.msk.bf16.gmra.mrb[80].mxu0 %vm942_vm3, %v15071_v24  ;;  %v5612_v24 = vrot.slane %v14568_v30, 2 }
 0x14b   : > { %12072 = vmatprep.mubr.msk.bf16.mxu0 %vm942_vm3, %v15076_v7  ;;  %v5610_v7 = vrot.slane %v14556_v29, 2 }
 0x14d   : > { %v15103_v35 = vsel %vm5518_vm5, %v5608_v51, %v5610_v7  ;;  %v15108_v54 = vsel %vm5518_vm5, %v5610_v7, %v5612_v24 }
 0x14e   : > { %11453 = vmatmul.mubr.msk.bf16.gmra.mrb[16].mxu1 %vm942_vm3, %v17945_v11  ;;  %v17949_v11 = vld [vmem:[#allocation23_spill] sm:$0xff]  ;;  %17950 = vst [vmem:[#allocation232_spill] sm:$0xff] %v15103_v35  ;;  %17952 = vst [vmem:[#allocation233_spill] sm:$0xff] %v15108_v54 }
 0x14f   : > { %11456 = vmatprep.mubr.msk.bf16.mxu1 %vm942_vm3, %v17947_v52  ;;  %v17951_v52 = vld [vmem:[#allocation27_spill] sm:$0xff] }
 0x152   : > { %12073 = vmatmul.mubr.msk.bf16.gmra.mrb[84].mxu0 %vm942_vm3, %v15087_v37  ;;  %v5616_v37 = vrot.slane %v14608_v28, 2 }
 0x153   : > { %12076 = vmatprep.mubr.msk.bf16.mxu0 %vm942_vm3, %v15092_v26  ;;  %v5614_v26 = vrot.slane %v14596_v22, 2 }
 0x155   : > { %v15119_v51 = vsel %vm5518_vm5, %v5612_v24, %v5614_v26  ;;  %v15124_v7 = vsel %vm5518_vm5, %v5614_v26, %v5616_v37 }
 0x156   : > { %11457 = vmatmul.mubr.msk.bf16.gmra.mrb[20].mxu1 %vm942_vm3, %v17949_v11  ;;  %v17953_v11 = vld [vmem:[#allocation28_spill] sm:$0xff]  ;;  %17954 = vst [vmem:[#allocation234_spill] sm:$0xff] %v15119_v51  ;;  %17956 = vst [vmem:[#allocation235_spill] sm:$0xff] %v15124_v7 }
 0x157   : > { %11460 = vmatprep.mubr.msk.bf16.mxu1 %vm942_vm3, %v17951_v52  ;;  %v17955_v52 = vld [vmem:[#allocation33_spill] sm:$0xff] }
 0x15a   : > { %12077 = vmatmul.mubr.msk.bf16.gmra.mrb[88].mxu0 %vm942_vm3, %v15103_v35  ;;  %v5620_v35 = vrot.slane %v14648_v10, 2 }
 0x15b   : > { %12080 = vmatprep.mubr.msk.bf16.mxu0 %vm942_vm3, %v15108_v54  ;;  %v5618_v54 = vrot.slane %v14636_v32, 2 }
 0x15d   : > { %v15135_v24 = vsel %vm5518_vm5, %v5616_v37, %v5618_v54  ;;  %v15140_v26 = vsel %vm5518_vm5, %v5618_v54, %v5620_v35 }
 0x15e   : > { %11461 = vmatmul.mubr.msk.bf16.gmra.mrb[24].mxu1 %vm942_vm3, %v17953_v11  ;;  %v17957_v11 = vld [vmem:[#allocation34_spill] sm:$0xff]  ;;  %17958 = vst [vmem:[#allocation236_spill] sm:$0xff] %v15135_v24  ;;  %17960 = vst [vmem:[#allocation237_spill] sm:$0xff] %v15140_v26 }
 0x15f   : > { %11464 = vmatprep.mubr.msk.bf16.mxu1 %vm942_vm3, %v17955_v52  ;;  %v17959_v52 = vld [vmem:[#allocation39_spill] sm:$0xff] }
 0x162   : > { %12081 = vmatmul.mubr.msk.bf16.gmra.mrb[92].mxu0 %vm942_vm3, %v15119_v51  ;;  %v5624_v51 = vrot.slane %v14688_v20, 2 }
 0x163   : > { %12084 = vmatprep.mubr.msk.bf16.mxu0 %vm942_vm3, %v15124_v7  ;;  %v5622_v7 = vrot.slane %v14676_v46, 2 }
 0x165   : > { %v15151_v37 = vsel %vm5518_vm5, %v5620_v35, %v5622_v7  ;;  %v15156_v54 = vsel %vm5518_vm5, %v5622_v7, %v5624_v51 }
 0x166   : > { %11465 = vmatmul.mubr.msk.bf16.gmra.mrb[28].mxu1 %vm942_vm3, %v17957_v11  ;;  %v17961_v11 = vld [vmem:[#allocation40_spill] sm:$0xff]  ;;  %17962 = vst [vmem:[#allocation238_spill] sm:$0xff] %v15151_v37  ;;  %17964 = vst [vmem:[#allocation239_spill] sm:$0xff] %v15156_v54 }
 0x167   : > { %11468 = vmatprep.mubr.msk.bf16.mxu1 %vm942_vm3, %v17959_v52  ;;  %v17963_v52 = vld [vmem:[#allocation45_spill] sm:$0xff] }
 0x16a   : > { %12085 = vmatmul.mubr.msk.bf16.gmra.mrb[96].mxu0 %vm942_vm3, %v15135_v24  ;;  %v5628_v24 = vrot.slane %v14728_v38, 2 }
 0x16b   : > { %12088 = vmatprep.mubr.msk.bf16.mxu0 %vm942_vm3, %v15140_v26  ;;  %v5626_v26 = vrot.slane %v14716_v19, 2 }
 0x16d   : > { %v15167_v35 = vsel %vm5518_vm5, %v5624_v51, %v5626_v26  ;;  %v15172_v7 = vsel %vm5518_vm5, %v5626_v26, %v5628_v24 }
 0x16e   : > { %11469 = vmatmul.mubr.msk.bf16.gmra.mrb[32].mxu1 %vm942_vm3, %v17961_v11  ;;  %v17965_v11 = vld [vmem:[#allocation46_spill] sm:$0xff]  ;;  %17966 = vst [vmem:[#allocation240_spill] sm:$0xff] %v15167_v35  ;;  %17968 = vst [vmem:[#allocation241_spill] sm:$0xff] %v15172_v7 }
 0x16f   : > { %11472 = vmatprep.mubr.msk.bf16.mxu1 %vm942_vm3, %v17963_v52  ;;  %v17967_v52 = vld [vmem:[#allocation51_spill] sm:$0xff] }
 0x172   : > { %12089 = vmatmul.mubr.msk.bf16.gmra.mrb[100].mxu0 %vm942_vm3, %v15151_v37  ;;  %v5632_v37 = vrot.slane %v14768_v60, 2 }
 0x173   : > { %12092 = vmatprep.mubr.msk.bf16.mxu0 %vm942_vm3, %v15156_v54  ;;  %v5630_v54 = vrot.slane %v14756_v16, 2 }
 0x175   : > { %v15183_v51 = vsel %vm5518_vm5, %v5628_v24, %v5630_v54  ;;  %v15188_v26 = vsel %vm5518_vm5, %v5630_v54, %v5632_v37 }
 0x176   : > { %11473 = vmatmul.mubr.msk.bf16.gmra.mrb[36].mxu1 %vm942_vm3, %v17965_v11  ;;  %v17969_v11 = vld [vmem:[#allocation52_spill] sm:$0xff]  ;;  %17970 = vst [vmem:[#allocation242_spill] sm:$0xff] %v15183_v51  ;;  %17972 = vst [vmem:[#allocation243_spill] sm:$0xff] %v15188_v26 }
 0x177   : > { %11476 = vmatprep.mubr.msk.bf16.mxu1 %vm942_vm3, %v17967_v52  ;;  %v17971_v52 = vld [vmem:[#allocation57_spill] sm:$0xff] }
 0x17a   : > { %12093 = vmatmul.mubr.msk.bf16.gmra.mrb[104].mxu0 %vm942_vm3, %v15167_v35  ;;  %v5636_v35 = vrot.slane %v14808_v50, 2 }
 0x17b   : > { %12096 = vmatprep.mubr.msk.bf16.mxu0 %vm942_vm3, %v15172_v7  ;;  %v5634_v7 = vrot.slane %v14796_v1, 2 }
 0x17d   : > { %v15199_v24 = vsel %vm5518_vm5, %v5632_v37, %v5634_v7  ;;  %v15204_v54 = vsel %vm5518_vm5, %v5634_v7, %v5636_v35 }
 0x17e   : > { %11477 = vmatmul.mubr.msk.bf16.gmra.mrb[40].mxu1 %vm942_vm3, %v17969_v11  ;;  %v17973_v11 = vld [vmem:[#allocation58_spill] sm:$0xff]  ;;  %17974 = vst [vmem:[#allocation244_spill] sm:$0xff] %v15199_v24  ;;  %17976 = vst [vmem:[#allocation245_spill] sm:$0xff] %v15204_v54 }
 0x17f   : > { %11480 = vmatprep.mubr.msk.bf16.mxu1 %vm942_vm3, %v17971_v52  ;;  %v17975_v52 = vld [vmem:[#allocation63_spill] sm:$0xff] }
 0x182   : > { %12097 = vmatmul.mubr.msk.bf16.gmra.mrb[108].mxu0 %vm942_vm3, %v15183_v51  ;;  %v5640_v51 = vrot.slane %v14848_v45, 2 }
 0x183   : > { %12100 = vmatprep.mubr.msk.bf16.mxu0 %vm942_vm3, %v15188_v26  ;;  %v5638_v26 = vrot.slane %v14836_v48, 2 }
 0x185   : > { %v15215_v37 = vsel %vm5518_vm5, %v5636_v35, %v5638_v26  ;;  %v15220_v7 = vsel %vm5518_vm5, %v5638_v26, %v5640_v51 }
 0x186   : > { %11481 = vmatmul.mubr.msk.bf16.gmra.mrb[44].mxu1 %vm942_vm3, %v17973_v11  ;;  %v17977_v11 = vld [vmem:[#allocation64_spill] sm:$0xff]  ;;  %17978 = vst [vmem:[#allocation246_spill] sm:$0xff] %v15215_v37  ;;  %17980 = vst [vmem:[#allocation247_spill] sm:$0xff] %v15220_v7 }
 0x187   : > { %11484 = vmatprep.mubr.msk.bf16.mxu1 %vm942_vm3, %v17975_v52  ;;  %v17979_v52 = vld [vmem:[#allocation69_spill] sm:$0xff] }
 0x18a   : > { %12101 = vmatmul.mubr.msk.bf16.gmra.mrb[112].mxu0 %vm942_vm3, %v15199_v24 }
 0x18b   : > { %12104 = vmatprep.mubr.msk.bf16.mxu0 %vm942_vm3, %v15204_v54  ;;  %v17981_v54 = vld [vmem:[#allocation206_spill] sm:$0xff] }
 0x18c   : > { %v5642_v24 = vrot.slane %v17981_v54, 2 }
 0x18e   : > { %11485 = vmatmul.mubr.msk.bf16.gmra.mrb[48].mxu1 %vm942_vm3, %v17977_v11  ;;  %v5644_v11 = vrot.slane %v14888_v59, 2  ;;  %v15231_v35 = vsel %vm5518_vm5, %v5640_v51, %v5642_v24  ;;  %v310_v51 = vld [vmem:[%s13709_s25 + $0x450] sm:$0xff] }
 0x18f   : > { %11488 = vmatprep.mubr.msk.bf16.mxu1 %vm942_vm3, %v17979_v52  ;;  %17983 = vst [vmem:[#allocation248_spill] sm:$0xff] %v15231_v35  ;;  %v17984_v52 = vld [vmem:[#allocation75_spill] sm:$0xff] }
 0x190   : > { %v15236_v26 = vsel %vm5518_vm5, %v5642_v24, %v5644_v11 }
 0x191   : > { %17985 = vst [vmem:[#allocation249_spill] sm:$0xff] %v15236_v26 }
 0x192   : > { %12105 = vmatmul.mubr.msk.bf16.gmra.mrb[116].mxu0 %vm942_vm3, %v15215_v37  ;;  %v5648_v37 = vrot.slane %v14928_v8, 2 }
 0x193   : > { %12108 = vmatprep.mubr.msk.bf16.mxu0 %vm942_vm3, %v15220_v7  ;;  %v5646_v7 = vrot.slane %v14916_v5, 2 }
 0x195   : > { %v15249_v24 = vsel %vm5518_vm5, %v5644_v11, %v5646_v7  ;;  %v312_v11 = vld [vmem:[%s13709_s25 + $0x460] sm:$0xff] }
 0x196   : > { %11489 = vmatmul.mubr.msk.bf16.gmra.mrb[52].mxu1 %vm942_vm3, %v17982_v0  ;;  %v311_v0 = vld [vmem:[%s13709_s25 + $0x458] sm:$0xff] }
 0x197   : > { %11492 = vmatprep.mubr.msk.bf16.mxu1 %vm942_vm3, %v17984_v52  ;;  %v17987_v52 = vld [vmem:[#allocation81_spill] sm:$0xff]  ;;  %v15256_v33 = vpack.c.bf16 %v311_v0, %v310_v51  ;;  %v15273_v0 = vpack.c.bf16 %v313_v57, %v312_v11  ;;  %v17990_v57 = vld [vmem:[#allocation112_spill] sm:$0xff] }
 0x198   : > { %v17992_v11 = vld [vmem:[#allocation120_spill] sm:$0xff] }
 0x199   : > { %17988 = vst [vmem:[#allocation250_spill] sm:$0xff] %v15256_v33 }
 0x19a   : > { %12109 = vmatmul.mubr.msk.bf16.gmra.mrb[120].mxu0 %vm942_vm3, %v15231_v35  ;;  %v15254_v35 = vsel %vm5518_vm5, %v5646_v7, %v5648_v37 }
 0x19b   : > { %12112 = vmatprep.mubr.msk.bf16.mxu0 %vm942_vm3, %v15236_v26  ;;  %v5650_v26 = vrot.slane %v14959_v13, 2 }
 0x19d   : > { %v15269_v7 = vsel %vm5518_vm5, %v5648_v37, %v5650_v26 }
 0x19e   : > { %11493 = vmatmul.mubr.msk.bf16.gmra.mrb[56].mxu1 %vm942_vm3, %v17986_v36  ;;  %v5652_v36 = vrot.slane %v15256_v33, 2  ;;  %v17645_v33 = vrot.slane %v15273_v0, 2 }
 0x19f   : > { %11496 = vmatprep.mubr.msk.bf16.mxu1 %vm942_vm3, %v17987_v52 }
 0x1a0   : > { %v15276_v51 = vsel %vm5518_vm5, %v5650_v26, %v5652_v36  ;;  %v15288_v37 = vsel %vm5518_vm5, %v5652_v36, %v17645_v33  ;;  %v17991_v26 = vld [vmem:[#allocation119_spill] sm:$0xff]  ;;  %v10258_v36 = vld [vmem:[%s17334_s1 + $0x6] sm:$0x3]  ;;  %v17994_v33 = vld [vmem:[#allocation128_spill] sm:$0xff] }
 0x1a2   : > { %12113 = vmatmul.mubr.msk.bf16.gmra.mrb[124].mxu0 %vm942_vm3, %v15249_v24 }
 0x1a3   : > { %12116 = vmatprep.mubr.msk.bf16.mxu0 %vm942_vm3, %v15254_v35 }
 0x1a6   : > { %11497 = vmatmul.mubr.msk.bf16.gmra.mrb[60].mxu1 %vm942_vm3, %v17989_v34 }
 0x1a7   : > { %11500 = vmatprep.mubr.msk.bf16.mxu1 %vm942_vm3, %v14240_v53 }
 0x1aa   : > { %12117 = vmatmul.mubr.msk.bf16.gmra.mrb[128].mxu0 %vm942_vm3, %v15269_v7 }
 0x1ab   : > { %12120 = vmatprep.mubr.msk.bf16.mxu0 %vm942_vm3, %v15276_v51 }
 0x1ae   : > { %11501 = vmatmul.mubr.msk.bf16.gmra.mrb[64].mxu1 %vm942_vm3, %v14245_v63 }
 0x1af   : > { %11504 = vmatprep.mubr.msk.bf16.mxu1 %vm942_vm3, %v14276_v42 }
 0x1b2   : > { %12121 = vmatmul.mubr.msk.bf16.gmra.mrb[132].mxu0 %vm942_vm3, %v15288_v37 }
 0x1b3   : > { %12126 = vmatprep.mubr.msk.bf16.mxu0 %vm942_vm3, %v17990_v57  ;;  %v15309_v57 = vand.u32 %v10258_v36, %v13683_v4  ;;  %v17996_v36 = vld [vmem:[#allocation136_spill] sm:$0xff] }
 0x1b5   : > { %11710 = vmatprep.subr.bf16.mxu1 %v15309_v57 }
 0x1b6   : > { %11505 = vmatmul.mubr.msk.bf16.gmra.mrb[68].mxu1 %vm942_vm3, %v14281_v27 }
 0x1b7   : > { %11508 = vmatprep.mubr.msk.bf16.mxu1 %vm942_vm3, %v14309_v44 }
 0x1ba   : > { %12127 = vmatmul.mubr.msk.bf16.vlgmr.msra.gmra.mrb[0].mxu0 %vm942_vm3, %v17991_v26  ;;  %v17993_v26 = vld [vmem:[#allocation127_spill] sm:$0xff] }
 0x1bb   : > { %12263 = vmatpush3.bf16.msra.mxu0 %v15033_v17  ;;  %12130 = vmatprep.mubr.msk.bf16.mxu0 %vm942_vm3, %v17992_v11  ;;  %v17995_v17 = vld [vmem:[#allocation135_spill] sm:$0xff] }
 0x1bc   : > { %v17997_v11 = vld [vmem:[#allocation143_spill] sm:$0xff] }
 0x1be   : > { %11509 = vmatmul.mubr.msk.bf16.gmra.mrb[72].mxu1 %vm942_vm3, %v14337_v23 }
 0x1bf   : > { %11512 = vmatprep.mubr.msk.bf16.mxu1 %vm942_vm3, %v14356_v12 }
 0x1c2   : > { %12131 = vmatmul.mubr.msk.bf16.gmra.mrb[4].mxu0 %vm942_vm3, %v17993_v26  ;;  %v17999_v26 = vld [vmem:[#allocation151_spill] sm:$0xff] }
 0x1c3   : > { %12134 = vmatprep.mubr.msk.bf16.mxu0 %vm942_vm3, %v17994_v33  ;;  %v17998_v33 = vld [vmem:[#allocation144_spill] sm:$0xff] }
 0x1c6   : > { %11513 = vmatmul.mubr.msk.bf16.gmra.mrb[76].mxu1 %vm942_vm3, %v14365_v2 }
 0x1c7   : > { %11516 = vmatprep.mubr.msk.bf16.mxu1 %vm942_vm3, %v14391_v62 }
 0x1ca   : > { %12135 = vmatmul.mubr.msk.bf16.gmra.mrb[8].mxu0 %vm942_vm3, %v17995_v17  ;;  %v18000_v17 = vld [vmem:[#allocation152_spill] sm:$0xff] }
 0x1cb   : > { %12138 = vmatprep.mubr.msk.bf16.mxu0 %vm942_vm3, %v17996_v36  ;;  %v18001_v36 = vld [vmem:[#allocation159_spill] sm:$0xff] }
 0x1ce   : > { %11517 = vmatmul.mubr.msk.bf16.gmra.mrb[80].mxu1 %vm942_vm3, %v14401_v3 }
 0x1cf   : > { %11520 = vmatprep.mubr.msk.bf16.mxu1 %vm942_vm3, %v14432_v6 }
 0x1d2   : > { %12139 = vmatmul.mubr.msk.bf16.gmra.mrb[12].mxu0 %vm942_vm3, %v17997_v11  ;;  %v18002_v11 = vld [vmem:[#allocation160_spill] sm:$0xff] }
 0x1d3   : > { %12142 = vmatprep.mubr.msk.bf16.mxu0 %vm942_vm3, %v17998_v33  ;;  %v18003_v33 = vld [vmem:[#allocation167_spill] sm:$0xff] }
 0x1d6   : > { %11521 = vmatmul.mubr.msk.bf16.gmra.mrb[84].mxu1 %vm942_vm3, %v14447_v47 }
 0x1d7   : > { %11524 = vmatprep.mubr.msk.bf16.mxu1 %vm942_vm3, %v14476_v39 }
 0x1da   : > { %12143 = vmatmul.mubr.msk.bf16.gmra.mrb[16].mxu0 %vm942_vm3, %v17999_v26  ;;  %v18004_v26 = vld [vmem:[#allocation168_spill] sm:$0xff] }
 0x1db   : > { %12146 = vmatprep.mubr.msk.bf16.mxu0 %vm942_vm3, %v18000_v17  ;;  %v18005_v17 = vld [vmem:[#allocation175_spill] sm:$0xff] }
 0x1de   : > { %11525 = vmatmul.mubr.msk.bf16.gmra.mrb[88].mxu1 %vm942_vm3, %v14488_v43 }
 0x1df   : > { %11528 = vmatprep.mubr.msk.bf16.mxu1 %vm942_vm3, %v14516_v56 }
 0x1e2   : > { %12147 = vmatmul.mubr.msk.bf16.gmra.mrb[20].mxu0 %vm942_vm3, %v18001_v36  ;;  %v18006_v36 = vld [vmem:[#allocation176_spill] sm:$0xff] }
 0x1e3   : > { %12150 = vmatprep.mubr.msk.bf16.mxu0 %vm942_vm3, %v18002_v11  ;;  %v18007_v11 = vld [vmem:[#allocation183_spill] sm:$0xff] }
 0x1e6   : > { %11529 = vmatmul.mubr.msk.bf16.gmra.mrb[92].mxu1 %vm942_vm3, %v14528_v14 }
 0x1e7   : > { %11532 = vmatprep.mubr.msk.bf16.mxu1 %vm942_vm3, %v14556_v29 }
 0x1ea   : > { %12151 = vmatmul.mubr.msk.bf16.gmra.mrb[24].mxu0 %vm942_vm3, %v18003_v33  ;;  %v18008_v33 = vld [vmem:[#allocation184_spill] sm:$0xff] }
 0x1eb   : > { %12154 = vmatprep.mubr.msk.bf16.mxu0 %vm942_vm3, %v18004_v26  ;;  %v18009_v26 = vld [vmem:[#allocation191_spill] sm:$0xff] }
 0x1ee   : > { %11533 = vmatmul.mubr.msk.bf16.gmra.mrb[96].mxu1 %vm942_vm3, %v14568_v30 }
 0x1ef   : > { %11536 = vmatprep.mubr.msk.bf16.mxu1 %vm942_vm3, %v14596_v22 }
 0x1f2   : > { %12155 = vmatmul.mubr.msk.bf16.gmra.mrb[28].mxu0 %vm942_vm3, %v18005_v17  ;;  %v18010_v17 = vld [vmem:[#allocation192_spill] sm:$0xff] }
 0x1f3   : > { %12158 = vmatprep.mubr.msk.bf16.mxu0 %vm942_vm3, %v18006_v36  ;;  %v18011_v36 = vld [vmem:[#allocation199_spill] sm:$0xff] }
 0x1f6   : > { %11537 = vmatmul.mubr.msk.bf16.gmra.mrb[100].mxu1 %vm942_vm3, %v14608_v28 }
 0x1f7   : > { %11540 = vmatprep.mubr.msk.bf16.mxu1 %vm942_vm3, %v14636_v32 }
 0x1fa   : > { %12159 = vmatmul.mubr.msk.bf16.gmra.mrb[32].mxu0 %vm942_vm3, %v18007_v11  ;;  %v18012_v11 = vld [vmem:[#allocation200_spill] sm:$0xff] }
 0x1fb   : > { %12162 = vmatprep.mubr.msk.bf16.mxu0 %vm942_vm3, %v18008_v33  ;;  %v18013_v33 = vld [vmem:[#allocation207_spill] sm:$0xff] }
 0x1fe   : > { %11541 = vmatmul.mubr.msk.bf16.gmra.mrb[104].mxu1 %vm942_vm3, %v14648_v10 }
 0x1ff   : > { %11544 = vmatprep.mubr.msk.bf16.mxu1 %vm942_vm3, %v14676_v46 }
 0x202   : > { %12163 = vmatmul.mubr.msk.bf16.gmra.mrb[36].mxu0 %vm942_vm3, %v18009_v26  ;;  %v18014_v26 = vld [vmem:[#allocation208_spill] sm:$0xff] }
 0x203   : > { %12166 = vmatprep.mubr.msk.bf16.mxu0 %vm942_vm3, %v18010_v17  ;;  %v18015_v17 = vld [vmem:[#allocation215_spill] sm:$0xff] }
 0x206   : > { %11545 = vmatmul.mubr.msk.bf16.gmra.mrb[108].mxu1 %vm942_vm3, %v14688_v20 }
 0x207   : > { %11548 = vmatprep.mubr.msk.bf16.mxu1 %vm942_vm3, %v14716_v19 }
 0x20a   : > { %12167 = vmatmul.mubr.msk.bf16.gmra.mrb[40].mxu0 %vm942_vm3, %v18011_v36  ;;  %v18016_v36 = vld [vmem:[#allocation216_spill] sm:$0xff] }
 0x20b   : > { %12170 = vmatprep.mubr.msk.bf16.mxu0 %vm942_vm3, %v18012_v11 }
 0x20e   : > { %11549 = vmatmul.mubr.msk.bf16.gmra.mrb[112].mxu1 %vm942_vm3, %v14728_v38 }
 0x20f   : > { %11552 = vmatprep.mubr.msk.bf16.mxu1 %vm942_vm3, %v14756_v16 }
 0x212   : > { %12171 = vmatmul.mubr.msk.bf16.gmra.mrb[44].mxu0 %vm942_vm3, %v18013_v33  ;;  %v18020_v33 = vld [vmem:[#allocation224_spill] sm:$0xff] }
 0x213   : > { %12174 = vmatprep.mubr.msk.bf16.mxu0 %vm942_vm3, %v18014_v26 }
 0x216   : > { %11553 = vmatmul.mubr.msk.bf16.gmra.mrb[116].mxu1 %vm942_vm3, %v14768_v60 }
 0x217   : > { %11556 = vmatprep.mubr.msk.bf16.mxu1 %vm942_vm3, %v14796_v1 }
 0x21a   : > { %12175 = vmatmul.mubr.msk.bf16.gmra.mrb[48].mxu0 %vm942_vm3, %v18015_v17 }
 0x21b   : > { %12178 = vmatprep.mubr.msk.bf16.mxu0 %vm942_vm3, %v18016_v36 }
 0x21e   : > { %11557 = vmatmul.mubr.msk.bf16.gmra.mrb[120].mxu1 %vm942_vm3, %v14808_v50 }
 0x21f   : > { %11560 = vmatprep.mubr.msk.bf16.mxu1 %vm942_vm3, %v14836_v48 }
 0x222   : > { %12179 = vmatmul.mubr.msk.bf16.gmra.mrb[52].mxu0 %vm942_vm3, %v14955_v41  ;;  %v2520_v41 = vrot.slane %v13721_v18, 1 }
 0x223   : > { %12182 = vmatprep.mubr.msk.bf16.mxu0 %vm942_vm3, %v14962_v49  ;;  %v2519_v49 = vrot.slane %v13717_v15, 1  ;;  %v2524_v15 = vrot.slane %v13730_v25, 1 }
 0x226   : > { %11561 = vmatmul.mubr.msk.bf16.gmra.mrb[124].mxu1 %vm942_vm3, %v14848_v45 }
 0x227   : > { %11564 = vmatprep.mubr.msk.bf16.mxu1 %vm942_vm3, %v17981_v54 }
 0x22a   : > { %12183 = vmatmul.mubr.msk.bf16.gmra.mrb[56].mxu0 %vm942_vm3, %v14982_v31  ;;  %v2521_v31 = vsel %vm2518_vm6, %v2519_v49, %v2520_v41  ;;  %v18022_v49 = vld [vmem:[#allocation7_spill] sm:$0xff] }
 0x22b   : > { %12186 = vmatprep.mubr.msk.bf16.mxu0 %vm942_vm3, %v14988_v58  ;;  %v2522_v58 = vrot.slane %v13725_v21, 1  ;;  %v18017_v21 = vld [vmem:[#allocation3_spill] sm:$0xff] }
 0x22c   : > { %v2526_v25 = vrot.slane %v18017_v21, 1  ;;  %v18038_v21 = vld [vmem:[#allocation28_spill] sm:$0xff] }
 0x22d   : > { %v2523_v18 = vsel %vm2518_vm6, %v2520_v41, %v2522_v58  ;;  %v2530_v41 = vrot.slane %v18022_v49, 1  ;;  %v18032_v49 = vld [vmem:[#allocation23_spill] sm:$0xff] }
 0x22e   : > { %11565 = vmatmul.mubr.msk.bf16.gmra.mrb[128].mxu1 %vm942_vm3, %v14888_v59  ;;  %v15460_v26 = vsel %vm2518_vm6, %v2524_v15, %v2526_v25 }
 0x22f   : > { %11568 = vmatprep.mubr.msk.bf16.mxu1 %vm942_vm3, %v14916_v5 }
 0x232   : > { %12187 = vmatmul.mubr.msk.bf16.gmra.mrb[60].mxu0 %vm942_vm3, %v14999_v55  ;;  %v15446_v55 = vsel %vm2518_vm6, %v2522_v58, %v2524_v15  ;;  %v18024_v15 = vld [vmem:[#allocation226_spill] sm:$0xff] }
 0x233   : > { %12190 = vmatprep.mubr.msk.bf16.mxu0 %vm942_vm3, %v15004_v9  ;;  %v18018_v9 = vld [vmem:[#allocation6_spill] sm:$0xff] }
 0x234   : > { %v2528_v11 = vrot.slane %v18018_v9, 1  ;;  %v2540_v9 = vrot.slane %v18032_v49, 1 }
 0x236   : > { %11569 = vmatmul.mubr.msk.bf16.gmra.mrb[132].mxu1 %vm942_vm3, %v14928_v8  ;;  %v15466_v17 = vsel %vm2518_vm6, %v2526_v25, %v2528_v11 }
 0x237   : > { %11574 = vmatprep.mubr.msk.bf16.mxu1 %vm942_vm3, %v2521_v31  ;;  %v18023_v31 = vld [vmem:[#allocation12_spill] sm:$0xff] }
 0x238   : > { %v2532_v58 = vrot.slane %v18023_v31, 1 }
 0x23a   : > { %12191 = vmatmul.mubr.msk.bf16.gmra.mrb[64].mxu0 %vm942_vm3, %v15016_v61  ;;  %v18019_v61 = vld [vmem:[#allocation2_spill] sm:$0xff]  ;;  %v15486_v25 = vsel %vm2518_vm6, %v2530_v41, %v2532_v58 }
 0x23b   : > { %12194 = vmatprep.mubr.msk.bf16.mxu0 %vm942_vm3, %v15021_v40  ;;  %v18021_v40 = vld [vmem:[#allocation225_spill] sm:$0xff] }
 0x23e   : > { %11575 = vmatmul.mubr.msk.bf16.vlgmr.msra.gmra.mrb[0].mxu1 %vm942_vm3, %v2523_v18  ;;  %v18025_v18 = vld [vmem:[#allocation227_spill] sm:$0xff] }
 0x23f   : > { %11711 = vmatpush3.bf16.msra.mxu1 %v15309_v57  ;;  %11578 = vmatprep.mubr.msk.bf16.mxu1 %vm942_vm3, %v15446_v55  ;;  %v10603_v57 = vld [vmem:[%s17334_s1 + $0x10] sm:$0x3] }
 0x240   : > { %12538 = vmatprep.subr.bf16.mxu1 %v18019_v61  ;;  %v15469_v36 = vand.u32 %v10603_v57, %v13683_v4  ;;  %v15483_v4 = vsel %vm2518_vm6, %v2528_v11, %v2530_v41  ;;  %v18027_v57 = vld [vmem:[#allocation18_spill] sm:$0xff] }
 0x241   : > { %v2536_v31 = vrot.slane %v18027_v57, 1 }
 0x242   : > { %12195 = vmatmul.mubr.msk.bf16.gmra.mrb[68].mxu0 %vm942_vm3, %v18020_v33  ;;  %12400 = vmatprep.subr.bf16.mxu0 %v15469_v36  ;;  %v18026_v33 = vld [vmem:[#allocation15_spill] sm:$0xff] }
 0x243   : > { %12198 = vmatprep.mubr.msk.bf16.mxu0 %vm942_vm3, %v18021_v40  ;;  %v2534_v40 = vrot.slane %v18026_v33, 1  ;;  %v18031_v33 = vld [vmem:[#allocation19_spill] sm:$0xff] }
 0x244   : > { %v2538_v57 = vrot.slane %v18031_v33, 1  ;;  %v18037_v33 = vld [vmem:[#allocation27_spill] sm:$0xff] }
 0x245   : > { %v15499_v11 = vsel %vm2518_vm6, %v2532_v58, %v2534_v40  ;;  %v15502_v41 = vsel %vm2518_vm6, %v2534_v40, %v2536_v31  ;;  %v2542_v49 = vrot.slane %v18037_v33, 1  ;;  %v18043_v33 = vld [vmem:[#allocation33_spill] sm:$0xff] }
 0x246   : > { %11579 = vmatmul.mubr.msk.bf16.gmra.mrb[4].mxu1 %vm942_vm3, %v15460_v26  ;;  %18030 = vst [vmem:[#allocation112_spill] sm:$0xff] %v15502_v41  ;;  %v15515_v58 = vsel %vm2518_vm6, %v2536_v31, %v2538_v57  ;;  %v15518_v40 = vsel %vm2518_vm6, %v2538_v57, %v2540_v9 }
 0x247   : > { %11582 = vmatprep.mubr.msk.bf16.mxu1 %vm942_vm3, %v15466_v17  ;;  %18035 = vst [vmem:[#allocation119_spill] sm:$0xff] %v15515_v58  ;;  %18036 = vst [vmem:[#allocation120_spill] sm:$0xff] %v15518_v40  ;;  %v15531_v31 = vsel %vm2518_vm6, %v2540_v9, %v2542_v49 }
 0x248   : > { %18041 = vst [vmem:[#allocation127_spill] sm:$0xff] %v15531_v31 }
 0x24a   : > { %12199 = vmatmul.mubr.msk.bf16.gmra.mrb[72].mxu0 %vm942_vm3, %v18024_v15  ;;  %v18028_v15 = vld [vmem:[#allocation228_spill] sm:$0xff] }
 0x24b   : > { %12202 = vmatprep.mubr.msk.bf16.mxu0 %vm942_vm3, %v18025_v18  ;;  %v18029_v18 = vld [vmem:[#allocation229_spill] sm:$0xff] }
 0x24e   : > { %11583 = vmatmul.mubr.msk.bf16.gmra.mrb[8].mxu1 %vm942_vm3, %v15483_v4 }
 0x24f   : > { %11586 = vmatprep.mubr.msk.bf16.mxu1 %vm942_vm3, %v15486_v25 }
 0x252   : > { %12203 = vmatmul.mubr.msk.bf16.gmra.mrb[76].mxu0 %vm942_vm3, %v18028_v15  ;;  %v18033_v15 = vld [vmem:[#allocation230_spill] sm:$0xff] }
 0x253   : > { %12206 = vmatprep.mubr.msk.bf16.mxu0 %vm942_vm3, %v18029_v18  ;;  %v18034_v18 = vld [vmem:[#allocation231_spill] sm:$0xff] }
 0x256   : > { %11587 = vmatmul.mubr.msk.bf16.gmra.mrb[12].mxu1 %vm942_vm3, %v15499_v11 }
 0x257   : > { %11590 = vmatprep.mubr.msk.bf16.mxu1 %vm942_vm3, %v15502_v41  ;;  %v2544_v41 = vrot.slane %v18038_v21, 1  ;;  %v2546_v21 = vrot.slane %v18043_v33, 1  ;;  %v18049_v33 = vld [vmem:[#allocation39_spill] sm:$0xff] }
 0x259   : > { %v15534_v57 = vsel %vm2518_vm6, %v2542_v49, %v2544_v41  ;;  %v15547_v9 = vsel %vm2518_vm6, %v2544_v41, %v2546_v21 }
 0x25a   : > { %12207 = vmatmul.mubr.msk.bf16.gmra.mrb[80].mxu0 %vm942_vm3, %v18033_v15  ;;  %v18039_v15 = vld [vmem:[#allocation232_spill] sm:$0xff]  ;;  %18042 = vst [vmem:[#allocation128_spill] sm:$0xff] %v15534_v57  ;;  %18047 = vst [vmem:[#allocation135_spill] sm:$0xff] %v15547_v9 }
 0x25b   : > { %12210 = vmatprep.mubr.msk.bf16.mxu0 %vm942_vm3, %v18034_v18  ;;  %v18040_v18 = vld [vmem:[#allocation233_spill] sm:$0xff] }
 0x25e   : > { %11591 = vmatmul.mubr.msk.bf16.gmra.mrb[16].mxu1 %vm942_vm3, %v15515_v58 }
 0x25f   : > { %11594 = vmatprep.mubr.msk.bf16.mxu1 %vm942_vm3, %v15518_v40  ;;  %v18044_v40 = vld [vmem:[#allocation34_spill] sm:$0xff] }
 0x260   : > { %v2548_v58 = vrot.slane %v18044_v40, 1  ;;  %v2550_v40 = vrot.slane %v18049_v33, 1  ;;  %v18055_v33 = vld [vmem:[#allocation45_spill] sm:$0xff] }
 0x262   : > { %12211 = vmatmul.mubr.msk.bf16.gmra.mrb[84].mxu0 %vm942_vm3, %v18039_v15  ;;  %v18045_v15 = vld [vmem:[#allocation234_spill] sm:$0xff]  ;;  %v15550_v49 = vsel %vm2518_vm6, %v2546_v21, %v2548_v58  ;;  %v15563_v41 = vsel %vm2518_vm6, %v2548_v58, %v2550_v40 }
 0x263   : > { %12214 = vmatprep.mubr.msk.bf16.mxu0 %vm942_vm3, %v18040_v18  ;;  %v18046_v18 = vld [vmem:[#allocation235_spill] sm:$0xff]  ;;  %18048 = vst [vmem:[#allocation136_spill] sm:$0xff] %v15550_v49  ;;  %18053 = vst [vmem:[#allocation143_spill] sm:$0xff] %v15563_v41 }
 0x266   : > { %11595 = vmatmul.mubr.msk.bf16.gmra.mrb[20].mxu1 %vm942_vm3, %v15531_v31 }
 0x267   : > { %11598 = vmatprep.mubr.msk.bf16.mxu1 %vm942_vm3, %v15534_v57  ;;  %v18050_v57 = vld [vmem:[#allocation40_spill] sm:$0xff] }
 0x268   : > { %v2552_v31 = vrot.slane %v18050_v57, 1  ;;  %v2554_v57 = vrot.slane %v18055_v33, 1  ;;  %v18061_v33 = vld [vmem:[#allocation51_spill] sm:$0xff] }
 0x26a   : > { %12215 = vmatmul.mubr.msk.bf16.gmra.mrb[88].mxu0 %vm942_vm3, %v18045_v15  ;;  %v18051_v15 = vld [vmem:[#allocation236_spill] sm:$0xff]  ;;  %v15566_v21 = vsel %vm2518_vm6, %v2550_v40, %v2552_v31  ;;  %v15579_v58 = vsel %vm2518_vm6, %v2552_v31, %v2554_v57 }
 0x26b   : > { %12218 = vmatprep.mubr.msk.bf16.mxu0 %vm942_vm3, %v18046_v18  ;;  %v18052_v18 = vld [vmem:[#allocation237_spill] sm:$0xff]  ;;  %18054 = vst [vmem:[#allocation144_spill] sm:$0xff] %v15566_v21  ;;  %18059 = vst [vmem:[#allocation151_spill] sm:$0xff] %v15579_v58 }
 0x26e   : > { %11599 = vmatmul.mubr.msk.bf16.gmra.mrb[24].mxu1 %vm942_vm3, %v15547_v9 }
 0x26f   : > { %11602 = vmatprep.mubr.msk.bf16.mxu1 %vm942_vm3, %v15550_v49  ;;  %v18056_v49 = vld [vmem:[#allocation46_spill] sm:$0xff] }
 0x270   : > { %v2556_v9 = vrot.slane %v18056_v49, 1  ;;  %v2558_v49 = vrot.slane %v18061_v33, 1  ;;  %v18067_v33 = vld [vmem:[#allocation57_spill] sm:$0xff] }
 0x272   : > { %12219 = vmatmul.mubr.msk.bf16.gmra.mrb[92].mxu0 %vm942_vm3, %v18051_v15  ;;  %v18057_v15 = vld [vmem:[#allocation238_spill] sm:$0xff]  ;;  %v15582_v40 = vsel %vm2518_vm6, %v2554_v57, %v2556_v9  ;;  %v15595_v31 = vsel %vm2518_vm6, %v2556_v9, %v2558_v49 }
 0x273   : > { %12222 = vmatprep.mubr.msk.bf16.mxu0 %vm942_vm3, %v18052_v18  ;;  %v18058_v18 = vld [vmem:[#allocation239_spill] sm:$0xff]  ;;  %18060 = vst [vmem:[#allocation152_spill] sm:$0xff] %v15582_v40  ;;  %18065 = vst [vmem:[#allocation159_spill] sm:$0xff] %v15595_v31 }
 0x276   : > { %11603 = vmatmul.mubr.msk.bf16.gmra.mrb[28].mxu1 %vm942_vm3, %v15563_v41 }
 0x277   : > { %11606 = vmatprep.mubr.msk.bf16.mxu1 %vm942_vm3, %v15566_v21  ;;  %v18062_v21 = vld [vmem:[#allocation52_spill] sm:$0xff] }
 0x278   : > { %v2560_v41 = vrot.slane %v18062_v21, 1  ;;  %v2562_v21 = vrot.slane %v18067_v33, 1  ;;  %v18073_v33 = vld [vmem:[#allocation63_spill] sm:$0xff] }
 0x27a   : > { %12223 = vmatmul.mubr.msk.bf16.gmra.mrb[96].mxu0 %vm942_vm3, %v18057_v15  ;;  %v18063_v15 = vld [vmem:[#allocation240_spill] sm:$0xff]  ;;  %v15598_v57 = vsel %vm2518_vm6, %v2558_v49, %v2560_v41  ;;  %v15611_v9 = vsel %vm2518_vm6, %v2560_v41, %v2562_v21 }
 0x27b   : > { %12226 = vmatprep.mubr.msk.bf16.mxu0 %vm942_vm3, %v18058_v18  ;;  %v18064_v18 = vld [vmem:[#allocation241_spill] sm:$0xff]  ;;  %18066 = vst [vmem:[#allocation160_spill] sm:$0xff] %v15598_v57  ;;  %18071 = vst [vmem:[#allocation167_spill] sm:$0xff] %v15611_v9 }
 0x27e   : > { %11607 = vmatmul.mubr.msk.bf16.gmra.mrb[32].mxu1 %vm942_vm3, %v15579_v58 }
 0x27f   : > { %11610 = vmatprep.mubr.msk.bf16.mxu1 %vm942_vm3, %v15582_v40  ;;  %v18068_v40 = vld [vmem:[#allocation58_spill] sm:$0xff] }
 0x280   : > { %v2564_v58 = vrot.slane %v18068_v40, 1  ;;  %v2566_v40 = vrot.slane %v18073_v33, 1  ;;  %v18079_v33 = vld [vmem:[#allocation69_spill] sm:$0xff] }
 0x282   : > { %12227 = vmatmul.mubr.msk.bf16.gmra.mrb[100].mxu0 %vm942_vm3, %v18063_v15  ;;  %v18069_v15 = vld [vmem:[#allocation242_spill] sm:$0xff]  ;;  %v15614_v49 = vsel %vm2518_vm6, %v2562_v21, %v2564_v58  ;;  %v15627_v41 = vsel %vm2518_vm6, %v2564_v58, %v2566_v40 }
 0x283   : > { %12230 = vmatprep.mubr.msk.bf16.mxu0 %vm942_vm3, %v18064_v18  ;;  %v18070_v18 = vld [vmem:[#allocation243_spill] sm:$0xff]  ;;  %18072 = vst [vmem:[#allocation168_spill] sm:$0xff] %v15614_v49  ;;  %18077 = vst [vmem:[#allocation175_spill] sm:$0xff] %v15627_v41 }
 0x286   : > { %11611 = vmatmul.mubr.msk.bf16.gmra.mrb[36].mxu1 %vm942_vm3, %v15595_v31 }
 0x287   : > { %11614 = vmatprep.mubr.msk.bf16.mxu1 %vm942_vm3, %v15598_v57  ;;  %v18074_v57 = vld [vmem:[#allocation64_spill] sm:$0xff] }
 0x288   : > { %v2568_v31 = vrot.slane %v18074_v57, 1  ;;  %v2570_v57 = vrot.slane %v18079_v33, 1 }
 0x28a   : > { %12231 = vmatmul.mubr.msk.bf16.gmra.mrb[104].mxu0 %vm942_vm3, %v18069_v15  ;;  %v18075_v15 = vld [vmem:[#allocation244_spill] sm:$0xff]  ;;  %v15630_v21 = vsel %vm2518_vm6, %v2566_v40, %v2568_v31  ;;  %v15643_v58 = vsel %vm2518_vm6, %v2568_v31, %v2570_v57  ;;  %v18086_v31 = vld [vmem:[#allocation249_spill] sm:$0xff] }
 0x28b   : > { %12234 = vmatprep.mubr.msk.bf16.mxu0 %vm942_vm3, %v18070_v18  ;;  %v18076_v18 = vld [vmem:[#allocation245_spill] sm:$0xff]  ;;  %18078 = vst [vmem:[#allocation176_spill] sm:$0xff] %v15630_v21 }
 0x28e   : > { %11615 = vmatmul.mubr.msk.bf16.gmra.mrb[40].mxu1 %vm942_vm3, %v15611_v9 }
 0x28f   : > { %11618 = vmatprep.mubr.msk.bf16.mxu1 %vm942_vm3, %v15614_v49  ;;  %v18080_v49 = vld [vmem:[#allocation70_spill] sm:$0xff] }
 0x290   : > { %v2572_v9 = vrot.slane %v18080_v49, 1  ;;  %v18083_v49 = vld [vmem:[#allocation75_spill] sm:$0xff] }
 0x291   : > { %v2574_v33 = vrot.slane %v18083_v49, 1  ;;  %v2580_v49 = vrot.slane %v17989_v34, 1 }
 0x292   : > { %12235 = vmatmul.mubr.msk.bf16.gmra.mrb[108].mxu0 %vm942_vm3, %v18075_v15  ;;  %v18081_v15 = vld [vmem:[#allocation246_spill] sm:$0xff]  ;;  %v15646_v40 = vsel %vm2518_vm6, %v2570_v57, %v2572_v9 }
 0x293   : > { %12238 = vmatprep.mubr.msk.bf16.mxu0 %vm942_vm3, %v18076_v18  ;;  %v18082_v18 = vld [vmem:[#allocation247_spill] sm:$0xff]  ;;  %v15659_v57 = vsel %vm2518_vm6, %v2572_v9, %v2574_v33 }
 0x294   : > { %18087 = vst [vmem:[#allocation183_spill] sm:$0xff] %v15659_v57 }
 0x296   : > { %11619 = vmatmul.mubr.msk.bf16.gmra.mrb[44].mxu1 %vm942_vm3, %v15627_v41  ;;  %v18085_v41 = vld [vmem:[#allocation248_spill] sm:$0xff] }
 0x297   : > { %11622 = vmatprep.mubr.msk.bf16.mxu1 %vm942_vm3, %v15630_v21 }
 0x29a   : > { %12239 = vmatmul.mubr.msk.bf16.gmra.mrb[112].mxu0 %vm942_vm3, %v18081_v15  ;;  %v18084_v15 = vld [vmem:[#allocation76_spill] sm:$0xff] }
 0x29b   : > { %12242 = vmatprep.mubr.msk.bf16.mxu0 %vm942_vm3, %v18082_v18  ;;  %v2576_v21 = vrot.slane %v18084_v15, 1  ;;  %v2578_v15 = vrot.slane %v17987_v52, 1 }
 0x29d   : > { %v15662_v18 = vsel %vm2518_vm6, %v2574_v33, %v2576_v21  ;;  %v15675_v33 = vsel %vm2518_vm6, %v2576_v21, %v2578_v15  ;;  %v15678_v9 = vsel %vm2518_vm6, %v2578_v15, %v2580_v49 }
 0x29e   : > { %11623 = vmatmul.mubr.msk.bf16.gmra.mrb[48].mxu1 %vm942_vm3, %v15643_v58  ;;  %18088 = vst [vmem:[#allocation184_spill] sm:$0xff] %v15662_v18  ;;  %18089 = vst [vmem:[#allocation191_spill] sm:$0xff] %v15675_v33 }
 0x29f   : > { %11626 = vmatprep.mubr.msk.bf16.mxu1 %vm942_vm3, %v15646_v40  ;;  %18090 = vst [vmem:[#allocation192_spill] sm:$0xff] %v15678_v9 }
 0x2a2   : > { %12243 = vmatmul.mubr.msk.bf16.gmra.mrb[116].mxu0 %vm942_vm3, %v18085_v41  ;;  %v314_v41 = vld [vmem:[%s13709_s25 + $0x470] sm:$0xff] }
 0x2a3   : > { %12246 = vmatprep.mubr.msk.bf16.mxu0 %vm942_vm3, %v18086_v31  ;;  %v315_v31 = vld [vmem:[%s13709_s25 + $0x478] sm:$0xff] }
 0x2a4   : > { %v15687_v34 = vpack.c.bf16 %v315_v31, %v314_v41  ;;  %v2588_v31 = vrot.slane %v14281_v27, 1 }
 0x2a6   : > { %11627 = vmatmul.mubr.msk.bf16.gmra.mrb[52].mxu1 %vm942_vm3, %v15659_v57  ;;  %18091 = vst [vmem:[#allocation199_spill] sm:$0xff] %v15687_v34  ;;  %v6580_v15 = vrot.slane %v15687_v34, 2 }
 0x2a7   : > { %11630 = vmatprep.mubr.msk.bf16.mxu1 %vm942_vm3, %v15662_v18 }
 0x2aa   : > { %12247 = vmatmul.mubr.msk.bf16.gmra.mrb[120].mxu0 %vm942_vm3, %v15249_v24  ;;  %v2582_v24 = vrot.slane %v14240_v53, 1  ;;  %v18096_v53 = vld [vmem:[#allocation4_spill] sm:$0xff] }
 0x2ab   : > { %12250 = vmatprep.mubr.msk.bf16.mxu0 %vm942_vm3, %v15254_v35  ;;  %v2584_v35 = vrot.slane %v14245_v63, 1  ;;  %v18095_v63 = vld [vmem:[#allocation5_spill] sm:$0xff]  ;;  %v7310_v34 = vrot.slane %v18096_v53, 3 }
 0x2ac   : > { %v15695_v21 = vsel %vm2518_vm6, %v2580_v49, %v2582_v24 }
 0x2ad   : > { %18092 = vst [vmem:[#allocation200_spill] sm:$0xff] %v15695_v21  ;;  %v15699_v52 = vsel %vm2518_vm6, %v2582_v24, %v2584_v35  ;;  %v7309_v24 = vrot.slane %v18095_v63, 2 }
 0x2ae   : > { %11631 = vmatmul.mubr.msk.bf16.gmra.mrb[56].mxu1 %vm942_vm3, %v15675_v33  ;;  %v18097_v33 = vld [vmem:[#allocation9_spill] sm:$0xff] }
 0x2af   : > { %11634 = vmatprep.mubr.msk.bf16.mxu1 %vm942_vm3, %v15678_v9  ;;  %v316_v9 = vld [vmem:[%s13709_s25 + $0x480] sm:$0x3f]  ;;  %v7312_v18 = vrot.slane %v18097_v33, 2  ;;  %v7311_v63 = vor.u32 %v7310_v34, %v7309_v24  ;;  %v18099_v33 = vld [vmem:[#allocation11_spill] sm:$0xff]  ;;  %v2592_v34 = vrot.slane %v14337_v23, 1  ;;  %v18102_v24 = vld [vmem:[#allocation13_spill] sm:$0xff] }
 0x2b0   : > { %v15710_v49 = vpack.c.bf16 %v316_v9, %v316_v9 }
 0x2b2   : > { %12251 = vmatmul.mubr.msk.bf16.gmra.mrb[124].mxu0 %vm942_vm3, %v15269_v7  ;;  %v18093_v7 = vrot.slane %v15273_v0, 2  ;;  %18094 = vst [vmem:[#allocation207_spill] sm:$0xff] %v15710_v49  ;;  %v6582_v9 = vrot.slane %v15710_v49, 2  ;;  %v7321_v49 = vrot.slane %v18102_v24, 3  ;;  %v18104_v24 = vld [vmem:[#allocation16_spill] sm:$0xff] }
 0x2b3   : > { %12254 = vmatprep.mubr.msk.bf16.mxu0 %vm942_vm3, %v15276_v51  ;;  %v2586_v51 = vrot.slane %v14276_v42, 1 }
 0x2b4   : > { %v6581_v41 = vsel %vm5518_vm5, %v18093_v7, %v6580_v15  ;;  %v6583_v53 = vsel %vm5518_vm5, %v6580_v15, %v6582_v9 }
 0x2b5   : > { %v15721_v7 = vsel %vm2518_vm6, %v2584_v35, %v2586_v51  ;;  %v15725_v27 = vsel %vm2518_vm6, %v2586_v51, %v2588_v31  ;;  %v7316_v35 = vrot.slane %v18099_v33, 2 }
 0x2b6   : > { %11635 = vmatmul.mubr.msk.bf16.gmra.mrb[60].mxu1 %vm942_vm3, %v15695_v21  ;;  %v18098_v21 = vld [vmem:[#allocation8_spill] sm:$0xff] }
 0x2b7   : > { %11638 = vmatprep.mubr.msk.bf16.mxu1 %vm942_vm3, %v15699_v52  ;;  %v7313_v57 = vrot.slane %v18098_v21, 3  ;;  %v18100_v21 = vld [vmem:[#allocation10_spill] sm:$0xff] }
 0x2b9   : > { %v7314_v42 = vor.u32 %v7313_v57, %v7312_v18  ;;  %v18101_v57 = vld [vmem:[#allocation14_spill] sm:$0xff] }
 0x2ba   : > { %12255 = vmatmul.mubr.msk.bf16.gmra.mrb[128].mxu0 %vm942_vm3, %v15288_v37  ;;  %v2590_v37 = vrot.slane %v14309_v44, 1  ;;  %v7320_v18 = vrot.slane %v18101_v57, 2  ;;  %v18103_v57 = vld [vmem:[#allocation17_spill] sm:$0xff] }
 0x2bb   : > { %12258 = vmatprep.mubr.msk.bf16.mxu0 %vm942_vm3, %v6581_v41  ;;  %v7317_v41 = vrot.slane %v18100_v21, 3  ;;  %v7315_v51 = vsel %vm7308_vm7, %v7311_v63, %v7314_v42 }
 0x2bc   : > { %v15742_v15 = vsel %vm2518_vm6, %v2588_v31, %v2590_v37  ;;  %v15745_v33 = vsel %vm2518_vm6, %v2590_v37, %v2592_v34  ;;  %v7322_v21 = vor.u32 %v7321_v49, %v7320_v18  ;;  %v7325_v31 = vrot.slane %v18104_v24, 3  ;;  %v18106_v18 = vld [vmem:[#allocation20_spill] sm:$0xff] }
 0x2bd   : > { %v7318_v9 = vor.u32 %v7317_v41, %v7316_v35  ;;  %v2596_v37 = vrot.slane %v14365_v2, 1  ;;  %v18105_v41 = vld [vmem:[#allocation21_spill] sm:$0xff]  ;;  %v7329_v23 = vrot.slane %v18106_v18, 3  ;;  %v18108_v18 = vld [vmem:[#allocation22_spill] sm:$0xff] }
 0x2be   : > { %11639 = vmatmul.mubr.msk.bf16.gmra.mrb[64].mxu1 %vm942_vm3, %v15721_v7  ;;  %v7328_v49 = vrot.slane %v18105_v41, 2 }
 0x2bf   : > { %11642 = vmatprep.mubr.msk.bf16.mxu1 %vm942_vm3, %v15725_v27  ;;  %v7319_v63 = vsel %vm7308_vm7, %v7314_v42, %v7318_v9  ;;  %v7323_v35 = vsel %vm7308_vm7, %v7318_v9, %v7322_v21 }
 0x2c0   : > { %v7330_v9 = vor.u32 %v7329_v23, %v7328_v49  ;;  %v18110_v49 = vld [vmem:[#allocation25_spill] sm:$0xff] }
 0x2c1   : > { %v7337_v2 = vrot.slane %v18110_v49, 3  ;;  %v18112_v49 = vld [vmem:[#allocation29_spill] sm:$0xff] }
 0x2c2   : > { %12259 = vmatmul.mubr.msk.bf16.gmra.mrb[132].mxu0 %vm942_vm3, %v6583_v53  ;;  %v2594_v53 = vrot.slane %v14356_v12, 1  ;;  %v18164_v12 = vld [vmem:[#allocation107_spill] sm:$0xff] }
 0x2c3   : > { %12264 = vmatprep.mubr.msk.bf16.mxu0 %vm942_vm3, %v7315_v51  ;;  %v7324_v51 = vrot.slane %v18103_v57, 2 }
 0x2c4   : > { %v15763_v42 = vsel %vm2518_vm6, %v2592_v34, %v2594_v53  ;;  %v15766_v24 = vsel %vm2518_vm6, %v2594_v53, %v2596_v37  ;;  %v7333_v34 = vrot.slane %v18108_v18, 3  ;;  %v2600_v53 = vrot.slane %v14401_v3, 1 }
 0x2c5   : > { %v7326_v57 = vor.u32 %v7325_v31, %v7324_v51  ;;  %v18109_v31 = vld [vmem:[#allocation26_spill] sm:$0xff] }
 0x2c6   : > { %11643 = vmatmul.mubr.msk.bf16.gmra.mrb[68].mxu1 %vm942_vm3, %v15742_v15  ;;  %v7336_v23 = vrot.slane %v18109_v31, 2  ;;  %v18111_v31 = vld [vmem:[#allocation30_spill] sm:$0xff] }
 0x2c7   : > { %11646 = vmatprep.mubr.msk.bf16.mxu1 %vm942_vm3, %v15745_v33  ;;  %v7327_v41 = vsel %vm7308_vm7, %v7322_v21, %v7326_v57  ;;  %v7331_v51 = vsel %vm7308_vm7, %v7326_v57, %v7330_v9 }
 0x2c8   : > { %v7338_v18 = vor.u32 %v7337_v2, %v7336_v23  ;;  %v18114_v23 = vld [vmem:[#allocation31_spill] sm:$0xff] }
 0x2c9   : > { %v7345_v3 = vrot.slane %v18114_v23, 3  ;;  %v18116_v23 = vld [vmem:[#allocation35_spill] sm:$0xff] }
 0x2ca   : > { %12265 = vmatmul.mubr.msk.bf16.vlgmr.msra.gmra.mrb[0].mxu0 %vm942_vm3, %v7319_v63  ;;  %v18107_v63 = vld [vmem:[#allocation24_spill] sm:$0xff] }
 0x2cb   : > { %12401 = vmatpush3.bf16.msra.mxu0 %v15469_v36  ;;  %12268 = vmatprep.mubr.msk.bf16.mxu0 %vm942_vm3, %v7323_v35  ;;  %v2598_v36 = vrot.slane %v14391_v62, 1  ;;  %v7332_v35 = vrot.slane %v18107_v63, 2 }
 0x2cd   : > { %v15783_v21 = vsel %vm2518_vm6, %v2596_v37, %v2598_v36  ;;  %v7334_v62 = vor.u32 %v7333_v34, %v7332_v35  ;;  %v15786_v63 = vsel %vm2518_vm6, %v2598_v36, %v2600_v53  ;;  %v7341_v37 = vrot.slane %v18112_v49, 3  ;;  %v18113_v34 = vld [vmem:[#allocation32_spill] sm:$0xff] }
 0x2ce   : > { %11647 = vmatmul.mubr.msk.bf16.gmra.mrb[72].mxu1 %vm942_vm3, %v15763_v42  ;;  %v2604_v36 = vrot.slane %v14447_v47, 1  ;;  %v7344_v2 = vrot.slane %v18113_v34, 2  ;;  %v18115_v34 = vld [vmem:[#allocation36_spill] sm:$0xff] }
 0x2cf   : > { %11650 = vmatprep.mubr.msk.bf16.mxu1 %vm942_vm3, %v15766_v24  ;;  %v7335_v57 = vsel %vm7308_vm7, %v7330_v9, %v7334_v62  ;;  %v7339_v35 = vsel %vm7308_vm7, %v7334_v62, %v7338_v18 }
 0x2d0   : > { %v7346_v49 = vor.u32 %v7345_v3, %v7344_v2  ;;  %v18118_v2 = vld [vmem:[#allocation37_spill] sm:$0xff] }
 0x2d1   : > { %v7353_v47 = vrot.slane %v18118_v2, 3  ;;  %v18120_v2 = vld [vmem:[#allocation41_spill] sm:$0xff] }
 0x2d2   : > { %12269 = vmatmul.mubr.msk.bf16.gmra.mrb[4].mxu0 %vm942_vm3, %v7327_v41  ;;  %v2602_v41 = vrot.slane %v14432_v6, 1 }
 0x2d3   : > { %12272 = vmatprep.mubr.msk.bf16.mxu0 %vm942_vm3, %v7331_v51  ;;  %v7340_v51 = vrot.slane %v18111_v31, 2 }
 0x2d4   : > { %v15803_v9 = vsel %vm2518_vm6, %v2600_v53, %v2602_v41  ;;  %v15806_v31 = vsel %vm2518_vm6, %v2602_v41, %v2604_v36  ;;  %v7349_v53 = vrot.slane %v18116_v23, 3  ;;  %v2608_v41 = vrot.slane %v14488_v43, 1 }
 0x2d5   : > { %v7342_v6 = vor.u32 %v7341_v37, %v7340_v51  ;;  %v18117_v37 = vld [vmem:[#allocation38_spill] sm:$0xff] }
 0x2d6   : > { %11651 = vmatmul.mubr.msk.bf16.gmra.mrb[76].mxu1 %vm942_vm3, %v15783_v21  ;;  %v7352_v3 = vrot.slane %v18117_v37, 2  ;;  %v18119_v37 = vld [vmem:[#allocation42_spill] sm:$0xff] }
 0x2d7   : > { %11654 = vmatprep.mubr.msk.bf16.mxu1 %vm942_vm3, %v15786_v63  ;;  %v7343_v62 = vsel %vm7308_vm7, %v7338_v18, %v7342_v6  ;;  %v7347_v51 = vsel %vm7308_vm7, %v7342_v6, %v7346_v49 }
 0x2d8   : > { %v7354_v23 = vor.u32 %v7353_v47, %v7352_v3  ;;  %v18122_v3 = vld [vmem:[#allocation43_spill] sm:$0xff] }
 0x2d9   : > { %v7361_v43 = vrot.slane %v18122_v3, 3  ;;  %v18124_v3 = vld [vmem:[#allocation47_spill] sm:$0xff] }
 0x2da   : > { %12273 = vmatmul.mubr.msk.bf16.gmra.mrb[8].mxu0 %vm942_vm3, %v7335_v57  ;;  %v2606_v57 = vrot.slane %v14476_v39, 1 }
 0x2db   : > { %12276 = vmatprep.mubr.msk.bf16.mxu0 %vm942_vm3, %v7339_v35  ;;  %v7348_v35 = vrot.slane %v18115_v34, 2 }
 0x2dc   : > { %v15823_v18 = vsel %vm2518_vm6, %v2604_v36, %v2606_v57  ;;  %v15826_v34 = vsel %vm2518_vm6, %v2606_v57, %v2608_v41  ;;  %v7357_v36 = vrot.slane %v18120_v2, 3  ;;  %v2612_v57 = vrot.slane %v14528_v14, 1 }
 0x2dd   : > { %v7350_v39 = vor.u32 %v7349_v53, %v7348_v35  ;;  %v18121_v53 = vld [vmem:[#allocation44_spill] sm:$0xff] }
 0x2de   : > { %11655 = vmatmul.mubr.msk.bf16.gmra.mrb[80].mxu1 %vm942_vm3, %v15803_v9  ;;  %v7360_v47 = vrot.slane %v18121_v53, 2  ;;  %v18123_v53 = vld [vmem:[#allocation48_spill] sm:$0xff] }
 0x2df   : > { %11658 = vmatprep.mubr.msk.bf16.mxu1 %vm942_vm3, %v15806_v31  ;;  %v7351_v6 = vsel %vm7308_vm7, %v7346_v49, %v7350_v39  ;;  %v7355_v35 = vsel %vm7308_vm7, %v7350_v39, %v7354_v23 }
 0x2e0   : > { %v7362_v2 = vor.u32 %v7361_v43, %v7360_v47  ;;  %v18126_v47 = vld [vmem:[#allocation49_spill] sm:$0xff] }
 0x2e1   : > { %v7369_v14 = vrot.slane %v18126_v47, 3  ;;  %v18128_v47 = vld [vmem:[#allocation53_spill] sm:$0xff] }
 0x2e2   : > { %12277 = vmatmul.mubr.msk.bf16.gmra.mrb[12].mxu0 %vm942_vm3, %v7343_v62  ;;  %v2610_v62 = vrot.slane %v14516_v56, 1 }
 0x2e3   : > { %12280 = vmatprep.mubr.msk.bf16.mxu0 %vm942_vm3, %v7347_v51  ;;  %v7356_v51 = vrot.slane %v18119_v37, 2 }
 0x2e4   : > { %v15843_v49 = vsel %vm2518_vm6, %v2608_v41, %v2610_v62  ;;  %v15846_v37 = vsel %vm2518_vm6, %v2610_v62, %v2612_v57  ;;  %v7365_v41 = vrot.slane %v18124_v3, 3  ;;  %v2616_v62 = vrot.slane %v14568_v30, 1 }
 0x2e5   : > { %v7358_v56 = vor.u32 %v7357_v36, %v7356_v51  ;;  %v18125_v36 = vld [vmem:[#allocation50_spill] sm:$0xff] }
 0x2e6   : > { %11659 = vmatmul.mubr.msk.bf16.gmra.mrb[84].mxu1 %vm942_vm3, %v15823_v18  ;;  %v7368_v43 = vrot.slane %v18125_v36, 2  ;;  %v18127_v36 = vld [vmem:[#allocation54_spill] sm:$0xff] }
 0x2e7   : > { %11662 = vmatprep.mubr.msk.bf16.mxu1 %vm942_vm3, %v15826_v34  ;;  %v7359_v39 = vsel %vm7308_vm7, %v7354_v23, %v7358_v56  ;;  %v7363_v51 = vsel %vm7308_vm7, %v7358_v56, %v7362_v2 }
 0x2e8   : > { %v7370_v3 = vor.u32 %v7369_v14, %v7368_v43  ;;  %v18130_v43 = vld [vmem:[#allocation55_spill] sm:$0xff] }
 0x2e9   : > { %v7377_v30 = vrot.slane %v18130_v43, 3  ;;  %v18132_v43 = vld [vmem:[#allocation59_spill] sm:$0xff] }
 0x2ea   : > { %12281 = vmatmul.mubr.msk.bf16.gmra.mrb[16].mxu0 %vm942_vm3, %v7351_v6  ;;  %v2614_v6 = vrot.slane %v14556_v29, 1 }
 0x2eb   : > { %12284 = vmatprep.mubr.msk.bf16.mxu0 %vm942_vm3, %v7355_v35  ;;  %v7364_v35 = vrot.slane %v18123_v53, 2 }
 0x2ec   : > { %v15863_v23 = vsel %vm2518_vm6, %v2612_v57, %v2614_v6  ;;  %v15866_v53 = vsel %vm2518_vm6, %v2614_v6, %v2616_v62  ;;  %v7373_v57 = vrot.slane %v18128_v47, 3  ;;  %v2620_v6 = vrot.slane %v14608_v28, 1 }
 0x2ed   : > { %v7366_v29 = vor.u32 %v7365_v41, %v7364_v35  ;;  %v18129_v41 = vld [vmem:[#allocation56_spill] sm:$0xff] }
 0x2ee   : > { %11663 = vmatmul.mubr.msk.bf16.gmra.mrb[88].mxu1 %vm942_vm3, %v15843_v49  ;;  %v7376_v14 = vrot.slane %v18129_v41, 2  ;;  %v18131_v41 = vld [vmem:[#allocation60_spill] sm:$0xff] }
 0x2ef   : > { %11666 = vmatprep.mubr.msk.bf16.mxu1 %vm942_vm3, %v15846_v37  ;;  %v7367_v56 = vsel %vm7308_vm7, %v7362_v2, %v7366_v29  ;;  %v7371_v35 = vsel %vm7308_vm7, %v7366_v29, %v7370_v3 }
 0x2f0   : > { %v7378_v47 = vor.u32 %v7377_v30, %v7376_v14  ;;  %v18134_v14 = vld [vmem:[#allocation61_spill] sm:$0xff] }
 0x2f1   : > { %v7385_v28 = vrot.slane %v18134_v14, 3  ;;  %v18136_v14 = vld [vmem:[#allocation65_spill] sm:$0xff] }
 0x2f2   : > { %12285 = vmatmul.mubr.msk.bf16.gmra.mrb[20].mxu0 %vm942_vm3, %v7359_v39  ;;  %v2618_v39 = vrot.slane %v14596_v22, 1 }
 0x2f3   : > { %12288 = vmatprep.mubr.msk.bf16.mxu0 %vm942_vm3, %v7363_v51  ;;  %v7372_v51 = vrot.slane %v18127_v36, 2 }
 0x2f4   : > { %v15883_v2 = vsel %vm2518_vm6, %v2616_v62, %v2618_v39  ;;  %v15886_v36 = vsel %vm2518_vm6, %v2618_v39, %v2620_v6  ;;  %v7381_v62 = vrot.slane %v18132_v43, 3  ;;  %v2624_v39 = vrot.slane %v14648_v10, 1 }
 0x2f5   : > { %v7374_v22 = vor.u32 %v7373_v57, %v7372_v51  ;;  %v18133_v57 = vld [vmem:[#allocation62_spill] sm:$0xff] }
 0x2f6   : > { %11667 = vmatmul.mubr.msk.bf16.gmra.mrb[92].mxu1 %vm942_vm3, %v15863_v23  ;;  %v7384_v30 = vrot.slane %v18133_v57, 2  ;;  %v18135_v57 = vld [vmem:[#allocation66_spill] sm:$0xff] }
 0x2f7   : > { %11670 = vmatprep.mubr.msk.bf16.mxu1 %vm942_vm3, %v15866_v53  ;;  %v7375_v29 = vsel %vm7308_vm7, %v7370_v3, %v7374_v22  ;;  %v7379_v51 = vsel %vm7308_vm7, %v7374_v22, %v7378_v47 }
 0x2f8   : > { %v7386_v43 = vor.u32 %v7385_v28, %v7384_v30  ;;  %v18138_v30 = vld [vmem:[#allocation67_spill] sm:$0xff] }
 0x2f9   : > { %v7393_v10 = vrot.slane %v18138_v30, 3  ;;  %v18140_v30 = vld [vmem:[#allocation71_spill] sm:$0xff] }
 0x2fa   : > { %12289 = vmatmul.mubr.msk.bf16.gmra.mrb[24].mxu0 %vm942_vm3, %v7367_v56  ;;  %v2622_v56 = vrot.slane %v14636_v32, 1 }
 0x2fb   : > { %12292 = vmatprep.mubr.msk.bf16.mxu0 %vm942_vm3, %v7371_v35  ;;  %v7380_v35 = vrot.slane %v18131_v41, 2 }
 0x2fc   : > { %v15903_v3 = vsel %vm2518_vm6, %v2620_v6, %v2622_v56  ;;  %v15906_v41 = vsel %vm2518_vm6, %v2622_v56, %v2624_v39  ;;  %v7389_v6 = vrot.slane %v18136_v14, 3  ;;  %v2628_v56 = vrot.slane %v14688_v20, 1 }
 0x2fd   : > { %v7382_v32 = vor.u32 %v7381_v62, %v7380_v35  ;;  %v18137_v62 = vld [vmem:[#allocation68_spill] sm:$0xff] }
 0x2fe   : > { %11671 = vmatmul.mubr.msk.bf16.gmra.mrb[96].mxu1 %vm942_vm3, %v15883_v2  ;;  %v7392_v28 = vrot.slane %v18137_v62, 2  ;;  %v18139_v62 = vld [vmem:[#allocation72_spill] sm:$0xff] }
 0x2ff   : > { %11674 = vmatprep.mubr.msk.bf16.mxu1 %vm942_vm3, %v15886_v36  ;;  %v7383_v22 = vsel %vm7308_vm7, %v7378_v47, %v7382_v32  ;;  %v7387_v35 = vsel %vm7308_vm7, %v7382_v32, %v7386_v43 }
 0x300   : > { %v7394_v14 = vor.u32 %v7393_v10, %v7392_v28  ;;  %v18142_v28 = vld [vmem:[#allocation73_spill] sm:$0xff] }
 0x301   : > { %v7401_v20 = vrot.slane %v18142_v28, 3  ;;  %v18144_v28 = vld [vmem:[#allocation77_spill] sm:$0xff] }
 0x302   : > { %12293 = vmatmul.mubr.msk.bf16.gmra.mrb[28].mxu0 %vm942_vm3, %v7375_v29  ;;  %v2626_v29 = vrot.slane %v14676_v46, 1 }
 0x303   : > { %12296 = vmatprep.mubr.msk.bf16.mxu0 %vm942_vm3, %v7379_v51  ;;  %v7388_v51 = vrot.slane %v18135_v57, 2 }
 0x304   : > { %v15923_v47 = vsel %vm2518_vm6, %v2624_v39, %v2626_v29  ;;  %v15926_v57 = vsel %vm2518_vm6, %v2626_v29, %v2628_v56  ;;  %v7397_v39 = vrot.slane %v18140_v30, 3  ;;  %v2632_v29 = vrot.slane %v14728_v38, 1 }
 0x305   : > { %v7390_v46 = vor.u32 %v7389_v6, %v7388_v51  ;;  %v18141_v6 = vld [vmem:[#allocation74_spill] sm:$0xff] }
 0x306   : > { %11675 = vmatmul.mubr.msk.bf16.gmra.mrb[100].mxu1 %vm942_vm3, %v15903_v3  ;;  %v7400_v10 = vrot.slane %v18141_v6, 2  ;;  %v18143_v6 = vld [vmem:[#allocation78_spill] sm:$0xff] }
 0x307   : > { %11678 = vmatprep.mubr.msk.bf16.mxu1 %vm942_vm3, %v15906_v41  ;;  %v7391_v32 = vsel %vm7308_vm7, %v7386_v43, %v7390_v46  ;;  %v7395_v51 = vsel %vm7308_vm7, %v7390_v46, %v7394_v14 }
 0x308   : > { %v7402_v30 = vor.u32 %v7401_v20, %v7400_v10  ;;  %v18146_v10 = vld [vmem:[#allocation79_spill] sm:$0xff] }
 0x309   : > { %v7409_v38 = vrot.slane %v18146_v10, 3  ;;  %v18148_v10 = vld [vmem:[#allocation83_spill] sm:$0xff] }
 0x30a   : > { %12297 = vmatmul.mubr.msk.bf16.gmra.mrb[32].mxu0 %vm942_vm3, %v7383_v22  ;;  %v2630_v22 = vrot.slane %v14716_v19, 1 }
 0x30b   : > { %12300 = vmatprep.mubr.msk.bf16.mxu0 %vm942_vm3, %v7387_v35  ;;  %v7396_v35 = vrot.slane %v18139_v62, 2 }
 0x30c   : > { %v15943_v43 = vsel %vm2518_vm6, %v2628_v56, %v2630_v22  ;;  %v15946_v62 = vsel %vm2518_vm6, %v2630_v22, %v2632_v29  ;;  %v7405_v56 = vrot.slane %v18144_v28, 3  ;;  %v2636_v22 = vrot.slane %v14768_v60, 1 }
 0x30d   : > { %v7398_v19 = vor.u32 %v7397_v39, %v7396_v35  ;;  %v18145_v39 = vld [vmem:[#allocation80_spill] sm:$0xff] }
 0x30e   : > { %11679 = vmatmul.mubr.msk.bf16.gmra.mrb[104].mxu1 %vm942_vm3, %v15923_v47  ;;  %v7408_v20 = vrot.slane %v18145_v39, 2  ;;  %v18147_v39 = vld [vmem:[#allocation84_spill] sm:$0xff] }
 0x30f   : > { %11682 = vmatprep.mubr.msk.bf16.mxu1 %vm942_vm3, %v15926_v57  ;;  %v7399_v46 = vsel %vm7308_vm7, %v7394_v14, %v7398_v19  ;;  %v7403_v35 = vsel %vm7308_vm7, %v7398_v19, %v7402_v30 }
 0x310   : > { %v7410_v28 = vor.u32 %v7409_v38, %v7408_v20  ;;  %v18150_v20 = vld [vmem:[#allocation85_spill] sm:$0xff] }
 0x311   : > { %v7417_v60 = vrot.slane %v18150_v20, 3  ;;  %v18152_v20 = vld [vmem:[#allocation89_spill] sm:$0xff] }
 0x312   : > { %12301 = vmatmul.mubr.msk.bf16.gmra.mrb[36].mxu0 %vm942_vm3, %v7391_v32  ;;  %v2634_v32 = vrot.slane %v14756_v16, 1 }
 0x313   : > { %12304 = vmatprep.mubr.msk.bf16.mxu0 %vm942_vm3, %v7395_v51  ;;  %v7404_v51 = vrot.slane %v18143_v6, 2 }
 0x314   : > { %v15963_v14 = vsel %vm2518_vm6, %v2632_v29, %v2634_v32  ;;  %v15966_v6 = vsel %vm2518_vm6, %v2634_v32, %v2636_v22  ;;  %v7413_v29 = vrot.slane %v18148_v10, 3  ;;  %v2640_v32 = vrot.slane %v14808_v50, 1 }
 0x315   : > { %v7406_v16 = vor.u32 %v7405_v56, %v7404_v51  ;;  %v18149_v56 = vld [vmem:[#allocation86_spill] sm:$0xff] }
 0x316   : > { %11683 = vmatmul.mubr.msk.bf16.gmra.mrb[108].mxu1 %vm942_vm3, %v15943_v43  ;;  %v7416_v38 = vrot.slane %v18149_v56, 2  ;;  %v18151_v56 = vld [vmem:[#allocation90_spill] sm:$0xff] }
 0x317   : > { %11686 = vmatprep.mubr.msk.bf16.mxu1 %vm942_vm3, %v15946_v62  ;;  %v7407_v19 = vsel %vm7308_vm7, %v7402_v30, %v7406_v16  ;;  %v7411_v51 = vsel %vm7308_vm7, %v7406_v16, %v7410_v28 }
 0x318   : > { %v7418_v10 = vor.u32 %v7417_v60, %v7416_v38  ;;  %v18154_v38 = vld [vmem:[#allocation91_spill] sm:$0xff] }
 0x319   : > { %v7425_v50 = vrot.slane %v18154_v38, 3  ;;  %v18156_v38 = vld [vmem:[#allocation95_spill] sm:$0xff] }
 0x31a   : > { %12305 = vmatmul.mubr.msk.bf16.gmra.mrb[40].mxu0 %vm942_vm3, %v7399_v46  ;;  %v2638_v46 = vrot.slane %v14796_v1, 1 }
 0x31b   : > { %12308 = vmatprep.mubr.msk.bf16.mxu0 %vm942_vm3, %v7403_v35  ;;  %v7412_v35 = vrot.slane %v18147_v39, 2 }
 0x31c   : > { %v15983_v30 = vsel %vm2518_vm6, %v2636_v22, %v2638_v46  ;;  %v15986_v39 = vsel %vm2518_vm6, %v2638_v46, %v2640_v32  ;;  %v7421_v22 = vrot.slane %v18152_v20, 3  ;;  %v2644_v46 = vrot.slane %v14848_v45, 1 }
 0x31d   : > { %v7414_v1 = vor.u32 %v7413_v29, %v7412_v35  ;;  %v18153_v29 = vld [vmem:[#allocation92_spill] sm:$0xff] }
 0x31e   : > { %11687 = vmatmul.mubr.msk.bf16.gmra.mrb[112].mxu1 %vm942_vm3, %v15963_v14  ;;  %v7424_v60 = vrot.slane %v18153_v29, 2  ;;  %v18155_v29 = vld [vmem:[#allocation96_spill] sm:$0xff] }
 0x31f   : > { %11690 = vmatprep.mubr.msk.bf16.mxu1 %vm942_vm3, %v15966_v6  ;;  %v7415_v16 = vsel %vm7308_vm7, %v7410_v28, %v7414_v1  ;;  %v7419_v35 = vsel %vm7308_vm7, %v7414_v1, %v7418_v10 }
 0x320   : > { %v7426_v20 = vor.u32 %v7425_v50, %v7424_v60  ;;  %v18158_v60 = vld [vmem:[#allocation97_spill] sm:$0xff] }
 0x321   : > { %v7433_v45 = vrot.slane %v18158_v60, 3  ;;  %v18160_v60 = vld [vmem:[#allocation100_spill] sm:$0xff] }
 0x322   : > { %12309 = vmatmul.mubr.msk.bf16.gmra.mrb[44].mxu0 %vm942_vm3, %v7407_v19  ;;  %v2642_v19 = vrot.slane %v14836_v48, 1 }
 0x323   : > { %12312 = vmatprep.mubr.msk.bf16.mxu0 %vm942_vm3, %v7411_v51  ;;  %v7420_v51 = vrot.slane %v18151_v56, 2 }
 0x324   : > { %v16003_v28 = vsel %vm2518_vm6, %v2640_v32, %v2642_v19  ;;  %v16006_v56 = vsel %vm2518_vm6, %v2642_v19, %v2644_v46  ;;  %v7429_v32 = vrot.slane %v18156_v38, 3  ;;  %v2648_v19 = vrot.slane %v14888_v59, 1 }
 0x325   : > { %v7422_v48 = vor.u32 %v7421_v22, %v7420_v51  ;;  %v18157_v22 = vld [vmem:[#allocation98_spill] sm:$0xff] }
 0x326   : > { %11691 = vmatmul.mubr.msk.bf16.gmra.mrb[116].mxu1 %vm942_vm3, %v15983_v30  ;;  %v7432_v50 = vrot.slane %v18157_v22, 2  ;;  %v18159_v22 = vld [vmem:[#allocation101_spill] sm:$0xff] }
 0x327   : > { %11694 = vmatprep.mubr.msk.bf16.mxu1 %vm942_vm3, %v15986_v39  ;;  %v7423_v1 = vsel %vm7308_vm7, %v7418_v10, %v7422_v48  ;;  %v7427_v51 = vsel %vm7308_vm7, %v7422_v48, %v7426_v20 }
 0x328   : > { %v7434_v38 = vor.u32 %v7433_v45, %v7432_v50  ;;  %v18162_v50 = vld [vmem:[#allocation104_spill] sm:$0xff] }
 0x329   : > { %v7441_v59 = vrot.slane %v18162_v50, 3  ;;  %v18166_v50 = vld [vmem:[#allocation110_spill] sm:$0xff] }
 0x32a   : > { %12313 = vmatmul.mubr.msk.bf16.gmra.mrb[48].mxu0 %vm942_vm3, %v7415_v16  ;;  %v2646_v16 = vrot.slane %v17981_v54, 1 }
 0x32b   : > { %12316 = vmatprep.mubr.msk.bf16.mxu0 %vm942_vm3, %v7419_v35  ;;  %v7428_v35 = vrot.slane %v18155_v29, 2 }
 0x32c   : > { %v16023_v10 = vsel %vm2518_vm6, %v2644_v46, %v2646_v16  ;;  %v16026_v29 = vsel %vm2518_vm6, %v2646_v16, %v2648_v19  ;;  %v7437_v46 = vrot.slane %v18160_v60, 3  ;;  %v2652_v16 = vrot.slane %v14928_v8, 1  ;;  %v18163_v8 = vld [vmem:[#allocation109_spill] sm:$0xff] }
 0x32d   : > { %v7430_v54 = vor.u32 %v7429_v32, %v7428_v35  ;;  %v18161_v32 = vld [vmem:[#allocation108_spill] sm:$0xff] }
 0x32e   : > { %11695 = vmatmul.mubr.msk.bf16.gmra.mrb[120].mxu1 %vm942_vm3, %v16003_v28  ;;  %v7440_v45 = vrot.slane %v18161_v32, 2 }
 0x32f   : > { %11698 = vmatprep.mubr.msk.bf16.mxu1 %vm942_vm3, %v16006_v56  ;;  %v7431_v48 = vsel %vm7308_vm7, %v7426_v20, %v7430_v54  ;;  %v7435_v35 = vsel %vm7308_vm7, %v7430_v54, %v7434_v38 }
 0x330   : > { %v7442_v60 = vor.u32 %v7441_v59, %v7440_v45  ;;  %v7449_v59 = vrot.slane %v18166_v50, 3  ;;  %v18167_v50 = vld [vmem:[#allocation116_spill] sm:$0xff] }
 0x332   : > { %12317 = vmatmul.mubr.msk.bf16.gmra.mrb[52].mxu0 %vm942_vm3, %v7423_v1  ;;  %v2650_v1 = vrot.slane %v14916_v5, 1 }
 0x333   : > { %12320 = vmatprep.mubr.msk.bf16.mxu0 %vm942_vm3, %v7427_v51  ;;  %v7436_v51 = vrot.slane %v18159_v22, 2 }
 0x334   : > { %v16043_v20 = vsel %vm2518_vm6, %v2648_v19, %v2650_v1  ;;  %v16046_v22 = vsel %vm2518_vm6, %v2650_v1, %v2652_v16  ;;  %v7445_v19 = vrot.slane %v18164_v12, 3 }
 0x335   : > { %v7438_v5 = vor.u32 %v7437_v46, %v7436_v51  ;;  %v18165_v46 = vld [vmem:[#allocation115_spill] sm:$0xff] }
 0x336   : > { %11699 = vmatmul.mubr.msk.bf16.gmra.mrb[124].mxu1 %vm942_vm3, %v16023_v10  ;;  %v7448_v1 = vrot.slane %v18165_v46, 2  ;;  %v7452_v46 = vrot.slane %v18167_v50, 2 }
 0x337   : > { %11702 = vmatprep.mubr.msk.bf16.mxu1 %vm942_vm3, %v16026_v29  ;;  %v7439_v54 = vsel %vm7308_vm7, %v7434_v38, %v7438_v5  ;;  %v7443_v51 = vsel %vm7308_vm7, %v7438_v5, %v7442_v60 }
 0x338   : > { %v7450_v32 = vor.u32 %v7449_v59, %v7448_v1  ;;  %v18172_v59 = vld [vmem:[#allocation122_spill] sm:$0xff] }
 0x33a   : > { %12321 = vmatmul.mubr.msk.bf16.gmra.mrb[56].mxu0 %vm942_vm3, %v7431_v48  ;;  %v17710_v48 = vrot.slane %v14959_v13, 1 }
 0x33b   : > { %12324 = vmatprep.mubr.msk.bf16.mxu0 %vm942_vm3, %v7435_v35  ;;  %v7444_v35 = vrot.slane %v18163_v8, 2  ;;  %v18169_v8 = vld [vmem:[#allocation123_spill] sm:$0xff] }
 0x33c   : > { %v16064_v38 = vsel %vm2518_vm6, %v2652_v16, %v17710_v48  ;;  %v7456_v44 = vrot.slane %v18169_v8, 2  ;;  %v18170_v16 = vld [vmem:[#allocation117_spill] sm:$0xff] }
 0x33d   : > { %v7446_v45 = vor.u32 %v7445_v19, %v7444_v35  ;;  %v7457_v48 = vrot.slane %v18170_v16, 3  ;;  %v18173_v16 = vld [vmem:[#allocation131_spill] sm:$0xff] }
 0x33e   : > { %11703 = vmatmul.mubr.msk.bf16.gmra.mrb[128].mxu1 %vm942_vm3, %v16043_v20 }
 0x33f   : > { %11706 = vmatprep.mubr.msk.bf16.mxu1 %vm942_vm3, %v16046_v22  ;;  %v7447_v5 = vsel %vm7308_vm7, %v7442_v60, %v7446_v45  ;;  %v7458_v19 = vor.u32 %v7457_v48, %v7456_v44  ;;  %v18171_v60 = vld [vmem:[#allocation124_spill] sm:$0xff] }
 0x340   : > { %v7460_v1 = vrot.slane %v18171_v60, 2 }
 0x342   : > { %12325 = vmatmul.mubr.msk.bf16.gmra.mrb[60].mxu0 %vm942_vm3, %v7439_v54  ;;  %v18168_v54 = vld [vmem:[#allocation114_spill] sm:$0xff] }
 0x343   : > { %12328 = vmatprep.mubr.msk.bf16.mxu0 %vm942_vm3, %v7443_v51  ;;  %v7453_v12 = vrot.slane %v18168_v54, 3  ;;  %v7451_v51 = vsel %vm7308_vm7, %v7446_v45, %v7450_v32  ;;  %v7461_v45 = vrot.slane %v18172_v59, 3  ;;  %v18178_v59 = vld [vmem:[#allocation133_spill] sm:$0xff] }
 0x345   : > { %v7454_v35 = vor.u32 %v7453_v12, %v7452_v46  ;;  %v18174_v12 = vld [vmem:[#allocation125_spill] sm:$0xff]  ;;  %v18176_v46 = vld [vmem:[#allocation130_spill] sm:$0xff] }
 0x346   : > { %11707 = vmatmul.mubr.msk.bf16.gmra.mrb[132].mxu1 %vm942_vm3, %v16064_v38  ;;  %v7465_v44 = vrot.slane %v18174_v12, 3 }
 0x347   : > { %11712 = vmatprep.mubr.msk.bf16.mxu1 %vm942_vm3, %v15446_v55  ;;  %v7455_v55 = vsel %vm7308_vm7, %v7450_v32, %v7454_v35  ;;  %v18175_v32 = vld [vmem:[#allocation132_spill] sm:$0xff] }
 0x348   : > { %v7468_v48 = vrot.slane %v18175_v32, 2 }
 0x34a   : > { %12329 = vmatmul.mubr.msk.bf16.gmra.mrb[64].mxu0 %vm942_vm3, %v7447_v5  ;;  %v7459_v5 = vsel %vm7308_vm7, %v7454_v35, %v7458_v19  ;;  %v7469_v35 = vrot.slane %v18176_v46, 3  ;;  %v18183_v46 = vld [vmem:[#allocation141_spill] sm:$0xff] }
 0x34b   : > { %12332 = vmatprep.mubr.msk.bf16.mxu0 %vm942_vm3, %v7451_v51  ;;  %v7464_v51 = vrot.slane %v18173_v16, 2  ;;  %v18177_v16 = vld [vmem:[#allocation139_spill] sm:$0xff] }
 0x34e   : > { %11713 = vmatmul.mubr.msk.bf16.vlgmr.msra.gmra.mrb[0].mxu1 %vm942_vm3, %v15460_v26  ;;  %v7466_v26 = vor.u32 %v7465_v44, %v7464_v51  ;;  %v18181_v44 = vld [vmem:[#allocation138_spill] sm:$0xff] }
 0x34f   : > { %12539 = vmatpush3.bf16.msra.mxu1 %v18019_v61  ;;  %11716 = vmatprep.mubr.msk.bf16.mxu1 %vm942_vm3, %v15466_v17  ;;  %v7462_v61 = vor.u32 %v7461_v45, %v7460_v1  ;;  %v18180_v45 = vld [vmem:[#allocation140_spill] sm:$0xff] }
 0x350   : > { %v7476_v51 = vrot.slane %v18180_v45, 2  ;;  %v18189_v45 = vld [vmem:[#allocation149_spill] sm:$0xff] }
 0x351   : > { %v7463_v17 = vsel %vm7308_vm7, %v7458_v19, %v7462_v61  ;;  %v7467_v12 = vsel %vm7308_vm7, %v7462_v61, %v7466_v26  ;;  %v18179_v19 = vld [vmem:[#allocation112_spill] sm:$0xff]  ;;  %v7477_v61 = vrot.slane %v18181_v44, 3  ;;  %v18188_v44 = vld [vmem:[#allocation155_spill] sm:$0xff] }
 0x352   : > { %12333 = vmatmul.mubr.msk.bf16.gmra.mrb[68].mxu0 %vm942_vm3, %v7455_v55  ;;  %v7472_v55 = vrot.slane %v18177_v16, 2  ;;  %v18182_v16 = vld [vmem:[#allocation147_spill] sm:$0xff] }
 0x353   : > { %12336 = vmatprep.mubr.msk.bf16.mxu0 %vm942_vm3, %v7459_v5  ;;  %v7473_v5 = vrot.slane %v18178_v59, 3 }
 0x355   : > { %v7474_v1 = vor.u32 %v7473_v5, %v7472_v55  ;;  %v18185_v55 = vld [vmem:[#allocation120_spill] sm:$0xff] }
 0x356   : > { %11717 = vmatmul.mubr.msk.bf16.gmra.mrb[4].mxu1 %vm942_vm3, %v15483_v4  ;;  %v7470_v4 = vor.u32 %v7469_v35, %v7468_v48  ;;  %v18186_v5 = vld [vmem:[#allocation148_spill] sm:$0xff] }
 0x357   : > { %11720 = vmatprep.mubr.msk.bf16.mxu1 %vm942_vm3, %v15486_v25 }
 0x358   : > { %v7471_v25 = vsel %vm7308_vm7, %v7466_v26, %v7470_v4  ;;  %v7475_v59 = vsel %vm7308_vm7, %v7470_v4, %v7474_v1  ;;  %v18184_v26 = vld [vmem:[#allocation119_spill] sm:$0xff]  ;;  %v7484_v4 = vrot.slane %v18186_v5, 2  ;;  %v18195_v5 = vld [vmem:[#allocation157_spill] sm:$0xff] }
 0x35a   : > { %12337 = vmatmul.mubr.msk.bf16.gmra.mrb[72].mxu0 %vm942_vm3, %v7463_v17  ;;  %v7480_v17 = vrot.slane %v18182_v16, 2 }
 0x35b   : > { %12340 = vmatprep.mubr.msk.bf16.mxu0 %vm942_vm3, %v7467_v12  ;;  %v7481_v12 = vrot.slane %v18183_v46, 3 }
 0x35d   : > { %v7482_v48 = vor.u32 %v7481_v12, %v7480_v17  ;;  %v18191_v12 = vld [vmem:[#allocation128_spill] sm:$0xff] }
 0x35e   : > { %11721 = vmatmul.mubr.msk.bf16.gmra.mrb[8].mxu1 %vm942_vm3, %v15499_v11  ;;  %v7478_v11 = vor.u32 %v7477_v61, %v7476_v51 }
 0x35f   : > { %11724 = vmatprep.mubr.msk.bf16.mxu1 %vm942_vm3, %v18179_v19  ;;  %v18187_v19 = vld [vmem:[#allocation146_spill] sm:$0xff] }
 0x360   : > { %v7479_v35 = vsel %vm7308_vm7, %v7474_v1, %v7478_v11  ;;  %v7485_v16 = vrot.slane %v18187_v19, 3  ;;  %v7483_v46 = vsel %vm7308_vm7, %v7478_v11, %v7482_v48  ;;  %v18190_v1 = vld [vmem:[#allocation127_spill] sm:$0xff] }
 0x361   : > { %v18194_v19 = vld [vmem:[#allocation163_spill] sm:$0xff] }
 0x362   : > { %12341 = vmatmul.mubr.msk.bf16.gmra.mrb[76].mxu0 %vm942_vm3, %v7471_v25  ;;  %v7488_v25 = vrot.slane %v18188_v44, 2  ;;  %v7486_v51 = vor.u32 %v7485_v16, %v7484_v4 }
 0x363   : > { %12344 = vmatprep.mubr.msk.bf16.mxu0 %vm942_vm3, %v7475_v59  ;;  %v7489_v59 = vrot.slane %v18189_v45, 3 }
 0x364   : > { %v7487_v17 = vsel %vm7308_vm7, %v7482_v48, %v7486_v51  ;;  %v18196_v48 = vld [vmem:[#allocation135_spill] sm:$0xff] }
 0x365   : > { %v7490_v61 = vor.u32 %v7489_v59, %v7488_v25  ;;  %v18197_v59 = vld [vmem:[#allocation136_spill] sm:$0xff] }
 0x366   : > { %11725 = vmatmul.mubr.msk.bf16.gmra.mrb[12].mxu1 %vm942_vm3, %v18184_v26  ;;  %v18192_v26 = vld [vmem:[#allocation156_spill] sm:$0xff] }
 0x367   : > { %11728 = vmatprep.mubr.msk.bf16.mxu1 %vm942_vm3, %v18185_v55  ;;  %v7492_v11 = vrot.slane %v18192_v26, 2  ;;  %v18193_v55 = vld [vmem:[#allocation154_spill] sm:$0xff]  ;;  %v7491_v45 = vsel %vm7308_vm7, %v7486_v51, %v7490_v61  ;;  %v18201_v26 = vld [vmem:[#allocation165_spill] sm:$0xff] }
 0x368   : > { %v7493_v44 = vrot.slane %v18193_v55, 3  ;;  %v18200_v55 = vld [vmem:[#allocation171_spill] sm:$0xff] }
 0x36a   : > { %12345 = vmatmul.mubr.msk.bf16.gmra.mrb[80].mxu0 %vm942_vm3, %v7479_v35  ;;  %v7496_v35 = vrot.slane %v18194_v19, 2  ;;  %v7494_v16 = vor.u32 %v7493_v44, %v7492_v11 }
 0x36b   : > { %12348 = vmatprep.mubr.msk.bf16.mxu0 %vm942_vm3, %v7483_v46  ;;  %v7497_v46 = vrot.slane %v18195_v5, 3 }
 0x36c   : > { %v7495_v25 = vsel %vm7308_vm7, %v7490_v61, %v7494_v16  ;;  %v18202_v61 = vld [vmem:[#allocation143_spill] sm:$0xff] }
 0x36d   : > { %v7498_v4 = vor.u32 %v7497_v46, %v7496_v35  ;;  %v18203_v46 = vld [vmem:[#allocation144_spill] sm:$0xff] }
 0x36e   : > { %11729 = vmatmul.mubr.msk.bf16.gmra.mrb[16].mxu1 %vm942_vm3, %v18190_v1  ;;  %v18198_v1 = vld [vmem:[#allocation164_spill] sm:$0xff] }
 0x36f   : > { %11732 = vmatprep.mubr.msk.bf16.mxu1 %vm942_vm3, %v18191_v12  ;;  %v7500_v51 = vrot.slane %v18198_v1, 2  ;;  %v18199_v12 = vld [vmem:[#allocation162_spill] sm:$0xff]  ;;  %v7499_v5 = vsel %vm7308_vm7, %v7494_v16, %v7498_v4  ;;  %v18207_v1 = vld [vmem:[#allocation173_spill] sm:$0xff] }
 0x370   : > { %v7501_v19 = vrot.slane %v18199_v12, 3  ;;  %v18206_v12 = vld [vmem:[#allocation179_spill] sm:$0xff] }
 0x372   : > { %12349 = vmatmul.mubr.msk.bf16.gmra.mrb[84].mxu0 %vm942_vm3, %v7487_v17  ;;  %v7504_v17 = vrot.slane %v18200_v55, 2  ;;  %v7502_v44 = vor.u32 %v7501_v19, %v7500_v51 }
 0x373   : > { %12352 = vmatprep.mubr.msk.bf16.mxu0 %vm942_vm3, %v7491_v45  ;;  %v7505_v45 = vrot.slane %v18201_v26, 3 }
 0x374   : > { %v7503_v35 = vsel %vm7308_vm7, %v7498_v4, %v7502_v44  ;;  %v18208_v4 = vld [vmem:[#allocation151_spill] sm:$0xff] }
 0x375   : > { %v7506_v11 = vor.u32 %v7505_v45, %v7504_v17  ;;  %v18209_v45 = vld [vmem:[#allocation152_spill] sm:$0xff] }
 0x376   : > { %11733 = vmatmul.mubr.msk.bf16.gmra.mrb[20].mxu1 %vm942_vm3, %v18196_v48  ;;  %v18204_v48 = vld [vmem:[#allocation172_spill] sm:$0xff] }
 0x377   : > { %11736 = vmatprep.mubr.msk.bf16.mxu1 %vm942_vm3, %v18197_v59  ;;  %v7508_v16 = vrot.slane %v18204_v48, 2  ;;  %v18205_v59 = vld [vmem:[#allocation170_spill] sm:$0xff]  ;;  %v7507_v26 = vsel %vm7308_vm7, %v7502_v44, %v7506_v11  ;;  %v18213_v48 = vld [vmem:[#allocation181_spill] sm:$0xff] }
 0x378   : > { %v7509_v55 = vrot.slane %v18205_v59, 3  ;;  %v18212_v59 = vld [vmem:[#allocation187_spill] sm:$0xff] }
 0x37a   : > { %12353 = vmatmul.mubr.msk.bf16.gmra.mrb[88].mxu0 %vm942_vm3, %v7495_v25  ;;  %v7512_v25 = vrot.slane %v18206_v12, 2  ;;  %v7510_v19 = vor.u32 %v7509_v55, %v7508_v16 }
 0x37b   : > { %12356 = vmatprep.mubr.msk.bf16.mxu0 %vm942_vm3, %v7499_v5  ;;  %v7513_v5 = vrot.slane %v18207_v1, 3 }
 0x37c   : > { %v7511_v17 = vsel %vm7308_vm7, %v7506_v11, %v7510_v19  ;;  %v18214_v11 = vld [vmem:[#allocation159_spill] sm:$0xff] }
 0x37d   : > { %v7514_v51 = vor.u32 %v7513_v5, %v7512_v25  ;;  %v18215_v5 = vld [vmem:[#allocation160_spill] sm:$0xff] }
 0x37e   : > { %11737 = vmatmul.mubr.msk.bf16.gmra.mrb[24].mxu1 %vm942_vm3, %v18202_v61  ;;  %v18210_v61 = vld [vmem:[#allocation180_spill] sm:$0xff] }
 0x37f   : > { %11740 = vmatprep.mubr.msk.bf16.mxu1 %vm942_vm3, %v18203_v46  ;;  %v7516_v44 = vrot.slane %v18210_v61, 2  ;;  %v18211_v46 = vld [vmem:[#allocation178_spill] sm:$0xff]  ;;  %v7515_v1 = vsel %vm7308_vm7, %v7510_v19, %v7514_v51  ;;  %v18219_v61 = vld [vmem:[#allocation189_spill] sm:$0xff] }
 0x380   : > { %v7517_v12 = vrot.slane %v18211_v46, 3  ;;  %v18218_v46 = vld [vmem:[#allocation195_spill] sm:$0xff] }
 0x382   : > { %12357 = vmatmul.mubr.msk.bf16.gmra.mrb[92].mxu0 %vm942_vm3, %v7503_v35  ;;  %v7520_v35 = vrot.slane %v18212_v59, 2  ;;  %v7518_v55 = vor.u32 %v7517_v12, %v7516_v44 }
 0x383   : > { %12360 = vmatprep.mubr.msk.bf16.mxu0 %vm942_vm3, %v7507_v26  ;;  %v7521_v26 = vrot.slane %v18213_v48, 3 }
 0x384   : > { %v7519_v25 = vsel %vm7308_vm7, %v7514_v51, %v7518_v55  ;;  %v18220_v51 = vld [vmem:[#allocation167_spill] sm:$0xff] }
 0x385   : > { %v7522_v16 = vor.u32 %v7521_v26, %v7520_v35  ;;  %v18221_v26 = vld [vmem:[#allocation168_spill] sm:$0xff] }
 0x386   : > { %11741 = vmatmul.mubr.msk.bf16.gmra.mrb[28].mxu1 %vm942_vm3, %v18208_v4  ;;  %v18216_v4 = vld [vmem:[#allocation188_spill] sm:$0xff] }
 0x387   : > { %11744 = vmatprep.mubr.msk.bf16.mxu1 %vm942_vm3, %v18209_v45  ;;  %v7524_v19 = vrot.slane %v18216_v4, 2  ;;  %v18217_v45 = vld [vmem:[#allocation186_spill] sm:$0xff]  ;;  %v7523_v48 = vsel %vm7308_vm7, %v7518_v55, %v7522_v16  ;;  %v18225_v4 = vld [vmem:[#allocation197_spill] sm:$0xff] }
 0x388   : > { %v7525_v59 = vrot.slane %v18217_v45, 3  ;;  %v18224_v45 = vld [vmem:[#allocation203_spill] sm:$0xff] }
 0x38a   : > { %12361 = vmatmul.mubr.msk.bf16.gmra.mrb[96].mxu0 %vm942_vm3, %v7511_v17  ;;  %v7528_v17 = vrot.slane %v18218_v46, 2  ;;  %v7526_v12 = vor.u32 %v7525_v59, %v7524_v19 }
 0x38b   : > { %12364 = vmatprep.mubr.msk.bf16.mxu0 %vm942_vm3, %v7515_v1  ;;  %v7529_v1 = vrot.slane %v18219_v61, 3 }
 0x38c   : > { %v7527_v35 = vsel %vm7308_vm7, %v7522_v16, %v7526_v12  ;;  %v18226_v16 = vld [vmem:[#allocation175_spill] sm:$0xff] }
 0x38d   : > { %v7530_v44 = vor.u32 %v7529_v1, %v7528_v17  ;;  %v18227_v1 = vld [vmem:[#allocation176_spill] sm:$0xff] }
 0x38e   : > { %11745 = vmatmul.mubr.msk.bf16.gmra.mrb[32].mxu1 %vm942_vm3, %v18214_v11  ;;  %v18222_v11 = vld [vmem:[#allocation196_spill] sm:$0xff] }
 0x38f   : > { %11748 = vmatprep.mubr.msk.bf16.mxu1 %vm942_vm3, %v18215_v5  ;;  %v7532_v55 = vrot.slane %v18222_v11, 2  ;;  %v18223_v5 = vld [vmem:[#allocation194_spill] sm:$0xff]  ;;  %v7531_v61 = vsel %vm7308_vm7, %v7526_v12, %v7530_v44  ;;  %v18231_v11 = vld [vmem:[#allocation205_spill] sm:$0xff] }
 0x390   : > { %v7533_v46 = vrot.slane %v18223_v5, 3  ;;  %v18230_v5 = vld [vmem:[#allocation211_spill] sm:$0xff] }
 0x392   : > { %12365 = vmatmul.mubr.msk.bf16.gmra.mrb[100].mxu0 %vm942_vm3, %v7519_v25  ;;  %v7536_v25 = vrot.slane %v18224_v45, 2  ;;  %v7534_v59 = vor.u32 %v7533_v46, %v7532_v55 }
 0x393   : > { %12368 = vmatprep.mubr.msk.bf16.mxu0 %vm942_vm3, %v7523_v48  ;;  %v7537_v48 = vrot.slane %v18225_v4, 3 }
 0x394   : > { %v7535_v17 = vsel %vm7308_vm7, %v7530_v44, %v7534_v59 }
 0x395   : > { %v7538_v19 = vor.u32 %v7537_v48, %v7536_v25  ;;  %v18232_v25 = vld [vmem:[#allocation212_spill] sm:$0xff] }
 0x396   : > { %11749 = vmatmul.mubr.msk.bf16.gmra.mrb[36].mxu1 %vm942_vm3, %v18220_v51  ;;  %v18228_v51 = vld [vmem:[#allocation204_spill] sm:$0xff]  ;;  %v7548_v48 = vrot.slane %v18232_v25, 2  ;;  %v18241_v25 = vld [vmem:[#allocation221_spill] sm:$0xff] }
 0x397   : > { %11752 = vmatprep.mubr.msk.bf16.mxu1 %vm942_vm3, %v18221_v26  ;;  %v7540_v12 = vrot.slane %v18228_v51, 2  ;;  %v18229_v26 = vld [vmem:[#allocation202_spill] sm:$0xff]  ;;  %v7539_v4 = vsel %vm7308_vm7, %v7534_v59, %v7538_v19 }
 0x398   : > { %v7541_v45 = vrot.slane %v18229_v26, 3  ;;  %v18233_v59 = vld [vmem:[#allocation210_spill] sm:$0xff] }
 0x39a   : > { %12369 = vmatmul.mubr.msk.bf16.gmra.mrb[104].mxu0 %vm942_vm3, %v7527_v35  ;;  %v7544_v35 = vrot.slane %v18230_v5, 2  ;;  %v7542_v46 = vor.u32 %v7541_v45, %v7540_v12  ;;  %v18235_v5 = vld [vmem:[#allocation213_spill] sm:$0xff]  ;;  %v18237_v12 = vld [vmem:[#allocation184_spill] sm:$0xff] }
 0x39b   : > { %12372 = vmatprep.mubr.msk.bf16.mxu0 %vm942_vm3, %v7531_v61  ;;  %v7545_v61 = vrot.slane %v18231_v11, 3  ;;  %v18234_v11 = vld [vmem:[#allocation219_spill] sm:$0xff] }
 0x39c   : > { %v7543_v44 = vsel %vm7308_vm7, %v7538_v19, %v7542_v46  ;;  %v18236_v19 = vld [vmem:[#allocation183_spill] sm:$0xff] }
 0x39d   : > { %v7546_v55 = vor.u32 %v7545_v61, %v7544_v35  ;;  %v18238_v35 = vld [vmem:[#allocation220_spill] sm:$0xff] }
 0x39e   : > { %11753 = vmatmul.mubr.msk.bf16.gmra.mrb[40].mxu1 %vm942_vm3, %v18226_v16  ;;  %v7549_v16 = vrot.slane %v18233_v59, 3  ;;  %v7556_v61 = vrot.slane %v18238_v35, 2  ;;  %v18240_v59 = vld [vmem:[#allocation222_spill] sm:$0xff] }
 0x39f   : > { %11756 = vmatprep.mubr.msk.bf16.mxu1 %vm942_vm3, %v18227_v1  ;;  %v7547_v1 = vsel %vm7308_vm7, %v7542_v46, %v7546_v55  ;;  %v18239_v46 = vld [vmem:[#allocation218_spill] sm:$0xff] }
 0x3a2   : > { %12373 = vmatmul.mubr.msk.bf16.gmra.mrb[108].mxu0 %vm942_vm3, %v7535_v17  ;;  %v7552_v17 = vrot.slane %v18234_v11, 2  ;;  %v7557_v11 = vrot.slane %v18239_v46, 3  ;;  %v18247_v46 = vld [vmem:[#allocation200_spill] sm:$0xff] }
 0x3a3   : > { %12376 = vmatprep.mubr.msk.bf16.mxu0 %vm942_vm3, %v7539_v4  ;;  %v7553_v4 = vrot.slane %v18235_v5, 3 }
 0x3a5   : > { %v7554_v45 = vor.u32 %v7553_v4, %v7552_v17  ;;  %v18242_v17 = vld [vmem:[#allocation250_spill] sm:$0xff] }
 0x3a6   : > { %11757 = vmatmul.mubr.msk.bf16.gmra.mrb[44].mxu1 %vm942_vm3, %v15643_v58  ;;  %v7550_v58 = vor.u32 %v7549_v16, %v7548_v48  ;;  %v7558_v48 = vor.u32 %v7557_v11, %v7556_v61  ;;  %v17712_v4 = vshrl.u32 %v18242_v17, 16 }
 0x3a7   : > { %11760 = vmatprep.mubr.msk.bf16.mxu1 %vm942_vm3, %v15646_v40 }
 0x3a8   : > { %v7551_v40 = vsel %vm7308_vm7, %v7546_v55, %v7550_v58  ;;  %v7555_v5 = vsel %vm7308_vm7, %v7550_v58, %v7554_v45  ;;  %v17711_v55 = vshrl.u32 %v14959_v13, 16  ;;  %v7559_v58 = vsel %vm7308_vm7, %v7554_v45, %v7558_v48 }
 0x3aa   : > { %12377 = vmatmul.mubr.msk.bf16.gmra.mrb[112].mxu0 %vm942_vm3, %v7543_v44  ;;  %v7560_v44 = vrot.slane %v18240_v59, 2  ;;  %v18244_v59 = vld [vmem:[#allocation192_spill] sm:$0xff] }
 0x3ab   : > { %12380 = vmatprep.mubr.msk.bf16.mxu0 %vm942_vm3, %v7547_v1  ;;  %v7561_v1 = vrot.slane %v18241_v25, 3  ;;  %v18246_v25 = vld [vmem:[#allocation199_spill] sm:$0xff] }
 0x3ad   : > { %v7562_v16 = vor.u32 %v7561_v1, %v7560_v44  ;;  %v7568_v44 = vrot.slane %v17712_v4, 2 }
 0x3ae   : > { %11761 = vmatmul.mubr.msk.bf16.gmra.mrb[48].mxu1 %vm942_vm3, %v18236_v19  ;;  %v17713_v19 = vshll.u32 %v18242_v17, 16 }
 0x3af   : > { %11764 = vmatprep.mubr.msk.bf16.mxu1 %vm942_vm3, %v18237_v12  ;;  %v18243_v12 = vld [vmem:[#allocation191_spill] sm:$0xff]  ;;  %v7563_v61 = vsel %vm7308_vm7, %v7558_v48, %v7562_v16  ;;  %v7580_v48 = vshll.u32 %v18246_v25, 16 }
 0x3b0   : > { %v7569_v1 = vrot.slane %v17713_v19, 3 }
 0x3b2   : > { %12381 = vmatmul.mubr.msk.bf16.gmra.mrb[116].mxu0 %vm942_vm3, %v7551_v40  ;;  %v7564_v40 = vrot.slane %v17711_v55, 2  ;;  %v7570_v55 = vor.u32 %v7569_v1, %v7568_v44  ;;  %v7582_v44 = vrot.slane %v7580_v48, 3  ;;  %v18248_v1 = vld [vmem:[#allocation207_spill] sm:$0xff] }
 0x3b3   : > { %12384 = vmatprep.mubr.msk.bf16.mxu0 %vm942_vm3, %v7555_v5  ;;  %v18245_v5 = vld [vmem:[#allocation223_spill] sm:$0xff]  ;;  %v7589_v19 = vshll.u32 %v18248_v1, 16 }
 0x3b4   : > { %v7565_v11 = vrot.slane %v18245_v5, 3  ;;  %v7577_v5 = vshrl.u32 %v18246_v25, 16 }
 0x3b6   : > { %11765 = vmatmul.mubr.msk.bf16.gmra.mrb[52].mxu1 %vm942_vm3, %v18243_v12  ;;  %v7566_v45 = vor.u32 %v7565_v11, %v7564_v40  ;;  %v17715_v12 = vshll.u32 %v15273_v0, 16 }
 0x3b7   : > { %11768 = vmatprep.mubr.msk.bf16.mxu1 %vm942_vm3, %v18244_v59  ;;  %v17714_v59 = vshrl.u32 %v15273_v0, 16 }
 0x3b8   : > { %v7567_v4 = vsel %vm7308_vm7, %v7562_v16, %v7566_v45  ;;  %v7573_v40 = vrot.slane %v17715_v12, 3  ;;  %v7571_v11 = vsel %vm7308_vm7, %v7566_v45, %v7570_v55  ;;  %v7586_v16 = vshrl.u32 %v18248_v1, 16 }
 0x3b9   : > { %v7591_v45 = vrot.slane %v7589_v19, 3 }
 0x3ba   : > { %12385 = vmatmul.mubr.msk.bf16.gmra.mrb[120].mxu0 %vm942_vm3, %v7559_v58  ;;  %v7572_v58 = vrot.slane %v17714_v59, 2 }
 0x3bb   : > { %12388 = vmatprep.mubr.msk.bf16.mxu0 %vm942_vm3, %v7563_v61  ;;  %v7579_v61 = vrot.slane %v7577_v5, 2  ;;  %v7588_v5 = vrot.slane %v7586_v16, 2 }
 0x3bd   : > { %v7592_v48 = vor.u32 %v7591_v45, %v7588_v5  ;;  %v18255_v45 = vld [vmem:[#allocation19_spill] sm:$0xff] }
 0x3be   : > { %11769 = vmatmul.mubr.msk.bf16.gmra.mrb[56].mxu1 %vm942_vm3, %v18247_v46  ;;  %v7574_v46 = vor.u32 %v7573_v40, %v7572_v58  ;;  %v18249_v58 = vld [vmem:[#allocation3_spill] sm:$0xff] }
 0x3bf   : > { %11772 = vmatprep.mubr.msk.bf16.mxu1 %vm942_vm3, %v15699_v52  ;;  %v7583_v52 = vor.u32 %v7582_v44, %v7579_v61  ;;  %v8517_v40 = vrot.slane %v18249_v58, 3 }
 0x3c0   : > { %v7575_v59 = vsel %vm7308_vm7, %v7570_v55, %v7574_v46  ;;  %v18251_v55 = vld [vmem:[#allocation7_spill] sm:$0xff] }
 0x3c1   : > { %v8520_v19 = vrot.slane %v18251_v55, 3 }
 0x3c2   : > { %12389 = vmatmul.mubr.msk.bf16.gmra.mrb[124].mxu0 %vm942_vm3, %v7567_v4  ;;  %v7584_v4 = vsel %vm7308_vm7, %v7574_v46, %v7583_v52  ;;  %v18253_v46 = vld [vmem:[#allocation15_spill] sm:$0xff] }
 0x3c3   : > { %12392 = vmatprep.mubr.msk.bf16.mxu0 %vm942_vm3, %v7571_v11  ;;  %v18250_v11 = vld [vmem:[#allocation6_spill] sm:$0xff]  ;;  %v8524_v16 = vrot.slane %v18253_v46, 3 }
 0x3c4   : > { %v8518_v61 = vrot.slane %v18250_v11, 3 }
 0x3c6   : > { %11773 = vmatmul.mubr.msk.bf16.gmra.mrb[60].mxu1 %vm942_vm3, %v15721_v7  ;;  %v7593_v7 = vsel %vm7308_vm7, %v7583_v52, %v7592_v48  ;;  %v18254_v52 = vld [vmem:[#allocation18_spill] sm:$0xff]  ;;  %v18256_v48 = vld [vmem:[#allocation23_spill] sm:$0xff] }
 0x3c7   : > { %11776 = vmatprep.mubr.msk.bf16.mxu1 %vm942_vm3, %v15725_v27  ;;  %v8519_v27 = vsel %vm8516_vm8, %v8517_v40, %v8518_v61  ;;  %v8526_v5 = vrot.slane %v18254_v52, 3  ;;  %v8530_v58 = vrot.slane %v18256_v48, 3  ;;  %v18257_v40 = vld [vmem:[#allocation27_spill] sm:$0xff] }
 0x3c8   : > { %v8532_v11 = vrot.slane %v18257_v40, 3 }
 0x3ca   : > { %12393 = vmatmul.mubr.msk.bf16.gmra.mrb[128].mxu0 %vm942_vm3, %v7575_v59  ;;  %v18252_v59 = vld [vmem:[#allocation12_spill] sm:$0xff] }
 0x3cb   : > { %12396 = vmatprep.mubr.msk.bf16.mxu0 %vm942_vm3, %v7584_v4  ;;  %v8522_v44 = vrot.slane %v18252_v59, 3  ;;  %v8528_v4 = vrot.slane %v18255_v45, 3 }
 0x3ce   : > { %11777 = vmatmul.mubr.msk.bf16.gmra.mrb[64].mxu1 %vm942_vm3, %v15742_v15  ;;  %v8521_v15 = vsel %vm8516_vm8, %v8518_v61, %v8520_v19  ;;  %v18258_v61 = vld [vmem:[#allocation28_spill] sm:$0xff] }
 0x3cf   : > { %11780 = vmatprep.mubr.msk.bf16.mxu1 %vm942_vm3, %v15745_v33  ;;  %v8523_v33 = vsel %vm8516_vm8, %v8520_v19, %v8522_v44  ;;  %v18260_v19 = vld [vmem:[#allocation34_spill] sm:$0xff] }
 0x3d0   : > { %v8538_v59 = vrot.slane %v18260_v19, 3  ;;  %v18271_v19 = vld [vmem:[#allocation69_spill] sm:$0xff] }
 0x3d2   : > { %12397 = vmatmul.mubr.msk.bf16.gmra.mrb[132].mxu0 %vm942_vm3, %v7593_v7  ;;  %v8534_v7 = vrot.slane %v18258_v61, 3 }
 0x3d3   : > { %12402 = vmatprep.mubr.msk.bf16.mxu0 %vm942_vm3, %v8519_v27  ;;  %v18259_v27 = vld [vmem:[#allocation33_spill] sm:$0xff] }
 0x3d4   : > { %v8536_v55 = vrot.slane %v18259_v27, 3 }
 0x3d6   : > { %11781 = vmatmul.mubr.msk.bf16.gmra.mrb[68].mxu1 %vm942_vm3, %v15763_v42  ;;  %v8525_v42 = vsel %vm8516_vm8, %v8522_v44, %v8524_v16  ;;  %v18261_v44 = vld [vmem:[#allocation39_spill] sm:$0xff] }
 0x3d7   : > { %11784 = vmatprep.mubr.msk.bf16.mxu1 %vm942_vm3, %v15766_v24  ;;  %v8527_v24 = vsel %vm8516_vm8, %v8524_v16, %v8526_v5  ;;  %v18263_v16 = vld [vmem:[#allocation45_spill] sm:$0xff] }
 0x3d8   : > { %v8544_v52 = vrot.slane %v18263_v16, 3  ;;  %v18274_v16 = vld [vmem:[#allocation76_spill] sm:$0xff] }
 0x3da   : > { %12403 = vmatmul.mubr.msk.bf16.vlgmr.msra.gmra.mrb[0].mxu0 %vm942_vm3, %v8521_v15  ;;  %v8540_v15 = vrot.slane %v18261_v44, 3 }
 0x3db   : > { %12406 = vmatprep.mubr.msk.bf16.mxu0 %vm942_vm3, %v8523_v33  ;;  %v18262_v33 = vld [vmem:[#allocation40_spill] sm:$0xff] }
 0x3dc   : > { %v8542_v46 = vrot.slane %v18262_v33, 3 }
 0x3de   : > { %11785 = vmatmul.mubr.msk.bf16.gmra.mrb[72].mxu1 %vm942_vm3, %v15783_v21  ;;  %v8529_v21 = vsel %vm8516_vm8, %v8526_v5, %v8528_v4  ;;  %v18264_v5 = vld [vmem:[#allocation46_spill] sm:$0xff] }
 0x3df   : > { %11788 = vmatprep.mubr.msk.bf16.mxu1 %vm942_vm3, %v15786_v63  ;;  %v8531_v63 = vsel %vm8516_vm8, %v8528_v4, %v8530_v58  ;;  %v18266_v4 = vld [vmem:[#allocation52_spill] sm:$0xff] }
 0x3e0   : > { %v8550_v48 = vrot.slane %v18266_v4, 3  ;;  %v18276_v4 = vld [vmem:[#allocation82_spill] sm:$0xff] }
 0x3e2   : > { %12407 = vmatmul.mubr.msk.bf16.gmra.mrb[4].mxu0 %vm942_vm3, %v8525_v42  ;;  %v8546_v42 = vrot.slane %v18264_v5, 3 }
 0x3e3   : > { %12410 = vmatprep.mubr.msk.bf16.mxu0 %vm942_vm3, %v8527_v24  ;;  %v18265_v24 = vld [vmem:[#allocation51_spill] sm:$0xff] }
 0x3e4   : > { %v8548_v45 = vrot.slane %v18265_v24, 3  ;;  %v18275_v24 = vld [vmem:[#allocation81_spill] sm:$0xff] }
 0x3e6   : > { %11789 = vmatmul.mubr.msk.bf16.gmra.mrb[76].mxu1 %vm942_vm3, %v15803_v9  ;;  %v8533_v9 = vsel %vm8516_vm8, %v8530_v58, %v8532_v11  ;;  %v18267_v58 = vld [vmem:[#allocation57_spill] sm:$0xff] }
 0x3e7   : > { %11792 = vmatprep.mubr.msk.bf16.mxu1 %vm942_vm3, %v15806_v31  ;;  %v8535_v31 = vsel %vm8516_vm8, %v8532_v11, %v8534_v7  ;;  %v18269_v11 = vld [vmem:[#allocation63_spill] sm:$0xff] }
 0x3e8   : > { %v8556_v61 = vrot.slane %v18269_v11, 3 }
 0x3ea   : > { %12411 = vmatmul.mubr.msk.bf16.gmra.mrb[8].mxu0 %vm942_vm3, %v8529_v21  ;;  %v8552_v21 = vrot.slane %v18267_v58, 3 }
 0x3eb   : > { %12414 = vmatprep.mubr.msk.bf16.mxu0 %vm942_vm3, %v8531_v63  ;;  %v18268_v63 = vld [vmem:[#allocation58_spill] sm:$0xff] }
 0x3ec   : > { %v8554_v40 = vrot.slane %v18268_v63, 3  ;;  %v18277_v63 = vld [vmem:[#allocation87_spill] sm:$0xff] }
 0x3ee   : > { %11793 = vmatmul.mubr.msk.bf16.gmra.mrb[80].mxu1 %vm942_vm3, %v15823_v18  ;;  %v8537_v18 = vsel %vm8516_vm8, %v8534_v7, %v8536_v55  ;;  %v18270_v7 = vld [vmem:[#allocation64_spill] sm:$0xff] }
 0x3ef   : > { %11796 = vmatprep.mubr.msk.bf16.mxu1 %vm942_vm3, %v15826_v34  ;;  %v8539_v34 = vsel %vm8516_vm8, %v8536_v55, %v8538_v59 }
 0x3f2   : > { %12415 = vmatmul.mubr.msk.bf16.gmra.mrb[12].mxu0 %vm942_vm3, %v8533_v9  ;;  %v8558_v9 = vrot.slane %v18270_v7, 3 }
 0x3f3   : > { %12418 = vmatprep.mubr.msk.bf16.mxu0 %vm942_vm3, %v8535_v31 }
 0x3f6   : > { %11797 = vmatmul.mubr.msk.bf16.gmra.mrb[84].mxu1 %vm942_vm3, %v15843_v49  ;;  %v8541_v49 = vsel %vm8516_vm8, %v8538_v59, %v8540_v15  ;;  %v8560_v59 = vrot.slane %v18271_v19, 3  ;;  %v18280_v19 = vld [vmem:[#allocation94_spill] sm:$0xff] }
 0x3f7   : > { %11800 = vmatprep.mubr.msk.bf16.mxu1 %vm942_vm3, %v15846_v37  ;;  %v8543_v37 = vsel %vm8516_vm8, %v8540_v15, %v8542_v46 }
 0x3fa   : > { %12419 = vmatmul.mubr.msk.bf16.gmra.mrb[16].mxu0 %vm942_vm3, %v8537_v18  ;;  %v18272_v18 = vld [vmem:[#allocation70_spill] sm:$0xff] }
 0x3fb   : > { %12422 = vmatprep.mubr.msk.bf16.mxu0 %vm942_vm3, %v8539_v34  ;;  %v8562_v34 = vrot.slane %v18272_v18, 3 }
 0x3fd   : > { %v8563_v44 = vsel %vm8516_vm8, %v8560_v59, %v8562_v34 }
 0x3fe   : > { %11801 = vmatmul.mubr.msk.bf16.gmra.mrb[88].mxu1 %vm942_vm3, %v15863_v23  ;;  %v8545_v23 = vsel %vm8516_vm8, %v8542_v46, %v8544_v52 }
 0x3ff   : > { %11804 = vmatprep.mubr.msk.bf16.mxu1 %vm942_vm3, %v15866_v53  ;;  %v8547_v53 = vsel %vm8516_vm8, %v8544_v52, %v8546_v42  ;;  %v8566_v52 = vrot.slane %v18274_v16, 3 }
 0x402   : > { %12423 = vmatmul.mubr.msk.bf16.gmra.mrb[20].mxu0 %vm942_vm3, %v8541_v49  ;;  %v18273_v49 = vld [vmem:[#allocation75_spill] sm:$0xff] }
 0x403   : > { %12426 = vmatprep.mubr.msk.bf16.mxu0 %vm942_vm3, %v8543_v37  ;;  %v8564_v37 = vrot.slane %v18273_v49, 3 }
 0x405   : > { %v8567_v5 = vsel %vm8516_vm8, %v8564_v37, %v8566_v52 }
 0x406   : > { %11805 = vmatmul.mubr.msk.bf16.gmra.mrb[92].mxu1 %vm942_vm3, %v15883_v2  ;;  %v8549_v2 = vsel %vm8516_vm8, %v8546_v42, %v8548_v45 }
 0x407   : > { %11808 = vmatprep.mubr.msk.bf16.mxu1 %vm942_vm3, %v15886_v36  ;;  %v8551_v36 = vsel %vm8516_vm8, %v8548_v45, %v8550_v48  ;;  %v8568_v45 = vrot.slane %v18275_v24, 3  ;;  %v18284_v24 = vld [vmem:[#allocation108_spill] sm:$0xff] }
 0x40a   : > { %12427 = vmatmul.mubr.msk.bf16.gmra.mrb[24].mxu0 %vm942_vm3, %v8545_v23 }
 0x40b   : > { %12430 = vmatprep.mubr.msk.bf16.mxu0 %vm942_vm3, %v8547_v53 }
 0x40e   : > { %11809 = vmatmul.mubr.msk.bf16.gmra.mrb[96].mxu1 %vm942_vm3, %v15903_v3  ;;  %v8553_v3 = vsel %vm8516_vm8, %v8550_v48, %v8552_v21  ;;  %v8570_v48 = vrot.slane %v18276_v4, 3  ;;  %v18285_v4 = vld [vmem:[#allocation104_spill] sm:$0xff] }
 0x40f   : > { %11812 = vmatprep.mubr.msk.bf16.mxu1 %vm942_vm3, %v15906_v41  ;;  %v8555_v41 = vsel %vm8516_vm8, %v8552_v21, %v8554_v40 }
 0x412   : > { %12431 = vmatmul.mubr.msk.bf16.gmra.mrb[28].mxu0 %vm942_vm3, %v8549_v2  ;;  %v8571_v2 = vsel %vm8516_vm8, %v8568_v45, %v8570_v48 }
 0x413   : > { %12434 = vmatprep.mubr.msk.bf16.mxu0 %vm942_vm3, %v8551_v36 }
 0x416   : > { %11813 = vmatmul.mubr.msk.bf16.gmra.mrb[100].mxu1 %vm942_vm3, %v15923_v47  ;;  %v8557_v47 = vsel %vm8516_vm8, %v8554_v40, %v8556_v61  ;;  %v8572_v40 = vrot.slane %v18277_v63, 3 }
 0x417   : > { %11816 = vmatprep.mubr.msk.bf16.mxu1 %vm942_vm3, %v15926_v57  ;;  %v8559_v57 = vsel %vm8516_vm8, %v8556_v61, %v8558_v9 }
 0x41a   : > { %12435 = vmatmul.mubr.msk.bf16.gmra.mrb[32].mxu0 %vm942_vm3, %v8553_v3  ;;  %v18278_v3 = vld [vmem:[#allocation88_spill] sm:$0xff] }
 0x41b   : > { %12438 = vmatprep.mubr.msk.bf16.mxu0 %vm942_vm3, %v8555_v41  ;;  %v8574_v41 = vrot.slane %v18278_v3, 3 }
 0x41d   : > { %v8575_v11 = vsel %vm8516_vm8, %v8572_v40, %v8574_v41 }
 0x41e   : > { %11817 = vmatmul.mubr.msk.bf16.gmra.mrb[104].mxu1 %vm942_vm3, %v15943_v43 }
 0x41f   : > { %11820 = vmatprep.mubr.msk.bf16.mxu1 %vm942_vm3, %v15946_v62  ;;  %v8561_v62 = vsel %vm8516_vm8, %v8558_v9, %v8560_v59  ;;  %v8578_v59 = vrot.slane %v18280_v19, 3 }
 0x421   : > { %v16387_v31 = vpop.f32.mrb[0].mxu1 }
 0x422   : > { %12439 = vmatmul.mubr.msk.bf16.gmra.mrb[36].mxu0 %vm942_vm3, %v8557_v47  ;;  %v16390_v27 = vpop.f32.mrb[1].mxu1  ;;  %v18279_v47 = vld [vmem:[#allocation93_spill] sm:$0xff] }
 0x423   : > { %v16392_v55 = vpop.f32.mrb[2].mxu1  ;;  %12442 = vmatprep.mubr.msk.bf16.mxu0 %vm942_vm3, %v8559_v57  ;;  %v8576_v57 = vrot.slane %v18279_v47, 3 }
 0x424   : > { %v16396_v43 = vpop.f32.mrb[3].mxu1 }
 0x425   : > { %v8579_v18 = vsel %vm8516_vm8, %v8576_v57, %v8578_v59 }
 0x426   : > { %11821 = vmatmul.mubr.msk.bf16.gmra.mrb[108].mxu1 %vm942_vm3, %v15963_v14 }
 0x427   : > { %11824 = vmatprep.mubr.msk.bf16.mxu1 %vm942_vm3, %v15966_v6  ;;  %v8565_v6 = vsel %vm8516_vm8, %v8562_v34, %v8564_v37  ;;  %v3580_v34 = vrot.slane %v18242_v17, 1 }
 0x429   : > { %v16405_v15 = vpop.f32.mrb[4].mxu1 }
 0x42a   : > { %12443 = vmatmul.mubr.msk.bf16.gmra.mrb[40].mxu0 %vm942_vm3, %v8561_v62  ;;  %v16408_v33 = vpop.f32.mrb[5].mxu1 }
 0x42b   : > { %v16410_v46 = vpop.f32.mrb[6].mxu1  ;;  %12446 = vmatprep.mubr.msk.bf16.mxu0 %vm942_vm3, %v8563_v44 }
 0x42c   : > { %v16414_v14 = vpop.f32.mrb[7].mxu1 }
 0x42e   : > { %11825 = vmatmul.mubr.msk.bf16.gmra.mrb[112].mxu1 %vm942_vm3, %v15983_v30 }
 0x42f   : > { %11828 = vmatprep.mubr.msk.bf16.mxu1 %vm942_vm3, %v15986_v39  ;;  %v8569_v39 = vsel %vm8516_vm8, %v8566_v52, %v8568_v45  ;;  %v4448_v45 = vrot.slane %v18284_v24, 1 }
 0x431   : > { %v16423_v42 = vpop.f32.mrb[8].mxu1 }
 0x432   : > { %12447 = vmatmul.mubr.msk.bf16.gmra.mrb[44].mxu0 %vm942_vm3, %v8565_v6  ;;  %v16426_v23 = vpop.f32.mrb[9].mxu1  ;;  %v18283_v6 = vld [vmem:[#allocation102_spill] sm:$0xff] }
 0x433   : > { %v16428_v53 = vpop.f32.mrb[10].mxu1  ;;  %12450 = vmatprep.mubr.msk.bf16.mxu0 %vm942_vm3, %v8567_v5  ;;  %v8582_v5 = vrot.slane %v18283_v6, 3  ;;  %v18291_v6 = vld [vmem:[#allocation115_spill] sm:$0xff] }
 0x434   : > { %v16432_v30 = vpop.f32.mrb[11].mxu1  ;;  %v4456_v24 = vrot.slane %v18291_v6, 1  ;;  %v4464_v6 = vrot.slane %v18169_v8, 1 }
 0x436   : > { %11829 = vmatmul.mubr.msk.bf16.gmra.mrb[116].mxu1 %vm942_vm3, %v16003_v28 }
 0x437   : > { %11832 = vmatprep.mubr.msk.bf16.mxu1 %vm942_vm3, %v16006_v56  ;;  %v8573_v56 = vsel %vm8516_vm8, %v8570_v48, %v8572_v40  ;;  %v4449_v48 = vrot.slane %v18285_v4, 2 }
 0x439   : > { %v16441_v36 = vpop.f32.mrb[12].mxu1  ;;  %v4450_v40 = vor.u32 %v4449_v48, %v4448_v45  ;;  %v18292_v45 = vld [vmem:[#allocation110_spill] sm:$0xff] }
 0x43a   : > { %12451 = vmatmul.mubr.msk.bf16.gmra.mrb[48].mxu0 %vm942_vm3, %v8569_v39  ;;  %v16444_v58 = vpop.f32.mrb[13].mxu1  ;;  %v4457_v4 = vrot.slane %v18292_v45, 2 }
 0x43b   : > { %v16446_v21 = vpop.f32.mrb[14].mxu1  ;;  %12454 = vmatprep.mubr.msk.bf16.mxu0 %vm942_vm3, %v8571_v2  ;;  %v3582_v2 = vrot.slane %v15273_v0, 1 }
 0x43c   : > { %v16450_v28 = vpop.f32.mrb[15].mxu1 }
 0x43e   : > { %11833 = vmatmul.mubr.msk.bf16.gmra.mrb[120].mxu1 %vm942_vm3, %v16023_v10 }
 0x43f   : > { %11836 = vmatprep.mubr.msk.bf16.mxu1 %vm942_vm3, %v16026_v29  ;;  %v8577_v29 = vsel %vm8516_vm8, %v8574_v41, %v8576_v57  ;;  %v18287_v57 = vld [vmem:[#allocation109_spill] sm:$0xff] }
 0x440   : > { %v4452_v19 = vrot.slane %v18287_v57, 1 }
 0x441   : > { %v16459_v61 = vpop.f32.mrb[16].mxu1 }
 0x442   : > { %12455 = vmatmul.mubr.msk.bf16.gmra.mrb[52].mxu0 %vm942_vm3, %v8573_v56  ;;  %v16462_v7 = vpop.f32.mrb[17].mxu1 }
 0x443   : > { %v16464_v9 = vpop.f32.mrb[18].mxu1  ;;  %12458 = vmatprep.mubr.msk.bf16.mxu0 %vm942_vm3, %v8575_v11  ;;  %v18286_v11 = vld [vmem:[#allocation105_spill] sm:$0xff] }
 0x444   : > { %v16468_v10 = vpop.f32.mrb[19].mxu1  ;;  %v8584_v47 = vrot.slane %v18286_v11, 3 }
 0x446   : > { %11837 = vmatmul.mubr.msk.bf16.gmra.mrb[124].mxu1 %vm942_vm3, %v16043_v20  ;;  %v18281_v20 = vld [vmem:[#allocation99_spill] sm:$0xff] }
 0x447   : > { %11840 = vmatprep.mubr.msk.bf16.mxu1 %vm942_vm3, %v16046_v22  ;;  %v8580_v37 = vrot.slane %v18281_v20, 3  ;;  %v18282_v22 = vrot.slane %v14959_v13, 1  ;;  %v18289_v20 = vld [vmem:[#allocation103_spill] sm:$0xff] }
 0x449   : > { %v16478_v62 = vpop.f32.mrb[20].mxu1  ;;  %v3581_v52 = vsel %vm2518_vm6, %v18282_v22, %v3580_v34  ;;  %v8581_v39 = vsel %vm8516_vm8, %v8578_v59, %v8580_v37  ;;  %v8583_v63 = vsel %vm8516_vm8, %v8580_v37, %v8582_v5  ;;  %v18288_v59 = vld [vmem:[#allocation107_spill] sm:$0xff]  ;;  %v4451_v37 = vsel %vm4308_vm4, %v18289_v20, %v4450_v40  ;;  %v18290_v22 = vld [vmem:[#allocation106_spill] sm:$0xff] }
 0x44a   : > { %12459 = vmatmul.mubr.msk.bf16.gmra.mrb[56].mxu0 %vm942_vm3, %v8577_v29  ;;  %v16481_v44 = vpop.f32.mrb[21].mxu1  ;;  %v4453_v29 = vrot.slane %v18288_v59, 2  ;;  %v18293_v59 = vld [vmem:[#allocation111_spill] sm:$0xff]  ;;  %v4460_v20 = vrot.slane %v18167_v50, 1 }
 0x44b   : > { %v16483_v49 = vpop.f32.mrb[22].mxu1  ;;  %12462 = vmatprep.mubr.msk.bf16.mxu0 %vm942_vm3, %v8579_v18 }
 0x44c   : > { %v16487_v16 = vpop.f32.mrb[23].mxu1  ;;  %v4454_v48 = vor.u32 %v4453_v29, %v4452_v19  ;;  %v4461_v19 = vrot.slane %v18168_v54, 2 }
 0x44e   : > { %11841 = vmatmul.mubr.msk.bf16.gmra.mrb[128].mxu1 %vm942_vm3, %v16064_v38  ;;  %v3583_v38 = vsel %vm2518_vm6, %v3580_v34, %v3582_v2  ;;  %v8585_v34 = vsel %vm8516_vm8, %v8582_v5, %v8584_v47  ;;  %v4458_v2 = vor.u32 %v4457_v4, %v4456_v24  ;;  %v8588_v5 = vrot.slane %v18293_v59, 3  ;;  %v18295_v24 = vld [vmem:[#allocation117_spill] sm:$0xff] }
 0x44f   : > { %11844 = vmatprep.mubr.msk.bf16.mxu1 %vm942_vm3, %v3581_v52  ;;  %v8586_v52 = vrot.slane %v18290_v22, 3  ;;  %v4465_v45 = vrot.slane %v18295_v24, 2  ;;  %v4462_v4 = vor.u32 %v4461_v19, %v4460_v20  ;;  %v4468_v59 = vrot.slane %v18171_v60, 1  ;;  %v18299_v20 = vld [vmem:[#allocation122_spill] sm:$0xff]  ;;  %v18302_v24 = vld [vmem:[#allocation131_spill] sm:$0xff] }
 0x450   : > { %v4459_v29 = vsel %vm4308_vm4, %v4454_v48, %v4458_v2  ;;  %v4469_v19 = vrot.slane %v18299_v20, 2 }
 0x451   : > { %v16501_v3 = vpop.f32.mrb[24].mxu1  ;;  %v4466_v54 = vor.u32 %v4465_v45, %v4464_v6  ;;  %v4463_v8 = vsel %vm4308_vm4, %v4458_v2, %v4462_v4  ;;  %v4472_v45 = vrot.slane %v18302_v24, 1  ;;  %v18307_v24 = vld [vmem:[#allocation126_spill] sm:$0xff] }
 0x452   : > { %12463 = vmatmul.mubr.msk.bf16.gmra.mrb[60].mxu0 %vm942_vm3, %v8581_v39  ;;  %v16504_v41 = vpop.f32.mrb[25].mxu1  ;;  %v8587_v39 = vsel %vm8516_vm8, %v8584_v47, %v8586_v52 }
 0x453   : > { %v16506_v56 = vpop.f32.mrb[26].mxu1  ;;  %12466 = vmatprep.mubr.msk.bf16.mxu0 %vm942_vm3, %v8583_v63 }
 0x454   : > { %v16513_v18 = vpop.f32.mrb[27].mxu1 }
 0x456   : > { %11845 = vmatmul.mubr.msk.bf16.gmra.mrb[132].mxu1 %vm942_vm3, %v3583_v38  ;;  %v4455_v38 = vsel %vm4308_vm4, %v4450_v40, %v4454_v48  ;;  %v8589_v40 = vsel %vm8516_vm8, %v8586_v52, %v8588_v5 }
 0x457   : > { %11918 = vmatprep.mubr.msk.bf16.mxu1 %vm942_vm3, %v4451_v37  ;;  %v18294_v37 = vld [vmem:[#allocation113_spill] sm:$0xff] }
 0x458   : > { %v8590_v22 = vrot.slane %v18294_v37, 3  ;;  %v18301_v37 = vld [vmem:[#allocation121_spill] sm:$0xff] }
 0x459   : > { %v16524_v63 = vpop.f32.mrb[28].mxu1  ;;  %v8594_v6 = vrot.slane %v18301_v37, 3 }
 0x45a   : > { %12467 = vmatmul.mubr.msk.bf16.gmra.mrb[64].mxu0 %vm942_vm3, %v8585_v34  ;;  %v16527_v11 = vpop.f32.mrb[29].mxu1  ;;  %v8591_v50 = vsel %vm8516_vm8, %v8588_v5, %v8590_v22 }
 0x45b   : > { %v16529_v57 = vpop.f32.mrb[30].mxu1  ;;  %12470 = vmatprep.mubr.msk.bf16.mxu0 %vm942_vm3, %v8587_v39 }
 0x45c   : > { %v16536_v47 = vpop.f32.mrb[31].mxu1 }
 0x45e   : > { %11919 = vmatmul.mubr.msk.bf16.vlgmr.msra.gmra.mrb[68].mxu1 %vm942_vm3, %v4455_v38  ;;  %v18298_v38 = vld [vmem:[#allocation118_spill] sm:$0xff] }
 0x45f   : > { %11922 = vmatprep.mubr.msk.bf16.mxu1 %vm942_vm3, %v4459_v29  ;;  %v8592_v52 = vrot.slane %v18298_v38, 3  ;;  %v4467_v29 = vsel %vm4308_vm4, %v4462_v4, %v4466_v54 }
 0x461   : > { %v16546_v34 = vpop.f32.mrb[32].mxu1  ;;  %v8593_v2 = vsel %vm8516_vm8, %v8590_v22, %v8592_v52  ;;  %v8595_v60 = vsel %vm8516_vm8, %v8592_v52, %v8594_v6  ;;  %v8596_v22 = vrot.slane %v18307_v24, 3 }
 0x462   : > { %12471 = vmatmul.mubr.msk.bf16.gmra.mrb[68].mxu0 %vm942_vm3, %v8589_v40  ;;  %v16549_v48 = vpop.f32.mrb[33].mxu1  ;;  %v18303_v40 = vld [vmem:[#allocation125_spill] sm:$0xff] }
 0x463   : > { %18296 = vst [vmem:[#allocation208_spill] sm:$0xff] %v16549_v48  ;;  %v16551_v39 = vpop.f32.mrb[34].mxu1  ;;  %12474 = vmatprep.mubr.msk.bf16.mxu0 %vm942_vm3, %v8591_v50  ;;  %v4473_v12 = vrot.slane %v18303_v40, 2  ;;  %v4470_v50 = vor.u32 %v4469_v19, %v4468_v59  ;;  %v18308_v59 = vld [vmem:[#allocation130_spill] sm:$0xff] }
 0x464   : > { %18297 = vst [vmem:[#allocation215_spill] sm:$0xff] %v16551_v39  ;;  %v16558_v5 = vpop.f32.mrb[35].mxu1  ;;  %v4477_v19 = vrot.slane %v18308_v59, 2 }
 0x465   : > { %18300 = vst [vmem:[#allocation216_spill] sm:$0xff] %v16558_v5  ;;  %v4474_v38 = vor.u32 %v4473_v12, %v4472_v45  ;;  %v18310_v45 = vld [vmem:[#allocation129_spill] sm:$0xff] }
 0x466   : > { %11923 = vmatmul.mubr.msk.bf16.gmra.mrb[72].mxu1 %vm942_vm3, %v4463_v8  ;;  %v4471_v8 = vsel %vm4308_vm4, %v4466_v54, %v4470_v50  ;;  %v8598_v40 = vrot.slane %v18310_v45, 3  ;;  %v8597_v54 = vsel %vm8516_vm8, %v8594_v6, %v8596_v22  ;;  %v18386_v5 = vld [vmem:[#allocation193_spill] sm:$0xff] }
 0x467   : > { %11926 = vmatprep.mubr.msk.bf16.mxu1 %vm942_vm3, %v4467_v29  ;;  %v4476_v29 = vrot.slane %v18175_v32, 1  ;;  %v4475_v12 = vsel %vm4308_vm4, %v4470_v50, %v4474_v38 }
 0x468   : > { %v8599_v32 = vsel %vm8516_vm8, %v8596_v22, %v8598_v40 }
 0x469   : > { %v16568_v20 = vpop.f32.mrb[36].mxu1 }
 0x46a   : > { %18304 = vst [vmem:[#allocation2_spill] sm:$0xff] %v16568_v20  ;;  %12475 = vmatmul.mubr.msk.bf16.gmra.mrb[72].mxu0 %vm942_vm3, %v8593_v2  ;;  %v16571_v4 = vpop.f32.mrb[37].mxu1  ;;  %v18311_v2 = vld [vmem:[#allocation139_spill] sm:$0xff]  ;;  %v18312_v20 = vld [vmem:[#allocation133_spill] sm:$0xff] }
 0x46b   : > { %18305 = vst [vmem:[#allocation224_spill] sm:$0xff] %v16571_v4  ;;  %v16573_v37 = vpop.f32.mrb[38].mxu1  ;;  %12478 = vmatprep.mubr.msk.bf16.mxu0 %vm942_vm3, %v8595_v60  ;;  %v4480_v4 = vrot.slane %v18311_v2, 1  ;;  %v4478_v60 = vor.u32 %v4477_v19, %v4476_v29  ;;  %v18317_v2 = vld [vmem:[#allocation140_spill] sm:$0xff]  ;;  %v18318_v29 = vld [vmem:[#allocation138_spill] sm:$0xff] }
 0x46c   : > { %18306 = vst [vmem:[#allocation225_spill] sm:$0xff] %v16573_v37  ;;  %v16580_v52 = vpop.f32.mrb[39].mxu1  ;;  %v4481_v37 = vrot.slane %v18312_v20, 2  ;;  %v4485_v19 = vrot.slane %v18318_v29, 2 }
 0x46d   : > { %18309 = vst [vmem:[#allocation226_spill] sm:$0xff] %v16580_v52  ;;  %v4479_v20 = vsel %vm4308_vm4, %v4474_v38, %v4478_v60  ;;  %v18322_v52 = vld [vmem:[#allocation141_spill] sm:$0xff] }
 0x46e   : > { %11927 = vmatmul.mubr.msk.bf16.gmra.mrb[76].mxu1 %vm942_vm3, %v4471_v8  ;;  %v4482_v24 = vor.u32 %v4481_v37, %v4480_v4  ;;  %v18316_v8 = vld [vmem:[#allocation134_spill] sm:$0xff]  ;;  %v18320_v37 = vld [vmem:[#allocation137_spill] sm:$0xff] }
 0x46f   : > { %11930 = vmatprep.mubr.msk.bf16.mxu1 %vm942_vm3, %v4475_v12  ;;  %v8600_v6 = vrot.slane %v18316_v8, 3  ;;  %v4484_v12 = vrot.slane %v18317_v2, 1 }
 0x470   : > { %v4483_v4 = vsel %vm4308_vm4, %v4478_v60, %v4482_v24 }
 0x471   : > { %v16590_v59 = vpop.f32.mrb[40].mxu1  ;;  %v8601_v38 = vsel %vm8516_vm8, %v8598_v40, %v8600_v6 }
 0x472   : > { %18313 = vst [vmem:[#allocation227_spill] sm:$0xff] %v16590_v59  ;;  %12479 = vmatmul.mubr.msk.bf16.gmra.mrb[76].mxu0 %vm942_vm3, %v8597_v54  ;;  %v16593_v50 = vpop.f32.mrb[41].mxu1  ;;  %v8602_v54 = vrot.slane %v18320_v37, 3  ;;  %v18321_v59 = vld [vmem:[#allocation147_spill] sm:$0xff] }
 0x473   : > { %18314 = vst [vmem:[#allocation228_spill] sm:$0xff] %v16593_v50  ;;  %v16595_v45 = vpop.f32.mrb[42].mxu1  ;;  %12482 = vmatprep.mubr.msk.bf16.mxu0 %vm942_vm3, %v8599_v32  ;;  %v4488_v50 = vrot.slane %v18321_v59, 1  ;;  %v4486_v32 = vor.u32 %v4485_v19, %v4484_v12  ;;  %v18326_v59 = vld [vmem:[#allocation142_spill] sm:$0xff] }
 0x474   : > { %18315 = vst [vmem:[#allocation229_spill] sm:$0xff] %v16595_v45  ;;  %v16602_v22 = vpop.f32.mrb[43].mxu1  ;;  %v4489_v45 = vrot.slane %v18322_v52, 2  ;;  %v8603_v8 = vsel %vm8516_vm8, %v8600_v6, %v8602_v54  ;;  %v8604_v40 = vrot.slane %v18326_v59, 3  ;;  %v18328_v12 = vld [vmem:[#allocation146_spill] sm:$0xff] }
 0x475   : > { %18319 = vst [vmem:[#allocation230_spill] sm:$0xff] %v16602_v22  ;;  %v4487_v52 = vsel %vm4308_vm4, %v4482_v24, %v4486_v32  ;;  %v4493_v19 = vrot.slane %v18328_v12, 2  ;;  %v18332_v22 = vld [vmem:[#allocation149_spill] sm:$0xff] }
 0x476   : > { %11931 = vmatmul.mubr.msk.bf16.gmra.mrb[80].mxu1 %vm942_vm3, %v4479_v20  ;;  %v4490_v2 = vor.u32 %v4489_v45, %v4488_v50  ;;  %v18327_v20 = vld [vmem:[#allocation148_spill] sm:$0xff]  ;;  %v18330_v45 = vld [vmem:[#allocation145_spill] sm:$0xff]  ;;  %v8605_v24 = vsel %vm8516_vm8, %v8602_v54, %v8604_v40 }
 0x477   : > { %11934 = vmatprep.mubr.msk.bf16.mxu1 %vm942_vm3, %v4483_v4  ;;  %v4492_v4 = vrot.slane %v18327_v20, 1 }
 0x478   : > { %v4491_v50 = vsel %vm4308_vm4, %v4486_v32, %v4490_v2 }
 0x479   : > { %v16612_v29 = vpop.f32.mrb[44].mxu1 }
 0x47a   : > { %18323 = vst [vmem:[#allocation231_spill] sm:$0xff] %v16612_v29  ;;  %12483 = vmatmul.mubr.msk.bf16.gmra.mrb[80].mxu0 %vm942_vm3, %v8601_v38  ;;  %v16615_v60 = vpop.f32.mrb[45].mxu1  ;;  %v8606_v38 = vrot.slane %v18330_v45, 3  ;;  %v18331_v29 = vld [vmem:[#allocation155_spill] sm:$0xff] }
 0x47b   : > { %18324 = vst [vmem:[#allocation232_spill] sm:$0xff] %v16615_v60  ;;  %v16617_v37 = vpop.f32.mrb[46].mxu1  ;;  %12486 = vmatprep.mubr.msk.bf16.mxu0 %vm942_vm3, %v8603_v8  ;;  %v4496_v60 = vrot.slane %v18331_v29, 1  ;;  %v4494_v8 = vor.u32 %v4493_v19, %v4492_v4  ;;  %v18336_v29 = vld [vmem:[#allocation150_spill] sm:$0xff] }
 0x47c   : > { %18325 = vst [vmem:[#allocation233_spill] sm:$0xff] %v16617_v37  ;;  %v16624_v6 = vpop.f32.mrb[47].mxu1  ;;  %v4497_v37 = vrot.slane %v18332_v22, 2  ;;  %v8607_v59 = vsel %vm8516_vm8, %v8604_v40, %v8606_v38  ;;  %v8608_v54 = vrot.slane %v18336_v29, 3  ;;  %v18338_v4 = vld [vmem:[#allocation154_spill] sm:$0xff] }
 0x47d   : > { %18329 = vst [vmem:[#allocation234_spill] sm:$0xff] %v16624_v6  ;;  %v4495_v22 = vsel %vm4308_vm4, %v4490_v2, %v4494_v8  ;;  %v4501_v19 = vrot.slane %v18338_v4, 2  ;;  %v18342_v6 = vld [vmem:[#allocation157_spill] sm:$0xff] }
 0x47e   : > { %11935 = vmatmul.mubr.msk.bf16.gmra.mrb[84].mxu1 %vm942_vm3, %v4487_v52  ;;  %v4498_v20 = vor.u32 %v4497_v37, %v4496_v60  ;;  %v18337_v52 = vld [vmem:[#allocation156_spill] sm:$0xff]  ;;  %v18340_v37 = vld [vmem:[#allocation153_spill] sm:$0xff]  ;;  %v8609_v2 = vsel %vm8516_vm8, %v8606_v38, %v8608_v54 }
 0x47f   : > { %11938 = vmatprep.mubr.msk.bf16.mxu1 %vm942_vm3, %v4491_v50  ;;  %v4500_v50 = vrot.slane %v18337_v52, 1 }
 0x480   : > { %v4499_v60 = vsel %vm4308_vm4, %v4494_v8, %v4498_v20 }
 0x481   : > { %v16634_v12 = vpop.f32.mrb[48].mxu1 }
 0x482   : > { %18333 = vst [vmem:[#allocation235_spill] sm:$0xff] %v16634_v12  ;;  %12487 = vmatmul.mubr.msk.bf16.gmra.mrb[84].mxu0 %vm942_vm3, %v8605_v24  ;;  %v16637_v32 = vpop.f32.mrb[49].mxu1  ;;  %v8610_v24 = vrot.slane %v18340_v37, 3  ;;  %v18341_v12 = vld [vmem:[#allocation163_spill] sm:$0xff] }
 0x483   : > { %18334 = vst [vmem:[#allocation236_spill] sm:$0xff] %v16637_v32  ;;  %v16639_v45 = vpop.f32.mrb[50].mxu1  ;;  %12490 = vmatprep.mubr.msk.bf16.mxu0 %vm942_vm3, %v8607_v59  ;;  %v4504_v32 = vrot.slane %v18341_v12, 1  ;;  %v4502_v59 = vor.u32 %v4501_v19, %v4500_v50  ;;  %v18346_v12 = vld [vmem:[#allocation158_spill] sm:$0xff] }
 0x484   : > { %18335 = vst [vmem:[#allocation237_spill] sm:$0xff] %v16639_v45  ;;  %v16646_v40 = vpop.f32.mrb[51].mxu1  ;;  %v4505_v45 = vrot.slane %v18342_v6, 2  ;;  %v8611_v29 = vsel %vm8516_vm8, %v8608_v54, %v8610_v24  ;;  %v8612_v38 = vrot.slane %v18346_v12, 3  ;;  %v18348_v50 = vld [vmem:[#allocation162_spill] sm:$0xff] }
 0x485   : > { %18339 = vst [vmem:[#allocation238_spill] sm:$0xff] %v16646_v40  ;;  %v4503_v6 = vsel %vm4308_vm4, %v4498_v20, %v4502_v59  ;;  %v4509_v19 = vrot.slane %v18348_v50, 2  ;;  %v18352_v40 = vld [vmem:[#allocation165_spill] sm:$0xff] }
 0x486   : > { %11939 = vmatmul.mubr.msk.bf16.gmra.mrb[88].mxu1 %vm942_vm3, %v4495_v22  ;;  %v4506_v52 = vor.u32 %v4505_v45, %v4504_v32  ;;  %v18347_v22 = vld [vmem:[#allocation164_spill] sm:$0xff]  ;;  %v18350_v45 = vld [vmem:[#allocation161_spill] sm:$0xff]  ;;  %v8613_v20 = vsel %vm8516_vm8, %v8610_v24, %v8612_v38 }
 0x487   : > { %11942 = vmatprep.mubr.msk.bf16.mxu1 %vm942_vm3, %v4499_v60  ;;  %v4508_v60 = vrot.slane %v18347_v22, 1 }
 0x488   : > { %v4507_v32 = vsel %vm4308_vm4, %v4502_v59, %v4506_v52 }
 0x489   : > { %v16656_v4 = vpop.f32.mrb[52].mxu1 }
 0x48a   : > { %18343 = vst [vmem:[#allocation239_spill] sm:$0xff] %v16656_v4  ;;  %12491 = vmatmul.mubr.msk.bf16.gmra.mrb[88].mxu0 %vm942_vm3, %v8609_v2  ;;  %v16659_v8 = vpop.f32.mrb[53].mxu1  ;;  %v8614_v2 = vrot.slane %v18350_v45, 3  ;;  %v18351_v4 = vld [vmem:[#allocation171_spill] sm:$0xff] }
 0x48b   : > { %18344 = vst [vmem:[#allocation240_spill] sm:$0xff] %v16659_v8  ;;  %v16661_v37 = vpop.f32.mrb[54].mxu1  ;;  %12494 = vmatprep.mubr.msk.bf16.mxu0 %vm942_vm3, %v8611_v29  ;;  %v4512_v8 = vrot.slane %v18351_v4, 1  ;;  %v4510_v29 = vor.u32 %v4509_v19, %v4508_v60  ;;  %v18356_v4 = vld [vmem:[#allocation166_spill] sm:$0xff] }
 0x48c   : > { %18345 = vst [vmem:[#allocation241_spill] sm:$0xff] %v16661_v37  ;;  %v16668_v54 = vpop.f32.mrb[55].mxu1  ;;  %v4513_v37 = vrot.slane %v18352_v40, 2  ;;  %v8615_v12 = vsel %vm8516_vm8, %v8612_v38, %v8614_v2  ;;  %v8616_v24 = vrot.slane %v18356_v4, 3  ;;  %v18358_v60 = vld [vmem:[#allocation170_spill] sm:$0xff] }
 0x48d   : > { %18349 = vst [vmem:[#allocation242_spill] sm:$0xff] %v16668_v54  ;;  %v4511_v40 = vsel %vm4308_vm4, %v4506_v52, %v4510_v29  ;;  %v4517_v19 = vrot.slane %v18358_v60, 2  ;;  %v18362_v54 = vld [vmem:[#allocation173_spill] sm:$0xff] }
 0x48e   : > { %11943 = vmatmul.mubr.msk.bf16.gmra.mrb[92].mxu1 %vm942_vm3, %v4503_v6  ;;  %v4514_v22 = vor.u32 %v4513_v37, %v4512_v8  ;;  %v18357_v6 = vld [vmem:[#allocation172_spill] sm:$0xff]  ;;  %v18360_v37 = vld [vmem:[#allocation169_spill] sm:$0xff]  ;;  %v8617_v52 = vsel %vm8516_vm8, %v8614_v2, %v8616_v24 }
 0x48f   : > { %11946 = vmatprep.mubr.msk.bf16.mxu1 %vm942_vm3, %v4507_v32  ;;  %v4516_v32 = vrot.slane %v18357_v6, 1 }
 0x490   : > { %v4515_v8 = vsel %vm4308_vm4, %v4510_v29, %v4514_v22 }
 0x491   : > { %v16678_v50 = vpop.f32.mrb[56].mxu1 }
 0x492   : > { %18353 = vst [vmem:[#allocation243_spill] sm:$0xff] %v16678_v50  ;;  %12495 = vmatmul.mubr.msk.bf16.gmra.mrb[92].mxu0 %vm942_vm3, %v8613_v20  ;;  %v16681_v59 = vpop.f32.mrb[57].mxu1  ;;  %v8618_v20 = vrot.slane %v18360_v37, 3  ;;  %v18361_v50 = vld [vmem:[#allocation179_spill] sm:$0xff] }
 0x493   : > { %18354 = vst [vmem:[#allocation244_spill] sm:$0xff] %v16681_v59  ;;  %v16683_v45 = vpop.f32.mrb[58].mxu1  ;;  %12498 = vmatprep.mubr.msk.bf16.mxu0 %vm942_vm3, %v8615_v12  ;;  %v4520_v59 = vrot.slane %v18361_v50, 1  ;;  %v4518_v12 = vor.u32 %v4517_v19, %v4516_v32  ;;  %v18366_v50 = vld [vmem:[#allocation174_spill] sm:$0xff] }
 0x494   : > { %18355 = vst [vmem:[#allocation245_spill] sm:$0xff] %v16683_v45  ;;  %v16690_v38 = vpop.f32.mrb[59].mxu1  ;;  %v4521_v45 = vrot.slane %v18362_v54, 2  ;;  %v8619_v4 = vsel %vm8516_vm8, %v8616_v24, %v8618_v20  ;;  %v8620_v2 = vrot.slane %v18366_v50, 3  ;;  %v18368_v32 = vld [vmem:[#allocation178_spill] sm:$0xff] }
 0x495   : > { %18359 = vst [vmem:[#allocation246_spill] sm:$0xff] %v16690_v38  ;;  %v4519_v54 = vsel %vm4308_vm4, %v4514_v22, %v4518_v12  ;;  %v4525_v19 = vrot.slane %v18368_v32, 2  ;;  %v18372_v38 = vld [vmem:[#allocation181_spill] sm:$0xff] }
 0x496   : > { %11947 = vmatmul.mubr.msk.bf16.gmra.mrb[96].mxu1 %vm942_vm3, %v4511_v40  ;;  %v4522_v6 = vor.u32 %v4521_v45, %v4520_v59  ;;  %v18367_v40 = vld [vmem:[#allocation180_spill] sm:$0xff]  ;;  %v18370_v45 = vld [vmem:[#allocation177_spill] sm:$0xff]  ;;  %v8621_v22 = vsel %vm8516_vm8, %v8618_v20, %v8620_v2 }
 0x497   : > { %11950 = vmatprep.mubr.msk.bf16.mxu1 %vm942_vm3, %v4515_v8  ;;  %v4524_v8 = vrot.slane %v18367_v40, 1 }
 0x498   : > { %v4523_v59 = vsel %vm4308_vm4, %v4518_v12, %v4522_v6 }
 0x499   : > { %v16700_v60 = vpop.f32.mrb[60].mxu1 }
 0x49a   : > { %18363 = vst [vmem:[#allocation247_spill] sm:$0xff] %v16700_v60  ;;  %12499 = vmatmul.mubr.msk.bf16.gmra.mrb[96].mxu0 %vm942_vm3, %v8617_v52  ;;  %v16703_v29 = vpop.f32.mrb[61].mxu1  ;;  %v8622_v52 = vrot.slane %v18370_v45, 3  ;;  %v18371_v60 = vld [vmem:[#allocation187_spill] sm:$0xff] }
 0x49b   : > { %18364 = vst [vmem:[#allocation248_spill] sm:$0xff] %v16703_v29  ;;  %v16705_v37 = vpop.f32.mrb[62].mxu1  ;;  %12502 = vmatprep.mubr.msk.bf16.mxu0 %vm942_vm3, %v8619_v4  ;;  %v4528_v29 = vrot.slane %v18371_v60, 1  ;;  %v4526_v4 = vor.u32 %v4525_v19, %v4524_v8  ;;  %v18376_v60 = vld [vmem:[#allocation182_spill] sm:$0xff] }
 0x49c   : > { %18365 = vst [vmem:[#allocation249_spill] sm:$0xff] %v16705_v37  ;;  %v16712_v24 = vpop.f32.mrb[63].mxu1  ;;  %v4529_v37 = vrot.slane %v18372_v38, 2  ;;  %v8623_v50 = vsel %vm8516_vm8, %v8620_v2, %v8622_v52  ;;  %v8624_v20 = vrot.slane %v18376_v60, 3  ;;  %v18378_v8 = vld [vmem:[#allocation186_spill] sm:$0xff] }
 0x49d   : > { %18369 = vst [vmem:[#allocation5_spill] sm:$0xff] %v16712_v24  ;;  %v4527_v38 = vsel %vm4308_vm4, %v4522_v6, %v4526_v4  ;;  %v4533_v19 = vrot.slane %v18378_v8, 2  ;;  %v18382_v24 = vld [vmem:[#allocation189_spill] sm:$0xff] }
 0x49e   : > { %11951 = vmatmul.mubr.msk.bf16.gmra.mrb[100].mxu1 %vm942_vm3, %v4519_v54  ;;  %v4530_v40 = vor.u32 %v4529_v37, %v4528_v29  ;;  %v18377_v54 = vld [vmem:[#allocation188_spill] sm:$0xff]  ;;  %v18380_v37 = vld [vmem:[#allocation185_spill] sm:$0xff]  ;;  %v8625_v6 = vsel %vm8516_vm8, %v8622_v52, %v8624_v20 }
 0x49f   : > { %11954 = vmatprep.mubr.msk.bf16.mxu1 %vm942_vm3, %v4523_v59  ;;  %v4532_v59 = vrot.slane %v18377_v54, 1 }
 0x4a0   : > { %v4531_v29 = vsel %vm4308_vm4, %v4526_v4, %v4530_v40  ;;  %v18383_v4 = vld [vmem:[#allocation196_spill] sm:$0xff] }
 0x4a1   : > { %v16722_v32 = vpop.f32.mrb[64].mxu1  ;;  %v4540_v8 = vrot.slane %v18383_v4, 1 }
 0x4a2   : > { %18373 = vst [vmem:[#allocation4_spill] sm:$0xff] %v16722_v32  ;;  %12503 = vmatmul.mubr.msk.bf16.gmra.mrb[100].mxu0 %vm942_vm3, %v8621_v22  ;;  %v16725_v12 = vpop.f32.mrb[65].mxu1  ;;  %v8626_v22 = vrot.slane %v18380_v37, 3  ;;  %v18381_v32 = vld [vmem:[#allocation195_spill] sm:$0xff]  ;;  %v18384_v37 = vld [vmem:[#allocation194_spill] sm:$0xff] }
 0x4a3   : > { %18374 = vst [vmem:[#allocation9_spill] sm:$0xff] %v16725_v12  ;;  %v16727_v45 = vpop.f32.mrb[66].mxu1  ;;  %12506 = vmatprep.mubr.msk.bf16.mxu0 %vm942_vm3, %v8623_v50  ;;  %v4536_v12 = vrot.slane %v18381_v32, 1  ;;  %v4534_v50 = vor.u32 %v4533_v19, %v4532_v59  ;;  %v18385_v32 = vld [vmem:[#allocation190_spill] sm:$0xff]  ;;  %v18387_v59 = vld [vmem:[#allocation203_spill] sm:$0xff] }
 0x4a4   : > { %18375 = vst [vmem:[#allocation8_spill] sm:$0xff] %v16727_v45  ;;  %v16734_v2 = vpop.f32.mrb[67].mxu1  ;;  %v4537_v45 = vrot.slane %v18382_v24, 2  ;;  %v8627_v60 = vsel %vm8516_vm8, %v8624_v20, %v8626_v22  ;;  %v4544_v19 = vrot.slane %v18387_v59, 1  ;;  %v18388_v20 = vld [vmem:[#allocation197_spill] sm:$0xff] }
 0x4a5   : > { %18379 = vst [vmem:[#allocation11_spill] sm:$0xff] %v16734_v2  ;;  %v4541_v2 = vrot.slane %v18384_v37, 2  ;;  %v4535_v24 = vsel %vm4308_vm4, %v4530_v40, %v4534_v50 }
 0x4a6   : > { %11955 = vmatmul.mubr.msk.bf16.gmra.mrb[104].mxu1 %vm942_vm3, %v4527_v38  ;;  %v4538_v54 = vor.u32 %v4537_v45, %v4536_v12  ;;  %v8628_v38 = vrot.slane %v18385_v32, 3  ;;  %v4545_v12 = vrot.slane %v18388_v20, 2 }
 0x4a7   : > { %11958 = vmatprep.mubr.msk.bf16.mxu1 %vm942_vm3, %v4531_v29  ;;  %v8630_v29 = vrot.slane %v18386_v5, 3  ;;  %v4542_v4 = vor.u32 %v4541_v2, %v4540_v8  ;;  %v18389_v2 = vld [vmem:[#allocation198_spill] sm:$0xff] }
 0x4a8   : > { %v4539_v52 = vsel %vm4308_vm4, %v4534_v50, %v4538_v54  ;;  %v8629_v37 = vsel %vm8516_vm8, %v8626_v22, %v8628_v38  ;;  %v4546_v48 = vor.u32 %v4545_v12, %v4544_v19  ;;  %v8632_v22 = vrot.slane %v18389_v2, 3 }
 0x4a9   : > { %v8631_v39 = vsel %vm8516_vm8, %v8628_v38, %v8630_v29  ;;  %v4548_v38 = vrot.slane %v18228_v51, 1 }
 0x4aa   : > { %12507 = vmatmul.mubr.msk.bf16.gmra.mrb[104].mxu0 %vm942_vm3, %v8625_v6  ;;  %v16758_v6 = vld [vmem:[%s17335_s2] ss:$0 sm:$0xff] }
 0x4ab   : > { %12510 = vmatprep.mubr.msk.bf16.mxu0 %vm942_vm3, %v8627_v60 }
 0x4ad   : > { %v12404_v45 = vpop.f32.mrb[0].mxu0 }
 0x4ae   : > { %v12540_v60 = vadd.f32 %v12404_v45, %v16387_v31  ;;  %v8895_v40 = vpop.f32.mrb[1].mxu0  ;;  %11959 = vmatmul.mubr.msk.bf16.gmra.mrb[108].mxu1 %vm942_vm3, %v4535_v24  ;;  %v4543_v24 = vsel %vm4308_vm4, %v4538_v54, %v4542_v4  ;;  %v4549_v45 = vrot.slane %v18229_v26, 2  ;;  %v18392_v54 = vld [vmem:[#allocation205_spill] sm:$0xff] }
 0x4af   : > { %v12541_v50 = vadd.f32 %v8895_v40, %v16390_v27  ;;  %v12405_v5 = vpop.f32.mrb[2].mxu0  ;;  %11962 = vmatprep.mubr.msk.bf16.mxu1 %vm942_vm3, %v4539_v52  ;;  %v4547_v40 = vsel %vm4308_vm4, %v4542_v4, %v4546_v48 }
 0x4b0   : > { %v9583_v32 = vadd.f32 %v12540_v60, %v16758_v6  ;;  %v12542_v59 = vadd.f32 %v12405_v5, %v16392_v55  ;;  %v8898_v20 = vpop.f32.mrb[3].mxu0 }
 0x4b1   : > { %v9581_v31 = vadd.f32 %v12541_v50, %v16758_v6  ;;  %v12543_v27 = vadd.f32 %v8898_v20, %v16396_v43  ;;  %v18390_v43 = vld [vmem:[#allocation201_spill] sm:$0xff]  ;;  %v18391_v50 = vld [vmem:[#allocation211_spill] sm:$0xff]  ;;  %v8633_v20 = vsel %vm8516_vm8, %v8630_v29, %v8632_v22 }
 0x4b2   : > { %v9719_v8 = vmax.f32 %v9583_v32, 0.0  ;;  %v9584_v55 = vadd.f32 %v12542_v59, %v16758_v6  ;;  %12511 = vmatmul.mubr.msk.bf16.gmra.mrb[108].mxu0 %vm942_vm3, %v8629_v37  ;;  %v8634_v12 = vrot.slane %v18390_v43, 3  ;;  %v4552_v5 = vrot.slane %v18391_v50, 1  ;;  %v18396_v50 = vld [vmem:[#allocation209_spill] sm:$0xff] }
 0x4b3   : > { %v9717_v52 = vmax.f32 %v9581_v31, 0.0  ;;  %v9582_v19 = vadd.f32 %v12543_v27, %v16758_v6  ;;  %12514 = vmatprep.mubr.msk.bf16.mxu0 %vm942_vm3, %v8631_v39  ;;  %v4553_v37 = vrot.slane %v18392_v54, 2  ;;  %v4550_v31 = vor.u32 %v4549_v45, %v4548_v38  ;;  %v18394_v38 = vld [vmem:[#allocation212_spill] sm:$0xff]  ;;  %v18395_v45 = vld [vmem:[#allocation210_spill] sm:$0xff] }
 0x4b4   : > { %9856 = vst.msk [vmem:[%s16771_s15 + $0x10] sm:$0xff] %vm9853_vm9, %v9719_v8  ;;  %v9720_v60 = vmax.f32 %v9584_v55, 0.0 }
 0x4b5   : > { %9854 = vst.msk [vmem:[%s16771_s15] sm:$0xff] %vm9853_vm9, %v9717_v52  ;;  %v9718_v51 = vmax.f32 %v9582_v19, 0.0  ;;  %v12408_v32 = vpop.f32.mrb[4].mxu0  ;;  %v4554_v55 = vor.u32 %v4553_v37, %v4552_v5  ;;  %v8638_v5 = vrot.slane %v18396_v50, 3 }
 0x4b6   : > { %9857 = vst.msk [vmem:[%s16771_s15 + $0x18] sm:$0xff] %vm9853_vm9, %v9720_v60  ;;  %v12544_v39 = vadd.f32 %v12408_v32, %v16405_v15  ;;  %v8911_v59 = vpop.f32.mrb[5].mxu0  ;;  %11963 = vmatmul.mubr.msk.bf16.gmra.mrb[112].mxu1 %vm942_vm3, %v4543_v24  ;;  %v8635_v15 = vsel %vm8516_vm8, %v8632_v22, %v8634_v12  ;;  %v4557_v60 = vrot.slane %v18395_v45, 2  ;;  %v4564_v45 = vrot.slane %v18238_v35, 1 }
 0x4b7   : > { %9855 = vst.msk [vmem:[%s16771_s15 + $0x8] sm:$0xff] %vm9853_vm9, %v9718_v51  ;;  %v12545_v26 = vadd.f32 %v8911_v59, %v16408_v33  ;;  %v12409_v4 = vpop.f32.mrb[6].mxu0  ;;  %11966 = vmatprep.mubr.msk.bf16.mxu1 %vm942_vm3, %v4547_v40  ;;  %v18393_v33 = vld [vmem:[#allocation206_spill] sm:$0xff]  ;;  %v4555_v37 = vsel %vm4308_vm4, %v4550_v31, %v4554_v55  ;;  %v18397_v51 = vld [vmem:[#allocation219_spill] sm:$0xff] }
 0x4b8   : > { %v9587_v27 = vadd.f32 %v12544_v39, %v16758_v6  ;;  %v12546_v2 = vadd.f32 %v12409_v4, %v16410_v46  ;;  %v8914_v8 = vpop.f32.mrb[7].mxu0  ;;  %v8636_v19 = vrot.slane %v18393_v33, 3  ;;  %v4556_v46 = vrot.slane %v18394_v38, 1  ;;  %v18398_v39 = vld [vmem:[#allocation213_spill] sm:$0xff]  ;;  %v18399_v38 = vld [vmem:[#allocation214_spill] sm:$0xff] }
 0x4b9   : > { %v9585_v24 = vadd.f32 %v12545_v26, %v16758_v6  ;;  %v12547_v52 = vadd.f32 %v8914_v8, %v16414_v14  ;;  %v4551_v14 = vsel %vm4308_vm4, %v4546_v48, %v4550_v31  ;;  %v4560_v32 = vrot.slane %v18397_v51, 1 }
 0x4ba   : > { %v9723_v29 = vmax.f32 %v9587_v27, 0.0  ;;  %v9588_v43 = vadd.f32 %v12546_v2, %v16758_v6  ;;  %12515 = vmatmul.mubr.msk.bf16.gmra.mrb[112].mxu0 %vm942_vm3, %v8633_v20  ;;  %v4561_v59 = vrot.slane %v18398_v39, 2  ;;  %v4558_v27 = vor.u32 %v4557_v60, %v4556_v46 }
 0x4bb   : > { %v9721_v40 = vmax.f32 %v9585_v24, 0.0  ;;  %v9586_v22 = vadd.f32 %v12547_v52, %v16758_v6  ;;  %12518 = vmatprep.mubr.msk.bf16.mxu0 %vm942_vm3, %v8635_v15  ;;  %v8637_v8 = vsel %vm8516_vm8, %v8634_v12, %v8636_v19 }
 0x4bc   : > { %9860 = vst.msk [vmem:[%s16771_s15 + $0x30] sm:$0xff] %vm9853_vm9, %v9723_v29  ;;  %v9724_v54 = vmax.f32 %v9588_v43, 0.0  ;;  %v4562_v33 = vor.u32 %v4561_v59, %v4560_v32 }
 0x4bd   : > { %9858 = vst.msk [vmem:[%s16771_s15 + $0x20] sm:$0xff] %vm9853_vm9, %v9721_v40  ;;  %v9722_v26 = vmax.f32 %v9586_v22, 0.0  ;;  %v12412_v4 = vpop.f32.mrb[8].mxu0  ;;  %v18401_v22 = vld [vmem:[#allocation218_spill] sm:$0xff] }
 0x4be   : > { %9861 = vst.msk [vmem:[%s16771_s15 + $0x38] sm:$0xff] %vm9853_vm9, %v9724_v54  ;;  %v12548_v20 = vadd.f32 %v12412_v4, %v16423_v42  ;;  %v8927_v48 = vpop.f32.mrb[9].mxu0  ;;  %11967 = vmatmul.mubr.msk.bf16.gmra.mrb[116].mxu1 %vm942_vm3, %v4551_v14  ;;  %v8639_v42 = vsel %vm8516_vm8, %v8636_v19, %v8638_v5  ;;  %v4565_v14 = vrot.slane %v18401_v22, 2  ;;  %v4563_v54 = vsel %vm4308_vm4, %v4558_v27, %v4562_v33 }
 0x4bf   : > { %9859 = vst.msk [vmem:[%s16771_s15 + $0x28] sm:$0xff] %vm9853_vm9, %v9722_v26  ;;  %v12549_v31 = vadd.f32 %v8927_v48, %v16426_v23  ;;  %v12413_v2 = vpop.f32.mrb[10].mxu0  ;;  %11970 = vmatprep.mubr.msk.bf16.mxu1 %vm942_vm3, %v4555_v37  ;;  %v8640_v23 = vrot.slane %v18399_v38, 3  ;;  %v18402_v37 = vld [vmem:[#allocation222_spill] sm:$0xff] }
 0x4c0   : > { %v9591_v15 = vadd.f32 %v12548_v20, %v16758_v6  ;;  %v12550_v24 = vadd.f32 %v12413_v2, %v16428_v53  ;;  %v8930_v52 = vpop.f32.mrb[11].mxu0  ;;  %v4559_v53 = vsel %vm4308_vm4, %v4554_v55, %v4558_v27  ;;  %v4568_v51 = vrot.slane %v18402_v37, 1  ;;  %v18403_v55 = vld [vmem:[#allocation221_spill] sm:$0xff] }
 0x4c1   : > { %v9589_v29 = vadd.f32 %v12549_v31, %v16758_v6  ;;  %v12551_v43 = vadd.f32 %v8930_v52, %v16432_v30  ;;  %v18400_v30 = vld [vmem:[#allocation217_spill] sm:$0xff]  ;;  %v4569_v32 = vrot.slane %v18403_v55, 2  ;;  %v8641_v48 = vsel %vm8516_vm8, %v8638_v5, %v8640_v23 }
 0x4c2   : > { %v9727_v46 = vmax.f32 %v9591_v15, 0.0  ;;  %v9592_v12 = vadd.f32 %v12550_v24, %v16758_v6  ;;  %12519 = vmatmul.mubr.msk.bf16.gmra.mrb[116].mxu0 %vm942_vm3, %v8637_v8  ;;  %v8642_v40 = vrot.slane %v18400_v30, 3  ;;  %v4566_v27 = vor.u32 %v4565_v14, %v4564_v45 }
 0x4c3   : > { %v9725_v60 = vmax.f32 %v9589_v29, 0.0  ;;  %v9590_v19 = vadd.f32 %v12551_v43, %v16758_v6  ;;  %12522 = vmatprep.mubr.msk.bf16.mxu0 %vm942_vm3, %v8639_v42  ;;  %v4570_v15 = vor.u32 %v4569_v32, %v4568_v51  ;;  %v18404_v29 = vshrl.u32 %v14959_v13, 16  ;;  %v18405_v43 = vld [vmem:[#allocation223_spill] sm:$0xff] }
 0x4c4   : > { %9864 = vst.msk [vmem:[%s16771_s15 + $0x50] sm:$0xff] %vm9853_vm9, %v9727_v46  ;;  %v9728_v50 = vmax.f32 %v9592_v12, 0.0  ;;  %v4575_v38 = vrot.slane %v18405_v43, 2  ;;  %v8646_v12 = vrot.slane %v18242_v17, 3 }
 0x4c5   : > { %9862 = vst.msk [vmem:[%s16771_s15 + $0x40] sm:$0xff] %vm9853_vm9, %v9725_v60  ;;  %v9726_v35 = vmax.f32 %v9590_v19, 0.0  ;;  %v12416_v39 = vpop.f32.mrb[12].mxu0  ;;  %v4571_v45 = vsel %vm4308_vm4, %v4566_v27, %v4570_v15  ;;  %v18407_v19 = vshll.u32 %v18242_v17, 16 }
 0x4c6   : > { %9865 = vst.msk [vmem:[%s16771_s15 + $0x58] sm:$0xff] %vm9853_vm9, %v9728_v50  ;;  %v12552_v59 = vadd.f32 %v12416_v39, %v16441_v36  ;;  %v8943_v26 = vpop.f32.mrb[13].mxu0  ;;  %11971 = vmatmul.mubr.msk.bf16.gmra.mrb[120].mxu1 %vm942_vm3, %v4559_v53  ;;  %v8643_v36 = vsel %vm8516_vm8, %v8640_v23, %v8642_v40 }
 0x4c7   : > { %9863 = vst.msk [vmem:[%s16771_s15 + $0x48] sm:$0xff] %vm9853_vm9, %v9726_v35  ;;  %v12553_v4 = vadd.f32 %v8943_v26, %v16444_v58  ;;  %v12417_v20 = vpop.f32.mrb[14].mxu0  ;;  %11974 = vmatprep.mubr.msk.bf16.mxu1 %vm942_vm3, %v4563_v54  ;;  %v8644_v58 = vrot.slane %v14959_v13, 3  ;;  %v18406_v13 = vshrl.u32 %v18242_v17, 16  ;;  %v4584_v30 = vrot.slane %v18407_v19, 2 }
 0x4c8   : > { %v9595_v31 = vadd.f32 %v12552_v59, %v16758_v6  ;;  %v12554_v2 = vadd.f32 %v12417_v20, %v16446_v21  ;;  %v8946_v8 = vpop.f32.mrb[15].mxu0  ;;  %v4574_v21 = vrot.slane %v18404_v29, 1 }
 0x4c9   : > { %v9593_v24 = vadd.f32 %v12553_v4, %v16758_v6  ;;  %v12555_v52 = vadd.f32 %v8946_v8, %v16450_v28  ;;  %v4567_v28 = vsel %vm4308_vm4, %v4562_v33, %v4566_v27  ;;  %v4581_v60 = vrot.slane %v18406_v13, 1 }
 0x4ca   : > { %v9731_v5 = vmax.f32 %v9595_v31, 0.0  ;;  %v9596_v42 = vadd.f32 %v12554_v2, %v16758_v6  ;;  %12523 = vmatmul.mubr.msk.bf16.gmra.mrb[120].mxu0 %vm942_vm3, %v8641_v48  ;;  %v4576_v54 = vor.u32 %v4575_v38, %v4574_v21  ;;  %v8645_v17 = vsel %vm8516_vm8, %v8642_v40, %v8644_v58 }
 0x4cb   : > { %v9729_v23 = vmax.f32 %v9593_v24, 0.0  ;;  %v9594_v46 = vadd.f32 %v12555_v52, %v16758_v6  ;;  %12526 = vmatprep.mubr.msk.bf16.mxu0 %vm942_vm3, %v8643_v36  ;;  %v4585_v39 = vor.u32 %v4584_v30, %v4581_v60  ;;  %v18408_v27 = vshrl.u32 %v15273_v0, 16 }
 0x4cc   : > { %9868 = vst.msk [vmem:[%s16771_s15 + $0x70] sm:$0xff] %vm9853_vm9, %v9731_v5  ;;  %v9732_v53 = vmax.f32 %v9596_v42, 0.0  ;;  %v4577_v40 = vsel %vm4308_vm4, %v4570_v15, %v4576_v54  ;;  %v8650_v15 = vrot.slane %v18246_v25, 3 }
 0x4cd   : > { %9866 = vst.msk [vmem:[%s16771_s15 + $0x60] sm:$0xff] %vm9853_vm9, %v9729_v23  ;;  %v9730_v22 = vmax.f32 %v9594_v46, 0.0  ;;  %v12420_v14 = vpop.f32.mrb[16].mxu0  ;;  %v4590_v31 = vrot.slane %v18408_v27, 1  ;;  %v4586_v36 = vsel %vm4308_vm4, %v4576_v54, %v4585_v39 }
 0x4ce   : > { %9869 = vst.msk [vmem:[%s16771_s15 + $0x78] sm:$0xff] %vm9853_vm9, %v9732_v53  ;;  %v12556_v33 = vadd.f32 %v12420_v14, %v16459_v61  ;;  %v8959_v50 = vpop.f32.mrb[17].mxu0  ;;  %11975 = vmatmul.mubr.msk.bf16.gmra.mrb[124].mxu1 %vm942_vm3, %v4567_v28  ;;  %v8647_v61 = vsel %vm8516_vm8, %v8644_v58, %v8646_v12 }
 0x4cf   : > { %9867 = vst.msk [vmem:[%s16771_s15 + $0x68] sm:$0xff] %vm9853_vm9, %v9730_v22  ;;  %v12557_v37 = vadd.f32 %v8959_v50, %v16462_v7  ;;  %v12421_v51 = vpop.f32.mrb[18].mxu0  ;;  %11978 = vmatprep.mubr.msk.bf16.mxu1 %vm942_vm3, %v4571_v45  ;;  %v8652_v45 = vrot.slane %v18248_v1, 3 }
 0x4d0   : > { %v9599_v55 = vadd.f32 %v12556_v33, %v16758_v6  ;;  %v12558_v32 = vadd.f32 %v12421_v51, %v16464_v9  ;;  %v8962_v35 = vpop.f32.mrb[19].mxu0  ;;  %v8648_v9 = vrot.slane %v15273_v0, 3 }
 0x4d1   : > { %v9597_v59 = vadd.f32 %v12557_v37, %v16758_v6  ;;  %v12559_v26 = vadd.f32 %v8962_v35, %v16468_v10  ;;  %v18409_v10 = vshll.u32 %v15273_v0, 16  ;;  %v8653_v14 = vsel %vm8516_vm8, %v8650_v15, %v8652_v45  ;;  %v18415_v45 = vld [vmem:[#allocation225_spill] sm:$0xff] }
 0x4d2   : > { %v9735_v7 = vmax.f32 %v9599_v55, 0.0  ;;  %v9600_v4 = vadd.f32 %v12558_v32, %v16758_v6  ;;  %12527 = vmatmul.mubr.msk.bf16.gmra.mrb[124].mxu0 %vm942_vm3, %v8645_v17  ;;  %v8649_v29 = vsel %vm8516_vm8, %v8646_v12, %v8648_v9  ;;  %v8651_v38 = vsel %vm8516_vm8, %v8648_v9, %v8650_v15 }
 0x4d3   : > { %v9733_v20 = vmax.f32 %v9597_v59, 0.0  ;;  %v9598_v48 = vadd.f32 %v12559_v26, %v16758_v6  ;;  %12530 = vmatprep.mubr.msk.bf16.mxu0 %vm942_vm3, %v8647_v61  ;;  %v4593_v2 = vrot.slane %v18409_v10, 2 }
 0x4d4   : > { %9872 = vst.msk [vmem:[%s16771_s15 + $0x90] sm:$0xff] %vm9853_vm9, %v9735_v7  ;;  %v9736_v8 = vmax.f32 %v9600_v4, 0.0 }
 0x4d5   : > { %9870 = vst.msk [vmem:[%s16771_s15 + $0x80] sm:$0xff] %vm9853_vm9, %v9733_v20  ;;  %v9734_v24 = vmax.f32 %v9598_v48, 0.0  ;;  %v12424_v52 = vpop.f32.mrb[20].mxu0  ;;  %v4594_v25 = vor.u32 %v4593_v2, %v4590_v31  ;;  %v18410_v2 = vld [vmem:[#allocation208_spill] sm:$0xff] }
 0x4d6   : > { %9873 = vst.msk [vmem:[%s16771_s15 + $0x98] sm:$0xff] %vm9853_vm9, %v9736_v8  ;;  %v12560_v58 = vadd.f32 %v12424_v52, %v16478_v62  ;;  %v8975_v5 = vpop.f32.mrb[21].mxu0  ;;  %11979 = vmatmul.mubr.msk.bf16.gmra.mrb[128].mxu1 %vm942_vm3, %v4577_v40 }
 0x4d7   : > { %9871 = vst.msk [vmem:[%s16771_s15 + $0x88] sm:$0xff] %vm9853_vm9, %v9734_v24  ;;  %v12561_v0 = vadd.f32 %v8975_v5, %v16481_v44  ;;  %v12425_v42 = vpop.f32.mrb[22].mxu0  ;;  %11982 = vmatprep.mubr.msk.bf16.mxu1 %vm942_vm3, %v4586_v36  ;;  %v18411_v24 = vld [vmem:[#allocation215_spill] sm:$0xff] }
 0x4d8   : > { %v9603_v21 = vadd.f32 %v12560_v58, %v16758_v6  ;;  %v12562_v43 = vadd.f32 %v12425_v42, %v16483_v49  ;;  %v8978_v62 = vpop.f32.mrb[23].mxu0  ;;  %v4595_v49 = vsel %vm4308_vm4, %v4585_v39, %v4594_v25 }
 0x4d9   : > { %v9601_v23 = vadd.f32 %v12561_v0, %v16758_v6  ;;  %v12563_v44 = vadd.f32 %v8978_v62, %v16487_v16  ;;  %v18412_v0 = vld [vmem:[#allocation216_spill] sm:$0xff] }
 0x4da   : > { %v9739_v46 = vmax.f32 %v9603_v21, 0.0  ;;  %v9604_v28 = vadd.f32 %v12562_v43, %v16758_v6  ;;  %12531 = vmatmul.mubr.msk.bf16.gmra.mrb[128].mxu0 %vm942_vm3, %v8649_v29 }
 0x4db   : > { %v9737_v12 = vmax.f32 %v9601_v23, 0.0  ;;  %v9602_v53 = vadd.f32 %v12563_v44, %v16758_v6  ;;  %12534 = vmatprep.mubr.msk.bf16.mxu0 %vm942_vm3, %v8651_v38  ;;  %v18413_v23 = vld [vmem:[#allocation2_spill] sm:$0xff] }
 0x4dc   : > { %9876 = vst.msk [vmem:[%s16771_s15 + $0xb0] sm:$0xff] %vm9853_vm9, %v9739_v46  ;;  %v9740_v13 = vmax.f32 %v9604_v28, 0.0  ;;  %v18414_v28 = vld [vmem:[#allocation224_spill] sm:$0xff] }
 0x4dd   : > { %9874 = vst.msk [vmem:[%s16771_s15 + $0xa0] sm:$0xff] %vm9853_vm9, %v9737_v12  ;;  %v9738_v16 = vmax.f32 %v9602_v53, 0.0  ;;  %v12428_v60 = vpop.f32.mrb[24].mxu0 }
 0x4de   : > { %9877 = vst.msk [vmem:[%s16771_s15 + $0xb8] sm:$0xff] %vm9853_vm9, %v9740_v13  ;;  %v12564_v19 = vadd.f32 %v12428_v60, %v16501_v3  ;;  %v8991_v30 = vpop.f32.mrb[25].mxu0  ;;  %11983 = vmatmul.mubr.msk.bf16.gmra.mrb[132].mxu1 %vm942_vm3, %v4595_v49 }
 0x4df   : > { %9875 = vst.msk [vmem:[%s16771_s15 + $0xa8] sm:$0xff] %vm9853_vm9, %v9738_v16  ;;  %v12565_v1 = vadd.f32 %v8991_v30, %v16504_v41  ;;  %v12429_v22 = vpop.f32.mrb[26].mxu0 }
 0x4e0   : > { %v9607_v33 = vadd.f32 %v12564_v19, %v16758_v6  ;;  %v12566_v50 = vadd.f32 %v12429_v22, %v16506_v56  ;;  %v8994_v54 = vpop.f32.mrb[27].mxu0  ;;  %v18416_v19 = vld [vmem:[#allocation226_spill] sm:$0xff] }
 0x4e1   : > { %v9605_v3 = vadd.f32 %v12565_v1, %v16758_v6  ;;  %v12567_v37 = vadd.f32 %v8994_v54, %v16513_v18 }
 0x4e2   : > { %v9743_v51 = vmax.f32 %v9607_v33, 0.0  ;;  %v9608_v17 = vadd.f32 %v12566_v50, %v16758_v6  ;;  %12535 = vmatmul.mubr.msk.bf16.gmra.mrb[132].mxu0 %vm942_vm3, %v8653_v14 }
 0x4e3   : > { %v9741_v41 = vmax.f32 %v9605_v3, 0.0  ;;  %v9606_v55 = vadd.f32 %v12567_v37, %v16758_v6  ;;  %v18417_v37 = vld [vmem:[#allocation227_spill] sm:$0xff] }
 0x4e4   : > { %9880 = vst.msk [vmem:[%s16771_s15 + $0xd0] sm:$0xff] %vm9853_vm9, %v9743_v51  ;;  %v9744_v32 = vmax.f32 %v9608_v17, 0.0 }
 0x4e5   : > { %9878 = vst.msk [vmem:[%s16771_s15 + $0xc0] sm:$0xff] %vm9853_vm9, %v9741_v41  ;;  %v9742_v56 = vmax.f32 %v9606_v55, 0.0  ;;  %v12432_v35 = vpop.f32.mrb[28].mxu0  ;;  %v18418_v41 = vld [vmem:[#allocation228_spill] sm:$0xff] }
 0x4e6   : > { %9881 = vst.msk [vmem:[%s16771_s15 + $0xd8] sm:$0xff] %vm9853_vm9, %v9744_v32  ;;  %v12568_v18 = vadd.f32 %v12432_v35, %v16524_v63  ;;  %v9007_v61 = vpop.f32.mrb[29].mxu0  ;;  %v18419_v35 = vld [vmem:[#allocation229_spill] sm:$0xff] }
 0x4e7   : > { %9879 = vst.msk [vmem:[%s16771_s15 + $0xc8] sm:$0xff] %vm9853_vm9, %v9742_v56  ;;  %v12569_v39 = vadd.f32 %v9007_v61, %v16527_v11  ;;  %v12433_v59 = vpop.f32.mrb[30].mxu0 }
 0x4e8   : > { %v9611_v26 = vadd.f32 %v12568_v18, %v16758_v6  ;;  %v12570_v7 = vadd.f32 %v12433_v59, %v16529_v57  ;;  %v9010_v4 = vpop.f32.mrb[31].mxu0  ;;  %v18420_v59 = vld [vmem:[#allocation230_spill] sm:$0xff] }
 0x4e9   : > { %v9609_v40 = vadd.f32 %v12569_v39, %v16758_v6  ;;  %v12571_v9 = vadd.f32 %v9010_v4, %v16536_v47 }
 0x4ea   : > { %v9747_v20 = vmax.f32 %v9611_v26, 0.0  ;;  %v9612_v63 = vadd.f32 %v12570_v7, %v16758_v6 }
 0x4eb   : > { %v9745_v48 = vmax.f32 %v9609_v40, 0.0  ;;  %v9610_v27 = vadd.f32 %v12571_v9, %v16758_v6 }
 0x4ec   : > { %9884 = vst.msk [vmem:[%s16771_s15 + $0xf0] sm:$0xff] %vm9853_vm9, %v9747_v20  ;;  %v9748_v11 = vmax.f32 %v9612_v63, 0.0 }
 0x4ed   : > { %9882 = vst.msk [vmem:[%s16771_s15 + $0xe0] sm:$0xff] %vm9853_vm9, %v9745_v48  ;;  %v9746_v31 = vmax.f32 %v9610_v27, 0.0  ;;  %v12436_v10 = vpop.f32.mrb[32].mxu0  ;;  %v18421_v27 = vld [vmem:[#allocation231_spill] sm:$0xff] }
 0x4ee   : > { %9885 = vst.msk [vmem:[%s16771_s15 + $0xf8] sm:$0xff] %vm9853_vm9, %v9748_v11  ;;  %v12572_v57 = vadd.f32 %v12436_v10, %v16546_v34  ;;  %v9023_v47 = vpop.f32.mrb[33].mxu0  ;;  %v18422_v10 = vld [vmem:[#allocation232_spill] sm:$0xff] }
 0x4ef   : > { %9883 = vst.msk [vmem:[%s16771_s15 + $0xe8] sm:$0xff] %vm9853_vm9, %v9746_v31  ;;  %v12573_v8 = vadd.f32 %v9023_v47, %v18410_v2  ;;  %v12437_v36 = vpop.f32.mrb[34].mxu0 }
 0x4f0   : > { %v9615_v15 = vadd.f32 %v12572_v57, %v16758_v6  ;;  %v12574_v52 = vadd.f32 %v12437_v36, %v18411_v24  ;;  %v9026_v58 = vpop.f32.mrb[35].mxu0 }
 0x4f1   : > { %v9613_v5 = vadd.f32 %v12573_v8, %v16758_v6  ;;  %v12575_v42 = vadd.f32 %v9026_v58, %v18412_v0  ;;  %v18423_v8 = vld [vmem:[#allocation233_spill] sm:$0xff] }
 0x4f2   : > { %v9751_v29 = vmax.f32 %v9615_v15, 0.0  ;;  %v9616_v34 = vadd.f32 %v12574_v52, %v16758_v6  ;;  %v18424_v52 = vld [vmem:[#allocation234_spill] sm:$0xff] }
 0x4f3   : > { %v9749_v25 = vmax.f32 %v9613_v5, 0.0  ;;  %v9614_v21 = vadd.f32 %v12575_v42, %v16758_v6 }
 0x4f4   : > { %9888 = vst.msk [vmem:[%s16771_s15 + $0x110] sm:$0xff] %vm9853_vm9, %v9751_v29  ;;  %v9752_v43 = vmax.f32 %v9616_v34, 0.0 }
 0x4f5   : > { %9886 = vst.msk [vmem:[%s16771_s15 + $0x100] sm:$0xff] %vm9853_vm9, %v9749_v25  ;;  %v9750_v62 = vmax.f32 %v9614_v21, 0.0  ;;  %v12440_v38 = vpop.f32.mrb[36].mxu0 }
 0x4f6   : > { %9889 = vst.msk [vmem:[%s16771_s15 + $0x118] sm:$0xff] %vm9853_vm9, %v9752_v43  ;;  %v12576_v44 = vadd.f32 %v12440_v38, %v18413_v23  ;;  %v9039_v46 = vpop.f32.mrb[37].mxu0  ;;  %v18425_v43 = vld [vmem:[#allocation235_spill] sm:$0xff]  ;;  %v18426_v23 = vld [vmem:[#allocation236_spill] sm:$0xff] }
 0x4f7   : > { %9887 = vst.msk [vmem:[%s16771_s15 + $0x108] sm:$0xff] %vm9853_vm9, %v9750_v62  ;;  %v12577_v12 = vadd.f32 %v9039_v46, %v18414_v28  ;;  %v12441_v53 = vpop.f32.mrb[38].mxu0 }
 0x4f8   : > { %v9619_v49 = vadd.f32 %v12576_v44, %v16758_v6  ;;  %v12578_v13 = vadd.f32 %v12441_v53, %v18415_v45  ;;  %v9042_v16 = vpop.f32.mrb[39].mxu0 }
 0x4f9   : > { %v9617_v60 = vadd.f32 %v12577_v12, %v16758_v6  ;;  %v12579_v30 = vadd.f32 %v9042_v16, %v18416_v19  ;;  %v18427_v12 = vld [vmem:[#allocation237_spill] sm:$0xff] }
 0x4fa   : > { %v9755_v1 = vmax.f32 %v9619_v49, 0.0  ;;  %v9620_v22 = vadd.f32 %v12578_v13, %v16758_v6  ;;  %v18428_v13 = vld [vmem:[#allocation238_spill] sm:$0xff] }
 0x4fb   : > { %v9753_v14 = vmax.f32 %v9617_v60, 0.0  ;;  %v9618_v33 = vadd.f32 %v12579_v30, %v16758_v6 }
 0x4fc   : > { %9892 = vst.msk [vmem:[%s16771_s15 + $0x130] sm:$0xff] %vm9853_vm9, %v9755_v1  ;;  %v9756_v50 = vmax.f32 %v9620_v22, 0.0 }
 0x4fd   : > { %9890 = vst.msk [vmem:[%s16771_s15 + $0x120] sm:$0xff] %vm9853_vm9, %v9753_v14  ;;  %v9754_v54 = vmax.f32 %v9618_v33, 0.0  ;;  %v12444_v3 = vpop.f32.mrb[40].mxu0 }
 0x4fe   : > { %9893 = vst.msk [vmem:[%s16771_s15 + $0x138] sm:$0xff] %vm9853_vm9, %v9756_v50  ;;  %v12580_v51 = vadd.f32 %v12444_v3, %v18417_v37  ;;  %v9055_v17 = vpop.f32.mrb[41].mxu0  ;;  %v18429_v50 = vld [vmem:[#allocation239_spill] sm:$0xff]  ;;  %v18430_v37 = vld [vmem:[#allocation240_spill] sm:$0xff] }
 0x4ff   : > { %9891 = vst.msk [vmem:[%s16771_s15 + $0x128] sm:$0xff] %vm9853_vm9, %v9754_v54  ;;  %v12581_v55 = vadd.f32 %v9055_v17, %v18418_v41  ;;  %v12445_v32 = vpop.f32.mrb[42].mxu0 }
 0x500   : > { %v9623_v56 = vadd.f32 %v12580_v51, %v16758_v6  ;;  %v12582_v18 = vadd.f32 %v12445_v32, %v18419_v35  ;;  %v9058_v61 = vpop.f32.mrb[43].mxu0 }
 0x501   : > { %v9621_v39 = vadd.f32 %v12581_v55, %v16758_v6  ;;  %v12583_v26 = vadd.f32 %v9058_v61, %v18420_v59  ;;  %v18431_v55 = vld [vmem:[#allocation241_spill] sm:$0xff] }
 0x502   : > { %v9759_v7 = vmax.f32 %v9623_v56, 0.0  ;;  %v9624_v4 = vadd.f32 %v12582_v18, %v16758_v6  ;;  %v18432_v18 = vld [vmem:[#allocation242_spill] sm:$0xff] }
 0x503   : > { %v9757_v40 = vmax.f32 %v9621_v39, 0.0  ;;  %v9622_v9 = vadd.f32 %v12583_v26, %v16758_v6 }
 0x504   : > { %9896 = vst.msk [vmem:[%s16771_s15 + $0x150] sm:$0xff] %vm9853_vm9, %v9759_v7  ;;  %v9760_v20 = vmax.f32 %v9624_v4, 0.0 }
 0x505   : > { %9894 = vst.msk [vmem:[%s16771_s15 + $0x140] sm:$0xff] %vm9853_vm9, %v9757_v40  ;;  %v9758_v63 = vmax.f32 %v9622_v9, 0.0  ;;  %v12448_v48 = vpop.f32.mrb[44].mxu0 }
 0x506   : > { %9897 = vst.msk [vmem:[%s16771_s15 + $0x158] sm:$0xff] %vm9853_vm9, %v9760_v20  ;;  %v12584_v11 = vadd.f32 %v12448_v48, %v18421_v27  ;;  %v9071_v31 = vpop.f32.mrb[45].mxu0  ;;  %v18433_v20 = vld [vmem:[#allocation243_spill] sm:$0xff]  ;;  %v18434_v27 = vld [vmem:[#allocation244_spill] sm:$0xff] }
 0x507   : > { %9895 = vst.msk [vmem:[%s16771_s15 + $0x148] sm:$0xff] %vm9853_vm9, %v9758_v63  ;;  %v12585_v57 = vadd.f32 %v9071_v31, %v18422_v10  ;;  %v12449_v47 = vpop.f32.mrb[46].mxu0 }
 0x508   : > { %v9627_v2 = vadd.f32 %v12584_v11, %v16758_v6  ;;  %v12586_v36 = vadd.f32 %v12449_v47, %v18423_v8  ;;  %v9074_v15 = vpop.f32.mrb[47].mxu0 }
 0x509   : > { %v9625_v24 = vadd.f32 %v12585_v57, %v16758_v6  ;;  %v12587_v58 = vadd.f32 %v9074_v15, %v18424_v52  ;;  %v18435_v57 = vld [vmem:[#allocation245_spill] sm:$0xff] }
 0x50a   : > { %v9763_v5 = vmax.f32 %v9627_v2, 0.0  ;;  %v9628_v0 = vadd.f32 %v12586_v36, %v16758_v6  ;;  %v18436_v36 = vld [vmem:[#allocation246_spill] sm:$0xff] }
 0x50b   : > { %v9761_v42 = vmax.f32 %v9625_v24, 0.0  ;;  %v9626_v29 = vadd.f32 %v12587_v58, %v16758_v6 }
 0x50c   : > { %9900 = vst.msk [vmem:[%s16771_s15 + $0x170] sm:$0xff] %vm9853_vm9, %v9763_v5  ;;  %v9764_v34 = vmax.f32 %v9628_v0, 0.0 }
 0x50d   : > { %9898 = vst.msk [vmem:[%s16771_s15 + $0x160] sm:$0xff] %vm9853_vm9, %v9761_v42  ;;  %v9762_v25 = vmax.f32 %v9626_v29, 0.0  ;;  %v12452_v21 = vpop.f32.mrb[48].mxu0 }
 0x50e   : > { %9901 = vst.msk [vmem:[%s16771_s15 + $0x178] sm:$0xff] %vm9853_vm9, %v9764_v34  ;;  %v12588_v62 = vadd.f32 %v12452_v21, %v18425_v43  ;;  %v9087_v38 = vpop.f32.mrb[49].mxu0  ;;  %v18437_v34 = vld [vmem:[#allocation247_spill] sm:$0xff]  ;;  %v18438_v43 = vld [vmem:[#allocation248_spill] sm:$0xff] }
 0x50f   : > { %9899 = vst.msk [vmem:[%s16771_s15 + $0x168] sm:$0xff] %vm9853_vm9, %v9762_v25  ;;  %v12589_v44 = vadd.f32 %v9087_v38, %v18426_v23  ;;  %v12453_v46 = vpop.f32.mrb[50].mxu0 }
 0x510   : > { %v9631_v28 = vadd.f32 %v12588_v62, %v16758_v6  ;;  %v12590_v53 = vadd.f32 %v12453_v46, %v18427_v12  ;;  %v9090_v49 = vpop.f32.mrb[51].mxu0 }
 0x511   : > { %v9629_v45 = vadd.f32 %v12589_v44, %v16758_v6  ;;  %v12591_v16 = vadd.f32 %v9090_v49, %v18428_v13  ;;  %v18439_v44 = vld [vmem:[#allocation249_spill] sm:$0xff] }
 0x512   : > { %v9767_v60 = vmax.f32 %v9631_v28, 0.0  ;;  %v9632_v19 = vadd.f32 %v12590_v53, %v16758_v6  ;;  %v18440_v53 = vld [vmem:[#allocation5_spill] sm:$0xff] }
 0x513   : > { %v9765_v30 = vmax.f32 %v9629_v45, 0.0  ;;  %v9630_v1 = vadd.f32 %v12591_v16, %v16758_v6 }
 0x514   : > { %9904 = vst.msk [vmem:[%s16771_s15 + $0x190] sm:$0xff] %vm9853_vm9, %v9767_v60  ;;  %v9768_v22 = vmax.f32 %v9632_v19, 0.0 }
 0x515   : > { %9902 = vst.msk [vmem:[%s16771_s15 + $0x180] sm:$0xff] %vm9853_vm9, %v9765_v30  ;;  %v9766_v14 = vmax.f32 %v9630_v1, 0.0  ;;  %v12456_v33 = vpop.f32.mrb[52].mxu0 }
 0x516   : > { %9905 = vst.msk [vmem:[%s16771_s15 + $0x198] sm:$0xff] %vm9853_vm9, %v9768_v22  ;;  %v12592_v54 = vadd.f32 %v12456_v33, %v18429_v50  ;;  %v9103_v3 = vpop.f32.mrb[53].mxu0  ;;  %v18441_v22 = vld [vmem:[#allocation4_spill] sm:$0xff]  ;;  %v18442_v50 = vld [vmem:[#allocation9_spill] sm:$0xff] }
 0x517   : > { %9903 = vst.msk [vmem:[%s16771_s15 + $0x188] sm:$0xff] %vm9853_vm9, %v9766_v14  ;;  %v12593_v51 = vadd.f32 %v9103_v3, %v18430_v37  ;;  %v12457_v17 = vpop.f32.mrb[54].mxu0 }
 0x518   : > { %v9635_v41 = vadd.f32 %v12592_v54, %v16758_v6  ;;  %v12594_v32 = vadd.f32 %v12457_v17, %v18431_v55  ;;  %v9106_v56 = vpop.f32.mrb[55].mxu0 }
 0x519   : > { %v9633_v35 = vadd.f32 %v12593_v51, %v16758_v6  ;;  %v12595_v61 = vadd.f32 %v9106_v56, %v18432_v18  ;;  %v18443_v51 = vld [vmem:[#allocation8_spill] sm:$0xff] }
 0x51a   : > { %v9771_v39 = vmax.f32 %v9635_v41, 0.0  ;;  %v9636_v59 = vadd.f32 %v12594_v32, %v16758_v6  ;;  %v18444_v32 = vld [vmem:[#allocation11_spill] sm:$0xff] }
 0x51b   : > { %v9769_v26 = vmax.f32 %v9633_v35, 0.0  ;;  %v9634_v7 = vadd.f32 %v12595_v61, %v16758_v6 }
 0x51c   : > { %9908 = vst.msk [vmem:[%s16771_s15 + $0x1b0] sm:$0xff] %vm9853_vm9, %v9771_v39  ;;  %v9772_v4 = vmax.f32 %v9636_v59, 0.0 }
 0x51d   : > { %9906 = vst.msk [vmem:[%s16771_s15 + $0x1a0] sm:$0xff] %vm9853_vm9, %v9769_v26  ;;  %v9770_v40 = vmax.f32 %v9634_v7, 0.0  ;;  %v12460_v9 = vpop.f32.mrb[56].mxu0 }
 0x51e   : > { %9909 = vst.msk [vmem:[%s16771_s15 + $0x1b8] sm:$0xff] %vm9853_vm9, %v9772_v4  ;;  %v12596_v63 = vadd.f32 %v12460_v9, %v18433_v20  ;;  %v9119_v48 = vpop.f32.mrb[57].mxu0 }
 0x51f   : > { %9907 = vst.msk [vmem:[%s16771_s15 + $0x1a8] sm:$0xff] %vm9853_vm9, %v9770_v40  ;;  %v12597_v11 = vadd.f32 %v9119_v48, %v18434_v27  ;;  %v12461_v31 = vpop.f32.mrb[58].mxu0 }
 0x520   : > { %v9639_v10 = vadd.f32 %v12596_v63, %v16758_v6  ;;  %v12598_v47 = vadd.f32 %v12461_v31, %v18435_v57  ;;  %v9122_v2 = vpop.f32.mrb[59].mxu0 }
 0x521   : > { %v9637_v8 = vadd.f32 %v12597_v11, %v16758_v6  ;;  %v12599_v15 = vadd.f32 %v9122_v2, %v18436_v36 }
 0x522   : > { %v9775_v24 = vmax.f32 %v9639_v10, 0.0  ;;  %v9640_v52 = vadd.f32 %v12598_v47, %v16758_v6 }
 0x523   : > { %v9773_v58 = vmax.f32 %v9637_v8, 0.0  ;;  %v9638_v5 = vadd.f32 %v12599_v15, %v16758_v6 }
 0x524   : > { %9912 = vst.msk [vmem:[%s16771_s15 + $0x1d0] sm:$0xff] %vm9853_vm9, %v9775_v24  ;;  %v9776_v0 = vmax.f32 %v9640_v52, 0.0 }
 0x525   : > { %9910 = vst.msk [vmem:[%s16771_s15 + $0x1c0] sm:$0xff] %vm9853_vm9, %v9773_v58  ;;  %v9774_v42 = vmax.f32 %v9638_v5, 0.0  ;;  %v12464_v29 = vpop.f32.mrb[60].mxu0 }
 0x526   : > { %9913 = vst.msk [vmem:[%s16771_s15 + $0x1d8] sm:$0xff] %vm9853_vm9, %v9776_v0  ;;  %v12600_v25 = vadd.f32 %v12464_v29, %v18437_v34  ;;  %v9135_v21 = vpop.f32.mrb[61].mxu0 }
 0x527   : > { %9911 = vst.msk [vmem:[%s16771_s15 + $0x1c8] sm:$0xff] %vm9853_vm9, %v9774_v42  ;;  %v12601_v62 = vadd.f32 %v9135_v21, %v18438_v43  ;;  %v12465_v38 = vpop.f32.mrb[62].mxu0 }
 0x528   : > { %v9643_v23 = vadd.f32 %v12600_v25, %v16758_v6  ;;  %v12602_v46 = vadd.f32 %v12465_v38, %v18439_v44  ;;  %v9138_v28 = vpop.f32.mrb[63].mxu0 }
 0x529   : > { %v9641_v12 = vadd.f32 %v12601_v62, %v16758_v6  ;;  %v12603_v49 = vadd.f32 %v9138_v28, %v18440_v53 }
 0x52a   : > { %v9779_v45 = vmax.f32 %v9643_v23, 0.0  ;;  %v9644_v13 = vadd.f32 %v12602_v46, %v16758_v6 }
 0x52b   : > { %v9777_v16 = vmax.f32 %v9641_v12, 0.0  ;;  %v9642_v60 = vadd.f32 %v12603_v49, %v16758_v6 }
 0x52c   : > { %9916 = vst.msk [vmem:[%s16771_s15 + $0x1f0] sm:$0xff] %vm9853_vm9, %v9779_v45  ;;  %v9780_v19 = vmax.f32 %v9644_v13, 0.0 }
 0x52d   : > { %9914 = vst.msk [vmem:[%s16771_s15 + $0x1e0] sm:$0xff] %vm9853_vm9, %v9777_v16  ;;  %v9778_v30 = vmax.f32 %v9642_v60, 0.0  ;;  %v12468_v1 = vpop.f32.mrb[64].mxu0 }
 0x52e   : > { %9917 = vst.msk [vmem:[%s16771_s15 + $0x1f8] sm:$0xff] %vm9853_vm9, %v9780_v19  ;;  %v12604_v14 = vadd.f32 %v12468_v1, %v18441_v22  ;;  %v9151_v33 = vpop.f32.mrb[65].mxu0 }
 0x52f   : > { %9915 = vst.msk [vmem:[%s16771_s15 + $0x1e8] sm:$0xff] %vm9853_vm9, %v9778_v30  ;;  %v12605_v54 = vadd.f32 %v9151_v33, %v18442_v50  ;;  %v12469_v3 = vpop.f32.mrb[66].mxu0 }
 0x530   : > { %v9647_v37 = vadd.f32 %v12604_v14, %v16758_v6  ;;  %v12606_v17 = vadd.f32 %v12469_v3, %v18443_v51  ;;  %v9154_v41 = vpop.f32.mrb[67].mxu0 }
 0x531   : > { %v9645_v55 = vadd.f32 %v12605_v54, %v16758_v6  ;;  %v12607_v56 = vadd.f32 %v9154_v41, %v18444_v32  ;;  %v11920_v35 = vpop.f32.mrb[68].mxu1 }
 0x532   : > { %v9783_v18 = vmax.f32 %v9647_v37, 0.0  ;;  %v9648_v61 = vadd.f32 %v12606_v17, %v16758_v6  ;;  %v5109_v39 = vpop.f32.mrb[69].mxu1 }
 0x533   : > { %v9781_v59 = vmax.f32 %v9645_v55, 0.0  ;;  %v9646_v26 = vadd.f32 %v12607_v56, %v16758_v6  ;;  %v11921_v7 = vpop.f32.mrb[70].mxu1 }
 0x534   : > { %9920 = vst.msk [vmem:[%s16771_s15 + $0x210] sm:$0xff] %vm9853_vm9, %v9783_v18  ;;  %v9784_v4 = vmax.f32 %v9648_v61, 0.0  ;;  %v5112_v40 = vpop.f32.mrb[71].mxu1 }
 0x535   : > { %9918 = vst.msk [vmem:[%s16771_s15 + $0x200] sm:$0xff] %vm9853_vm9, %v9781_v59  ;;  %v9782_v9 = vmax.f32 %v9646_v26, 0.0  ;;  %v12472_v20 = vpop.f32.mrb[68].mxu0 }
 0x536   : > { %9921 = vst.msk [vmem:[%s16771_s15 + $0x218] sm:$0xff] %vm9853_vm9, %v9784_v4  ;;  %v12608_v63 = vadd.f32 %v12472_v20, %v11920_v35  ;;  %v9167_v48 = vpop.f32.mrb[69].mxu0 }
 0x537   : > { %9919 = vst.msk [vmem:[%s16771_s15 + $0x208] sm:$0xff] %vm9853_vm9, %v9782_v9  ;;  %v12609_v27 = vadd.f32 %v9167_v48, %v5109_v39  ;;  %v12473_v11 = vpop.f32.mrb[70].mxu0 }
 0x538   : > { %v9651_v31 = vadd.f32 %v12608_v63, %v16758_v6  ;;  %v12610_v10 = vadd.f32 %v12473_v11, %v11921_v7  ;;  %v9170_v57 = vpop.f32.mrb[71].mxu0 }
 0x539   : > { %v9649_v47 = vadd.f32 %v12609_v27, %v16758_v6  ;;  %v12611_v2 = vadd.f32 %v9170_v57, %v5112_v40  ;;  %v11924_v8 = vpop.f32.mrb[72].mxu1 }
 0x53a   : > { %v9787_v36 = vmax.f32 %v9651_v31, 0.0  ;;  %v9652_v15 = vadd.f32 %v12610_v10, %v16758_v6  ;;  %v5125_v24 = vpop.f32.mrb[73].mxu1 }
 0x53b   : > { %v9785_v52 = vmax.f32 %v9649_v47, 0.0  ;;  %v9650_v58 = vadd.f32 %v12611_v2, %v16758_v6  ;;  %v11925_v5 = vpop.f32.mrb[74].mxu1 }
 0x53c   : > { %9924 = vst.msk [vmem:[%s16771_s15 + $0x230] sm:$0xff] %vm9853_vm9, %v9787_v36  ;;  %v9788_v0 = vmax.f32 %v9652_v15, 0.0  ;;  %v5128_v42 = vpop.f32.mrb[75].mxu1 }
 0x53d   : > { %9922 = vst.msk [vmem:[%s16771_s15 + $0x220] sm:$0xff] %vm9853_vm9, %v9785_v52  ;;  %v9786_v29 = vmax.f32 %v9650_v58, 0.0  ;;  %v12476_v34 = vpop.f32.mrb[72].mxu0 }
 0x53e   : > { %9925 = vst.msk [vmem:[%s16771_s15 + $0x238] sm:$0xff] %vm9853_vm9, %v9788_v0  ;;  %v12612_v25 = vadd.f32 %v12476_v34, %v11924_v8  ;;  %v9183_v21 = vpop.f32.mrb[73].mxu0 }
 0x53f   : > { %9923 = vst.msk [vmem:[%s16771_s15 + $0x228] sm:$0xff] %vm9853_vm9, %v9786_v29  ;;  %v12613_v43 = vadd.f32 %v9183_v21, %v5125_v24  ;;  %v12477_v62 = vpop.f32.mrb[74].mxu0 }
 0x540   : > { %v9655_v38 = vadd.f32 %v12612_v25, %v16758_v6  ;;  %v12614_v23 = vadd.f32 %v12477_v62, %v11925_v5  ;;  %v9186_v44 = vpop.f32.mrb[75].mxu0 }
 0x541   : > { %v9653_v46 = vadd.f32 %v12613_v43, %v16758_v6  ;;  %v12615_v28 = vadd.f32 %v9186_v44, %v5128_v42  ;;  %v11928_v12 = vpop.f32.mrb[76].mxu1 }
 0x542   : > { %v9791_v53 = vmax.f32 %v9655_v38, 0.0  ;;  %v9656_v49 = vadd.f32 %v12614_v23, %v16758_v6  ;;  %v5141_v45 = vpop.f32.mrb[77].mxu1 }
 0x543   : > { %v9789_v13 = vmax.f32 %v9653_v46, 0.0  ;;  %v9654_v16 = vadd.f32 %v12615_v28, %v16758_v6  ;;  %v11929_v60 = vpop.f32.mrb[78].mxu1 }
 0x544   : > { %9928 = vst.msk [vmem:[%s16771_s15 + $0x250] sm:$0xff] %vm9853_vm9, %v9791_v53  ;;  %v9792_v19 = vmax.f32 %v9656_v49, 0.0  ;;  %v5144_v30 = vpop.f32.mrb[79].mxu1 }
 0x545   : > { %9926 = vst.msk [vmem:[%s16771_s15 + $0x240] sm:$0xff] %vm9853_vm9, %v9789_v13  ;;  %v9790_v1 = vmax.f32 %v9654_v16, 0.0  ;;  %v12480_v22 = vpop.f32.mrb[76].mxu0 }
 0x546   : > { %9929 = vst.msk [vmem:[%s16771_s15 + $0x258] sm:$0xff] %vm9853_vm9, %v9792_v19  ;;  %v12616_v14 = vadd.f32 %v12480_v22, %v11928_v12  ;;  %v9199_v33 = vpop.f32.mrb[77].mxu0 }
 0x547   : > { %9927 = vst.msk [vmem:[%s16771_s15 + $0x248] sm:$0xff] %vm9853_vm9, %v9790_v1  ;;  %v12617_v50 = vadd.f32 %v9199_v33, %v5141_v45  ;;  %v12481_v54 = vpop.f32.mrb[78].mxu0 }
 0x548   : > { %v9659_v3 = vadd.f32 %v12616_v14, %v16758_v6  ;;  %v12618_v37 = vadd.f32 %v12481_v54, %v11929_v60  ;;  %v9202_v51 = vpop.f32.mrb[79].mxu0 }
 0x549   : > { %v9657_v17 = vadd.f32 %v12617_v50, %v16758_v6  ;;  %v12619_v41 = vadd.f32 %v9202_v51, %v5144_v30  ;;  %v11932_v55 = vpop.f32.mrb[80].mxu1 }
 0x54a   : > { %v9795_v32 = vmax.f32 %v9659_v3, 0.0  ;;  %v9660_v56 = vadd.f32 %v12618_v37, %v16758_v6  ;;  %v5157_v35 = vpop.f32.mrb[81].mxu1 }
 0x54b   : > { %v9793_v18 = vmax.f32 %v9657_v17, 0.0  ;;  %v9658_v61 = vadd.f32 %v12619_v41, %v16758_v6  ;;  %v11933_v39 = vpop.f32.mrb[82].mxu1  ;;  %v17160_v6 = vld [vmem:[%s17335_s2] ss:$0 sm:$0xff] }
 0x54c   : > { %9932 = vst.msk [vmem:[%s16771_s15 + $0x270] sm:$0xff] %vm9853_vm9, %v9795_v32  ;;  %v9796_v59 = vmax.f32 %v9660_v56, 0.0  ;;  %v5160_v26 = vpop.f32.mrb[83].mxu1 }
 0x54d   : > { %9930 = vst.msk [vmem:[%s16771_s15 + $0x260] sm:$0xff] %vm9853_vm9, %v9793_v18  ;;  %v9794_v7 = vmax.f32 %v9658_v61, 0.0  ;;  %v12484_v4 = vpop.f32.mrb[80].mxu0 }
 0x54e   : > { %9933 = vst.msk [vmem:[%s16771_s15 + $0x278] sm:$0xff] %vm9853_vm9, %v9796_v59  ;;  %v12620_v40 = vadd.f32 %v12484_v4, %v11932_v55  ;;  %v9215_v9 = vpop.f32.mrb[81].mxu0 }
 0x54f   : > { %9931 = vst.msk [vmem:[%s16771_s15 + $0x268] sm:$0xff] %vm9853_vm9, %v9794_v7  ;;  %v12621_v20 = vadd.f32 %v9215_v9, %v5157_v35  ;;  %v12485_v63 = vpop.f32.mrb[82].mxu0 }
 0x550   : > { %v9663_v48 = vadd.f32 %v17160_v6, %v12620_v40  ;;  %v12622_v27 = vadd.f32 %v12485_v63, %v11933_v39  ;;  %v9218_v11 = vpop.f32.mrb[83].mxu0 }
 0x551   : > { %v9661_v31 = vadd.f32 %v17160_v6, %v12621_v20  ;;  %v12623_v10 = vadd.f32 %v9218_v11, %v5160_v26  ;;  %v11936_v57 = vpop.f32.mrb[84].mxu1 }
 0x552   : > { %v9799_v47 = vmax.f32 %v9663_v48, 0.0  ;;  %v9664_v2 = vadd.f32 %v17160_v6, %v12622_v27  ;;  %v5173_v8 = vpop.f32.mrb[85].mxu1 }
 0x553   : > { %v9797_v36 = vmax.f32 %v9661_v31, 0.0  ;;  %v9662_v15 = vadd.f32 %v17160_v6, %v12623_v10  ;;  %v11937_v24 = vpop.f32.mrb[86].mxu1 }
 0x554   : > { %9936 = vst.msk [vmem:[%s16771_s15 + $0x290] sm:$0xff] %vm9853_vm9, %v9799_v47  ;;  %v9800_v52 = vmax.f32 %v9664_v2, 0.0  ;;  %v5176_v58 = vpop.f32.mrb[87].mxu1 }
 0x555   : > { %9934 = vst.msk [vmem:[%s16771_s15 + $0x280] sm:$0xff] %vm9853_vm9, %v9797_v36  ;;  %v9798_v5 = vmax.f32 %v9662_v15, 0.0  ;;  %v12488_v0 = vpop.f32.mrb[84].mxu0 }
 0x556   : > { %9937 = vst.msk [vmem:[%s16771_s15 + $0x298] sm:$0xff] %vm9853_vm9, %v9800_v52  ;;  %v12624_v42 = vadd.f32 %v12488_v0, %v11936_v57  ;;  %v9231_v29 = vpop.f32.mrb[85].mxu0 }
 0x557   : > { %9935 = vst.msk [vmem:[%s16771_s15 + $0x288] sm:$0xff] %vm9853_vm9, %v9798_v5  ;;  %v12625_v34 = vadd.f32 %v9231_v29, %v5173_v8  ;;  %v12489_v25 = vpop.f32.mrb[86].mxu0 }
 0x558   : > { %v9667_v21 = vadd.f32 %v17160_v6, %v12624_v42  ;;  %v12626_v43 = vadd.f32 %v12489_v25, %v11937_v24  ;;  %v9234_v62 = vpop.f32.mrb[87].mxu0 }
 0x559   : > { %v9665_v38 = vadd.f32 %v17160_v6, %v12625_v34  ;;  %v12627_v23 = vadd.f32 %v9234_v62, %v5176_v58  ;;  %v11940_v44 = vpop.f32.mrb[88].mxu1 }
 0x55a   : > { %v9803_v46 = vmax.f32 %v9667_v21, 0.0  ;;  %v9668_v28 = vadd.f32 %v17160_v6, %v12626_v43  ;;  %v5189_v12 = vpop.f32.mrb[89].mxu1 }
 0x55b   : > { %v9801_v53 = vmax.f32 %v9665_v38, 0.0  ;;  %v9666_v49 = vadd.f32 %v17160_v6, %v12627_v23  ;;  %v11941_v45 = vpop.f32.mrb[90].mxu1 }
 0x55c   : > { %9940 = vst.msk [vmem:[%s16771_s15 + $0x2b0] sm:$0xff] %vm9853_vm9, %v9803_v46  ;;  %v9804_v13 = vmax.f32 %v9668_v28, 0.0  ;;  %v5192_v16 = vpop.f32.mrb[91].mxu1 }
 0x55d   : > { %9938 = vst.msk [vmem:[%s16771_s15 + $0x2a0] sm:$0xff] %vm9853_vm9, %v9801_v53  ;;  %v9802_v60 = vmax.f32 %v9666_v49, 0.0  ;;  %v12492_v19 = vpop.f32.mrb[88].mxu0 }
 0x55e   : > { %9941 = vst.msk [vmem:[%s16771_s15 + $0x2b8] sm:$0xff] %vm9853_vm9, %v9804_v13  ;;  %v12628_v30 = vadd.f32 %v12492_v19, %v11940_v44  ;;  %v9247_v1 = vpop.f32.mrb[89].mxu0 }
 0x55f   : > { %9939 = vst.msk [vmem:[%s16771_s15 + $0x2a8] sm:$0xff] %vm9853_vm9, %v9802_v60  ;;  %v12629_v22 = vadd.f32 %v9247_v1, %v5189_v12  ;;  %v12493_v14 = vpop.f32.mrb[90].mxu0 }
 0x560   : > { %v9671_v33 = vadd.f32 %v17160_v6, %v12628_v30  ;;  %v12630_v50 = vadd.f32 %v12493_v14, %v11941_v45  ;;  %v9250_v54 = vpop.f32.mrb[91].mxu0 }
 0x561   : > { %v9669_v3 = vadd.f32 %v17160_v6, %v12629_v22  ;;  %v12631_v37 = vadd.f32 %v9250_v54, %v5192_v16  ;;  %v11944_v51 = vpop.f32.mrb[92].mxu1 }
 0x562   : > { %v9807_v17 = vmax.f32 %v9671_v33, 0.0  ;;  %v9672_v41 = vadd.f32 %v17160_v6, %v12630_v50  ;;  %v5205_v55 = vpop.f32.mrb[93].mxu1 }
 0x563   : > { %v9805_v32 = vmax.f32 %v9669_v3, 0.0  ;;  %v9670_v56 = vadd.f32 %v17160_v6, %v12631_v37  ;;  %v11945_v35 = vpop.f32.mrb[94].mxu1 }
 0x564   : > { %9944 = vst.msk [vmem:[%s16771_s15 + $0x2d0] sm:$0xff] %vm9853_vm9, %v9807_v17  ;;  %v9808_v18 = vmax.f32 %v9672_v41, 0.0  ;;  %v5208_v61 = vpop.f32.mrb[95].mxu1 }
 0x565   : > { %9942 = vst.msk [vmem:[%s16771_s15 + $0x2c0] sm:$0xff] %vm9853_vm9, %v9805_v32  ;;  %v9806_v39 = vmax.f32 %v9670_v56, 0.0  ;;  %v12496_v59 = vpop.f32.mrb[92].mxu0 }
 0x566   : > { %9945 = vst.msk [vmem:[%s16771_s15 + $0x2d8] sm:$0xff] %vm9853_vm9, %v9808_v18  ;;  %v12632_v26 = vadd.f32 %v12496_v59, %v11944_v51  ;;  %v9263_v7 = vpop.f32.mrb[93].mxu0 }
 0x567   : > { %9943 = vst.msk [vmem:[%s16771_s15 + $0x2c8] sm:$0xff] %vm9853_vm9, %v9806_v39  ;;  %v12633_v4 = vadd.f32 %v9263_v7, %v5205_v55  ;;  %v12497_v40 = vpop.f32.mrb[94].mxu0 }
 0x568   : > { %v9675_v9 = vadd.f32 %v17160_v6, %v12632_v26  ;;  %v12634_v20 = vadd.f32 %v12497_v40, %v11945_v35  ;;  %v9266_v63 = vpop.f32.mrb[95].mxu0 }
 0x569   : > { %v9673_v48 = vadd.f32 %v17160_v6, %v12633_v4  ;;  %v12635_v27 = vadd.f32 %v9266_v63, %v5208_v61  ;;  %v11948_v11 = vpop.f32.mrb[96].mxu1 }
 0x56a   : > { %v9811_v31 = vmax.f32 %v9675_v9, 0.0  ;;  %v9676_v10 = vadd.f32 %v17160_v6, %v12634_v20  ;;  %v5221_v57 = vpop.f32.mrb[97].mxu1 }
 0x56b   : > { %v9809_v47 = vmax.f32 %v9673_v48, 0.0  ;;  %v9674_v2 = vadd.f32 %v17160_v6, %v12635_v27  ;;  %v11949_v8 = vpop.f32.mrb[98].mxu1 }
 0x56c   : > { %9948 = vst.msk [vmem:[%s16771_s15 + $0x2f0] sm:$0xff] %vm9853_vm9, %v9811_v31  ;;  %v9812_v36 = vmax.f32 %v9676_v10, 0.0  ;;  %v5224_v15 = vpop.f32.mrb[99].mxu1 }
 0x56d   : > { %9946 = vst.msk [vmem:[%s16771_s15 + $0x2e0] sm:$0xff] %vm9853_vm9, %v9809_v47  ;;  %v9810_v24 = vmax.f32 %v9674_v2, 0.0  ;;  %v12500_v52 = vpop.f32.mrb[96].mxu0 }
 0x56e   : > { %9949 = vst.msk [vmem:[%s16771_s15 + $0x2f8] sm:$0xff] %vm9853_vm9, %v9812_v36  ;;  %v12636_v58 = vadd.f32 %v12500_v52, %v11948_v11  ;;  %v9279_v5 = vpop.f32.mrb[97].mxu0 }
 0x56f   : > { %9947 = vst.msk [vmem:[%s16771_s15 + $0x2e8] sm:$0xff] %vm9853_vm9, %v9810_v24  ;;  %v12637_v0 = vadd.f32 %v9279_v5, %v5221_v57  ;;  %v12501_v42 = vpop.f32.mrb[98].mxu0 }
 0x570   : > { %v9679_v29 = vadd.f32 %v17160_v6, %v12636_v58  ;;  %v12638_v34 = vadd.f32 %v12501_v42, %v11949_v8  ;;  %v9282_v25 = vpop.f32.mrb[99].mxu0 }
 0x571   : > { %v9677_v21 = vadd.f32 %v17160_v6, %v12637_v0  ;;  %v12639_v43 = vadd.f32 %v9282_v25, %v5224_v15  ;;  %v11952_v62 = vpop.f32.mrb[100].mxu1 }
 0x572   : > { %v9815_v38 = vmax.f32 %v9679_v29, 0.0  ;;  %v9680_v23 = vadd.f32 %v17160_v6, %v12638_v34  ;;  %v5237_v44 = vpop.f32.mrb[101].mxu1 }
 0x573   : > { %v9813_v46 = vmax.f32 %v9677_v21, 0.0  ;;  %v9678_v28 = vadd.f32 %v17160_v6, %v12639_v43  ;;  %v11953_v12 = vpop.f32.mrb[102].mxu1 }
 0x574   : > { %9952 = vst.msk [vmem:[%s16771_s15 + $0x310] sm:$0xff] %vm9853_vm9, %v9815_v38  ;;  %v9816_v53 = vmax.f32 %v9680_v23, 0.0  ;;  %v5240_v49 = vpop.f32.mrb[103].mxu1 }
 0x575   : > { %9950 = vst.msk [vmem:[%s16771_s15 + $0x300] sm:$0xff] %vm9853_vm9, %v9813_v46  ;;  %v9814_v45 = vmax.f32 %v9678_v28, 0.0  ;;  %v12504_v13 = vpop.f32.mrb[100].mxu0 }
 0x576   : > { %9953 = vst.msk [vmem:[%s16771_s15 + $0x318] sm:$0xff] %vm9853_vm9, %v9816_v53  ;;  %v12640_v16 = vadd.f32 %v12504_v13, %v11952_v62  ;;  %v9295_v60 = vpop.f32.mrb[101].mxu0 }
 0x577   : > { %9951 = vst.msk [vmem:[%s16771_s15 + $0x308] sm:$0xff] %vm9853_vm9, %v9814_v45  ;;  %v12641_v19 = vadd.f32 %v9295_v60, %v5237_v44  ;;  %v12505_v30 = vpop.f32.mrb[102].mxu0 }
 0x578   : > { %v9683_v1 = vadd.f32 %v17160_v6, %v12640_v16  ;;  %v12642_v22 = vadd.f32 %v12505_v30, %v11953_v12  ;;  %v9298_v14 = vpop.f32.mrb[103].mxu0 }
 0x579   : > { %v9681_v33 = vadd.f32 %v17160_v6, %v12641_v19  ;;  %v12643_v50 = vadd.f32 %v9298_v14, %v5240_v49  ;;  %v11956_v54 = vpop.f32.mrb[104].mxu1 }
 0x57a   : > { %v9819_v3 = vmax.f32 %v9683_v1, 0.0  ;;  %v9684_v37 = vadd.f32 %v17160_v6, %v12642_v22  ;;  %v5253_v51 = vpop.f32.mrb[105].mxu1 }
 0x57b   : > { %v9817_v17 = vmax.f32 %v9681_v33, 0.0  ;;  %v9682_v41 = vadd.f32 %v17160_v6, %v12643_v50  ;;  %v11957_v55 = vpop.f32.mrb[106].mxu1 }
 0x57c   : > { %9956 = vst.msk [vmem:[%s16771_s15 + $0x330] sm:$0xff] %vm9853_vm9, %v9819_v3  ;;  %v9820_v32 = vmax.f32 %v9684_v37, 0.0  ;;  %v5256_v56 = vpop.f32.mrb[107].mxu1 }
 0x57d   : > { %9954 = vst.msk [vmem:[%s16771_s15 + $0x320] sm:$0xff] %vm9853_vm9, %v9817_v17  ;;  %v9818_v35 = vmax.f32 %v9682_v41, 0.0  ;;  %v12508_v18 = vpop.f32.mrb[104].mxu0 }
 0x57e   : > { %9957 = vst.msk [vmem:[%s16771_s15 + $0x338] sm:$0xff] %vm9853_vm9, %v9820_v32  ;;  %v12644_v61 = vadd.f32 %v12508_v18, %v11956_v54  ;;  %v9311_v39 = vpop.f32.mrb[105].mxu0 }
 0x57f   : > { %9955 = vst.msk [vmem:[%s16771_s15 + $0x328] sm:$0xff] %vm9853_vm9, %v9818_v35  ;;  %v12645_v59 = vadd.f32 %v9311_v39, %v5253_v51  ;;  %v12509_v26 = vpop.f32.mrb[106].mxu0 }
 0x580   : > { %v9687_v7 = vadd.f32 %v17160_v6, %v12644_v61  ;;  %v12646_v4 = vadd.f32 %v12509_v26, %v11957_v55  ;;  %v9314_v40 = vpop.f32.mrb[107].mxu0 }
 0x581   : > { %v9685_v9 = vadd.f32 %v17160_v6, %v12645_v59  ;;  %v12647_v20 = vadd.f32 %v9314_v40, %v5256_v56  ;;  %v11960_v63 = vpop.f32.mrb[108].mxu1 }
 0x582   : > { %v9823_v48 = vmax.f32 %v9687_v7, 0.0  ;;  %v9688_v27 = vadd.f32 %v17160_v6, %v12646_v4  ;;  %v5269_v11 = vpop.f32.mrb[109].mxu1 }
 0x583   : > { %v9821_v31 = vmax.f32 %v9685_v9, 0.0  ;;  %v9686_v10 = vadd.f32 %v17160_v6, %v12647_v20  ;;  %v11961_v57 = vpop.f32.mrb[110].mxu1 }
 0x584   : > { %9960 = vst.msk [vmem:[%s16771_s15 + $0x350] sm:$0xff] %vm9853_vm9, %v9823_v48  ;;  %v9824_v47 = vmax.f32 %v9688_v27, 0.0  ;;  %v5272_v2 = vpop.f32.mrb[111].mxu1 }
 0x585   : > { %9958 = vst.msk [vmem:[%s16771_s15 + $0x340] sm:$0xff] %vm9853_vm9, %v9821_v31  ;;  %v9822_v8 = vmax.f32 %v9686_v10, 0.0  ;;  %v12512_v36 = vpop.f32.mrb[108].mxu0 }
 0x586   : > { %9961 = vst.msk [vmem:[%s16771_s15 + $0x358] sm:$0xff] %vm9853_vm9, %v9824_v47  ;;  %v12648_v15 = vadd.f32 %v12512_v36, %v11960_v63  ;;  %v9327_v24 = vpop.f32.mrb[109].mxu0 }
 0x587   : > { %9959 = vst.msk [vmem:[%s16771_s15 + $0x348] sm:$0xff] %vm9853_vm9, %v9822_v8  ;;  %v12649_v52 = vadd.f32 %v9327_v24, %v5269_v11  ;;  %v12513_v58 = vpop.f32.mrb[110].mxu0 }
 0x588   : > { %v9691_v5 = vadd.f32 %v17160_v6, %v12648_v15  ;;  %v12650_v0 = vadd.f32 %v12513_v58, %v11961_v57  ;;  %v9330_v42 = vpop.f32.mrb[111].mxu0 }
 0x589   : > { %v9689_v29 = vadd.f32 %v17160_v6, %v12649_v52  ;;  %v12651_v34 = vadd.f32 %v9330_v42, %v5272_v2  ;;  %v11964_v25 = vpop.f32.mrb[112].mxu1 }
 0x58a   : > { %v9827_v21 = vmax.f32 %v9691_v5, 0.0  ;;  %v9692_v43 = vadd.f32 %v17160_v6, %v12650_v0  ;;  %v5285_v62 = vpop.f32.mrb[113].mxu1 }
 0x58b   : > { %v9825_v38 = vmax.f32 %v9689_v29, 0.0  ;;  %v9690_v23 = vadd.f32 %v17160_v6, %v12651_v34  ;;  %v11965_v44 = vpop.f32.mrb[114].mxu1 }
 0x58c   : > { %9964 = vst.msk [vmem:[%s16771_s15 + $0x370] sm:$0xff] %vm9853_vm9, %v9827_v21  ;;  %v9828_v46 = vmax.f32 %v9692_v43, 0.0  ;;  %v5288_v28 = vpop.f32.mrb[115].mxu1 }
 0x58d   : > { %9962 = vst.msk [vmem:[%s16771_s15 + $0x360] sm:$0xff] %vm9853_vm9, %v9825_v38  ;;  %v9826_v12 = vmax.f32 %v9690_v23, 0.0  ;;  %v12516_v53 = vpop.f32.mrb[112].mxu0 }
 0x58e   : > { %9965 = vst.msk [vmem:[%s16771_s15 + $0x378] sm:$0xff] %vm9853_vm9, %v9828_v46  ;;  %v12652_v49 = vadd.f32 %v12516_v53, %v11964_v25  ;;  %v9343_v45 = vpop.f32.mrb[113].mxu0 }
 0x58f   : > { %9963 = vst.msk [vmem:[%s16771_s15 + $0x368] sm:$0xff] %vm9853_vm9, %v9826_v12  ;;  %v12653_v13 = vadd.f32 %v9343_v45, %v5285_v62  ;;  %v12517_v16 = vpop.f32.mrb[114].mxu0 }
 0x590   : > { %v9695_v60 = vadd.f32 %v17160_v6, %v12652_v49  ;;  %v12654_v19 = vadd.f32 %v12517_v16, %v11965_v44  ;;  %v9346_v30 = vpop.f32.mrb[115].mxu0 }
 0x591   : > { %v9693_v1 = vadd.f32 %v17160_v6, %v12653_v13  ;;  %v12655_v22 = vadd.f32 %v9346_v30, %v5288_v28  ;;  %v11968_v14 = vpop.f32.mrb[116].mxu1 }
 0x592   : > { %v9831_v33 = vmax.f32 %v9695_v60, 0.0  ;;  %v9696_v50 = vadd.f32 %v17160_v6, %v12654_v19  ;;  %v5301_v54 = vpop.f32.mrb[117].mxu1 }
 0x593   : > { %v9829_v3 = vmax.f32 %v9693_v1, 0.0  ;;  %v9694_v37 = vadd.f32 %v17160_v6, %v12655_v22  ;;  %v11969_v51 = vpop.f32.mrb[118].mxu1 }
 0x594   : > { %9968 = vst.msk [vmem:[%s16771_s15 + $0x390] sm:$0xff] %vm9853_vm9, %v9831_v33  ;;  %v9832_v17 = vmax.f32 %v9696_v50, 0.0  ;;  %v5304_v41 = vpop.f32.mrb[119].mxu1 }
 0x595   : > { %9966 = vst.msk [vmem:[%s16771_s15 + $0x380] sm:$0xff] %vm9853_vm9, %v9829_v3  ;;  %v9830_v55 = vmax.f32 %v9694_v37, 0.0  ;;  %v12520_v32 = vpop.f32.mrb[116].mxu0 }
 0x596   : > { %9969 = vst.msk [vmem:[%s16771_s15 + $0x398] sm:$0xff] %vm9853_vm9, %v9832_v17  ;;  %v12656_v56 = vadd.f32 %v12520_v32, %v11968_v14  ;;  %v9359_v35 = vpop.f32.mrb[117].mxu0 }
 0x597   : > { %9967 = vst.msk [vmem:[%s16771_s15 + $0x388] sm:$0xff] %vm9853_vm9, %v9830_v55  ;;  %v12657_v18 = vadd.f32 %v9359_v35, %v5301_v54  ;;  %v12521_v61 = vpop.f32.mrb[118].mxu0 }
 0x598   : > { %v9699_v39 = vadd.f32 %v17160_v6, %v12656_v56  ;;  %v12658_v59 = vadd.f32 %v12521_v61, %v11969_v51  ;;  %v9362_v26 = vpop.f32.mrb[119].mxu0 }
 0x599   : > { %v9697_v7 = vadd.f32 %v17160_v6, %v12657_v18  ;;  %v12659_v4 = vadd.f32 %v9362_v26, %v5304_v41  ;;  %v11972_v40 = vpop.f32.mrb[120].mxu1 }
 0x59a   : > { %v9835_v9 = vmax.f32 %v9699_v39, 0.0  ;;  %v9700_v20 = vadd.f32 %v17160_v6, %v12658_v59  ;;  %v5317_v63 = vpop.f32.mrb[121].mxu1 }
 0x59b   : > { %v9833_v48 = vmax.f32 %v9697_v7, 0.0  ;;  %v9698_v27 = vadd.f32 %v17160_v6, %v12659_v4  ;;  %v11973_v11 = vpop.f32.mrb[122].mxu1 }
 0x59c   : > { %9972 = vst.msk [vmem:[%s16771_s15 + $0x3b0] sm:$0xff] %vm9853_vm9, %v9835_v9  ;;  %v9836_v31 = vmax.f32 %v9700_v20, 0.0  ;;  %v5320_v10 = vpop.f32.mrb[123].mxu1 }
 0x59d   : > { %9970 = vst.msk [vmem:[%s16771_s15 + $0x3a0] sm:$0xff] %vm9853_vm9, %v9833_v48  ;;  %v9834_v57 = vmax.f32 %v9698_v27, 0.0  ;;  %v12524_v47 = vpop.f32.mrb[120].mxu0 }
 0x59e   : > { %9973 = vst.msk [vmem:[%s16771_s15 + $0x3b8] sm:$0xff] %vm9853_vm9, %v9836_v31  ;;  %v12660_v2 = vadd.f32 %v12524_v47, %v11972_v40  ;;  %v9375_v8 = vpop.f32.mrb[121].mxu0 }
 0x59f   : > { %9971 = vst.msk [vmem:[%s16771_s15 + $0x3a8] sm:$0xff] %vm9853_vm9, %v9834_v57  ;;  %v12661_v36 = vadd.f32 %v9375_v8, %v5317_v63  ;;  %v12525_v15 = vpop.f32.mrb[122].mxu0 }
 0x5a0   : > { %v9703_v24 = vadd.f32 %v17160_v6, %v12660_v2  ;;  %v12662_v52 = vadd.f32 %v12525_v15, %v11973_v11  ;;  %v9378_v58 = vpop.f32.mrb[123].mxu0 }
 0x5a1   : > { %v9701_v5 = vadd.f32 %v17160_v6, %v12661_v36  ;;  %v12663_v0 = vadd.f32 %v9378_v58, %v5320_v10  ;;  %v11976_v42 = vpop.f32.mrb[124].mxu1 }
 0x5a2   : > { %v9839_v29 = vmax.f32 %v9703_v24, 0.0  ;;  %v9704_v34 = vadd.f32 %v17160_v6, %v12662_v52  ;;  %v5333_v25 = vpop.f32.mrb[125].mxu1 }
 0x5a3   : > { %v9837_v21 = vmax.f32 %v9701_v5, 0.0  ;;  %v9702_v43 = vadd.f32 %v17160_v6, %v12663_v0  ;;  %v11977_v62 = vpop.f32.mrb[126].mxu1 }
 0x5a4   : > { %9976 = vst.msk [vmem:[%s16771_s15 + $0x3d0] sm:$0xff] %vm9853_vm9, %v9839_v29  ;;  %v9840_v38 = vmax.f32 %v9704_v34, 0.0  ;;  %v5336_v23 = vpop.f32.mrb[127].mxu1 }
 0x5a5   : > { %9974 = vst.msk [vmem:[%s16771_s15 + $0x3c0] sm:$0xff] %vm9853_vm9, %v9837_v21  ;;  %v9838_v44 = vmax.f32 %v9702_v43, 0.0  ;;  %v12528_v46 = vpop.f32.mrb[124].mxu0 }
 0x5a6   : > { %9977 = vst.msk [vmem:[%s16771_s15 + $0x3d8] sm:$0xff] %vm9853_vm9, %v9840_v38  ;;  %v12664_v28 = vadd.f32 %v12528_v46, %v11976_v42  ;;  %v9391_v12 = vpop.f32.mrb[125].mxu0 }
 0x5a7   : > { %9975 = vst.msk [vmem:[%s16771_s15 + $0x3c8] sm:$0xff] %vm9853_vm9, %v9838_v44  ;;  %v12665_v53 = vadd.f32 %v9391_v12, %v5333_v25  ;;  %v12529_v49 = vpop.f32.mrb[126].mxu0 }
 0x5a8   : > { %v9707_v45 = vadd.f32 %v17160_v6, %v12664_v28  ;;  %v12666_v13 = vadd.f32 %v12529_v49, %v11977_v62  ;;  %v9394_v16 = vpop.f32.mrb[127].mxu0 }
 0x5a9   : > { %v9705_v60 = vadd.f32 %v17160_v6, %v12665_v53  ;;  %v12667_v19 = vadd.f32 %v9394_v16, %v5336_v23  ;;  %v11980_v30 = vpop.f32.mrb[128].mxu1 }
 0x5aa   : > { %v9843_v1 = vmax.f32 %v9707_v45, 0.0  ;;  %v9708_v22 = vadd.f32 %v17160_v6, %v12666_v13  ;;  %v5349_v14 = vpop.f32.mrb[129].mxu1 }
 0x5ab   : > { %v9841_v33 = vmax.f32 %v9705_v60, 0.0  ;;  %v9706_v50 = vadd.f32 %v17160_v6, %v12667_v19  ;;  %v11981_v54 = vpop.f32.mrb[130].mxu1 }
 0x5ac   : > { %9980 = vst.msk [vmem:[%s16771_s15 + $0x3f0] sm:$0xff] %vm9853_vm9, %v9843_v1  ;;  %v9844_v3 = vmax.f32 %v9708_v22, 0.0  ;;  %v5352_v37 = vpop.f32.mrb[131].mxu1 }
 0x5ad   : > { %9978 = vst.msk [vmem:[%s16771_s15 + $0x3e0] sm:$0xff] %vm9853_vm9, %v9841_v33  ;;  %v9842_v51 = vmax.f32 %v9706_v50, 0.0  ;;  %v12532_v17 = vpop.f32.mrb[128].mxu0 }
 0x5ae   : > { %9981 = vst.msk [vmem:[%s16771_s15 + $0x3f8] sm:$0xff] %vm9853_vm9, %v9844_v3  ;;  %v12668_v41 = vadd.f32 %v12532_v17, %v11980_v30  ;;  %v9407_v55 = vpop.f32.mrb[129].mxu0 }
 0x5af   : > { %9979 = vst.msk [vmem:[%s16771_s15 + $0x3e8] sm:$0xff] %vm9853_vm9, %v9842_v51  ;;  %v12669_v32 = vadd.f32 %v9407_v55, %v5349_v14  ;;  %v12533_v56 = vpop.f32.mrb[130].mxu0 }
 0x5b0   : > { %v9711_v35 = vadd.f32 %v17160_v6, %v12668_v41  ;;  %v12670_v18 = vadd.f32 %v12533_v56, %v11981_v54  ;;  %v9410_v61 = vpop.f32.mrb[131].mxu0 }
 0x5b1   : > { %v9709_v39 = vadd.f32 %v17160_v6, %v12669_v32  ;;  %v12671_v59 = vadd.f32 %v9410_v61, %v5352_v37  ;;  %v11984_v26 = vpop.f32.mrb[132].mxu1 }
 0x5b2   : > { %v9847_v7 = vmax.f32 %v9711_v35, 0.0  ;;  %v9712_v4 = vadd.f32 %v17160_v6, %v12670_v18  ;;  %v5365_v40 = vpop.f32.mrb[133].mxu1 }
 0x5b3   : > { %v9845_v9 = vmax.f32 %v9709_v39, 0.0  ;;  %v9710_v20 = vadd.f32 %v17160_v6, %v12671_v59  ;;  %v11985_v63 = vpop.f32.mrb[134].mxu1 }
 0x5b4   : > { %9984 = vst.msk [vmem:[%s16771_s15 + $0x410] sm:$0xff] %vm9853_vm9, %v9847_v7  ;;  %v9848_v48 = vmax.f32 %v9712_v4, 0.0  ;;  %v5368_v27 = vpop.f32.mrb[135].mxu1 }
 0x5b5   : > { %9982 = vst.msk [vmem:[%s16771_s15 + $0x400] sm:$0xff] %vm9853_vm9, %v9845_v9  ;;  %v9846_v11 = vmax.f32 %v9710_v20, 0.0  ;;  %v12536_v31 = vpop.f32.mrb[132].mxu0 }
 0x5b6   : > { %9985 = vst.msk [vmem:[%s16771_s15 + $0x418] sm:$0xff] %vm9853_vm9, %v9848_v48  ;;  %v12672_v10 = vadd.f32 %v12536_v31, %v11984_v26  ;;  %v9423_v57 = vpop.f32.mrb[133].mxu0 }
 0x5b7   : > { %9983 = vst.msk [vmem:[%s16771_s15 + $0x408] sm:$0xff] %vm9853_vm9, %v9846_v11  ;;  %v12673_v47 = vadd.f32 %v9423_v57, %v5365_v40  ;;  %v12537_v2 = vpop.f32.mrb[134].mxu0 }
 0x5b8   : > { %v9715_v8 = vadd.f32 %v17160_v6, %v12672_v10  ;;  %v12674_v36 = vadd.f32 %v12537_v2, %v11985_v63  ;;  %v9426_v15 = vpop.f32.mrb[135].mxu0 }
 0x5b9   : > { %v9713_v24 = vadd.f32 %v17160_v6, %v12673_v47  ;;  %v12675_v52 = vadd.f32 %v9426_v15, %v5368_v27 }
 0x5ba   : > { %v9851_v58 = vmax.f32 %v9715_v8, 0.0  ;;  %v9716_v5 = vadd.f32 %v17160_v6, %v12674_v36 }
 0x5bb   : > { %v9849_v0 = vmax.f32 %v9713_v24, 0.0  ;;  %v9714_v42 = vadd.f32 %v17160_v6, %v12675_v52 }
 0x5bc   : > { %9988 = vst.msk [vmem:[%s16771_s15 + $0x430] sm:$0xff] %vm9853_vm9, %v9851_v58  ;;  %v9852_v29 = vmax.f32 %v9716_v5, 0.0 }
 0x5bd   : > { %9986 = vst.msk [vmem:[%s16771_s15 + $0x420] sm:$0xff] %vm9853_vm9, %v9849_v0  ;;  %v9850_v34 = vmax.f32 %v9714_v42, 0.0 }
 0x5be   : > { %9989 = vst.msk [vmem:[%s16771_s15 + $0x438] sm:$0xff] %vm9853_vm9, %v9852_v29 }
 0x5bf   : > { %9987 = vst.msk [vmem:[%s16771_s15 + $0x428] sm:$0xff] %vm9853_vm9, %v9850_v34 }
 0x5c0 PF: > { %s13_s12 = sadd.s32 1, %s13646_s12  }
 0x5c1   : > { %p10_p4 = scmp.ge.s32.totalorder %s13_s12, 4  }
 0x5c3   :  { %12 = sbr.rel (!%p10_p4) target bundleno = 1 (0x1), region = 70 }

// kernel: cnn_forward.13
= control target key start
LH: loop header
LB: loop body
LE: loop exit
PB: predicated region body
PF: predicated region fallthrough
CT: control target
= control target key end

     0   :  { %10 = vsyncpa [#allocation4], 0  ;;  %s2875_s18 = smov 0   ;;  %s3259_s0 = inlined_call_operand.vmem [shape: f32[2,2048], index: 0, kind: input, shape index: {}]   ;;  %s3260_s1 = inlined_call_operand.vmem [shape: bf16[2048,640], index: 1, kind: input, shape index: {}]   ;;  %s3261_s2 = inlined_call_operand.vmem [shape: f32[1,640], index: 2, kind: input, shape index: {}]   ;;  %s3262_s3 = inlined_call_operand.vmem [shape: bf16[640,128], index: 3, kind: input, shape index: {}]   ;;  %s3263_s4 = inlined_call_operand.vmem [shape: f32[1,128], index: 4, kind: input, shape index: {}]   ;;  %s3264_s5 = inlined_call_operand.hbm [shape: f32[2,128], index: 5, kind: output, shape index: {}]  }
   0x1 LB: > { %s2881_s19 = sadd.s32 4294967295, %s2838_s18   ;;  %p2180_p0 = scmp.ge.s32.totalorder %s2838_s18, 1  ;;  %s2838_s18 = sphi %s2875_s18, %s16_s18  }
   0x2   : > { %p196_p1 = scmp.lt.s32.totalorder %s2838_s18, 5 }
   0x4   : > { %p197_p2 = pnand %p2180_p0, %p196_p1 }
   0x5   : > { %s2181_s20 = sshll.u32 (!%p197_p2), %s2881_s19, 2  ;;  %s2183_s21 = sshll.u32 (!%p197_p2), %s2881_s19, 6 }
   0x6   : > { %200 = sbr.rel (%p197_p2) target bundleno = 679 (0x2a7), region = 40  ;;  %p226_p3 = scmp.lt.s32.totalorder (!%p197_p2), %s2181_s20, 15 }
   0x7   : > { %p232_p4 = scmp.lt.s32.totalorder (!%p197_p2), %s2183_s21, 255  ;;  %p2185_p5 = scmp.ne.s32.totalorder (!%p197_p2), %s2881_s19, 0 }
   0xd   : > { %s3266_s20 = smov (!%p226_p3, %s2181_s20), 15  ;;  %s3268_s21 = smov (!%p232_p4, %s2183_s21), 255 }
   0xe   : > { %s2182_s22 = sshll.u32 %s3266_s20, 1  ;;  %s2517_s26 = smul.u32 20, %s3268_s21  ;;  %v2840_v0 = vmov (!%p2185_p5), 0.0  }
   0xf   : > { %s2890_s25 = scalar_lea.vmem %s3259_s0, %s2182_s22  ;;  %242 = sbr.rel (%p2185_p5) target bundleno = 22 (0x16), region = 44  ;;  %243 = vst [vmem:[#allocation2] sm:$0xff] (!%p2185_p5), %v2840_v0  ;;  %244 = vst [vmem:[#allocation2 + $0x8] sm:$0x3] (!%p2185_p5), %v2840_v0 }
  0x10   : > { %s2895_s29 = scalar_lea.vmem %s3260_s1, %s2517_s26 }
  0x16 PF: > { %v2537_v1 = vld [vmem:[%s2895_s29 + $0x4] ss:$20 sps:$4 sm:$0xff]   ;;  %v2539_v2 = vld [vmem:[%s2895_s29 + $0xc] ss:$20 sps:$4 sm:$0xff]   ;;  %v2542_v4 = vld [vmem:[%s2895_s29 + $0x8] ss:$20 sps:$4 sm:$0xff]   ;;  %v251_v39 = vlaneseq }
  0x17   : > { %1298 = vmatprep.subr.bf16.mxu0 %v2537_v1  ;;  %v2541_v3 = vld [vmem:[%s2895_s29] ss:$20 sps:$4 sm:$0xff]   ;;  %1380 = vmatprep.subr.bf16.mxu1 %v2539_v2  ;;  %v2547_v7 = vld [vmem:[%s2895_s29 + $0x28] ss:$20 sps:$4 sm:$0xff]   ;;  %v2548_v8 = vld [vmem:[%s2895_s29 + $0x30] ss:$20 sps:$4 sm:$0xff]  }
  0x18   : > { %v2543_v5 = vld [vmem:[%s2895_s29 + $0x2c] ss:$20 sps:$4 sm:$0xff]   ;;  %1299 = vmatpush1.bf16.msra.mxu0 %v2541_v3  ;;  %1381 = vmatpush1.bf16.msra.mxu1 %v2542_v4  ;;  %v2545_v6 = vld [vmem:[%s2895_s29 + $0x34] ss:$20 sps:$4 sm:$0xff]   ;;  %v2551_v10 = vld [vmem:[%s2895_s29 + $0x5c] ss:$20 sps:$4 sm:$0xff]  }
  0x19   : > { %1300 = vmatprep.subr.bf16.mxu0 %v2543_v5  ;;  %1382 = vmatprep.subr.bf16.mxu1 %v2545_v6  ;;  %v2549_v9 = vld [vmem:[%s2895_s29 + $0x54] ss:$20 sps:$4 sm:$0xff]   ;;  %v2553_v11 = vld [vmem:[%s2895_s29 + $0x50] ss:$20 sps:$4 sm:$0xff]   ;;  %v2554_v12 = vld [vmem:[%s2895_s29 + $0x58] ss:$20 sps:$4 sm:$0xff]  }
  0x1a   : > { %v2555_v13 = vld [vmem:[%s2895_s29 + $0x7c] ss:$20 sps:$4 sm:$0xff]   ;;  %v2557_v14 = vld [vmem:[%s2895_s29 + $0x84] ss:$20 sps:$4 sm:$0xff]   ;;  %v2560_v16 = vld [vmem:[%s2895_s29 + $0x80] ss:$20 sps:$4 sm:$0xff]  }
  0x1b   : > { %v2559_v15 = vld [vmem:[%s2895_s29 + $0x78] ss:$20 sps:$4 sm:$0xff]   ;;  %v2565_v19 = vld [vmem:[%s2895_s29 + $0xa0] ss:$20 sps:$4 sm:$0xff]   ;;  %v2566_v20 = vld [vmem:[%s2895_s29 + $0xa8] ss:$20 sps:$4 sm:$0xff]  }
  0x1c   : > { %1301 = vmatpush1.bf16.msra.mxu0 %v2547_v7  ;;  %1383 = vmatpush1.bf16.msra.mxu1 %v2548_v8  ;;  %v2561_v17 = vld [vmem:[%s2895_s29 + $0xa4] ss:$20 sps:$4 sm:$0xff]   ;;  %v2563_v18 = vld [vmem:[%s2895_s29 + $0xac] ss:$20 sps:$4 sm:$0xff]   ;;  %v2569_v22 = vld [vmem:[%s2895_s29 + $0xd4] ss:$20 sps:$4 sm:$0xff]  }
  0x1d   : > { %1302 = vmatprep.subr.bf16.mxu0 %v2549_v9  ;;  %1384 = vmatprep.subr.bf16.mxu1 %v2551_v10  ;;  %v2567_v21 = vld [vmem:[%s2895_s29 + $0xcc] ss:$20 sps:$4 sm:$0xff]   ;;  %v2571_v23 = vld [vmem:[%s2895_s29 + $0xc8] ss:$20 sps:$4 sm:$0xff]   ;;  %v2572_v24 = vld [vmem:[%s2895_s29 + $0xd0] ss:$20 sps:$4 sm:$0xff]  }
  0x1e   : > { %v2573_v25 = vld [vmem:[%s2895_s29 + $0xf4] ss:$20 sps:$4 sm:$0xff]   ;;  %v2575_v26 = vld [vmem:[%s2895_s29 + $0xfc] ss:$20 sps:$4 sm:$0xff]   ;;  %v2578_v28 = vld [vmem:[%s2895_s29 + $0xf8] ss:$20 sps:$4 sm:$0xff]  }
  0x1f   : > { %v2577_v27 = vld [vmem:[%s2895_s29 + $0xf0] ss:$20 sps:$4 sm:$0xff]   ;;  %v2583_v31 = vld [vmem:[%s2895_s29 + $0x118] ss:$20 sps:$4 sm:$0xff]   ;;  %v2584_v32 = vld [vmem:[%s2895_s29 + $0x120] ss:$20 sps:$4 sm:$0xff]  }
  0x20   : > { %1303 = vmatpush1.bf16.msra.mxu0 %v2553_v11  ;;  %1385 = vmatpush1.bf16.msra.mxu1 %v2554_v12  ;;  %v2579_v29 = vld [vmem:[%s2895_s29 + $0x11c] ss:$20 sps:$4 sm:$0xff]   ;;  %v2581_v30 = vld [vmem:[%s2895_s29 + $0x124] ss:$20 sps:$4 sm:$0xff]   ;;  %v2587_v34 = vld [vmem:[%s2895_s29 + $0x14c] ss:$20 sps:$4 sm:$0xff]  }
  0x21   : > { %1304 = vmatprep.subr.bf16.mxu0 %v2555_v13  ;;  %1386 = vmatprep.subr.bf16.mxu1 %v2557_v14  ;;  %v2585_v33 = vld [vmem:[%s2895_s29 + $0x144] ss:$20 sps:$4 sm:$0xff]   ;;  %v2589_v35 = vld [vmem:[%s2895_s29 + $0x140] ss:$20 sps:$4 sm:$0xff]   ;;  %v2590_v36 = vld [vmem:[%s2895_s29 + $0x148] ss:$20 sps:$4 sm:$0xff]  }
  0x22   : > { %v2841_v37 = vmov 1983009808   ;;  %v2591_v40 = vld [vmem:[%s2895_s29 + $0x16c] ss:$20 sps:$4 sm:$0xff]   ;;  %v2593_v41 = vld [vmem:[%s2895_s29 + $0x174] ss:$20 sps:$4 sm:$0xff]  }
  0x23   : > { %v249_v38 = vunpack.c.l.s4 %v2841_v37  ;;  %v2595_v42 = vld [vmem:[%s2895_s29 + $0x168] ss:$20 sps:$4 sm:$0xff]   ;;  %v2937_v44 = vshrl.u32 %v251_v39, 7  ;;  %v2596_v45 = vld [vmem:[%s2895_s29 + $0x170] ss:$20 sps:$4 sm:$0xff]   ;;  %p2346_p6 = scmp.ne.s32.totalorder %s2881_s19, 3 }
  0x24   : > { %1305 = vmatpush1.bf16.msra.mxu0 %v2559_v15  ;;  %1387 = vmatpush1.bf16.msra.mxu1 %v2560_v16  ;;  %v2597_v46 = vld [vmem:[%s2895_s29 + $0x194] ss:$20 sps:$4 sm:$0xff]   ;;  %v2599_v47 = vld [vmem:[%s2895_s29 + $0x19c] ss:$20 sps:$4 sm:$0xff]   ;;  %v2602_v49 = vld [vmem:[%s2895_s29 + $0x198] ss:$20 sps:$4 sm:$0xff]  }
  0x25   : > { %1306 = vmatprep.subr.bf16.mxu0 %v2561_v17  ;;  %1388 = vmatprep.subr.bf16.mxu1 %v2563_v18  ;;  %v250_v43 = vunpack.c.0.s8 %v249_v38  ;;  %v2601_v48 = vld [vmem:[%s2895_s29 + $0x190] ss:$20 sps:$4 sm:$0xff]   ;;  %v2607_v54 = vld [vmem:[%s2895_s29 + $0x1b8] ss:$20 sps:$4 sm:$0xff]   ;;  %v2608_v56 = vld [vmem:[%s2895_s29 + $0x1c0] ss:$20 sps:$4 sm:$0xff]  }
  0x26   : > { %v2603_v51 = vld [vmem:[%s2895_s29 + $0x1bc] ss:$20 sps:$4 sm:$0xff]   ;;  %v2605_v52 = vld [vmem:[%s2895_s29 + $0x1c4] ss:$20 sps:$4 sm:$0xff]   ;;  %v2611_v58 = vld [vmem:[%s2895_s29 + $0x1ec] ss:$20 sps:$4 sm:$0xff]  }
  0x27   : > { %v2945_v50 = vsub.s32 %v250_v43, %v2937_v44  ;;  %v245_v53 = vld [vmem:[%s2890_s25] sm:$0xff]  ;;  %v2614_v62 = vld [vmem:[%s2895_s29 + $0x1e8] ss:$20 sps:$4 sm:$0xff]   ;;  %v2626_v7 = vld [vmem:[%s2895_s29 + $0x238] ss:$20 sps:$4 sm:$0xff]   ;;  %vm2843_vm0 = vmmov (!%p2346_p6), 0  }
  0x28   : > { %1307 = vmatpush1.bf16.msra.mxu0 %v2565_v19  ;;  %1389 = vmatpush1.bf16.msra.mxu1 %v2566_v20  ;;  %v2609_v57 = vld [vmem:[%s2895_s29 + $0x1e4] ss:$20 sps:$4 sm:$0xff]   ;;  %v2613_v60 = vld [vmem:[%s2895_s29 + $0x1e0] ss:$20 sps:$4 sm:$0xff]   ;;  %v2619_v1 = vld [vmem:[%s2895_s29 + $0x208] ss:$20 sps:$4 sm:$0xff]   ;;  %v247_v5 = vcombine.high %v245_v53, %v245_v53 }
  0x29   : > { %1308 = vmatprep.subr.bf16.mxu0 %v2567_v21  ;;  %1390 = vmatprep.subr.bf16.mxu1 %v2569_v22  ;;  %v254_v55 = vrot.slane %v245_v53, %v2945_v50  ;;  %v2615_v63 = vld [vmem:[%s2895_s29 + $0x20c] ss:$20 sps:$4 sm:$0xff]   ;;  %v2617_v0 = vld [vmem:[%s2895_s29 + $0x214] ss:$20 sps:$4 sm:$0xff]   ;;  %v2620_v2 = vld [vmem:[%s2895_s29 + $0x210] ss:$20 sps:$4 sm:$0xff]  }
  0x2a   : > { %v2621_v3 = vld [vmem:[%s2895_s29 + $0x234] ss:$20 sps:$4 sm:$0xff]   ;;  %v2623_v4 = vld [vmem:[%s2895_s29 + $0x23c] ss:$20 sps:$4 sm:$0xff]   ;;  %v2629_v9 = vld [vmem:[%s2895_s29 + $0x264] ss:$20 sps:$4 sm:$0xff]   ;;  %v2972_v10 = vrot.slane %v247_v5, %v2945_v50 }
  0x2b   : > { %v262_v59 = vcombine.high %v254_v55, %v254_v55  ;;  %v2625_v6 = vld [vmem:[%s2895_s29 + $0x230] ss:$20 sps:$4 sm:$0xff]   ;;  %v2631_v11 = vld [vmem:[%s2895_s29 + $0x258] ss:$20 sps:$4 sm:$0xff]   ;;  %v2632_v12 = vld [vmem:[%s2895_s29 + $0x260] ss:$20 sps:$4 sm:$0xff]   ;;  %v2981_v17 = vpack.c.bf16 %v254_v55, %v254_v55 }
  0x2c   : > { %1309 = vmatpush1.bf16.msra.mxu0 %v2571_v23  ;;  %1391 = vmatpush1.bf16.msra.mxu1 %v2572_v24  ;;  %v2627_v8 = vld [vmem:[%s2895_s29 + $0x25c] ss:$20 sps:$4 sm:$0xff]   ;;  %v2635_v13 = vld [vmem:[%s2895_s29 + $0x284] ss:$20 sps:$4 sm:$0xff]   ;;  %v2638_v14 = vld [vmem:[%s2895_s29 + $0x28c] ss:$20 sps:$4 sm:$0xff]   ;;  %v263_v15 = vcombine.high %v2972_v10, %v2972_v10 }
  0x2d   : > { %1310 = vmatprep.subr.bf16.mxu0 %v2573_v25  ;;  %1392 = vmatprep.subr.bf16.mxu1 %v2575_v26  ;;  %v2956_v61 = vpack.c.bf16 %v262_v59, %v262_v59  ;;  %v2633_v16 = vld [vmem:[%s2895_s29 + $0x280] ss:$20 sps:$4 sm:$0xff]   ;;  %v2636_v18 = vld [vmem:[%s2895_s29 + $0x288] ss:$20 sps:$4 sm:$0xff]   ;;  %v2642_v23 = vld [vmem:[%s2895_s29 + $0x2b0] ss:$20 sps:$4 sm:$0xff]  }
  0x2e   : > { %v2641_v19 = vld [vmem:[%s2895_s29 + $0x2ac] ss:$20 sps:$4 sm:$0xff]   ;;  %v2644_v20 = vld [vmem:[%s2895_s29 + $0x2b4] ss:$20 sps:$4 sm:$0xff]   ;;  %v2986_v21 = vpack.c.bf16 %v263_v15, %v263_v15  ;;  %v2650_v25 = vld [vmem:[%s2895_s29 + $0x2dc] ss:$20 sps:$4 sm:$0xff]  }
  0x2f   : > { %1330 = vmatprep.mubr.bf16.mxu0 %v2956_v61  ;;  %1412 = vmatprep.mubr.bf16.mxu1 %v2956_v61  ;;  %v2639_v22 = vld [vmem:[%s2895_s29 + $0x2a8] ss:$20 sps:$4 sm:$0xff]   ;;  %v2645_v26 = vld [vmem:[%s2895_s29 + $0x2d0] ss:$20 sps:$4 sm:$0xff]   ;;  %v2672_v43 = vld [vmem:[%s2895_s29 + $0x378] ss:$20 sps:$4 sm:$0xff]  }
  0x30   : > { %1311 = vmatpush1.bf16.msra.mxu0 %v2577_v27  ;;  %1393 = vmatpush1.bf16.msra.mxu1 %v2578_v28  ;;  %v2647_v24 = vld [vmem:[%s2895_s29 + $0x2d4] ss:$20 sps:$4 sm:$0xff]   ;;  %v2648_v27 = vld [vmem:[%s2895_s29 + $0x2d8] ss:$20 sps:$4 sm:$0xff]   ;;  %v2653_v28 = vld [vmem:[%s2895_s29 + $0x2fc] ss:$20 sps:$4 sm:$0xff]  }
  0x31   : > { %1312 = vmatprep.subr.bf16.mxu0 %v2579_v29  ;;  %1394 = vmatprep.subr.bf16.mxu1 %v2581_v30  ;;  %v2656_v29 = vld [vmem:[%s2895_s29 + $0x304] ss:$20 sps:$4 sm:$0xff]   ;;  %v2668_v37 = vld [vmem:[%s2895_s29 + $0x354] ss:$20 sps:$4 sm:$0xff]   ;;  %v2698_v59 = vld [vmem:[%s2895_s29 + $0x41c] ss:$20 sps:$4 sm:$0xff]  }
  0x32   : > { %v2651_v30 = vld [vmem:[%s2895_s29 + $0x2f8] ss:$20 sps:$4 sm:$0xff]   ;;  %v2663_v38 = vld [vmem:[%s2895_s29 + $0x348] ss:$20 sps:$4 sm:$0xff]   ;;  %v2666_v39 = vld [vmem:[%s2895_s29 + $0x350] ss:$20 sps:$4 sm:$0xff]  }
  0x33   : > { %v2684_v53 = vld [vmem:[%s2895_s29 + $0x3c8] ss:$20 sps:$4 sm:$0xff]   ;;  %v2705_v5 = vld [vmem:[%s2895_s29 + $0x460] ss:$20 sps:$4 sm:$0xff]   ;;  %v2720_v15 = vld [vmem:[%s2895_s29 + $0x4b8] ss:$20 sps:$4 sm:$0xff]  }
  0x34   : > { %1313 = vmatpush1.bf16.msra.mxu0 %v2583_v31  ;;  %1395 = vmatpush1.bf16.msra.mxu1 %v2584_v32  ;;  %v2654_v31 = vld [vmem:[%s2895_s29 + $0x300] ss:$20 sps:$4 sm:$0xff]   ;;  %v2659_v32 = vld [vmem:[%s2895_s29 + $0x324] ss:$20 sps:$4 sm:$0xff]  }
  0x35   : > { %1314 = vmatprep.subr.bf16.mxu0 %v2585_v33  ;;  %1396 = vmatprep.subr.bf16.mxu1 %v2587_v34  ;;  %v2662_v33 = vld [vmem:[%s2895_s29 + $0x32c] ss:$20 sps:$4 sm:$0xff]   ;;  %v2692_v55 = vld [vmem:[%s2895_s29 + $0x3f4] ss:$20 sps:$4 sm:$0xff]  }
  0x36   : > { %v2657_v34 = vld [vmem:[%s2895_s29 + $0x320] ss:$20 sps:$4 sm:$0xff]  }
  0x38   : > { %1315 = vmatpush1.bf16.msra.mxu0 %v2589_v35  ;;  %1397 = vmatpush1.bf16.msra.mxu1 %v2590_v36  ;;  %v2660_v35 = vld [vmem:[%s2895_s29 + $0x328] ss:$20 sps:$4 sm:$0xff]   ;;  %v2665_v36 = vld [vmem:[%s2895_s29 + $0x34c] ss:$20 sps:$4 sm:$0xff]  }
  0x39   : > { %1316 = vmatprep.subr.bf16.mxu0 %v2591_v40  ;;  %1398 = vmatprep.subr.bf16.mxu1 %v2593_v41  ;;  %v2671_v40 = vld [vmem:[%s2895_s29 + $0x374] ss:$20 sps:$4 sm:$0xff]   ;;  %v2674_v41 = vld [vmem:[%s2895_s29 + $0x37c] ss:$20 sps:$4 sm:$0xff]  }
  0x3c   : > { %1317 = vmatpush1.bf16.msra.mxu0 %v2595_v42  ;;  %1399 = vmatpush1.bf16.msra.mxu1 %v2596_v45  ;;  %v2669_v42 = vld [vmem:[%s2895_s29 + $0x370] ss:$20 sps:$4 sm:$0xff]  }
  0x3d   : > { %1318 = vmatprep.subr.bf16.mxu0 %v2597_v46  ;;  %1400 = vmatprep.subr.bf16.mxu1 %v2599_v47  ;;  %v2677_v45 = vld [vmem:[%s2895_s29 + $0x39c] ss:$20 sps:$4 sm:$0xff]   ;;  %v2680_v46 = vld [vmem:[%s2895_s29 + $0x3a4] ss:$20 sps:$4 sm:$0xff]  }
  0x3e   : > { %v2675_v47 = vld [vmem:[%s2895_s29 + $0x398] ss:$20 sps:$4 sm:$0xff]  }
  0x40   : > { %1319 = vmatpush1.bf16.msra.mxu0 %v2601_v48  ;;  %1401 = vmatpush1.bf16.msra.mxu1 %v2602_v49  ;;  %v2678_v48 = vld [vmem:[%s2895_s29 + $0x3a0] ss:$20 sps:$4 sm:$0xff]   ;;  %v2683_v49 = vld [vmem:[%s2895_s29 + $0x3c4] ss:$20 sps:$4 sm:$0xff]  }
  0x41   : > { %1320 = vmatprep.subr.bf16.mxu0 %v2603_v51  ;;  %1402 = vmatprep.subr.bf16.mxu1 %v2605_v52  ;;  %v2686_v51 = vld [vmem:[%s2895_s29 + $0x3cc] ss:$20 sps:$4 sm:$0xff]  }
  0x42   : > { %v2681_v52 = vld [vmem:[%s2895_s29 + $0x3c0] ss:$20 sps:$4 sm:$0xff]  }
  0x44   : > { %1321 = vmatpush1.bf16.msra.mxu0 %v2607_v54  ;;  %1403 = vmatpush1.bf16.msra.mxu1 %v2608_v56  ;;  %v2689_v54 = vld [vmem:[%s2895_s29 + $0x3ec] ss:$20 sps:$4 sm:$0xff]   ;;  %v2687_v56 = vld [vmem:[%s2895_s29 + $0x3e8] ss:$20 sps:$4 sm:$0xff]  }
  0x45   : > { %1322 = vmatprep.subr.bf16.mxu0 %v2609_v57  ;;  %1404 = vmatprep.subr.bf16.mxu1 %v2611_v58  ;;  %v2690_v57 = vld [vmem:[%s2895_s29 + $0x3f0] ss:$20 sps:$4 sm:$0xff]   ;;  %v2695_v58 = vld [vmem:[%s2895_s29 + $0x414] ss:$20 sps:$4 sm:$0xff]  }
  0x48   : > { %1323 = vmatpush1.bf16.msra.mxu0 %v2613_v60  ;;  %1405 = vmatpush1.bf16.msra.mxu1 %v2614_v62  ;;  %v2693_v60 = vld [vmem:[%s2895_s29 + $0x410] ss:$20 sps:$4 sm:$0xff]   ;;  %v2696_v62 = vld [vmem:[%s2895_s29 + $0x418] ss:$20 sps:$4 sm:$0xff]  }
  0x49   : > { %1324 = vmatprep.subr.bf16.mxu0 %v2615_v63  ;;  %1406 = vmatprep.subr.bf16.mxu1 %v2617_v0  ;;  %v2701_v63 = vld [vmem:[%s2895_s29 + $0x43c] ss:$20 sps:$4 sm:$0xff]   ;;  %v2704_v0 = vld [vmem:[%s2895_s29 + $0x444] ss:$20 sps:$4 sm:$0xff]  }
  0x4c   : > { %1325 = vmatpush1.bf16.msra.mxu0 %v2619_v1  ;;  %1407 = vmatpush1.bf16.msra.mxu1 %v2620_v2  ;;  %v2699_v1 = vld [vmem:[%s2895_s29 + $0x438] ss:$20 sps:$4 sm:$0xff]   ;;  %v2702_v2 = vld [vmem:[%s2895_s29 + $0x440] ss:$20 sps:$4 sm:$0xff]  }
  0x4d   : > { %1326 = vmatprep.subr.bf16.mxu0 %v2621_v3  ;;  %1408 = vmatprep.subr.bf16.mxu1 %v2623_v4  ;;  %v2707_v3 = vld [vmem:[%s2895_s29 + $0x464] ss:$20 sps:$4 sm:$0xff]   ;;  %v2710_v4 = vld [vmem:[%s2895_s29 + $0x46c] ss:$20 sps:$4 sm:$0xff]  }
  0x50   : > { %1327 = vmatpush1.bf16.msra.mxu0 %v2625_v6  ;;  %1409 = vmatpush1.bf16.msra.mxu1 %v2626_v7  ;;  %v2708_v6 = vld [vmem:[%s2895_s29 + $0x468] ss:$20 sps:$4 sm:$0xff]   ;;  %v2713_v7 = vld [vmem:[%s2895_s29 + $0x48c] ss:$20 sps:$4 sm:$0xff]  }
  0x51   : > { %1328 = vmatprep.subr.bf16.mxu0 %v2627_v8  ;;  %1410 = vmatprep.subr.bf16.mxu1 %v2629_v9  ;;  %v2716_v8 = vld [vmem:[%s2895_s29 + $0x494] ss:$20 sps:$4 sm:$0xff]  }
  0x52   : > { %v2711_v9 = vld [vmem:[%s2895_s29 + $0x488] ss:$20 sps:$4 sm:$0xff]  }
  0x54   : > { %1329 = vmatpush1.bf16.msra.mxu0 %v2631_v11  ;;  %1411 = vmatpush1.bf16.msra.mxu1 %v2632_v12  ;;  %v2714_v11 = vld [vmem:[%s2895_s29 + $0x490] ss:$20 sps:$4 sm:$0xff]   ;;  %v2719_v12 = vld [vmem:[%s2895_s29 + $0x4b4] ss:$20 sps:$4 sm:$0xff]  }
  0x55   : > { %1339 = vmatprep.subr.bf16.mxu0 %v2635_v13  ;;  %1421 = vmatprep.subr.bf16.mxu1 %v2638_v14  ;;  %v2722_v13 = vld [vmem:[%s2895_s29 + $0x4bc] ss:$20 sps:$4 sm:$0xff]  }
  0x56   : > { %v2717_v14 = vld [vmem:[%s2895_s29 + $0x4b0] ss:$20 sps:$4 sm:$0xff]  }
  0x57   : > { %1331 = vmatmul.mubr.bf16.vlgmr.msra.gmra.mrb[0].mxu0 %v2981_v17  ;;  %1413 = vmatmul.mubr.bf16.vlgmr.msra.gmra.mrb[0].mxu1 %v2981_v17 }
  0x58   : > { %1340 = vmatpush1.bf16.msra.mxu0 %v2633_v16  ;;  %1422 = vmatpush1.bf16.msra.mxu1 %v2636_v18  ;;  %v2725_v16 = vld [vmem:[%s2895_s29 + $0x4dc] ss:$20 sps:$4 sm:$0xff]   ;;  %v2728_v18 = vld [vmem:[%s2895_s29 + $0x4e4] ss:$20 sps:$4 sm:$0xff]  }
  0x59   : > { %1341 = vmatprep.subr.bf16.mxu0 %v2641_v19  ;;  %1423 = vmatprep.subr.bf16.mxu1 %v2644_v20  ;;  %v2723_v19 = vld [vmem:[%s2895_s29 + $0x4d8] ss:$20 sps:$4 sm:$0xff]   ;;  %v2726_v20 = vld [vmem:[%s2895_s29 + $0x4e0] ss:$20 sps:$4 sm:$0xff]  }
  0x5a   : > { %1371 = vmatprep.mubr.bf16.mxu0 %v2986_v21  ;;  %1453 = vmatprep.mubr.bf16.mxu1 %v2986_v21 }
  0x5c   : > { %1342 = vmatpush1.bf16.msra.mxu0 %v2639_v22  ;;  %1424 = vmatpush1.bf16.msra.mxu1 %v2642_v23  ;;  %v2730_v22 = vld [vmem:[%s2895_s29 + $0x150] ss:$20 sps:$4 sm:$0xff]  }
  0x5d   : > { %1343 = vmatprep.subr.bf16.mxu0 %v2647_v24  ;;  %1425 = vmatprep.subr.bf16.mxu1 %v2650_v25  ;;  %v2731_v23 = vld [vmem:[%s2895_s29 + $0x3d0] ss:$20 sps:$4 sm:$0xff]   ;;  %v3054_v24 = vpack.c.bf16 %v2972_v10, %v2972_v10  ;;  %v2736_v10 = vld [vmem:[%s2895_s29 + $0x38] ss:$20 sps:$4 sm:$0xff]  }
  0x5e   : > { %v2732_v25 = vld [vmem:[%s2895_s29 + $0x10] ss:$20 sps:$4 sm:$0xff]  }
  0x60   : > { %1344 = vmatpush1.bf16.msra.mxu0 %v2645_v26  ;;  %1426 = vmatpush1.bf16.msra.mxu1 %v2648_v27  ;;  %v2733_v26 = vld [vmem:[%s2895_s29 + $0x290] ss:$20 sps:$4 sm:$0xff]   ;;  %v2734_v27 = vld [vmem:[%s2895_s29 + $0x178] ss:$20 sps:$4 sm:$0xff]  }
  0x61   : > { %1345 = vmatprep.subr.bf16.mxu0 %v2653_v28  ;;  %1427 = vmatprep.subr.bf16.mxu1 %v2656_v29  ;;  %v2735_v28 = vld [vmem:[%s2895_s29 + $0x3f8] ss:$20 sps:$4 sm:$0xff]  }
  0x62   : > { %v2737_v29 = vld [vmem:[%s2895_s29 + $0x2b8] ss:$20 sps:$4 sm:$0xff]  }
  0x64   : > { %1346 = vmatpush1.bf16.msra.mxu0 %v2651_v30  ;;  %1428 = vmatpush1.bf16.msra.mxu1 %v2654_v31  ;;  %v2738_v30 = vld [vmem:[%s2895_s29 + $0x1a0] ss:$20 sps:$4 sm:$0xff]  }
  0x65   : > { %1347 = vmatprep.subr.bf16.mxu0 %v2659_v32  ;;  %1429 = vmatprep.subr.bf16.mxu1 %v2662_v33  ;;  %v2739_v31 = vld [vmem:[%s2895_s29 + $0x420] ss:$20 sps:$4 sm:$0xff]  }
  0x66   : > { %v2740_v32 = vld [vmem:[%s2895_s29 + $0x60] ss:$20 sps:$4 sm:$0xff]  }
  0x67   : > { %v2741_v33 = vld [vmem:[%s2895_s29 + $0x2e0] ss:$20 sps:$4 sm:$0xff]  }
  0x68   : > { %1348 = vmatpush1.bf16.msra.mxu0 %v2657_v34  ;;  %1430 = vmatpush1.bf16.msra.mxu1 %v2660_v35  ;;  %v2742_v34 = vld [vmem:[%s2895_s29 + $0x1c8] ss:$20 sps:$4 sm:$0xff]  }
  0x69   : > { %1349 = vmatprep.subr.bf16.mxu0 %v2665_v36  ;;  %1431 = vmatprep.subr.bf16.mxu1 %v2668_v37  ;;  %v2743_v35 = vld [vmem:[%s2895_s29 + $0x448] ss:$20 sps:$4 sm:$0xff]   ;;  %v2747_v37 = vld [vmem:[%s2895_s29 + $0x470] ss:$20 sps:$4 sm:$0xff]  }
  0x6a   : > { %v2744_v36 = vld [vmem:[%s2895_s29 + $0x88] ss:$20 sps:$4 sm:$0xff]  }
  0x6c   : > { %1350 = vmatpush1.bf16.msra.mxu0 %v2663_v38  ;;  %1432 = vmatpush1.bf16.msra.mxu1 %v2666_v39  ;;  %v2748_v38 = vld [vmem:[%s2895_s29 + $0xb0] ss:$20 sps:$4 sm:$0xff]  }
  0x6d   : > { %1351 = vmatprep.subr.bf16.mxu0 %v2671_v40  ;;  %1433 = vmatprep.subr.bf16.mxu1 %v2674_v41  ;;  %v2749_v39 = vld [vmem:[%s2895_s29 + $0x330] ss:$20 sps:$4 sm:$0xff]   ;;  %v2750_v40 = vld [vmem:[%s2895_s29 + $0x218] ss:$20 sps:$4 sm:$0xff]  }
  0x6e   : > { %v2751_v41 = vld [vmem:[%s2895_s29 + $0x498] ss:$20 sps:$4 sm:$0xff]  }
  0x70   : > { %1352 = vmatpush1.bf16.msra.mxu0 %v2669_v42  ;;  %1434 = vmatpush1.bf16.msra.mxu1 %v2672_v43  ;;  %v2752_v42 = vld [vmem:[%s2895_s29 + $0xd8] ss:$20 sps:$4 sm:$0xff]  }
  0x71   : > { %1353 = vmatprep.subr.bf16.mxu0 %v2677_v45  ;;  %1435 = vmatprep.subr.bf16.mxu1 %v2680_v46  ;;  %v2753_v43 = vld [vmem:[%s2895_s29 + $0x358] ss:$20 sps:$4 sm:$0xff]   ;;  %v2754_v45 = vld [vmem:[%s2895_s29 + $0x240] ss:$20 sps:$4 sm:$0xff]  }
  0x72   : > { %v2755_v46 = vld [vmem:[%s2895_s29 + $0x4c0] ss:$20 sps:$4 sm:$0xff]  }
  0x74   : > { %1354 = vmatpush1.bf16.msra.mxu0 %v2675_v47  ;;  %1436 = vmatpush1.bf16.msra.mxu1 %v2678_v48  ;;  %v2756_v47 = vld [vmem:[%s2895_s29 + $0x100] ss:$20 sps:$4 sm:$0xff]  }
  0x75   : > { %1355 = vmatprep.subr.bf16.mxu0 %v2683_v49  ;;  %1437 = vmatprep.subr.bf16.mxu1 %v2686_v51  ;;  %v2757_v48 = vld [vmem:[%s2895_s29 + $0x380] ss:$20 sps:$4 sm:$0xff]   ;;  %v2758_v49 = vld [vmem:[%s2895_s29 + $0x268] ss:$20 sps:$4 sm:$0xff]  }
  0x76   : > { %v2759_v51 = vld [vmem:[%s2895_s29 + $0x4e8] ss:$20 sps:$4 sm:$0xff]  }
  0x78   : > { %1356 = vmatpush1.bf16.msra.mxu0 %v2681_v52  ;;  %1438 = vmatpush1.bf16.msra.mxu1 %v2684_v53  ;;  %v2760_v52 = vld [vmem:[%s2895_s29 + $0x128] ss:$20 sps:$4 sm:$0xff]  }
  0x79   : > { %1357 = vmatprep.subr.bf16.mxu0 %v2689_v54  ;;  %1439 = vmatprep.subr.bf16.mxu1 %v2692_v55  ;;  %v2761_v53 = vld [vmem:[%s2895_s29 + $0x3a8] ss:$20 sps:$4 sm:$0xff]  }
  0x7c   : > { %1358 = vmatpush1.bf16.msra.mxu0 %v2687_v56  ;;  %1440 = vmatpush1.bf16.msra.mxu1 %v2690_v57 }
  0x7d   : > { %1359 = vmatprep.subr.bf16.mxu0 %v2695_v58  ;;  %1441 = vmatprep.subr.bf16.mxu1 %v2698_v59 }
  0x80   : > { %1360 = vmatpush1.bf16.msra.mxu0 %v2693_v60  ;;  %1442 = vmatpush1.bf16.msra.mxu1 %v2696_v62 }
  0x81   : > { %1361 = vmatprep.subr.bf16.mxu0 %v2701_v63  ;;  %1443 = vmatprep.subr.bf16.mxu1 %v2704_v0 }
  0x84   : > { %1362 = vmatpush1.bf16.msra.mxu0 %v2699_v1  ;;  %1444 = vmatpush1.bf16.msra.mxu1 %v2702_v2 }
  0x85   : > { %1363 = vmatprep.subr.bf16.mxu0 %v2707_v3  ;;  %1445 = vmatprep.subr.bf16.mxu1 %v2710_v4  ;;  %v272_v3 = vld [vmem:[#allocation2] sm:$0xff] }
  0x88   : > { %1364 = vmatpush1.bf16.msra.mxu0 %v2705_v5  ;;  %1446 = vmatpush1.bf16.msra.mxu1 %v2708_v6 }
  0x89   : > { %1365 = vmatprep.subr.bf16.mxu0 %v2713_v7  ;;  %1447 = vmatprep.subr.bf16.mxu1 %v2716_v8 }
  0x8c   : > { %1366 = vmatpush1.bf16.msra.mxu0 %v2711_v9  ;;  %1448 = vmatpush1.bf16.msra.mxu1 %v2714_v11 }
  0x8d   : > { %1367 = vmatprep.subr.bf16.mxu0 %v2719_v12  ;;  %1449 = vmatprep.subr.bf16.mxu1 %v2722_v13 }
  0x90   : > { %1368 = vmatpush1.bf16.msra.mxu0 %v2717_v14  ;;  %1450 = vmatpush1.bf16.msra.mxu1 %v2720_v15 }
  0x91   : > { %1369 = vmatprep.subr.bf16.mxu0 %v2725_v16  ;;  %1451 = vmatprep.subr.bf16.mxu1 %v2728_v18  ;;  %v273_v18 = vld [vmem:[#allocation2 + $0x8] sm:$0x3] }
  0x94   : > { %1370 = vmatpush1.bf16.msra.mxu0 %v2723_v19  ;;  %1452 = vmatpush1.bf16.msra.mxu1 %v2726_v20 }
  0x95   : > { %2392 = vmatprep.subr.bf16.mxu0 %v2730_v22  ;;  %2414 = vmatprep.subr.bf16.mxu1 %v2731_v23  ;;  %v2762_v22 = vld [vmem:[%s3262_s3 + $0x40] sm:$0xff] (!%p2346_p6)  }
  0x96   : > { %v2763_v23 = vld [vmem:[%s3262_s3] sm:$0xff] (!%p2346_p6)  }
  0x97   : > { %1372 = vmatmul.mubr.bf16.vlgmr.msra.gmra.mrb[0].mxu0 %v3054_v24  ;;  %1454 = vmatmul.mubr.bf16.vlgmr.msra.gmra.mrb[0].mxu1 %v3054_v24 }
  0x98   : > { %2393 = vmatpush3.bf16.msra.mxu0 %v2732_v25  ;;  %2415 = vmatpush3.bf16.msra.mxu1 %v2733_v26  ;;  %v2765_v25 = vld [vmem:[%s3262_s3 + $0x80] sm:$0xff] (!%p2346_p6)   ;;  %v2766_v26 = vld [vmem:[%s3262_s3 + $0x48] sm:$0xff] (!%p2346_p6)  }
  0x99   : > { %2394 = vmatprep.subr.bf16.mxu0 %v2734_v27  ;;  %2416 = vmatprep.subr.bf16.mxu1 %v2735_v28  ;;  %v2767_v27 = vld [vmem:[%s3262_s3 + $0x8] sm:$0xff] (!%p2346_p6)  }
  0x9a   : > { %1494 = vmatprep.mubr.bf16.mxu0 %v2956_v61  ;;  %1534 = vmatprep.mubr.bf16.mxu1 %v2986_v21  ;;  %v2745_v61 = vld [vmem:[%s2895_s29 + $0x308] ss:$20 sps:$4 sm:$0xff]   ;;  %v2746_v21 = vld [vmem:[%s2895_s29 + $0x1f0] ss:$20 sps:$4 sm:$0xff]  }
  0x9b   : > { %v2768_v28 = vld [vmem:[%s3262_s3 + $0xc8] sm:$0xff] (!%p2346_p6)  }
  0x9c   : > { %2395 = vmatpush3.bf16.msra.mxu0 %v2736_v10  ;;  %2417 = vmatpush3.bf16.msra.mxu1 %v2737_v29  ;;  %v2769_v10 = vld [vmem:[%s3262_s3 + $0x88] sm:$0xff] (!%p2346_p6)   ;;  %v2770_v29 = vld [vmem:[%s3262_s3 + $0x50] sm:$0xff] (!%p2346_p6)  }
  0x9d   : > { %2396 = vmatprep.subr.bf16.mxu0 %v2738_v30  ;;  %2418 = vmatprep.subr.bf16.mxu1 %v2739_v31  ;;  %v2771_v30 = vld [vmem:[%s3262_s3 + $0x10] sm:$0xff] (!%p2346_p6)  }
  0x9e   : > { %v2772_v31 = vld [vmem:[%s3262_s3 + $0xd0] sm:$0xff] (!%p2346_p6)  }
  0xa0   : > { %2397 = vmatpush3.bf16.msra.mxu0 %v2740_v32  ;;  %2419 = vmatpush3.bf16.msra.mxu1 %v2741_v33  ;;  %v2773_v32 = vld [vmem:[%s3262_s3 + $0x90] sm:$0xff] (!%p2346_p6)   ;;  %v2774_v33 = vld [vmem:[%s3262_s3 + $0x58] sm:$0xff] (!%p2346_p6)  }
  0xa1   : > { %2398 = vmatprep.subr.bf16.mxu0 %v2742_v34  ;;  %2420 = vmatprep.subr.bf16.mxu1 %v2743_v35  ;;  %v2775_v34 = vld [vmem:[%s3262_s3 + $0x18] sm:$0xff] (!%p2346_p6)  }
  0xa2   : > { %v2776_v35 = vld [vmem:[%s3262_s3 + $0xd8] sm:$0xff] (!%p2346_p6)  }
  0xa4   : > { %2399 = vmatpush3.bf16.msra.mxu0 %v2744_v36  ;;  %2421 = vmatpush3.bf16.msra.mxu1 %v2745_v61  ;;  %v2777_v36 = vld [vmem:[%s3262_s3 + $0x98] sm:$0xff] (!%p2346_p6)   ;;  %v2778_v61 = vld [vmem:[%s3262_s3 + $0x60] sm:$0xff] (!%p2346_p6)  }
  0xa5   : > { %2400 = vmatprep.subr.bf16.mxu0 %v2746_v21  ;;  %2422 = vmatprep.subr.bf16.mxu1 %v2747_v37  ;;  %v2779_v21 = vld [vmem:[%s3262_s3 + $0x20] sm:$0xff] (!%p2346_p6)  }
  0xa6   : > { %v2780_v37 = vld [vmem:[%s3262_s3 + $0xe0] sm:$0xff] (!%p2346_p6)  }
  0xa8   : > { %2401 = vmatpush3.bf16.msra.mxu0 %v2748_v38  ;;  %2423 = vmatpush3.bf16.msra.mxu1 %v2749_v39  ;;  %v2781_v38 = vld [vmem:[%s3262_s3 + $0xa0] sm:$0xff] (!%p2346_p6)   ;;  %v2782_v39 = vld [vmem:[%s3262_s3 + $0x68] sm:$0xff] (!%p2346_p6)  }
  0xa9   : > { %2402 = vmatprep.subr.bf16.mxu0 %v2750_v40  ;;  %2424 = vmatprep.subr.bf16.mxu1 %v2751_v41  ;;  %v2783_v40 = vld [vmem:[%s3262_s3 + $0x28] sm:$0xff] (!%p2346_p6)  }
  0xaa   : > { %v2784_v41 = vld [vmem:[%s3262_s3 + $0xe8] sm:$0xff] (!%p2346_p6)  }
  0xac   : > { %2403 = vmatpush3.bf16.msra.mxu0 %v2752_v42  ;;  %2425 = vmatpush3.bf16.msra.mxu1 %v2753_v43  ;;  %v2785_v42 = vld [vmem:[%s3262_s3 + $0xa8] sm:$0xff] (!%p2346_p6)   ;;  %v2786_v43 = vld [vmem:[%s3262_s3 + $0x70] sm:$0xff] (!%p2346_p6)  }
  0xad   : > { %2404 = vmatprep.subr.bf16.mxu0 %v2754_v45  ;;  %2426 = vmatprep.subr.bf16.mxu1 %v2755_v46  ;;  %v2787_v45 = vld [vmem:[%s3262_s3 + $0x30] sm:$0xff] (!%p2346_p6)   ;;  %v1587_v46 = vsub.s32 (!%p2346_p6), 0, %v2937_v44 }
  0xb0   : > { %2405 = vmatpush3.bf16.msra.mxu0 %v2756_v47  ;;  %2427 = vmatpush3.bf16.msra.mxu1 %v2757_v48  ;;  %v2788_v47 = vld [vmem:[%s3262_s3 + $0xf0] sm:$0xff] (!%p2346_p6)   ;;  %v1591_v48 = vsub.s32 (!%p2346_p6), 1, %v2937_v44 }
  0xb1   : > { %2406 = vmatprep.subr.bf16.mxu0 %v2758_v49  ;;  %2428 = vmatprep.subr.bf16.mxu1 %v2759_v51  ;;  %v2789_v49 = vld [vmem:[%s3262_s3 + $0xb0] sm:$0xff] (!%p2346_p6)   ;;  %v1595_v51 = vsub.s32 (!%p2346_p6), 2, %v2937_v44 }
  0xb4   : > { %2407 = vmatpush3.bf16.msra.mxu0 %v2760_v52  ;;  %2429 = vmatpush3.bf16.msra.mxu1 %v2761_v53  ;;  %v2790_v52 = vld [vmem:[%s3262_s3 + $0x78] sm:$0xff] (!%p2346_p6)   ;;  %v1599_v53 = vsub.s32 (!%p2346_p6), 3, %v2937_v44 }
  0xb5   : > { %2436 = vmatprep.subr.bf16.mxu0 (!%p2346_p6), %v2762_v22  ;;  %v2796_v22 = vld [vmem:[%s3262_s3 + $0x110] sm:$0xff] (!%p2346_p6)  }
  0xb7   : > { %1495 = vmatmul.mubr.bf16.vlgmr.msra.gmra.mrb[4].mxu0 %v2981_v17  ;;  %1535 = vmatmul.mubr.bf16.vlgmr.msra.gmra.mrb[4].mxu1 %v3054_v24  ;;  %v2764_v24 = vld [vmem:[%s3262_s3 + $0xc0] sm:$0xff] (!%p2346_p6)  }
  0xb8   : > { %2437 = vmatpush3.bf16.msra.mxu0 (!%p2346_p6), %v2763_v23  ;;  %2458 = vmatprep.subr.bf16.mxu1 (!%p2346_p6), %v2764_v24  ;;  %v2797_v24 = vld [vmem:[%s3262_s3 + $0x118] sm:$0xff] (!%p2346_p6)  }
  0xb9   : > { %2459 = vmatpush3.bf16.msra.mxu1 (!%p2346_p6), %v2765_v25  ;;  %2438 = vmatprep.subr.bf16.mxu0 (!%p2346_p6), %v2766_v26 }
  0xba   : > { %2460 = vmatprep.subr.bf16.mxu1 (!%p2346_p6), %v2768_v28  ;;  %v2799_v28 = vld [vmem:[%s3262_s3 + $0x128] sm:$0xff] (!%p2346_p6)  }
  0xbc   : > { %2439 = vmatpush3.bf16.msra.mxu0 (!%p2346_p6), %v2767_v27 }
  0xbd   : > { %2461 = vmatpush3.bf16.msra.mxu1 (!%p2346_p6), %v2769_v10  ;;  %2440 = vmatprep.subr.bf16.mxu0 (!%p2346_p6), %v2770_v29  ;;  %v2800_v29 = vld [vmem:[%s3262_s3 + $0x130] sm:$0xff] (!%p2346_p6)  }
  0xbe   : > { %2462 = vmatprep.subr.bf16.mxu1 (!%p2346_p6), %v2772_v31  ;;  %v2801_v31 = vld [vmem:[%s3262_s3 + $0x138] sm:$0xff] (!%p2346_p6)  }
  0xc0   : > { %2441 = vmatpush3.bf16.msra.mxu0 (!%p2346_p6), %v2771_v30 }
  0xc1   : > { %2463 = vmatpush3.bf16.msra.mxu1 (!%p2346_p6), %v2773_v32  ;;  %2442 = vmatprep.subr.bf16.mxu0 (!%p2346_p6), %v2774_v33 }
  0xc2   : > { %2464 = vmatprep.subr.bf16.mxu1 (!%p2346_p6), %v2776_v35 }
  0xc4   : > { %2443 = vmatpush3.bf16.msra.mxu0 (!%p2346_p6), %v2775_v34  ;;  %v2347_v34 = vld [vmem:[%s3263_s4] ss:$0 sm:$0xff] (!%p2346_p6) }
  0xc5   : > { %2465 = vmatpush3.bf16.msra.mxu1 (!%p2346_p6), %v2777_v36  ;;  %2444 = vmatprep.subr.bf16.mxu0 (!%p2346_p6), %v2778_v61 }
  0xc6   : > { %2466 = vmatprep.subr.bf16.mxu1 (!%p2346_p6), %v2780_v37 }
  0xc8   : > { %2445 = vmatpush3.bf16.msra.mxu0 (!%p2346_p6), %v2779_v21 }
  0xc9   : > { %2467 = vmatpush3.bf16.msra.mxu1 (!%p2346_p6), %v2781_v38  ;;  %2446 = vmatprep.subr.bf16.mxu0 (!%p2346_p6), %v2782_v39 }
  0xca   : > { %2468 = vmatprep.subr.bf16.mxu1 (!%p2346_p6), %v2784_v41 }
  0xcc   : > { %2447 = vmatpush3.bf16.msra.mxu0 (!%p2346_p6), %v2783_v40 }
  0xcd   : > { %2469 = vmatpush3.bf16.msra.mxu1 (!%p2346_p6), %v2785_v42  ;;  %2448 = vmatprep.subr.bf16.mxu0 (!%p2346_p6), %v2786_v43 }
  0xce   : > { %2470 = vmatprep.subr.bf16.mxu1 (!%p2346_p6), %v2788_v47 }
  0xd0   : > { %2449 = vmatpush3.bf16.msra.mxu0 (!%p2346_p6), %v2787_v45 }
  0xd1   : > { %2471 = vmatpush3.bf16.msra.mxu1 (!%p2346_p6), %v2789_v49  ;;  %2450 = vmatprep.subr.bf16.mxu0 (!%p2346_p6), %v2790_v52 }
 0x16a   : > { %v1373_v54 = vpop.f32.mrb[0].mxu0  ;;  %v1455_v55 = vpop.f32.mrb[0].mxu1 }
 0x16b   : > { %v1375_v56 = vpop.f32.mrb[1].mxu0  ;;  %v1457_v57 = vpop.f32.mrb[1].mxu1 }
 0x16c   : > { %v1547_v58 = vcombine.low %v1373_v54, %v1375_v56  ;;  %v1548_v59 = vcombine.low %v1455_v55, %v1457_v57  ;;  %v1377_v60 = vpop.f32.mrb[2].mxu0  ;;  %v1459_v62 = vpop.f32.mrb[2].mxu1  ;;  %v2791_v54 = vld [vmem:[%s3262_s3 + $0x38] sm:$0xff] (!%p2346_p6)   ;;  %v1583_v56 = vld [vmem:[%s3261_s2] sm:$0x1f] (!%p2346_p6) }
 0x16d   : > { %v1378_v63 = vpop.f32.mrb[3].mxu0  ;;  %v1460_v0 = vpop.f32.mrb[3].mxu1  ;;  %v2792_v55 = vld [vmem:[%s3262_s3 + $0xf8] sm:$0xff] (!%p2346_p6)   ;;  %2451 = vmatpush3.bf16.msra.mxu0 (!%p2346_p6), %v2791_v54  ;;  %v1588_v57 = vrot.slane (!%p2346_p6), %v1583_v56, %v1587_v46  ;;  %v1600_v60 = vrot.slane (!%p2346_p6), %v1583_v56, %v1599_v53 }
 0x16e   : > { %v1555_v1 = vrot.slane %v1547_v58, %v2945_v50  ;;  %v1562_v2 = vrot.slane %v1548_v59, %v2945_v50  ;;  %2472 = vmatprep.subr.bf16.mxu1 (!%p2346_p6), %v2792_v55  ;;  %v1592_v58 = vrot.slane (!%p2346_p6), %v1583_v56, %v1591_v48  ;;  %v1596_v59 = vrot.slane (!%p2346_p6), %v1583_v56, %v1595_v51  ;;  %v2793_v62 = vld [vmem:[%s3262_s3 + $0xb8] sm:$0xff] (!%p2346_p6)  }
 0x16f   : > { %v2842_v63 = vmov (!%p2346_p6), 0.0   ;;  %2473 = vmatpush3.bf16.msra.mxu1 (!%p2346_p6), %v2793_v62 }
 0x170   : > { %v1563_v4 = vcombine.low %v1555_v1, %v1562_v2  ;;  %2489 = vmatprep.subr.bf16.mxu0 (!%p2346_p6), %v2842_v63  ;;  %v1605_v0 = vcombine.low (!%p2346_p6), %v1588_v57, %v1592_v58  ;;  %v1606_v1 = vcombine.low (!%p2346_p6), %v1596_v59, %v1600_v60 }
 0x172   : > { %v1573_v5 = vadd.f32 %v1563_v4, %v272_v3  ;;  %v1613_v2 = vrot.slane (!%p2346_p6), %v1605_v0, %v2945_v50  ;;  %v1620_v3 = vrot.slane (!%p2346_p6), %v1606_v1, %v2945_v50 }
 0x174   : > { %1575 = vst [vmem:[#allocation2] sm:$0xff] %v1573_v5  ;;  %v1621_v5 = vcombine.low (!%p2346_p6), %v1613_v2, %v1620_v3 }
 0x17b   : > { %v1581_v4 = vld [vmem:[#allocation2] sm:$0xff] (!%p2346_p6) }
 0x18a   : > { %v2408_v17 = vpop.f32.mrb[4].mxu0  ;;  %v2430_v6 = vpop.f32.mrb[4].mxu1 }
 0x18b   : > { %v2409_v7 = vpop.f32.mrb[5].mxu0  ;;  %v2431_v8 = vpop.f32.mrb[5].mxu1 }
 0x18c   : > { %v2410_v9 = vadd.f32 %v2409_v7, %v2408_v17  ;;  %v2432_v11 = vadd.f32 %v2431_v8, %v2430_v6  ;;  %v2411_v12 = vpop.f32.mrb[6].mxu0  ;;  %v2433_v13 = vpop.f32.mrb[6].mxu1  ;;  %v1631_v17 = vadd.f32 (!%p2346_p6), %v1621_v5, %v1581_v4 }
 0x18d   : > { %v2412_v14 = vpop.f32.mrb[7].mxu0  ;;  %v2434_v15 = vpop.f32.mrb[7].mxu1 }
 0x18e   : > { %v1537_v16 = vadd.f32 %v2432_v11, %v2410_v9  ;;  %1580 = sbr.rel (%p2346_p6) target bundleno = 654 (0x28e), region = 48  ;;  %v1633_v6 = vmax.f32 (!%p2346_p6), %v1631_v17, 0.0  ;;  %v2794_v15 = vld [vmem:[%s3262_s3 + $0x100] sm:$0xff] (!%p2346_p6)  }
 0x190   : > { %v1570_v19 = vrot.slane %v1537_v16, %v2945_v50  ;;  %v1644_v7 = vrot.slane (!%p2346_p6), %v1633_v6, %v2945_v50  ;;  %v1637_v8 = vcombine.high (!%p2346_p6), %v1633_v6, %v1633_v6 }
 0x192   : > { %v1574_v20 = vadd.f32 %v1570_v19, %v273_v18  ;;  %v1652_v9 = vcombine.high (!%p2346_p6), %v1644_v7, %v1644_v7  ;;  %v1651_v11 = vrot.slane (!%p2346_p6), %v1637_v8, %v2945_v50  ;;  %v1666_v12 = vpack.c.bf16 (!%p2346_p6), %v1644_v7, %v1644_v7  ;;  %v2795_v19 = vld [vmem:[%s3262_s3 + $0x108] sm:$0xff] (!%p2346_p6)  }
 0x194   : > { %1576 = vst [vmem:[#allocation2 + $0x8] sm:$0x3] %v1574_v20  ;;  %v1667_v13 = vpack.c.bf16 (!%p2346_p6), %v1652_v9, %v1652_v9  ;;  %v1653_v14 = vcombine.high (!%p2346_p6), %v1651_v11, %v1651_v11  ;;  %v1668_v16 = vpack.c.bf16 (!%p2346_p6), %v1651_v11, %v1651_v11  ;;  %v1603_v20 = vsub.s32 (!%p2346_p6), 4, %v2937_v44  ;;  %v2798_v44 = vld [vmem:[%s3262_s3 + $0x120] sm:$0xff] (!%p2346_p6)  }
 0x196   : > { %2030 = vmatprep.mubr.bf16.mxu0 %v1667_v13  ;;  %v1669_v18 = vpack.c.bf16 %v1653_v14, %v1653_v14  ;;  %v1604_v23 = vrot.slane %v1583_v56, %v1603_v20 }
 0x197   : > { %2031 = vmatmul.mubr.bf16.vlgmr.msra.gmra.mrb[0].mxu0 %v1666_v12 }
 0x198   : > { %2070 = vmatprep.mubr.bf16.mxu1 %v1669_v18  ;;  %2490 = vmatpush3.bf16.msra.mxu0 %v2794_v15  ;;  %v1628_v25 = vrot.slane %v1604_v23, %v2945_v50 }
 0x199   : > { %2071 = vmatmul.mubr.bf16.vlgmr.msra.gmra.mrb[0].mxu1 %v1668_v16  ;;  %2491 = vmatprep.subr.bf16.mxu0 %v2842_v63 }
 0x19a   : > { %2505 = vmatprep.mubr.msk.bf16.mxu0 %vm2843_vm0, %v2842_v63 }
 0x19b   : > { %v1582_v26 = vld [vmem:[#allocation2 + $0x8] sm:$0x3] }
 0x19c   : > { %2492 = vmatpush3.bf16.msra.mxu0 %v2795_v19  ;;  %v1632_v27 = vadd.f32 %v1628_v25, %v1582_v26 }
 0x19d   : > { %2493 = vmatprep.subr.bf16.mxu0 %v2842_v63 }
 0x19e   : > { %v1634_v10 = vmax.f32 %v1632_v27, 0.0 }
 0x1a0   : > { %2494 = vmatpush3.bf16.msra.mxu0 %v2796_v22  ;;  %v1660_v30 = vrot.slane %v1634_v10, %v2945_v50 }
 0x1a1   : > { %2495 = vmatprep.subr.bf16.mxu0 %v2842_v63 }
 0x1a2   : > { %v1670_v32 = vpack.c.bf16 %v1660_v30, %v1660_v30 }
 0x1a4   : > { %2496 = vmatpush3.bf16.msra.mxu0 %v2797_v24 }
 0x1a5   : > { %2497 = vmatprep.subr.bf16.mxu0 %v2842_v63 }
 0x1a8   : > { %2498 = vmatpush3.bf16.msra.mxu0 %v2798_v44 }
 0x1a9   : > { %2499 = vmatprep.subr.bf16.mxu0 %v2842_v63 }
 0x1ac   : > { %2500 = vmatpush3.bf16.msra.mxu0 %v2799_v28 }
 0x1ad   : > { %2501 = vmatprep.subr.bf16.mxu0 %v2842_v63 }
 0x1b0   : > { %2502 = vmatpush3.bf16.msra.mxu0 %v2800_v29 }
 0x1b1   : > { %2503 = vmatprep.subr.bf16.mxu0 %v2842_v63 }
 0x1b4   : > { %2504 = vmatpush3.bf16.msra.mxu0 %v2801_v31 }
 0x1b7   : > { %2506 = vmatmul.mubr.bf16.vlgmr.msra.gmra.mrb[4].mxu0 %v1670_v32 }
 0x26a   : > { %v2452_v33 = vpop.f32.mrb[0].mxu0 }
 0x26b   : > { %v2453_v35 = vpop.f32.mrb[1].mxu0 }
 0x26c   : > { %v2454_v36 = vadd.f32 %v2453_v35, %v2452_v33  ;;  %v2455_v61 = vpop.f32.mrb[2].mxu0  ;;  %v2474_v21 = vpop.f32.mrb[0].mxu1 }
 0x26d   : > { %v2456_v37 = vpop.f32.mrb[3].mxu0  ;;  %v2475_v50 = vpop.f32.mrb[1].mxu1 }
 0x26e   : > { %v2033_v38 = vadd.f32 %v2454_v36, %v2347_v34  ;;  %v2476_v39 = vadd.f32 %v2475_v50, %v2474_v21  ;;  %v2477_v40 = vpop.f32.mrb[2].mxu1 }
 0x26f   : > { %v2478_v41 = vpop.f32.mrb[3].mxu1 }
 0x270   : > { %v2073_v42 = vadd.f32 %v2476_v39, %v2033_v38 }
 0x28a   : > { %v2112_v43 = vpop.f32.mrb[4].mxu0 }
 0x28b   : > { %v2113_v45 = vadd.f32 %v2112_v43, %v2073_v42  ;;  %v2507_v46 = vpop.f32.mrb[5].mxu0 }
 0x28c   : > { %v2115_v47 = vpop.f32.mrb[6].mxu0 }
 0x28d   : > { %2118 = vst [vmem:[#allocation3] sm:$0x3] %v2113_v45  ;;  %v2508_v48 = vpop.f32.mrb[7].mxu0 }
 0x28e PF: > { %p2522_p7 = scmp.eq.s32.totalorder %s2881_s19, 3  ;;  %s2844_s22 = smov [#allocation3]  }
 0x28f   : > { %s2126_s23 = sshll.u32 %s2844_s22, 4  ;;  %s2127_s23 = int_to_ptr.vmem [resolvable:$true] %s2126_s23 }
 0x290   : > { %s2802_s24 = scalar_lea.vmem %s2127_s23, 32  ;;  %p2809_p11 = scmp.lt.s32.totalorder %s2127_s23, %s2127_s23 }
 0x291   : > { %p2803_p8 = scmp.ne.s32.totalorder %s2127_s23, %s2802_s24  ;;  %p2810_p12 = scmp.lt.s32.totalorder %s2802_s24, %s2802_s24 }
 0x293   : > { %p2804_p9 = pnand %p2803_p8, %p2522_p7  ;;  %p2811_p13 = por %p2810_p12, %p2809_p11 }
 0x295   : > { %p2805_p10 = pneg %p2804_p9 }
 0x297   : > { %p2812_p0 = pnand %p2811_p13, %p2805_p10 }
 0x299   : > { %2815 = shalt.err (!%p2812_p0)
}
 0x29a   : > { %s2816_s27 = scalar_lea.hbm %s3264_s5, 32 }
 0x29b   : > { %p2817_p1 = scmp.ne.s32.totalorder %s3264_s5, %s2816_s27  ;;  %p2822_p4 = scmp.lt.u32.totalorder %s2816_s27, %s3264_s5 }
 0x29d   : > { %p2818_p2 = pnand %p2817_p1, %p2522_p7 }
 0x29f   : > { %p2819_p3 = pneg %p2818_p2 }
 0x2a1   : > { %p2824_p5 = pnand %p2822_p4, %p2819_p3 }
 0x2a3   : > { %2827 = shalt.err (!%p2824_p5)
}
 0x2a4   : > { %2519 = dma.vmem_to_hbm [thread:$0]  (%p2522_p7), %s2127_s23, 32, %s3264_s5, [#allocation4]  }
 0x2a5   : > { %2833 = dma.done.wait (%p2522_p7), [#allocation4], 32  }
 0x2a6   : > { %2835 = vsyncadd (%p2522_p7), [#allocation4], 4294967264 }
 0x2a7 PF: > { %s16_s18 = sadd.s32 1, %s2838_s18  }
 0x2a8   : > { %p13_p6 = scmp.ge.s32.totalorder %s16_s18, 6  }
 0x2aa   :  { %15 = sbr.rel (!%p13_p6) target bundleno = 1 (0x1), region = 78 }
 0x2b1   :  { %2139 = vsyncpa [#allocation4], 1 }
 0x2b2   :  { %2141 = vsyncpa [#allocation4 + $0x1], 1 }

</bundles_post_ra>
